<compile_context>
chip_gen: v5e
topology: v5e:2x2
jax: 0.10.0
libtpu: 0.0.40
codegen_flags: <defaults>
</compile_context>

<pallas_src>
import functools

import jax
import jax.numpy as jnp
from jax.experimental import pallas as pl
from jax.experimental.pallas import tpu as pltpu


# ----------------------------------------------------------------------------
# helpers
# ----------------------------------------------------------------------------
def _gelu_erf(x):
    # Exact (erf-based) GELU.  erf via Abramowitz & Stegun 7.1.26
    # (|error| <= 1.5e-7); exp and the reciprocal land on the EUP slot.
    z = x * 0.7071067811865476
    a = jnp.abs(z)
    t = pl.reciprocal(1.0 + 0.3275911 * a, approx=True)
    poly = t * (0.254829592 + t * (-0.284496736 + t * (1.421413741
                + t * (-1.453152027 + t * 1.061405429))))
    erf_a = 1.0 - poly * jnp.exp(-a * a)
    erf_z = jnp.where(z < 0.0, -erf_a, erf_a)
    return 0.5 * x * (1.0 + erf_z)


def _fold_wc(x4, w):
    # [D, H, W, C] value -> [D, H, W*C]: merge the (sublane) W dim into lanes
    # via W small sublane-selects + one lane concat (guaranteed to lower;
    # avoids a general minor-dim reshape).
    return jnp.concatenate([x4[:, :, ww, :] for ww in range(w)], axis=-1)


# ----------------------------------------------------------------------------
# Fused kernel: to_qkv -> per-head L2-norm "spectral" attention -> projection
#               + (pad -> dw-conv3x3x3 -> GELU -> pad -> dw-conv3x3x3)
# One grid step per batch element.  All contractions go to the MXU; the conv
# runs lane-dense on a (W*C)-minor layout.
# ----------------------------------------------------------------------------
def _ms_msa3d_kernel(x_ref, wqkv_ref, wproj_ref, bproj_ref, rescale_ref,
                     w1t_ref, w2t_ref, o_ref, pad_ref,
                     *, heads, dim_head, d, h, w, c):
    inner = heads * dim_head
    wc = w * c

    # ------------------------- attention branch ---------------------------
    x = x_ref[0]                                                  # [n, c]

    # One fat qkv matmul; columns are (q|k|v, head, dim_head) - exactly the
    # torch to_qkv column order, so per-head views are static lane slices.
    qkv = jnp.dot(x, wqkv_ref[...],
                  preferred_element_type=jnp.float32)             # [n, 3*inner]

    ohs = []
    for hh in range(heads):
        o_q = 0 * inner + hh * dim_head
        o_k = 1 * inner + hh * dim_head
        o_v = 2 * inner + hh * dim_head
        q = qkv[:, o_q:o_q + dim_head]                            # [n, dh]
        k = qkv[:, o_k:o_k + dim_head]
        v = qkv[:, o_v:o_v + dim_head]

        # F.normalize(dim=-1) of torch's [dh, n] tensors == normalize over n.
        # rsqrt(max(sumsq, eps^2)) == 1 / max(norm, eps)  (eps = 1e-12).
        qn = q * jax.lax.rsqrt(
            jnp.maximum(jnp.sum(q * q, axis=0, keepdims=True), 1e-24))
        kn = k * jax.lax.rsqrt(
            jnp.maximum(jnp.sum(k * k, axis=0, keepdims=True), 1e-24))

        # attn^T[j, i] = sum_n qn[n, j] * kn[n, i]   (MXU, K = n contraction)
        attn_t = jax.lax.dot_general(
            qn, kn, (((0,), (0,)), ((), ())),
            preferred_element_type=jnp.float32)                   # [dh, dh]
        attn_t = attn_t * rescale_ref[hh]

        # softmax over torch's last axis == axis 0 of attn^T.
        attn_t = attn_t - jnp.max(attn_t, axis=0, keepdims=True)
        attn_t = jnp.exp(attn_t)
        attn_t = attn_t * pl.reciprocal(
            jnp.sum(attn_t, axis=0, keepdims=True), approx=True)

        # out_h[n, i] = sum_j v[n, j] * attn[i, j] = (v @ attn^T)[n, i]
        ohs.append(jnp.dot(v, attn_t,
                           preferred_element_type=jnp.float32))   # [n, dh]

    # Fused projection: lane-concat heads -> single [n, inner] @ [inner, c].
    xo = jnp.concatenate(ohs, axis=-1)                            # [n, inner]
    out_c = jnp.dot(xo, wproj_ref[...],
                    preferred_element_type=jnp.float32) + bproj_ref[...]

    # ---------------------- positional-embedding branch -------------------
    # Zero only the 1-wide border faces of the padded scratch; the interior
    # is fully overwritten (twice) below.  Re-done every grid step so a
    # megacore-partitioned batch axis stays safe.
    pad_ref[0:1, :, :] = jnp.zeros((1, h + 2, (w + 2) * c), jnp.float32)
    pad_ref[d + 1:d + 2, :, :] = jnp.zeros((1, h + 2, (w + 2) * c), jnp.float32)
    pad_ref[1:d + 1, 0:1, :] = jnp.zeros((d, 1, (w + 2) * c), jnp.float32)
    pad_ref[1:d + 1, h + 1:h + 2, :] = jnp.zeros((d, 1, (w + 2) * c), jnp.float32)
    pad_ref[1:d + 1, 1:h + 1, 0:c] = jnp.zeros((d, h, c), jnp.float32)
    pad_ref[1:d + 1, 1:h + 1, (w + 1) * c:(w + 2) * c] = \
        jnp.zeros((d, h, c), jnp.float32)

    # Interior <- x in the folded [d, h, w*c] layout (single lane-dense store).
    x4 = x.reshape(d, h, w, c)          # layout-preserving (w,c minor unchanged)
    pad_ref[1:d + 1, 1:h + 1, c:(w + 1) * c] = _fold_wc(x4, w)

    w1t = w1t_ref[...]                                            # [3,3,3,w*c]
    w2t = w2t_ref[...]

    def dwconv(wt):
        acc = jnp.zeros((d, h, wc), jnp.float32)
        pad = pad_ref[...]                                        # [d+2,h+2,(w+2)c]
        for kw in range(3):
            # kw tap shift = static lane slice of kw*c; kd/kh shifts are
            # major-dim slices (address offsets only).
            xw = pad[:, :, kw * c:kw * c + wc]                    # [d+2,h+2,w*c]
            for kd in range(3):
                for kh in range(3):
                    acc = acc + xw[kd:kd + d, kh:kh + h, :] * wt[kd, kh, kw]
        return acc

    p = _gelu_erf(dwconv(w1t))
    # Second conv reuses the same zero-bordered scratch.
    pad_ref[1:d + 1, 1:h + 1, c:(w + 1) * c] = p
    out_p = dwconv(w2t)                                           # [d, h, w*c]

    # --------------------- combine + lane-dense store ---------------------
    outc_f = _fold_wc(out_c.reshape(d, h, w, c), w)               # [d, h, w*c]
    o_ref[0] = outc_f + out_p


# ----------------------------------------------------------------------------
# Wrapper
# ----------------------------------------------------------------------------
def ms_msa3d_pallas(x_in, params, *, heads, dim_head):
    b, d, h, w, c = x_in.shape
    n = d * h * w
    inner = heads * dim_head
    wc = w * c

    x2 = x_in.reshape(b, n, c)

    # Depthwise conv weights [27, c] -> [3, 3, 3, c] -> lane-tiled [3,3,3,w*c]
    # (weight per tap depends only on the channel, repeated across w lanes).
    def tile_w(w27):
        wk = w27.reshape(3, 3, 3, c)
        return jnp.broadcast_to(
            wk[:, :, :, None, :], (3, 3, 3, w, c)).reshape(3, 3, 3, wc)

    w1t = tile_w(params["w_conv1"])
    w2t = tile_w(params["w_conv2"])

    # Generation-aware VMEM limit (v5e/v6e: 128 MiB physical, v7x: 64 MiB).
    try:
        vmem_cap = pltpu.get_tpu_info().vmem_capacity_bytes
    except Exception:
        vmem_cap = 64 * 1024 * 1024
    vmem_limit = max(32 * 1024 * 1024,
                     min(int(vmem_cap) * 3 // 4, 112 * 1024 * 1024))

    cparams = pltpu.CompilerParams(
        dimension_semantics=("parallel",),
        vmem_limit_bytes=vmem_limit)

    out = pl.pallas_call(
        functools.partial(_ms_msa3d_kernel, heads=heads, dim_head=dim_head,
                          d=d, h=h, w=w, c=c),
        out_shape=jax.ShapeDtypeStruct((b, d, h, wc), jnp.float32),
        grid=(b,),
        in_specs=[
            pl.BlockSpec((1, n, c), lambda bi: (bi, 0, 0)),        # x
            pl.BlockSpec((c, 3 * inner), lambda bi: (0, 0)),       # W_qkv
            pl.BlockSpec((inner, c), lambda bi: (0, 0)),           # W_proj
            pl.BlockSpec((1, c), lambda bi: (0, 0)),               # b_proj
            pl.BlockSpec(memory_space=pltpu.MemorySpace.SMEM),     # rescale
            pl.BlockSpec((3, 3, 3, wc), lambda bi: (0, 0, 0, 0)),  # conv1 (tiled)
            pl.BlockSpec((3, 3, 3, wc), lambda bi: (0, 0, 0, 0)),  # conv2 (tiled)
        ],
        out_specs=pl.BlockSpec((1, d, h, wc), lambda bi: (bi, 0, 0, 0)),
        scratch_shapes=[
            pltpu.VMEM((d + 2, h + 2, (w + 2) * c), jnp.float32),  # padded volume
        ],
        compiler_params=cparams,
    )(x2, params["w_qkv"], params["w_proj"], params["b_proj"],
      params["rescale"], w1t, w2t)

    return out.reshape(b, d, h, w, c)


# ----------------------------------------------------------------------------
# Pure-JAX reference (mirrors the PyTorch forward), run at highest precision.
# ----------------------------------------------------------------------------
def _depthwise_conv3d_ref(x, w27):
    c = x.shape[-1]
    w = w27.reshape(3, 3, 3, 1, c)
    return jax.lax.conv_general_dilated(
        x, w, window_strides=(1, 1, 1),
        padding=((1, 1), (1, 1), (1, 1)),
        dimension_numbers=("NDHWC", "DHWIO", "NDHWC"),
        feature_group_count=c)


def ms_msa3d_ref(x_in, params, *, heads, dim_head):
    with jax.default_matmul_precision("highest"):
        b, d, h, w, c = x_in.shape
        n = d * h * w
        inner = heads * dim_head
        x = x_in.reshape(b, n, c)
        qkv = x @ params["w_qkv"]
        q, k, v = jnp.split(qkv, 3, axis=-1)

        def split_heads(t):  # [b, n, inner] -> [b, heads, dh, n]
            return jnp.transpose(t.reshape(b, n, heads, dim_head), (0, 2, 3, 1))

        q, k, v = map(split_heads, (q, k, v))

        def l2n(t):
            return t / jnp.maximum(
                jnp.sqrt(jnp.sum(t * t, axis=-1, keepdims=True)), 1e-12)

        q, k = l2n(q), l2n(k)
        attn = jnp.einsum("bhin,bhjn->bhij", k, q)
        attn = attn * params["rescale"][None, :, None, None]
        attn = jax.nn.softmax(attn, axis=-1)
        xo = jnp.einsum("bhij,bhjn->bhin", attn, v)           # [b, heads, dh, n]
        xo = jnp.transpose(xo, (0, 3, 1, 2)).reshape(b, n, inner)
        out_c = (xo @ params["w_proj"] + params["b_proj"]).reshape(b, d, h, w, c)

        p = _depthwise_conv3d_ref(x_in, params["w_conv1"])
        p = jax.nn.gelu(p, approximate=False)
        out_p = _depthwise_conv3d_ref(p, params["w_conv2"])
        return out_c + out_p


# ----------------------------------------------------------------------------
if __name__ == "__main__":
    # Small, forward-consistent shapes: dim(=c)=8, heads=2, dim_head=4.
    b, d, h, w = 2, 4, 8, 8
    dim, dim_head, heads = 8, 4, 2
    inner = heads * dim_head

    key = jax.random.PRNGKey(0)
    k0, k1, k2, k3, k4, k5 = jax.random.split(key, 6)

    # Round inputs/weights to bf16-representable f32 values so the default
    # (single-pass bf16) MXU precision in the kernel introduces no
    # first-layer rounding error vs. the highest-precision reference.
    def bf16r(a):
        return a.astype(jnp.bfloat16).astype(jnp.float32)

    x_in = bf16r(jax.random.normal(k0, (b, d, h, w, dim), jnp.float32))
    params = {
        # to_qkv: nn.Linear(dim, 3*inner, bias=False) -> stored as W.T [dim, 3*inner]
        "w_qkv": bf16r(0.2 * jax.random.normal(k1, (dim, 3 * inner), jnp.float32)),
        # proj: nn.Linear(inner, dim, bias=True)      -> stored as W.T [inner, dim]
        "w_proj": bf16r(0.2 * jax.random.normal(k2, (inner, dim), jnp.float32)),
        "b_proj": bf16r(0.1 * jax.random.normal(k3, (1, dim), jnp.float32)),
        # rescale: nn.Parameter(ones(heads,1,1)) -> deterministic per-head scalars
        "rescale": bf16r(jnp.linspace(0.5, 1.5, heads, dtype=jnp.float32)),
        # depthwise Conv3d weights [dim,1,3,3,3] stored flattened as [27, dim]
        "w_conv1": bf16r(0.2 * jax.random.normal(k4, (27, dim), jnp.float32)),
        "w_conv2": bf16r(0.2 * jax.random.normal(k5, (27, dim), jnp.float32)),
    }

    out = jax.block_until_ready(
        ms_msa3d_pallas(x_in, params, heads=heads, dim_head=dim_head))
    ref = jax.block_until_ready(
        ms_msa3d_ref(x_in, params, heads=heads, dim_head=dim_head))

    err = float(jnp.max(jnp.abs(out - ref)))
    assert out.shape == (b, d, h, w, dim), out.shape
    # Tolerance covers default-precision (bf16 single-pass) MXU rounding of
    # the f32 attention intermediates and the approx erf/reciprocal GELU.
    assert err < 2e-2, f"max abs error too large: {err}"
    print("KERNEL_OK")
</pallas_src>

<mosaic_0001>
module attributes {stable_mosaic.version = 11 : i64} {
  func.func @_ms_msa3d_kernel(%arg0: i32, %arg1: memref<1x256x8xf32, #tpu.memory_space<vmem>>, %arg2: memref<8x24xf32, #tpu.memory_space<vmem>>, %arg3: memref<8x8xf32, #tpu.memory_space<vmem>>, %arg4: memref<1x8xf32, #tpu.memory_space<vmem>>, %arg5: memref<2xf32, #tpu.memory_space<smem>>, %arg6: memref<3x3x3x64xf32, #tpu.memory_space<vmem>>, %arg7: memref<3x3x3x64xf32, #tpu.memory_space<vmem>>, %arg8: memref<1x4x8x64xf32, #tpu.memory_space<vmem>>, %arg9: memref<6x10x80xf32, #tpu.memory_space<vmem>>) attributes {dimension_semantics = [#tpu.dimension_semantics<parallel>], iteration_bounds = array<i64: 2>, scalar_prefetch = 0 : i64, scratch_operands = 1 : i64, tpu.core_type = #tpu.core_type<tc>, window_params = [{transform_indices = @transform_0, window_bounds = array<i64: 1, 256, 8>}, {pipeline_mode = #tpu.pipeline_mode<synchronous>, transform_indices = @transform_1, window_bounds = array<i64: 8, 24>}, {pipeline_mode = #tpu.pipeline_mode<synchronous>, transform_indices = @transform_2, window_bounds = array<i64: 8, 8>}, {pipeline_mode = #tpu.pipeline_mode<synchronous>, transform_indices = @transform_3, window_bounds = array<i64: 1, 8>}, {transform_indices = @transform_4, window_bounds = array<i64: 2>}, {pipeline_mode = #tpu.pipeline_mode<synchronous>, transform_indices = @transform_5, window_bounds = array<i64: 3, 3, 3, 64>}, {pipeline_mode = #tpu.pipeline_mode<synchronous>, transform_indices = @transform_6, window_bounds = array<i64: 3, 3, 3, 64>}, {transform_indices = @transform_7, window_bounds = array<i64: 1, 4, 8, 64>}]} {
    %c0 = arith.constant 0 : index
    %c0_0 = arith.constant 0 : index
    %c0_1 = arith.constant 0 : index
    %0 = vector.load %arg1[%c0, %c0_0, %c0_1] : memref<1x256x8xf32, #tpu.memory_space<vmem>>, vector<1x256x8xf32>
    %1 = vector.shape_cast %0 : vector<1x256x8xf32> to vector<256x8xf32>
    %c0_2 = arith.constant 0 : index
    %c0_3 = arith.constant 0 : index
    %2 = vector.load %arg2[%c0_2, %c0_3] : memref<8x24xf32, #tpu.memory_space<vmem>>, vector<8x24xf32>
    %cst = arith.constant dense<0.000000e+00> : vector<256x24xf32>
    %3 = tpu.matmul %1, %2, %cst {dimension_numbers = #tpu.dot_dimension_numbers<[1], [0], [0], [1], [0, 0, 1, 1], [], []>} : vector<256x8xf32>, vector<8x24xf32>, vector<256x24xf32> -> vector<256x24xf32>
    %4 = vector.extract_strided_slice %3 {offsets = [0, 0], sizes = [256, 4], strides = [1, 1]} : vector<256x24xf32> to vector<256x4xf32>
    %5 = vector.extract_strided_slice %3 {offsets = [0, 8], sizes = [256, 4], strides = [1, 1]} : vector<256x24xf32> to vector<256x4xf32>
    %6 = vector.extract_strided_slice %3 {offsets = [0, 16], sizes = [256, 4], strides = [1, 1]} : vector<256x24xf32> to vector<256x4xf32>
    %7 = arith.mulf %4, %4 : vector<256x4xf32>
    %cst_4 = arith.constant dense<0.000000e+00> : vector<4xf32>
    %8 = vector.multi_reduction <add>, %7, %cst_4 [0] : vector<256x4xf32> to vector<4xf32>
    %9 = vector.shape_cast %8 : vector<4xf32> to vector<1x4xf32>
    %cst_5 = arith.constant 1.000000e-24 : f32
    %10 = vector.broadcast %cst_5 : f32 to vector<1x4xf32>
    %11 = arith.maximumf %9, %10 : vector<1x4xf32>
    %12 = math.rsqrt %11 : vector<1x4xf32>
    %13 = vector.broadcast %12 : vector<1x4xf32> to vector<256x4xf32>
    %14 = arith.mulf %4, %13 : vector<256x4xf32>
    %15 = arith.mulf %5, %5 : vector<256x4xf32>
    %cst_6 = arith.constant dense<0.000000e+00> : vector<4xf32>
    %16 = vector.multi_reduction <add>, %15, %cst_6 [0] : vector<256x4xf32> to vector<4xf32>
    %17 = vector.shape_cast %16 : vector<4xf32> to vector<1x4xf32>
    %cst_7 = arith.constant 1.000000e-24 : f32
    %18 = vector.broadcast %cst_7 : f32 to vector<1x4xf32>
    %19 = arith.maximumf %17, %18 : vector<1x4xf32>
    %20 = math.rsqrt %19 : vector<1x4xf32>
    %21 = vector.broadcast %20 : vector<1x4xf32> to vector<256x4xf32>
    %22 = arith.mulf %5, %21 : vector<256x4xf32>
    %cst_8 = arith.constant dense<0.000000e+00> : vector<4x4xf32>
    %23 = tpu.matmul %14, %22, %cst_8 {dimension_numbers = #tpu.dot_dimension_numbers<[0], [0], [1], [1], [0, 1, 1, 1], [], []>} : vector<256x4xf32>, vector<256x4xf32>, vector<4x4xf32> -> vector<4x4xf32>
    %c0_9 = arith.constant 0 : index
    %24 = memref.load %arg5[%c0_9] : memref<2xf32, #tpu.memory_space<smem>>
    %25 = vector.broadcast %24 : f32 to vector<4x4xf32>
    %26 = arith.mulf %23, %25 : vector<4x4xf32>
    %cst_10 = arith.constant dense<0xFF800000> : vector<4xf32>
    %27 = vector.multi_reduction <maximumf>, %26, %cst_10 [0] : vector<4x4xf32> to vector<4xf32>
    %28 = vector.shape_cast %27 : vector<4xf32> to vector<1x4xf32>
    %29 = vector.broadcast %28 : vector<1x4xf32> to vector<4x4xf32>
    %30 = arith.subf %26, %29 : vector<4x4xf32>
    %31 = math.exp %30 : vector<4x4xf32>
    %cst_11 = arith.constant dense<0.000000e+00> : vector<4xf32>
    %32 = vector.multi_reduction <add>, %31, %cst_11 [0] : vector<4x4xf32> to vector<4xf32>
    %33 = vector.shape_cast %32 : vector<4xf32> to vector<1x4xf32>
    %34 = tpu.reciprocal %33 {approx = true} : vector<1x4xf32> -> vector<1x4xf32>
    %35 = vector.broadcast %34 : vector<1x4xf32> to vector<4x4xf32>
    %36 = arith.mulf %31, %35 : vector<4x4xf32>
    %cst_12 = arith.constant dense<0.000000e+00> : vector<256x4xf32>
    %37 = tpu.matmul %6, %36, %cst_12 {dimension_numbers = #tpu.dot_dimension_numbers<[1], [0], [0], [1], [0, 0, 1, 1], [], []>} : vector<256x4xf32>, vector<4x4xf32>, vector<256x4xf32> -> vector<256x4xf32>
    %38 = vector.extract_strided_slice %3 {offsets = [0, 4], sizes = [256, 4], strides = [1, 1]} : vector<256x24xf32> to vector<256x4xf32>
    %39 = vector.extract_strided_slice %3 {offsets = [0, 12], sizes = [256, 4], strides = [1, 1]} : vector<256x24xf32> to vector<256x4xf32>
    %40 = vector.extract_strided_slice %3 {offsets = [0, 20], sizes = [256, 4], strides = [1, 1]} : vector<256x24xf32> to vector<256x4xf32>
    %41 = arith.mulf %38, %38 : vector<256x4xf32>
    %cst_13 = arith.constant dense<0.000000e+00> : vector<4xf32>
    %42 = vector.multi_reduction <add>, %41, %cst_13 [0] : vector<256x4xf32> to vector<4xf32>
    %43 = vector.shape_cast %42 : vector<4xf32> to vector<1x4xf32>
    %cst_14 = arith.constant 1.000000e-24 : f32
    %44 = vector.broadcast %cst_14 : f32 to vector<1x4xf32>
    %45 = arith.maximumf %43, %44 : vector<1x4xf32>
    %46 = math.rsqrt %45 : vector<1x4xf32>
    %47 = vector.broadcast %46 : vector<1x4xf32> to vector<256x4xf32>
    %48 = arith.mulf %38, %47 : vector<256x4xf32>
    %49 = arith.mulf %39, %39 : vector<256x4xf32>
    %cst_15 = arith.constant dense<0.000000e+00> : vector<4xf32>
    %50 = vector.multi_reduction <add>, %49, %cst_15 [0] : vector<256x4xf32> to vector<4xf32>
    %51 = vector.shape_cast %50 : vector<4xf32> to vector<1x4xf32>
    %cst_16 = arith.constant 1.000000e-24 : f32
    %52 = vector.broadcast %cst_16 : f32 to vector<1x4xf32>
    %53 = arith.maximumf %51, %52 : vector<1x4xf32>
    %54 = math.rsqrt %53 : vector<1x4xf32>
    %55 = vector.broadcast %54 : vector<1x4xf32> to vector<256x4xf32>
    %56 = arith.mulf %39, %55 : vector<256x4xf32>
    %cst_17 = arith.constant dense<0.000000e+00> : vector<4x4xf32>
    %57 = tpu.matmul %48, %56, %cst_17 {dimension_numbers = #tpu.dot_dimension_numbers<[0], [0], [1], [1], [0, 1, 1, 1], [], []>} : vector<256x4xf32>, vector<256x4xf32>, vector<4x4xf32> -> vector<4x4xf32>
    %c1 = arith.constant 1 : index
    %58 = memref.load %arg5[%c1] : memref<2xf32, #tpu.memory_space<smem>>
    %59 = vector.broadcast %58 : f32 to vector<4x4xf32>
    %60 = arith.mulf %57, %59 : vector<4x4xf32>
    %cst_18 = arith.constant dense<0xFF800000> : vector<4xf32>
    %61 = vector.multi_reduction <maximumf>, %60, %cst_18 [0] : vector<4x4xf32> to vector<4xf32>
    %62 = vector.shape_cast %61 : vector<4xf32> to vector<1x4xf32>
    %63 = vector.broadcast %62 : vector<1x4xf32> to vector<4x4xf32>
    %64 = arith.subf %60, %63 : vector<4x4xf32>
    %65 = math.exp %64 : vector<4x4xf32>
    %cst_19 = arith.constant dense<0.000000e+00> : vector<4xf32>
    %66 = vector.multi_reduction <add>, %65, %cst_19 [0] : vector<4x4xf32> to vector<4xf32>
    %67 = vector.shape_cast %66 : vector<4xf32> to vector<1x4xf32>
    %68 = tpu.reciprocal %67 {approx = true} : vector<1x4xf32> -> vector<1x4xf32>
    %69 = vector.broadcast %68 : vector<1x4xf32> to vector<4x4xf32>
    %70 = arith.mulf %65, %69 : vector<4x4xf32>
    %cst_20 = arith.constant dense<0.000000e+00> : vector<256x4xf32>
    %71 = tpu.matmul %40, %70, %cst_20 {dimension_numbers = #tpu.dot_dimension_numbers<[1], [0], [0], [1], [0, 0, 1, 1], [], []>} : vector<256x4xf32>, vector<4x4xf32>, vector<256x4xf32> -> vector<256x4xf32>
    %72 = tpu.concatenate %37, %71 in 1 : vector<256x4xf32>, vector<256x4xf32> -> vector<256x8xf32>
    %c0_21 = arith.constant 0 : index
    %c0_22 = arith.constant 0 : index
    %73 = vector.load %arg3[%c0_21, %c0_22] : memref<8x8xf32, #tpu.memory_space<vmem>>, vector<8x8xf32>
    %cst_23 = arith.constant dense<0.000000e+00> : vector<256x8xf32>
    %74 = tpu.matmul %72, %73, %cst_23 {dimension_numbers = #tpu.dot_dimension_numbers<[1], [0], [0], [1], [0, 0, 1, 1], [], []>} : vector<256x8xf32>, vector<8x8xf32>, vector<256x8xf32> -> vector<256x8xf32>
    %c0_24 = arith.constant 0 : index
    %c0_25 = arith.constant 0 : index
    %75 = vector.load %arg4[%c0_24, %c0_25] : memref<1x8xf32, #tpu.memory_space<vmem>>, vector<1x8xf32>
    %76 = vector.broadcast %75 : vector<1x8xf32> to vector<256x8xf32>
    %77 = arith.addf %74, %76 : vector<256x8xf32>
    %cst_26 = arith.constant 0.000000e+00 : f32
    %78 = vector.broadcast %cst_26 : f32 to vector<1x10x80xf32>
    %c0_27 = arith.constant 0 : index
    %c0_28 = arith.constant 0 : index
    %c0_29 = arith.constant 0 : index
    %79 = vector.load %arg9[%c0_27, %c0_28, %c0_29] : memref<6x10x80xf32, #tpu.memory_space<vmem>>, vector<1x10x80xf32>
    tpu.vector_store %arg9[%c0_27, %c0_28, %c0_29], %78 {strides = array<i32>} : memref<6x10x80xf32, #tpu.memory_space<vmem>>, vector<1x10x80xf32>,
    %cst_30 = arith.constant 0.000000e+00 : f32
    %80 = vector.broadcast %cst_30 : f32 to vector<1x10x80xf32>
    %c5 = arith.constant 5 : index
    %c0_31 = arith.constant 0 : index
    %c0_32 = arith.constant 0 : index
    %81 = vector.load %arg9[%c5, %c0_31, %c0_32] : memref<6x10x80xf32, #tpu.memory_space<vmem>>, vector<1x10x80xf32>
    tpu.vector_store %arg9[%c5, %c0_31, %c0_32], %80 {strides = array<i32>} : memref<6x10x80xf32, #tpu.memory_space<vmem>>, vector<1x10x80xf32>,
    %cst_33 = arith.constant 0.000000e+00 : f32
    %82 = vector.broadcast %cst_33 : f32 to vector<4x1x80xf32>
    %c1_34 = arith.constant 1 : index
    %c0_35 = arith.constant 0 : index
    %c0_36 = arith.constant 0 : index
    %83 = vector.load %arg9[%c1_34, %c0_35, %c0_36] : memref<6x10x80xf32, #tpu.memory_space<vmem>>, vector<4x1x80xf32>
    tpu.vector_store %arg9[%c1_34, %c0_35, %c0_36], %82 {strides = array<i32>} : memref<6x10x80xf32, #tpu.memory_space<vmem>>, vector<4x1x80xf32>,
    %cst_37 = arith.constant 0.000000e+00 : f32
    %84 = vector.broadcast %cst_37 : f32 to vector<4x1x80xf32>
    %c1_38 = arith.constant 1 : index
    %c9 = arith.constant 9 : index
    %c0_39 = arith.constant 0 : index
    %85 = vector.load %arg9[%c1_38, %c9, %c0_39] : memref<6x10x80xf32, #tpu.memory_space<vmem>>, vector<4x1x80xf32>
    tpu.vector_store %arg9[%c1_38, %c9, %c0_39], %84 {strides = array<i32>} : memref<6x10x80xf32, #tpu.memory_space<vmem>>, vector<4x1x80xf32>,
    %cst_40 = arith.constant 0.000000e+00 : f32
    %86 = vector.broadcast %cst_40 : f32 to vector<4x8x8xf32>
    %c1_41 = arith.constant 1 : index
    %c1_42 = arith.constant 1 : index
    %c0_43 = arith.constant 0 : index
    %87 = vector.load %arg9[%c1_41, %c1_42, %c0_43] : memref<6x10x80xf32, #tpu.memory_space<vmem>>, vector<4x8x8xf32>
    tpu.vector_store %arg9[%c1_41, %c1_42, %c0_43], %86 {strides = array<i32>} : memref<6x10x80xf32, #tpu.memory_space<vmem>>, vector<4x8x8xf32>,
    %cst_44 = arith.constant 0.000000e+00 : f32
    %88 = vector.broadcast %cst_44 : f32 to vector<4x8x8xf32>
    %c1_45 = arith.constant 1 : index
    %c1_46 = arith.constant 1 : index
    %c72 = arith.constant 72 : index
    %89 = vector.load %arg9[%c1_45, %c1_46, %c72] : memref<6x10x80xf32, #tpu.memory_space<vmem>>, vector<4x8x8xf32>
    tpu.vector_store %arg9[%c1_45, %c1_46, %c72], %88 {strides = array<i32>} : memref<6x10x80xf32, #tpu.memory_space<vmem>>, vector<4x8x8xf32>,
    %90 = vector.shape_cast %1 : vector<256x8xf32> to vector<4x8x8x8xf32>
    %91 = vector.extract_strided_slice %90 {offsets = [0, 0, 0, 0], sizes = [4, 8, 1, 8], strides = [1, 1, 1, 1]} : vector<4x8x8x8xf32> to vector<4x8x1x8xf32>
    %92 = vector.shape_cast %91 : vector<4x8x1x8xf32> to vector<4x8x8xf32>
    %93 = vector.extract_strided_slice %90 {offsets = [0, 0, 1, 0], sizes = [4, 8, 1, 8], strides = [1, 1, 1, 1]} : vector<4x8x8x8xf32> to vector<4x8x1x8xf32>
    %94 = vector.shape_cast %93 : vector<4x8x1x8xf32> to vector<4x8x8xf32>
    %95 = vector.extract_strided_slice %90 {offsets = [0, 0, 2, 0], sizes = [4, 8, 1, 8], strides = [1, 1, 1, 1]} : vector<4x8x8x8xf32> to vector<4x8x1x8xf32>
    %96 = vector.shape_cast %95 : vector<4x8x1x8xf32> to vector<4x8x8xf32>
    %97 = vector.extract_strided_slice %90 {offsets = [0, 0, 3, 0], sizes = [4, 8, 1, 8], strides = [1, 1, 1, 1]} : vector<4x8x8x8xf32> to vector<4x8x1x8xf32>
    %98 = vector.shape_cast %97 : vector<4x8x1x8xf32> to vector<4x8x8xf32>
    %99 = vector.extract_strided_slice %90 {offsets = [0, 0, 4, 0], sizes = [4, 8, 1, 8], strides = [1, 1, 1, 1]} : vector<4x8x8x8xf32> to vector<4x8x1x8xf32>
    %100 = vector.shape_cast %99 : vector<4x8x1x8xf32> to vector<4x8x8xf32>
    %101 = vector.extract_strided_slice %90 {offsets = [0, 0, 5, 0], sizes = [4, 8, 1, 8], strides = [1, 1, 1, 1]} : vector<4x8x8x8xf32> to vector<4x8x1x8xf32>
    %102 = vector.shape_cast %101 : vector<4x8x1x8xf32> to vector<4x8x8xf32>
    %103 = vector.extract_strided_slice %90 {offsets = [0, 0, 6, 0], sizes = [4, 8, 1, 8], strides = [1, 1, 1, 1]} : vector<4x8x8x8xf32> to vector<4x8x1x8xf32>
    %104 = vector.shape_cast %103 : vector<4x8x1x8xf32> to vector<4x8x8xf32>
    %105 = vector.extract_strided_slice %90 {offsets = [0, 0, 7, 0], sizes = [4, 8, 1, 8], strides = [1, 1, 1, 1]} : vector<4x8x8x8xf32> to vector<4x8x1x8xf32>
    %106 = vector.shape_cast %105 : vector<4x8x1x8xf32> to vector<4x8x8xf32>
    %107 = tpu.concatenate %92, %94, %96, %98, %100, %102, %104, %106 in 2 : vector<4x8x8xf32>, vector<4x8x8xf32>, vector<4x8x8xf32>, vector<4x8x8xf32>, vector<4x8x8xf32>, vector<4x8x8xf32>, vector<4x8x8xf32>, vector<4x8x8xf32> -> vector<4x8x64xf32>
    %c1_47 = arith.constant 1 : index
    %c1_48 = arith.constant 1 : index
    %c8 = arith.constant 8 : index
    %108 = vector.load %arg9[%c1_47, %c1_48, %c8] : memref<6x10x80xf32, #tpu.memory_space<vmem>>, vector<4x8x64xf32>
    tpu.vector_store %arg9[%c1_47, %c1_48, %c8], %107 {strides = array<i32>} : memref<6x10x80xf32, #tpu.memory_space<vmem>>, vector<4x8x64xf32>,
    %c0_49 = arith.constant 0 : index
    %c0_50 = arith.constant 0 : index
    %c0_51 = arith.constant 0 : index
    %c0_52 = arith.constant 0 : index
    %109 = vector.load %arg6[%c0_49, %c0_50, %c0_51, %c0_52] : memref<3x3x3x64xf32, #tpu.memory_space<vmem>>, vector<3x3x3x64xf32>
    %c0_53 = arith.constant 0 : index
    %c0_54 = arith.constant 0 : index
    %c0_55 = arith.constant 0 : index
    %c0_56 = arith.constant 0 : index
    %110 = vector.load %arg7[%c0_53, %c0_54, %c0_55, %c0_56] : memref<3x3x3x64xf32, #tpu.memory_space<vmem>>, vector<3x3x3x64xf32>
    %cst_57 = arith.constant 0.000000e+00 : f32
    %111 = vector.broadcast %cst_57 : f32 to vector<4x8x64xf32>
    %c0_58 = arith.constant 0 : index
    %c0_59 = arith.constant 0 : index
    %c0_60 = arith.constant 0 : index
    %112 = vector.load %arg9[%c0_58, %c0_59, %c0_60] : memref<6x10x80xf32, #tpu.memory_space<vmem>>, vector<6x10x80xf32>
    %113 = vector.extract_strided_slice %112 {offsets = [0, 0, 0], sizes = [6, 10, 64], strides = [1, 1, 1]} : vector<6x10x80xf32> to vector<6x10x64xf32>
    %114 = vector.extract_strided_slice %113 {offsets = [0, 0, 0], sizes = [4, 8, 64], strides = [1, 1, 1]} : vector<6x10x64xf32> to vector<4x8x64xf32>
    %115 = vector.extract_strided_slice %109 {offsets = [0, 0, 0, 0], sizes = [1, 1, 1, 64], strides = [1, 1, 1, 1]} : vector<3x3x3x64xf32> to vector<1x1x1x64xf32>
    %116 = vector.shape_cast %115 : vector<1x1x1x64xf32> to vector<64xf32>
    %117 = vector.shape_cast %116 : vector<64xf32> to vector<1x1x64xf32>
    %118 = vector.broadcast %117 : vector<1x1x64xf32> to vector<4x8x64xf32>
    %119 = arith.mulf %114, %118 : vector<4x8x64xf32>
    %120 = arith.addf %111, %119 : vector<4x8x64xf32>
    %121 = vector.extract_strided_slice %113 {offsets = [0, 1, 0], sizes = [4, 8, 64], strides = [1, 1, 1]} : vector<6x10x64xf32> to vector<4x8x64xf32>
    %122 = vector.extract_strided_slice %109 {offsets = [0, 1, 0, 0], sizes = [1, 1, 1, 64], strides = [1, 1, 1, 1]} : vector<3x3x3x64xf32> to vector<1x1x1x64xf32>
    %123 = vector.shape_cast %122 : vector<1x1x1x64xf32> to vector<64xf32>
    %124 = vector.shape_cast %123 : vector<64xf32> to vector<1x1x64xf32>
    %125 = vector.broadcast %124 : vector<1x1x64xf32> to vector<4x8x64xf32>
    %126 = arith.mulf %121, %125 : vector<4x8x64xf32>
    %127 = arith.addf %120, %126 : vector<4x8x64xf32>
    %128 = vector.extract_strided_slice %113 {offsets = [0, 2, 0], sizes = [4, 8, 64], strides = [1, 1, 1]} : vector<6x10x64xf32> to vector<4x8x64xf32>
    %129 = vector.extract_strided_slice %109 {offsets = [0, 2, 0, 0], sizes = [1, 1, 1, 64], strides = [1, 1, 1, 1]} : vector<3x3x3x64xf32> to vector<1x1x1x64xf32>
    %130 = vector.shape_cast %129 : vector<1x1x1x64xf32> to vector<64xf32>
    %131 = vector.shape_cast %130 : vector<64xf32> to vector<1x1x64xf32>
    %132 = vector.broadcast %131 : vector<1x1x64xf32> to vector<4x8x64xf32>
    %133 = arith.mulf %128, %132 : vector<4x8x64xf32>
    %134 = arith.addf %127, %133 : vector<4x8x64xf32>
    %135 = vector.extract_strided_slice %113 {offsets = [1, 0, 0], sizes = [4, 8, 64], strides = [1, 1, 1]} : vector<6x10x64xf32> to vector<4x8x64xf32>
    %136 = vector.extract_strided_slice %109 {offsets = [1, 0, 0, 0], sizes = [1, 1, 1, 64], strides = [1, 1, 1, 1]} : vector<3x3x3x64xf32> to vector<1x1x1x64xf32>
    %137 = vector.shape_cast %136 : vector<1x1x1x64xf32> to vector<64xf32>
    %138 = vector.shape_cast %137 : vector<64xf32> to vector<1x1x64xf32>
    %139 = vector.broadcast %138 : vector<1x1x64xf32> to vector<4x8x64xf32>
    %140 = arith.mulf %135, %139 : vector<4x8x64xf32>
    %141 = arith.addf %134, %140 : vector<4x8x64xf32>
    %142 = vector.extract_strided_slice %113 {offsets = [1, 1, 0], sizes = [4, 8, 64], strides = [1, 1, 1]} : vector<6x10x64xf32> to vector<4x8x64xf32>
    %143 = vector.extract_strided_slice %109 {offsets = [1, 1, 0, 0], sizes = [1, 1, 1, 64], strides = [1, 1, 1, 1]} : vector<3x3x3x64xf32> to vector<1x1x1x64xf32>
    %144 = vector.shape_cast %143 : vector<1x1x1x64xf32> to vector<64xf32>
    %145 = vector.shape_cast %144 : vector<64xf32> to vector<1x1x64xf32>
    %146 = vector.broadcast %145 : vector<1x1x64xf32> to vector<4x8x64xf32>
    %147 = arith.mulf %142, %146 : vector<4x8x64xf32>
    %148 = arith.addf %141, %147 : vector<4x8x64xf32>
    %149 = vector.extract_strided_slice %113 {offsets = [1, 2, 0], sizes = [4, 8, 64], strides = [1, 1, 1]} : vector<6x10x64xf32> to vector<4x8x64xf32>
    %150 = vector.extract_strided_slice %109 {offsets = [1, 2, 0, 0], sizes = [1, 1, 1, 64], strides = [1, 1, 1, 1]} : vector<3x3x3x64xf32> to vector<1x1x1x64xf32>
    %151 = vector.shape_cast %150 : vector<1x1x1x64xf32> to vector<64xf32>
    %152 = vector.shape_cast %151 : vector<64xf32> to vector<1x1x64xf32>
    %153 = vector.broadcast %152 : vector<1x1x64xf32> to vector<4x8x64xf32>
    %154 = arith.mulf %149, %153 : vector<4x8x64xf32>
    %155 = arith.addf %148, %154 : vector<4x8x64xf32>
    %156 = vector.extract_strided_slice %113 {offsets = [2, 0, 0], sizes = [4, 8, 64], strides = [1, 1, 1]} : vector<6x10x64xf32> to vector<4x8x64xf32>
    %157 = vector.extract_strided_slice %109 {offsets = [2, 0, 0, 0], sizes = [1, 1, 1, 64], strides = [1, 1, 1, 1]} : vector<3x3x3x64xf32> to vector<1x1x1x64xf32>
    %158 = vector.shape_cast %157 : vector<1x1x1x64xf32> to vector<64xf32>
    %159 = vector.shape_cast %158 : vector<64xf32> to vector<1x1x64xf32>
    %160 = vector.broadcast %159 : vector<1x1x64xf32> to vector<4x8x64xf32>
    %161 = arith.mulf %156, %160 : vector<4x8x64xf32>
    %162 = arith.addf %155, %161 : vector<4x8x64xf32>
    %163 = vector.extract_strided_slice %113 {offsets = [2, 1, 0], sizes = [4, 8, 64], strides = [1, 1, 1]} : vector<6x10x64xf32> to vector<4x8x64xf32>
    %164 = vector.extract_strided_slice %109 {offsets = [2, 1, 0, 0], sizes = [1, 1, 1, 64], strides = [1, 1, 1, 1]} : vector<3x3x3x64xf32> to vector<1x1x1x64xf32>
    %165 = vector.shape_cast %164 : vector<1x1x1x64xf32> to vector<64xf32>
    %166 = vector.shape_cast %165 : vector<64xf32> to vector<1x1x64xf32>
    %167 = vector.broadcast %166 : vector<1x1x64xf32> to vector<4x8x64xf32>
    %168 = arith.mulf %163, %167 : vector<4x8x64xf32>
    %169 = arith.addf %162, %168 : vector<4x8x64xf32>
    %170 = vector.extract_strided_slice %113 {offsets = [2, 2, 0], sizes = [4, 8, 64], strides = [1, 1, 1]} : vector<6x10x64xf32> to vector<4x8x64xf32>
    %171 = vector.extract_strided_slice %109 {offsets = [2, 2, 0, 0], sizes = [1, 1, 1, 64], strides = [1, 1, 1, 1]} : vector<3x3x3x64xf32> to vector<1x1x1x64xf32>
    %172 = vector.shape_cast %171 : vector<1x1x1x64xf32> to vector<64xf32>
    %173 = vector.shape_cast %172 : vector<64xf32> to vector<1x1x64xf32>
    %174 = vector.broadcast %173 : vector<1x1x64xf32> to vector<4x8x64xf32>
    %175 = arith.mulf %170, %174 : vector<4x8x64xf32>
    %176 = arith.addf %169, %175 : vector<4x8x64xf32>
    %177 = vector.extract_strided_slice %112 {offsets = [0, 0, 8], sizes = [6, 10, 64], strides = [1, 1, 1]} : vector<6x10x80xf32> to vector<6x10x64xf32>
    %178 = vector.extract_strided_slice %177 {offsets = [0, 0, 0], sizes = [4, 8, 64], strides = [1, 1, 1]} : vector<6x10x64xf32> to vector<4x8x64xf32>
    %179 = vector.extract_strided_slice %109 {offsets = [0, 0, 1, 0], sizes = [1, 1, 1, 64], strides = [1, 1, 1, 1]} : vector<3x3x3x64xf32> to vector<1x1x1x64xf32>
    %180 = vector.shape_cast %179 : vector<1x1x1x64xf32> to vector<64xf32>
    %181 = vector.shape_cast %180 : vector<64xf32> to vector<1x1x64xf32>
    %182 = vector.broadcast %181 : vector<1x1x64xf32> to vector<4x8x64xf32>
    %183 = arith.mulf %178, %182 : vector<4x8x64xf32>
    %184 = arith.addf %176, %183 : vector<4x8x64xf32>
    %185 = vector.extract_strided_slice %177 {offsets = [0, 1, 0], sizes = [4, 8, 64], strides = [1, 1, 1]} : vector<6x10x64xf32> to vector<4x8x64xf32>
    %186 = vector.extract_strided_slice %109 {offsets = [0, 1, 1, 0], sizes = [1, 1, 1, 64], strides = [1, 1, 1, 1]} : vector<3x3x3x64xf32> to vector<1x1x1x64xf32>
    %187 = vector.shape_cast %186 : vector<1x1x1x64xf32> to vector<64xf32>
    %188 = vector.shape_cast %187 : vector<64xf32> to vector<1x1x64xf32>
    %189 = vector.broadcast %188 : vector<1x1x64xf32> to vector<4x8x64xf32>
    %190 = arith.mulf %185, %189 : vector<4x8x64xf32>
    %191 = arith.addf %184, %190 : vector<4x8x64xf32>
    %192 = vector.extract_strided_slice %177 {offsets = [0, 2, 0], sizes = [4, 8, 64], strides = [1, 1, 1]} : vector<6x10x64xf32> to vector<4x8x64xf32>
    %193 = vector.extract_strided_slice %109 {offsets = [0, 2, 1, 0], sizes = [1, 1, 1, 64], strides = [1, 1, 1, 1]} : vector<3x3x3x64xf32> to vector<1x1x1x64xf32>
    %194 = vector.shape_cast %193 : vector<1x1x1x64xf32> to vector<64xf32>
    %195 = vector.shape_cast %194 : vector<64xf32> to vector<1x1x64xf32>
    %196 = vector.broadcast %195 : vector<1x1x64xf32> to vector<4x8x64xf32>
    %197 = arith.mulf %192, %196 : vector<4x8x64xf32>
    %198 = arith.addf %191, %197 : vector<4x8x64xf32>
    %199 = vector.extract_strided_slice %177 {offsets = [1, 0, 0], sizes = [4, 8, 64], strides = [1, 1, 1]} : vector<6x10x64xf32> to vector<4x8x64xf32>
    %200 = vector.extract_strided_slice %109 {offsets = [1, 0, 1, 0], sizes = [1, 1, 1, 64], strides = [1, 1, 1, 1]} : vector<3x3x3x64xf32> to vector<1x1x1x64xf32>
    %201 = vector.shape_cast %200 : vector<1x1x1x64xf32> to vector<64xf32>
    %202 = vector.shape_cast %201 : vector<64xf32> to vector<1x1x64xf32>
    %203 = vector.broadcast %202 : vector<1x1x64xf32> to vector<4x8x64xf32>
    %204 = arith.mulf %199, %203 : vector<4x8x64xf32>
    %205 = arith.addf %198, %204 : vector<4x8x64xf32>
    %206 = vector.extract_strided_slice %177 {offsets = [1, 1, 0], sizes = [4, 8, 64], strides = [1, 1, 1]} : vector<6x10x64xf32> to vector<4x8x64xf32>
    %207 = vector.extract_strided_slice %109 {offsets = [1, 1, 1, 0], sizes = [1, 1, 1, 64], strides = [1, 1, 1, 1]} : vector<3x3x3x64xf32> to vector<1x1x1x64xf32>
    %208 = vector.shape_cast %207 : vector<1x1x1x64xf32> to vector<64xf32>
    %209 = vector.shape_cast %208 : vector<64xf32> to vector<1x1x64xf32>
    %210 = vector.broadcast %209 : vector<1x1x64xf32> to vector<4x8x64xf32>
    %211 = arith.mulf %206, %210 : vector<4x8x64xf32>
    %212 = arith.addf %205, %211 : vector<4x8x64xf32>
    %213 = vector.extract_strided_slice %177 {offsets = [1, 2, 0], sizes = [4, 8, 64], strides = [1, 1, 1]} : vector<6x10x64xf32> to vector<4x8x64xf32>
    %214 = vector.extract_strided_slice %109 {offsets = [1, 2, 1, 0], sizes = [1, 1, 1, 64], strides = [1, 1, 1, 1]} : vector<3x3x3x64xf32> to vector<1x1x1x64xf32>
    %215 = vector.shape_cast %214 : vector<1x1x1x64xf32> to vector<64xf32>
    %216 = vector.shape_cast %215 : vector<64xf32> to vector<1x1x64xf32>
    %217 = vector.broadcast %216 : vector<1x1x64xf32> to vector<4x8x64xf32>
    %218 = arith.mulf %213, %217 : vector<4x8x64xf32>
    %219 = arith.addf %212, %218 : vector<4x8x64xf32>
    %220 = vector.extract_strided_slice %177 {offsets = [2, 0, 0], sizes = [4, 8, 64], strides = [1, 1, 1]} : vector<6x10x64xf32> to vector<4x8x64xf32>
    %221 = vector.extract_strided_slice %109 {offsets = [2, 0, 1, 0], sizes = [1, 1, 1, 64], strides = [1, 1, 1, 1]} : vector<3x3x3x64xf32> to vector<1x1x1x64xf32>
    %222 = vector.shape_cast %221 : vector<1x1x1x64xf32> to vector<64xf32>
    %223 = vector.shape_cast %222 : vector<64xf32> to vector<1x1x64xf32>
    %224 = vector.broadcast %223 : vector<1x1x64xf32> to vector<4x8x64xf32>
    %225 = arith.mulf %220, %224 : vector<4x8x64xf32>
    %226 = arith.addf %219, %225 : vector<4x8x64xf32>
    %227 = vector.extract_strided_slice %177 {offsets = [2, 1, 0], sizes = [4, 8, 64], strides = [1, 1, 1]} : vector<6x10x64xf32> to vector<4x8x64xf32>
    %228 = vector.extract_strided_slice %109 {offsets = [2, 1, 1, 0], sizes = [1, 1, 1, 64], strides = [1, 1, 1, 1]} : vector<3x3x3x64xf32> to vector<1x1x1x64xf32>
    %229 = vector.shape_cast %228 : vector<1x1x1x64xf32> to vector<64xf32>
    %230 = vector.shape_cast %229 : vector<64xf32> to vector<1x1x64xf32>
    %231 = vector.broadcast %230 : vector<1x1x64xf32> to vector<4x8x64xf32>
    %232 = arith.mulf %227, %231 : vector<4x8x64xf32>
    %233 = arith.addf %226, %232 : vector<4x8x64xf32>
    %234 = vector.extract_strided_slice %177 {offsets = [2, 2, 0], sizes = [4, 8, 64], strides = [1, 1, 1]} : vector<6x10x64xf32> to vector<4x8x64xf32>
    %235 = vector.extract_strided_slice %109 {offsets = [2, 2, 1, 0], sizes = [1, 1, 1, 64], strides = [1, 1, 1, 1]} : vector<3x3x3x64xf32> to vector<1x1x1x64xf32>
    %236 = vector.shape_cast %235 : vector<1x1x1x64xf32> to vector<64xf32>
    %237 = vector.shape_cast %236 : vector<64xf32> to vector<1x1x64xf32>
    %238 = vector.broadcast %237 : vector<1x1x64xf32> to vector<4x8x64xf32>
    %239 = arith.mulf %234, %238 : vector<4x8x64xf32>
    %240 = arith.addf %233, %239 : vector<4x8x64xf32>
    %241 = vector.extract_strided_slice %112 {offsets = [0, 0, 16], sizes = [6, 10, 64], strides = [1, 1, 1]} : vector<6x10x80xf32> to vector<6x10x64xf32>
    %242 = vector.extract_strided_slice %241 {offsets = [0, 0, 0], sizes = [4, 8, 64], strides = [1, 1, 1]} : vector<6x10x64xf32> to vector<4x8x64xf32>
    %243 = vector.extract_strided_slice %109 {offsets = [0, 0, 2, 0], sizes = [1, 1, 1, 64], strides = [1, 1, 1, 1]} : vector<3x3x3x64xf32> to vector<1x1x1x64xf32>
    %244 = vector.shape_cast %243 : vector<1x1x1x64xf32> to vector<64xf32>
    %245 = vector.shape_cast %244 : vector<64xf32> to vector<1x1x64xf32>
    %246 = vector.broadcast %245 : vector<1x1x64xf32> to vector<4x8x64xf32>
    %247 = arith.mulf %242, %246 : vector<4x8x64xf32>
    %248 = arith.addf %240, %247 : vector<4x8x64xf32>
    %249 = vector.extract_strided_slice %241 {offsets = [0, 1, 0], sizes = [4, 8, 64], strides = [1, 1, 1]} : vector<6x10x64xf32> to vector<4x8x64xf32>
    %250 = vector.extract_strided_slice %109 {offsets = [0, 1, 2, 0], sizes = [1, 1, 1, 64], strides = [1, 1, 1, 1]} : vector<3x3x3x64xf32> to vector<1x1x1x64xf32>
    %251 = vector.shape_cast %250 : vector<1x1x1x64xf32> to vector<64xf32>
    %252 = vector.shape_cast %251 : vector<64xf32> to vector<1x1x64xf32>
    %253 = vector.broadcast %252 : vector<1x1x64xf32> to vector<4x8x64xf32>
    %254 = arith.mulf %249, %253 : vector<4x8x64xf32>
    %255 = arith.addf %248, %254 : vector<4x8x64xf32>
    %256 = vector.extract_strided_slice %241 {offsets = [0, 2, 0], sizes = [4, 8, 64], strides = [1, 1, 1]} : vector<6x10x64xf32> to vector<4x8x64xf32>
    %257 = vector.extract_strided_slice %109 {offsets = [0, 2, 2, 0], sizes = [1, 1, 1, 64], strides = [1, 1, 1, 1]} : vector<3x3x3x64xf32> to vector<1x1x1x64xf32>
    %258 = vector.shape_cast %257 : vector<1x1x1x64xf32> to vector<64xf32>
    %259 = vector.shape_cast %258 : vector<64xf32> to vector<1x1x64xf32>
    %260 = vector.broadcast %259 : vector<1x1x64xf32> to vector<4x8x64xf32>
    %261 = arith.mulf %256, %260 : vector<4x8x64xf32>
    %262 = arith.addf %255, %261 : vector<4x8x64xf32>
    %263 = vector.extract_strided_slice %241 {offsets = [1, 0, 0], sizes = [4, 8, 64], strides = [1, 1, 1]} : vector<6x10x64xf32> to vector<4x8x64xf32>
    %264 = vector.extract_strided_slice %109 {offsets = [1, 0, 2, 0], sizes = [1, 1, 1, 64], strides = [1, 1, 1, 1]} : vector<3x3x3x64xf32> to vector<1x1x1x64xf32>
    %265 = vector.shape_cast %264 : vector<1x1x1x64xf32> to vector<64xf32>
    %266 = vector.shape_cast %265 : vector<64xf32> to vector<1x1x64xf32>
    %267 = vector.broadcast %266 : vector<1x1x64xf32> to vector<4x8x64xf32>
    %268 = arith.mulf %263, %267 : vector<4x8x64xf32>
    %269 = arith.addf %262, %268 : vector<4x8x64xf32>
    %270 = vector.extract_strided_slice %241 {offsets = [1, 1, 0], sizes = [4, 8, 64], strides = [1, 1, 1]} : vector<6x10x64xf32> to vector<4x8x64xf32>
    %271 = vector.extract_strided_slice %109 {offsets = [1, 1, 2, 0], sizes = [1, 1, 1, 64], strides = [1, 1, 1, 1]} : vector<3x3x3x64xf32> to vector<1x1x1x64xf32>
    %272 = vector.shape_cast %271 : vector<1x1x1x64xf32> to vector<64xf32>
    %273 = vector.shape_cast %272 : vector<64xf32> to vector<1x1x64xf32>
    %274 = vector.broadcast %273 : vector<1x1x64xf32> to vector<4x8x64xf32>
    %275 = arith.mulf %270, %274 : vector<4x8x64xf32>
    %276 = arith.addf %269, %275 : vector<4x8x64xf32>
    %277 = vector.extract_strided_slice %241 {offsets = [1, 2, 0], sizes = [4, 8, 64], strides = [1, 1, 1]} : vector<6x10x64xf32> to vector<4x8x64xf32>
    %278 = vector.extract_strided_slice %109 {offsets = [1, 2, 2, 0], sizes = [1, 1, 1, 64], strides = [1, 1, 1, 1]} : vector<3x3x3x64xf32> to vector<1x1x1x64xf32>
    %279 = vector.shape_cast %278 : vector<1x1x1x64xf32> to vector<64xf32>
    %280 = vector.shape_cast %279 : vector<64xf32> to vector<1x1x64xf32>
    %281 = vector.broadcast %280 : vector<1x1x64xf32> to vector<4x8x64xf32>
    %282 = arith.mulf %277, %281 : vector<4x8x64xf32>
    %283 = arith.addf %276, %282 : vector<4x8x64xf32>
    %284 = vector.extract_strided_slice %241 {offsets = [2, 0, 0], sizes = [4, 8, 64], strides = [1, 1, 1]} : vector<6x10x64xf32> to vector<4x8x64xf32>
    %285 = vector.extract_strided_slice %109 {offsets = [2, 0, 2, 0], sizes = [1, 1, 1, 64], strides = [1, 1, 1, 1]} : vector<3x3x3x64xf32> to vector<1x1x1x64xf32>
    %286 = vector.shape_cast %285 : vector<1x1x1x64xf32> to vector<64xf32>
    %287 = vector.shape_cast %286 : vector<64xf32> to vector<1x1x64xf32>
    %288 = vector.broadcast %287 : vector<1x1x64xf32> to vector<4x8x64xf32>
    %289 = arith.mulf %284, %288 : vector<4x8x64xf32>
    %290 = arith.addf %283, %289 : vector<4x8x64xf32>
    %291 = vector.extract_strided_slice %241 {offsets = [2, 1, 0], sizes = [4, 8, 64], strides = [1, 1, 1]} : vector<6x10x64xf32> to vector<4x8x64xf32>
    %292 = vector.extract_strided_slice %109 {offsets = [2, 1, 2, 0], sizes = [1, 1, 1, 64], strides = [1, 1, 1, 1]} : vector<3x3x3x64xf32> to vector<1x1x1x64xf32>
    %293 = vector.shape_cast %292 : vector<1x1x1x64xf32> to vector<64xf32>
    %294 = vector.shape_cast %293 : vector<64xf32> to vector<1x1x64xf32>
    %295 = vector.broadcast %294 : vector<1x1x64xf32> to vector<4x8x64xf32>
    %296 = arith.mulf %291, %295 : vector<4x8x64xf32>
    %297 = arith.addf %290, %296 : vector<4x8x64xf32>
    %298 = vector.extract_strided_slice %241 {offsets = [2, 2, 0], sizes = [4, 8, 64], strides = [1, 1, 1]} : vector<6x10x64xf32> to vector<4x8x64xf32>
    %299 = vector.extract_strided_slice %109 {offsets = [2, 2, 2, 0], sizes = [1, 1, 1, 64], strides = [1, 1, 1, 1]} : vector<3x3x3x64xf32> to vector<1x1x1x64xf32>
    %300 = vector.shape_cast %299 : vector<1x1x1x64xf32> to vector<64xf32>
    %301 = vector.shape_cast %300 : vector<64xf32> to vector<1x1x64xf32>
    %302 = vector.broadcast %301 : vector<1x1x64xf32> to vector<4x8x64xf32>
    %303 = arith.mulf %298, %302 : vector<4x8x64xf32>
    %304 = arith.addf %297, %303 : vector<4x8x64xf32>
    %cst_61 = arith.constant 0.707106769 : f32
    %305 = vector.broadcast %cst_61 : f32 to vector<4x8x64xf32>
    %306 = arith.mulf %304, %305 : vector<4x8x64xf32>
    %307 = math.absf %306 : vector<4x8x64xf32>
    %cst_62 = arith.constant 0.327591091 : f32
    %308 = vector.broadcast %cst_62 : f32 to vector<4x8x64xf32>
    %309 = arith.mulf %308, %307 : vector<4x8x64xf32>
    %cst_63 = arith.constant 1.000000e+00 : f32
    %310 = vector.broadcast %cst_63 : f32 to vector<4x8x64xf32>
    %311 = arith.addf %310, %309 : vector<4x8x64xf32>
    %312 = tpu.reciprocal %311 {approx = true} : vector<4x8x64xf32> -> vector<4x8x64xf32>
    %cst_64 = arith.constant 1.06140542 : f32
    %313 = vector.broadcast %cst_64 : f32 to vector<4x8x64xf32>
    %314 = arith.mulf %312, %313 : vector<4x8x64xf32>
    %cst_65 = arith.constant -1.45315206 : f32
    %315 = vector.broadcast %cst_65 : f32 to vector<4x8x64xf32>
    %316 = arith.addf %315, %314 : vector<4x8x64xf32>
    %317 = arith.mulf %312, %316 : vector<4x8x64xf32>
    %cst_66 = arith.constant 1.42141378 : f32
    %318 = vector.broadcast %cst_66 : f32 to vector<4x8x64xf32>
    %319 = arith.addf %318, %317 : vector<4x8x64xf32>
    %320 = arith.mulf %312, %319 : vector<4x8x64xf32>
    %cst_67 = arith.constant -0.284496725 : f32
    %321 = vector.broadcast %cst_67 : f32 to vector<4x8x64xf32>
    %322 = arith.addf %321, %320 : vector<4x8x64xf32>
    %323 = arith.mulf %312, %322 : vector<4x8x64xf32>
    %cst_68 = arith.constant 0.254829586 : f32
    %324 = vector.broadcast %cst_68 : f32 to vector<4x8x64xf32>
    %325 = arith.addf %324, %323 : vector<4x8x64xf32>
    %326 = arith.mulf %312, %325 : vector<4x8x64xf32>
    %cst_69 = arith.constant 0.000000e+00 : f32
    %327 = vector.broadcast %cst_69 : f32 to vector<4x8x64xf32>
    %328 = arith.subf %327, %307 : vector<4x8x64xf32>
    %329 = arith.mulf %328, %307 : vector<4x8x64xf32>
    %330 = math.exp %329 : vector<4x8x64xf32>
    %331 = arith.mulf %326, %330 : vector<4x8x64xf32>
    %cst_70 = arith.constant 1.000000e+00 : f32
    %332 = vector.broadcast %cst_70 : f32 to vector<4x8x64xf32>
    %333 = arith.subf %332, %331 : vector<4x8x64xf32>
    %cst_71 = arith.constant 0.000000e+00 : f32
    %334 = vector.broadcast %cst_71 : f32 to vector<4x8x64xf32>
    %335 = arith.cmpf olt, %306, %334 : vector<4x8x64xf32>
    %cst_72 = arith.constant 0.000000e+00 : f32
    %336 = vector.broadcast %cst_72 : f32 to vector<4x8x64xf32>
    %337 = arith.subf %336, %333 : vector<4x8x64xf32>
    %338 = arith.select %335, %337, %333 : vector<4x8x64xi1>, vector<4x8x64xf32>
    %cst_73 = arith.constant 5.000000e-01 : f32
    %339 = vector.broadcast %cst_73 : f32 to vector<4x8x64xf32>
    %340 = arith.mulf %339, %304 : vector<4x8x64xf32>
    %cst_74 = arith.constant 1.000000e+00 : f32
    %341 = vector.broadcast %cst_74 : f32 to vector<4x8x64xf32>
    %342 = arith.addf %341, %338 : vector<4x8x64xf32>
    %343 = arith.mulf %340, %342 : vector<4x8x64xf32>
    %c1_75 = arith.constant 1 : index
    %c1_76 = arith.constant 1 : index
    %c8_77 = arith.constant 8 : index
    %344 = vector.load %arg9[%c1_75, %c1_76, %c8_77] : memref<6x10x80xf32, #tpu.memory_space<vmem>>, vector<4x8x64xf32>
    tpu.vector_store %arg9[%c1_75, %c1_76, %c8_77], %343 {strides = array<i32>} : memref<6x10x80xf32, #tpu.memory_space<vmem>>, vector<4x8x64xf32>,
    %cst_78 = arith.constant 0.000000e+00 : f32
    %345 = vector.broadcast %cst_78 : f32 to vector<4x8x64xf32>
    %c0_79 = arith.constant 0 : index
    %c0_80 = arith.constant 0 : index
    %c0_81 = arith.constant 0 : index
    %346 = vector.load %arg9[%c0_79, %c0_80, %c0_81] : memref<6x10x80xf32, #tpu.memory_space<vmem>>, vector<6x10x80xf32>
    %347 = vector.extract_strided_slice %346 {offsets = [0, 0, 0], sizes = [6, 10, 64], strides = [1, 1, 1]} : vector<6x10x80xf32> to vector<6x10x64xf32>
    %348 = vector.extract_strided_slice %347 {offsets = [0, 0, 0], sizes = [4, 8, 64], strides = [1, 1, 1]} : vector<6x10x64xf32> to vector<4x8x64xf32>
    %349 = vector.extract_strided_slice %110 {offsets = [0, 0, 0, 0], sizes = [1, 1, 1, 64], strides = [1, 1, 1, 1]} : vector<3x3x3x64xf32> to vector<1x1x1x64xf32>
    %350 = vector.shape_cast %349 : vector<1x1x1x64xf32> to vector<64xf32>
    %351 = vector.shape_cast %350 : vector<64xf32> to vector<1x1x64xf32>
    %352 = vector.broadcast %351 : vector<1x1x64xf32> to vector<4x8x64xf32>
    %353 = arith.mulf %348, %352 : vector<4x8x64xf32>
    %354 = arith.addf %345, %353 : vector<4x8x64xf32>
    %355 = vector.extract_strided_slice %347 {offsets = [0, 1, 0], sizes = [4, 8, 64], strides = [1, 1, 1]} : vector<6x10x64xf32> to vector<4x8x64xf32>
    %356 = vector.extract_strided_slice %110 {offsets = [0, 1, 0, 0], sizes = [1, 1, 1, 64], strides = [1, 1, 1, 1]} : vector<3x3x3x64xf32> to vector<1x1x1x64xf32>
    %357 = vector.shape_cast %356 : vector<1x1x1x64xf32> to vector<64xf32>
    %358 = vector.shape_cast %357 : vector<64xf32> to vector<1x1x64xf32>
    %359 = vector.broadcast %358 : vector<1x1x64xf32> to vector<4x8x64xf32>
    %360 = arith.mulf %355, %359 : vector<4x8x64xf32>
    %361 = arith.addf %354, %360 : vector<4x8x64xf32>
    %362 = vector.extract_strided_slice %347 {offsets = [0, 2, 0], sizes = [4, 8, 64], strides = [1, 1, 1]} : vector<6x10x64xf32> to vector<4x8x64xf32>
    %363 = vector.extract_strided_slice %110 {offsets = [0, 2, 0, 0], sizes = [1, 1, 1, 64], strides = [1, 1, 1, 1]} : vector<3x3x3x64xf32> to vector<1x1x1x64xf32>
    %364 = vector.shape_cast %363 : vector<1x1x1x64xf32> to vector<64xf32>
    %365 = vector.shape_cast %364 : vector<64xf32> to vector<1x1x64xf32>
    %366 = vector.broadcast %365 : vector<1x1x64xf32> to vector<4x8x64xf32>
    %367 = arith.mulf %362, %366 : vector<4x8x64xf32>
    %368 = arith.addf %361, %367 : vector<4x8x64xf32>
    %369 = vector.extract_strided_slice %347 {offsets = [1, 0, 0], sizes = [4, 8, 64], strides = [1, 1, 1]} : vector<6x10x64xf32> to vector<4x8x64xf32>
    %370 = vector.extract_strided_slice %110 {offsets = [1, 0, 0, 0], sizes = [1, 1, 1, 64], strides = [1, 1, 1, 1]} : vector<3x3x3x64xf32> to vector<1x1x1x64xf32>
    %371 = vector.shape_cast %370 : vector<1x1x1x64xf32> to vector<64xf32>
    %372 = vector.shape_cast %371 : vector<64xf32> to vector<1x1x64xf32>
    %373 = vector.broadcast %372 : vector<1x1x64xf32> to vector<4x8x64xf32>
    %374 = arith.mulf %369, %373 : vector<4x8x64xf32>
    %375 = arith.addf %368, %374 : vector<4x8x64xf32>
    %376 = vector.extract_strided_slice %347 {offsets = [1, 1, 0], sizes = [4, 8, 64], strides = [1, 1, 1]} : vector<6x10x64xf32> to vector<4x8x64xf32>
    %377 = vector.extract_strided_slice %110 {offsets = [1, 1, 0, 0], sizes = [1, 1, 1, 64], strides = [1, 1, 1, 1]} : vector<3x3x3x64xf32> to vector<1x1x1x64xf32>
    %378 = vector.shape_cast %377 : vector<1x1x1x64xf32> to vector<64xf32>
    %379 = vector.shape_cast %378 : vector<64xf32> to vector<1x1x64xf32>
    %380 = vector.broadcast %379 : vector<1x1x64xf32> to vector<4x8x64xf32>
    %381 = arith.mulf %376, %380 : vector<4x8x64xf32>
    %382 = arith.addf %375, %381 : vector<4x8x64xf32>
    %383 = vector.extract_strided_slice %347 {offsets = [1, 2, 0], sizes = [4, 8, 64], strides = [1, 1, 1]} : vector<6x10x64xf32> to vector<4x8x64xf32>
    %384 = vector.extract_strided_slice %110 {offsets = [1, 2, 0, 0], sizes = [1, 1, 1, 64], strides = [1, 1, 1, 1]} : vector<3x3x3x64xf32> to vector<1x1x1x64xf32>
    %385 = vector.shape_cast %384 : vector<1x1x1x64xf32> to vector<64xf32>
    %386 = vector.shape_cast %385 : vector<64xf32> to vector<1x1x64xf32>
    %387 = vector.broadcast %386 : vector<1x1x64xf32> to vector<4x8x64xf32>
    %388 = arith.mulf %383, %387 : vector<4x8x64xf32>
    %389 = arith.addf %382, %388 : vector<4x8x64xf32>
    %390 = vector.extract_strided_slice %347 {offsets = [2, 0, 0], sizes = [4, 8, 64], strides = [1, 1, 1]} : vector<6x10x64xf32> to vector<4x8x64xf32>
    %391 = vector.extract_strided_slice %110 {offsets = [2, 0, 0, 0], sizes = [1, 1, 1, 64], strides = [1, 1, 1, 1]} : vector<3x3x3x64xf32> to vector<1x1x1x64xf32>
    %392 = vector.shape_cast %391 : vector<1x1x1x64xf32> to vector<64xf32>
    %393 = vector.shape_cast %392 : vector<64xf32> to vector<1x1x64xf32>
    %394 = vector.broadcast %393 : vector<1x1x64xf32> to vector<4x8x64xf32>
    %395 = arith.mulf %390, %394 : vector<4x8x64xf32>
    %396 = arith.addf %389, %395 : vector<4x8x64xf32>
    %397 = vector.extract_strided_slice %347 {offsets = [2, 1, 0], sizes = [4, 8, 64], strides = [1, 1, 1]} : vector<6x10x64xf32> to vector<4x8x64xf32>
    %398 = vector.extract_strided_slice %110 {offsets = [2, 1, 0, 0], sizes = [1, 1, 1, 64], strides = [1, 1, 1, 1]} : vector<3x3x3x64xf32> to vector<1x1x1x64xf32>
    %399 = vector.shape_cast %398 : vector<1x1x1x64xf32> to vector<64xf32>
    %400 = vector.shape_cast %399 : vector<64xf32> to vector<1x1x64xf32>
    %401 = vector.broadcast %400 : vector<1x1x64xf32> to vector<4x8x64xf32>
    %402 = arith.mulf %397, %401 : vector<4x8x64xf32>
    %403 = arith.addf %396, %402 : vector<4x8x64xf32>
    %404 = vector.extract_strided_slice %347 {offsets = [2, 2, 0], sizes = [4, 8, 64], strides = [1, 1, 1]} : vector<6x10x64xf32> to vector<4x8x64xf32>
    %405 = vector.extract_strided_slice %110 {offsets = [2, 2, 0, 0], sizes = [1, 1, 1, 64], strides = [1, 1, 1, 1]} : vector<3x3x3x64xf32> to vector<1x1x1x64xf32>
    %406 = vector.shape_cast %405 : vector<1x1x1x64xf32> to vector<64xf32>
    %407 = vector.shape_cast %406 : vector<64xf32> to vector<1x1x64xf32>
    %408 = vector.broadcast %407 : vector<1x1x64xf32> to vector<4x8x64xf32>
    %409 = arith.mulf %404, %408 : vector<4x8x64xf32>
    %410 = arith.addf %403, %409 : vector<4x8x64xf32>
    %411 = vector.extract_strided_slice %346 {offsets = [0, 0, 8], sizes = [6, 10, 64], strides = [1, 1, 1]} : vector<6x10x80xf32> to vector<6x10x64xf32>
    %412 = vector.extract_strided_slice %411 {offsets = [0, 0, 0], sizes = [4, 8, 64], strides = [1, 1, 1]} : vector<6x10x64xf32> to vector<4x8x64xf32>
    %413 = vector.extract_strided_slice %110 {offsets = [0, 0, 1, 0], sizes = [1, 1, 1, 64], strides = [1, 1, 1, 1]} : vector<3x3x3x64xf32> to vector<1x1x1x64xf32>
    %414 = vector.shape_cast %413 : vector<1x1x1x64xf32> to vector<64xf32>
    %415 = vector.shape_cast %414 : vector<64xf32> to vector<1x1x64xf32>
    %416 = vector.broadcast %415 : vector<1x1x64xf32> to vector<4x8x64xf32>
    %417 = arith.mulf %412, %416 : vector<4x8x64xf32>
    %418 = arith.addf %410, %417 : vector<4x8x64xf32>
    %419 = vector.extract_strided_slice %411 {offsets = [0, 1, 0], sizes = [4, 8, 64], strides = [1, 1, 1]} : vector<6x10x64xf32> to vector<4x8x64xf32>
    %420 = vector.extract_strided_slice %110 {offsets = [0, 1, 1, 0], sizes = [1, 1, 1, 64], strides = [1, 1, 1, 1]} : vector<3x3x3x64xf32> to vector<1x1x1x64xf32>
    %421 = vector.shape_cast %420 : vector<1x1x1x64xf32> to vector<64xf32>
    %422 = vector.shape_cast %421 : vector<64xf32> to vector<1x1x64xf32>
    %423 = vector.broadcast %422 : vector<1x1x64xf32> to vector<4x8x64xf32>
    %424 = arith.mulf %419, %423 : vector<4x8x64xf32>
    %425 = arith.addf %418, %424 : vector<4x8x64xf32>
    %426 = vector.extract_strided_slice %411 {offsets = [0, 2, 0], sizes = [4, 8, 64], strides = [1, 1, 1]} : vector<6x10x64xf32> to vector<4x8x64xf32>
    %427 = vector.extract_strided_slice %110 {offsets = [0, 2, 1, 0], sizes = [1, 1, 1, 64], strides = [1, 1, 1, 1]} : vector<3x3x3x64xf32> to vector<1x1x1x64xf32>
    %428 = vector.shape_cast %427 : vector<1x1x1x64xf32> to vector<64xf32>
    %429 = vector.shape_cast %428 : vector<64xf32> to vector<1x1x64xf32>
    %430 = vector.broadcast %429 : vector<1x1x64xf32> to vector<4x8x64xf32>
    %431 = arith.mulf %426, %430 : vector<4x8x64xf32>
    %432 = arith.addf %425, %431 : vector<4x8x64xf32>
    %433 = vector.extract_strided_slice %411 {offsets = [1, 0, 0], sizes = [4, 8, 64], strides = [1, 1, 1]} : vector<6x10x64xf32> to vector<4x8x64xf32>
    %434 = vector.extract_strided_slice %110 {offsets = [1, 0, 1, 0], sizes = [1, 1, 1, 64], strides = [1, 1, 1, 1]} : vector<3x3x3x64xf32> to vector<1x1x1x64xf32>
    %435 = vector.shape_cast %434 : vector<1x1x1x64xf32> to vector<64xf32>
    %436 = vector.shape_cast %435 : vector<64xf32> to vector<1x1x64xf32>
    %437 = vector.broadcast %436 : vector<1x1x64xf32> to vector<4x8x64xf32>
    %438 = arith.mulf %433, %437 : vector<4x8x64xf32>
    %439 = arith.addf %432, %438 : vector<4x8x64xf32>
    %440 = vector.extract_strided_slice %411 {offsets = [1, 1, 0], sizes = [4, 8, 64], strides = [1, 1, 1]} : vector<6x10x64xf32> to vector<4x8x64xf32>
    %441 = vector.extract_strided_slice %110 {offsets = [1, 1, 1, 0], sizes = [1, 1, 1, 64], strides = [1, 1, 1, 1]} : vector<3x3x3x64xf32> to vector<1x1x1x64xf32>
    %442 = vector.shape_cast %441 : vector<1x1x1x64xf32> to vector<64xf32>
    %443 = vector.shape_cast %442 : vector<64xf32> to vector<1x1x64xf32>
    %444 = vector.broadcast %443 : vector<1x1x64xf32> to vector<4x8x64xf32>
    %445 = arith.mulf %440, %444 : vector<4x8x64xf32>
    %446 = arith.addf %439, %445 : vector<4x8x64xf32>
    %447 = vector.extract_strided_slice %411 {offsets = [1, 2, 0], sizes = [4, 8, 64], strides = [1, 1, 1]} : vector<6x10x64xf32> to vector<4x8x64xf32>
    %448 = vector.extract_strided_slice %110 {offsets = [1, 2, 1, 0], sizes = [1, 1, 1, 64], strides = [1, 1, 1, 1]} : vector<3x3x3x64xf32> to vector<1x1x1x64xf32>
    %449 = vector.shape_cast %448 : vector<1x1x1x64xf32> to vector<64xf32>
    %450 = vector.shape_cast %449 : vector<64xf32> to vector<1x1x64xf32>
    %451 = vector.broadcast %450 : vector<1x1x64xf32> to vector<4x8x64xf32>
    %452 = arith.mulf %447, %451 : vector<4x8x64xf32>
    %453 = arith.addf %446, %452 : vector<4x8x64xf32>
    %454 = vector.extract_strided_slice %411 {offsets = [2, 0, 0], sizes = [4, 8, 64], strides = [1, 1, 1]} : vector<6x10x64xf32> to vector<4x8x64xf32>
    %455 = vector.extract_strided_slice %110 {offsets = [2, 0, 1, 0], sizes = [1, 1, 1, 64], strides = [1, 1, 1, 1]} : vector<3x3x3x64xf32> to vector<1x1x1x64xf32>
    %456 = vector.shape_cast %455 : vector<1x1x1x64xf32> to vector<64xf32>
    %457 = vector.shape_cast %456 : vector<64xf32> to vector<1x1x64xf32>
    %458 = vector.broadcast %457 : vector<1x1x64xf32> to vector<4x8x64xf32>
    %459 = arith.mulf %454, %458 : vector<4x8x64xf32>
    %460 = arith.addf %453, %459 : vector<4x8x64xf32>
    %461 = vector.extract_strided_slice %411 {offsets = [2, 1, 0], sizes = [4, 8, 64], strides = [1, 1, 1]} : vector<6x10x64xf32> to vector<4x8x64xf32>
    %462 = vector.extract_strided_slice %110 {offsets = [2, 1, 1, 0], sizes = [1, 1, 1, 64], strides = [1, 1, 1, 1]} : vector<3x3x3x64xf32> to vector<1x1x1x64xf32>
    %463 = vector.shape_cast %462 : vector<1x1x1x64xf32> to vector<64xf32>
    %464 = vector.shape_cast %463 : vector<64xf32> to vector<1x1x64xf32>
    %465 = vector.broadcast %464 : vector<1x1x64xf32> to vector<4x8x64xf32>
    %466 = arith.mulf %461, %465 : vector<4x8x64xf32>
    %467 = arith.addf %460, %466 : vector<4x8x64xf32>
    %468 = vector.extract_strided_slice %411 {offsets = [2, 2, 0], sizes = [4, 8, 64], strides = [1, 1, 1]} : vector<6x10x64xf32> to vector<4x8x64xf32>
    %469 = vector.extract_strided_slice %110 {offsets = [2, 2, 1, 0], sizes = [1, 1, 1, 64], strides = [1, 1, 1, 1]} : vector<3x3x3x64xf32> to vector<1x1x1x64xf32>
    %470 = vector.shape_cast %469 : vector<1x1x1x64xf32> to vector<64xf32>
    %471 = vector.shape_cast %470 : vector<64xf32> to vector<1x1x64xf32>
    %472 = vector.broadcast %471 : vector<1x1x64xf32> to vector<4x8x64xf32>
    %473 = arith.mulf %468, %472 : vector<4x8x64xf32>
    %474 = arith.addf %467, %473 : vector<4x8x64xf32>
    %475 = vector.extract_strided_slice %346 {offsets = [0, 0, 16], sizes = [6, 10, 64], strides = [1, 1, 1]} : vector<6x10x80xf32> to vector<6x10x64xf32>
    %476 = vector.extract_strided_slice %475 {offsets = [0, 0, 0], sizes = [4, 8, 64], strides = [1, 1, 1]} : vector<6x10x64xf32> to vector<4x8x64xf32>
    %477 = vector.extract_strided_slice %110 {offsets = [0, 0, 2, 0], sizes = [1, 1, 1, 64], strides = [1, 1, 1, 1]} : vector<3x3x3x64xf32> to vector<1x1x1x64xf32>
    %478 = vector.shape_cast %477 : vector<1x1x1x64xf32> to vector<64xf32>
    %479 = vector.shape_cast %478 : vector<64xf32> to vector<1x1x64xf32>
    %480 = vector.broadcast %479 : vector<1x1x64xf32> to vector<4x8x64xf32>
    %481 = arith.mulf %476, %480 : vector<4x8x64xf32>
    %482 = arith.addf %474, %481 : vector<4x8x64xf32>
    %483 = vector.extract_strided_slice %475 {offsets = [0, 1, 0], sizes = [4, 8, 64], strides = [1, 1, 1]} : vector<6x10x64xf32> to vector<4x8x64xf32>
    %484 = vector.extract_strided_slice %110 {offsets = [0, 1, 2, 0], sizes = [1, 1, 1, 64], strides = [1, 1, 1, 1]} : vector<3x3x3x64xf32> to vector<1x1x1x64xf32>
    %485 = vector.shape_cast %484 : vector<1x1x1x64xf32> to vector<64xf32>
    %486 = vector.shape_cast %485 : vector<64xf32> to vector<1x1x64xf32>
    %487 = vector.broadcast %486 : vector<1x1x64xf32> to vector<4x8x64xf32>
    %488 = arith.mulf %483, %487 : vector<4x8x64xf32>
    %489 = arith.addf %482, %488 : vector<4x8x64xf32>
    %490 = vector.extract_strided_slice %475 {offsets = [0, 2, 0], sizes = [4, 8, 64], strides = [1, 1, 1]} : vector<6x10x64xf32> to vector<4x8x64xf32>
    %491 = vector.extract_strided_slice %110 {offsets = [0, 2, 2, 0], sizes = [1, 1, 1, 64], strides = [1, 1, 1, 1]} : vector<3x3x3x64xf32> to vector<1x1x1x64xf32>
    %492 = vector.shape_cast %491 : vector<1x1x1x64xf32> to vector<64xf32>
    %493 = vector.shape_cast %492 : vector<64xf32> to vector<1x1x64xf32>
    %494 = vector.broadcast %493 : vector<1x1x64xf32> to vector<4x8x64xf32>
    %495 = arith.mulf %490, %494 : vector<4x8x64xf32>
    %496 = arith.addf %489, %495 : vector<4x8x64xf32>
    %497 = vector.extract_strided_slice %475 {offsets = [1, 0, 0], sizes = [4, 8, 64], strides = [1, 1, 1]} : vector<6x10x64xf32> to vector<4x8x64xf32>
    %498 = vector.extract_strided_slice %110 {offsets = [1, 0, 2, 0], sizes = [1, 1, 1, 64], strides = [1, 1, 1, 1]} : vector<3x3x3x64xf32> to vector<1x1x1x64xf32>
    %499 = vector.shape_cast %498 : vector<1x1x1x64xf32> to vector<64xf32>
    %500 = vector.shape_cast %499 : vector<64xf32> to vector<1x1x64xf32>
    %501 = vector.broadcast %500 : vector<1x1x64xf32> to vector<4x8x64xf32>
    %502 = arith.mulf %497, %501 : vector<4x8x64xf32>
    %503 = arith.addf %496, %502 : vector<4x8x64xf32>
    %504 = vector.extract_strided_slice %475 {offsets = [1, 1, 0], sizes = [4, 8, 64], strides = [1, 1, 1]} : vector<6x10x64xf32> to vector<4x8x64xf32>
    %505 = vector.extract_strided_slice %110 {offsets = [1, 1, 2, 0], sizes = [1, 1, 1, 64], strides = [1, 1, 1, 1]} : vector<3x3x3x64xf32> to vector<1x1x1x64xf32>
    %506 = vector.shape_cast %505 : vector<1x1x1x64xf32> to vector<64xf32>
    %507 = vector.shape_cast %506 : vector<64xf32> to vector<1x1x64xf32>
    %508 = vector.broadcast %507 : vector<1x1x64xf32> to vector<4x8x64xf32>
    %509 = arith.mulf %504, %508 : vector<4x8x64xf32>
    %510 = arith.addf %503, %509 : vector<4x8x64xf32>
    %511 = vector.extract_strided_slice %475 {offsets = [1, 2, 0], sizes = [4, 8, 64], strides = [1, 1, 1]} : vector<6x10x64xf32> to vector<4x8x64xf32>
    %512 = vector.extract_strided_slice %110 {offsets = [1, 2, 2, 0], sizes = [1, 1, 1, 64], strides = [1, 1, 1, 1]} : vector<3x3x3x64xf32> to vector<1x1x1x64xf32>
    %513 = vector.shape_cast %512 : vector<1x1x1x64xf32> to vector<64xf32>
    %514 = vector.shape_cast %513 : vector<64xf32> to vector<1x1x64xf32>
    %515 = vector.broadcast %514 : vector<1x1x64xf32> to vector<4x8x64xf32>
    %516 = arith.mulf %511, %515 : vector<4x8x64xf32>
    %517 = arith.addf %510, %516 : vector<4x8x64xf32>
    %518 = vector.extract_strided_slice %475 {offsets = [2, 0, 0], sizes = [4, 8, 64], strides = [1, 1, 1]} : vector<6x10x64xf32> to vector<4x8x64xf32>
    %519 = vector.extract_strided_slice %110 {offsets = [2, 0, 2, 0], sizes = [1, 1, 1, 64], strides = [1, 1, 1, 1]} : vector<3x3x3x64xf32> to vector<1x1x1x64xf32>
    %520 = vector.shape_cast %519 : vector<1x1x1x64xf32> to vector<64xf32>
    %521 = vector.shape_cast %520 : vector<64xf32> to vector<1x1x64xf32>
    %522 = vector.broadcast %521 : vector<1x1x64xf32> to vector<4x8x64xf32>
    %523 = arith.mulf %518, %522 : vector<4x8x64xf32>
    %524 = arith.addf %517, %523 : vector<4x8x64xf32>
    %525 = vector.extract_strided_slice %475 {offsets = [2, 1, 0], sizes = [4, 8, 64], strides = [1, 1, 1]} : vector<6x10x64xf32> to vector<4x8x64xf32>
    %526 = vector.extract_strided_slice %110 {offsets = [2, 1, 2, 0], sizes = [1, 1, 1, 64], strides = [1, 1, 1, 1]} : vector<3x3x3x64xf32> to vector<1x1x1x64xf32>
    %527 = vector.shape_cast %526 : vector<1x1x1x64xf32> to vector<64xf32>
    %528 = vector.shape_cast %527 : vector<64xf32> to vector<1x1x64xf32>
    %529 = vector.broadcast %528 : vector<1x1x64xf32> to vector<4x8x64xf32>
    %530 = arith.mulf %525, %529 : vector<4x8x64xf32>
    %531 = arith.addf %524, %530 : vector<4x8x64xf32>
    %532 = vector.extract_strided_slice %475 {offsets = [2, 2, 0], sizes = [4, 8, 64], strides = [1, 1, 1]} : vector<6x10x64xf32> to vector<4x8x64xf32>
    %533 = vector.extract_strided_slice %110 {offsets = [2, 2, 2, 0], sizes = [1, 1, 1, 64], strides = [1, 1, 1, 1]} : vector<3x3x3x64xf32> to vector<1x1x1x64xf32>
    %534 = vector.shape_cast %533 : vector<1x1x1x64xf32> to vector<64xf32>
    %535 = vector.shape_cast %534 : vector<64xf32> to vector<1x1x64xf32>
    %536 = vector.broadcast %535 : vector<1x1x64xf32> to vector<4x8x64xf32>
    %537 = arith.mulf %532, %536 : vector<4x8x64xf32>
    %538 = arith.addf %531, %537 : vector<4x8x64xf32>
    %539 = vector.shape_cast %77 : vector<256x8xf32> to vector<4x8x8x8xf32>
    %540 = vector.extract_strided_slice %539 {offsets = [0, 0, 0, 0], sizes = [4, 8, 1, 8], strides = [1, 1, 1, 1]} : vector<4x8x8x8xf32> to vector<4x8x1x8xf32>
    %541 = vector.shape_cast %540 : vector<4x8x1x8xf32> to vector<4x8x8xf32>
    %542 = vector.extract_strided_slice %539 {offsets = [0, 0, 1, 0], sizes = [4, 8, 1, 8], strides = [1, 1, 1, 1]} : vector<4x8x8x8xf32> to vector<4x8x1x8xf32>
    %543 = vector.shape_cast %542 : vector<4x8x1x8xf32> to vector<4x8x8xf32>
    %544 = vector.extract_strided_slice %539 {offsets = [0, 0, 2, 0], sizes = [4, 8, 1, 8], strides = [1, 1, 1, 1]} : vector<4x8x8x8xf32> to vector<4x8x1x8xf32>
    %545 = vector.shape_cast %544 : vector<4x8x1x8xf32> to vector<4x8x8xf32>
    %546 = vector.extract_strided_slice %539 {offsets = [0, 0, 3, 0], sizes = [4, 8, 1, 8], strides = [1, 1, 1, 1]} : vector<4x8x8x8xf32> to vector<4x8x1x8xf32>
    %547 = vector.shape_cast %546 : vector<4x8x1x8xf32> to vector<4x8x8xf32>
    %548 = vector.extract_strided_slice %539 {offsets = [0, 0, 4, 0], sizes = [4, 8, 1, 8], strides = [1, 1, 1, 1]} : vector<4x8x8x8xf32> to vector<4x8x1x8xf32>
    %549 = vector.shape_cast %548 : vector<4x8x1x8xf32> to vector<4x8x8xf32>
    %550 = vector.extract_strided_slice %539 {offsets = [0, 0, 5, 0], sizes = [4, 8, 1, 8], strides = [1, 1, 1, 1]} : vector<4x8x8x8xf32> to vector<4x8x1x8xf32>
    %551 = vector.shape_cast %550 : vector<4x8x1x8xf32> to vector<4x8x8xf32>
    %552 = vector.extract_strided_slice %539 {offsets = [0, 0, 6, 0], sizes = [4, 8, 1, 8], strides = [1, 1, 1, 1]} : vector<4x8x8x8xf32> to vector<4x8x1x8xf32>
    %553 = vector.shape_cast %552 : vector<4x8x1x8xf32> to vector<4x8x8xf32>
    %554 = vector.extract_strided_slice %539 {offsets = [0, 0, 7, 0], sizes = [4, 8, 1, 8], strides = [1, 1, 1, 1]} : vector<4x8x8x8xf32> to vector<4x8x1x8xf32>
    %555 = vector.shape_cast %554 : vector<4x8x1x8xf32> to vector<4x8x8xf32>
    %556 = tpu.concatenate %541, %543, %545, %547, %549, %551, %553, %555 in 2 : vector<4x8x8xf32>, vector<4x8x8xf32>, vector<4x8x8xf32>, vector<4x8x8xf32>, vector<4x8x8xf32>, vector<4x8x8xf32>, vector<4x8x8xf32>, vector<4x8x8xf32> -> vector<4x8x64xf32>
    %557 = arith.addf %556, %538 : vector<4x8x64xf32>
    %c0_82 = arith.constant 0 : index
    %c0_83 = arith.constant 0 : index
    %c0_84 = arith.constant 0 : index
    %c0_85 = arith.constant 0 : index
    %558 = vector.load %arg8[%c0_82, %c0_83, %c0_84, %c0_85] : memref<1x4x8x64xf32, #tpu.memory_space<vmem>>, vector<1x4x8x64xf32>
    %559 = vector.shape_cast %558 : vector<1x4x8x64xf32> to vector<4x8x64xf32>
    %560 = vector.shape_cast %557 : vector<4x8x64xf32> to vector<1x4x8x64xf32>
    tpu.vector_store %arg8[%c0_82, %c0_83, %c0_84, %c0_85], %560 {strides = array<i32>} : memref<1x4x8x64xf32, #tpu.memory_space<vmem>>, vector<1x4x8x64xf32>,
    return
  }
  func.func @transform_0(%arg0: i32) -> (i32, i32, i32) {
    %c0_i32 = arith.constant 0 : i32
    %c0_i32_0 = arith.constant 0 : i32
    %c0_i32_1 = arith.constant 0 : i32
    return %arg0, %c0_i32, %c0_i32_0 : i32, i32, i32
  }
  func.func @transform_1(%arg0: i32) -> (i32, i32) {
    %c0_i32 = arith.constant 0 : i32
    %c0_i32_0 = arith.constant 0 : i32
    %c0_i32_1 = arith.constant 0 : i32
    return %c0_i32, %c0_i32_0 : i32, i32
  }
  func.func @transform_2(%arg0: i32) -> (i32, i32) {
    %c0_i32 = arith.constant 0 : i32
    %c0_i32_0 = arith.constant 0 : i32
    %c0_i32_1 = arith.constant 0 : i32
    return %c0_i32, %c0_i32_0 : i32, i32
  }
  func.func @transform_3(%arg0: i32) -> (i32, i32) {
    %c0_i32 = arith.constant 0 : i32
    %c0_i32_0 = arith.constant 0 : i32
    %c0_i32_1 = arith.constant 0 : i32
    return %c0_i32, %c0_i32_0 : i32, i32
  }
  func.func @transform_4(%arg0: i32) -> i32 {
    %c0_i32 = arith.constant 0 : i32
    %c0_i32_0 = arith.constant 0 : i32
    return %c0_i32 : i32
  }
  func.func @transform_5(%arg0: i32) -> (i32, i32, i32, i32) {
    %c0_i32 = arith.constant 0 : i32
    %c0_i32_0 = arith.constant 0 : i32
    %c0_i32_1 = arith.constant 0 : i32
    %c0_i32_2 = arith.constant 0 : i32
    %c0_i32_3 = arith.constant 0 : i32
    return %c0_i32, %c0_i32_0, %c0_i32_1, %c0_i32_2 : i32, i32, i32, i32
  }
  func.func @transform_6(%arg0: i32) -> (i32, i32, i32, i32) {
    %c0_i32 = arith.constant 0 : i32
    %c0_i32_0 = arith.constant 0 : i32
    %c0_i32_1 = arith.constant 0 : i32
    %c0_i32_2 = arith.constant 0 : i32
    %c0_i32_3 = arith.constant 0 : i32
    return %c0_i32, %c0_i32_0, %c0_i32_1, %c0_i32_2 : i32, i32, i32, i32
  }
  func.func @transform_7(%arg0: i32) -> (i32, i32, i32, i32) {
    %c0_i32 = arith.constant 0 : i32
    %c0_i32_0 = arith.constant 0 : i32
    %c0_i32_1 = arith.constant 0 : i32
    %c0_i32_2 = arith.constant 0 : i32
    return %arg0, %c0_i32, %c0_i32_0, %c0_i32_1 : i32, i32, i32, i32
  }
}

</mosaic_0001>

<bundles_post_ra>
// kernel: tpu_custom_call.1
= control target key start
LH: loop header
LB: loop body
LE: loop exit
PB: predicated region body
PF: predicated region fallthrough
CT: control target
= control target key end

     0   :  { %12 = vsyncpa [#allocation5], 0  ;;  %s11373_s0 = inlined_call_operand.vmem [shape: f32[2,256,8], index: 0, kind: input, shape index: {}]   ;;  %s11374_s1 = inlined_call_operand.vmem [shape: f32[8,24], index: 1, kind: input, shape index: {}]   ;;  %s11375_s2 = inlined_call_operand.vmem [shape: f32[8,8], index: 2, kind: input, shape index: {}]   ;;  %s11376_s3 = inlined_call_operand.vmem [shape: f32[1,8], index: 3, kind: input, shape index: {}]   ;;  %s11377_s4 = inlined_call_operand.vmem [shape: f32[2], index: 4, kind: input, shape index: {}]   ;;  %s11378_s5 = inlined_call_operand.vmem [shape: f32[3,3,3,64], index: 5, kind: input, shape index: {}]   ;;  %s11379_s6 = inlined_call_operand.vmem [shape: f32[3,3,3,64], index: 6, kind: input, shape index: {}]   ;;  %s11380_s7 = inlined_call_operand.hbm [shape: f32[2,4,8,64], index: 7, kind: output, shape index: {}]  }
   0x1   :  { %13 = vsyncpa [#allocation4], 0 }
   0x2   :  { %15 = vsyncpa [#allocation4 + $0x1], 0  ;;  %s6853_s24 = smov 0   ;;  %s6855_s25 = smov 0  }
   0x3   :  { %s6857_s26 = smov 0   ;;  %s6859_s27 = smov 0  }
   0x4 LB: > { %s6874_s28 = sadd.s32 4294967295, %s6794_s27   ;;  %s6059_s29 = sadd.s32 4294967294, %s6794_s27   ;;  %s6794_s27 = sphi %s6859_s27, %s11985_s27   ;;  %s6790_s26 = sphi %s6857_s26, %s11984_s26   ;;  %s6786_s25 = sphi %s6855_s25, %s11983_s25   ;;  %s6782_s24 = sphi %s6853_s24, %s11982_s24  }
   0x5   : > { %s6878_s30 = sadd.s32 1, %s6794_s27   ;;  %s180_s8 = sadd.s32 1, %s6790_s26 }
   0x6   : > { %s177_s9 = ssub.s32 %s6794_s27, %s6878_s30  ;;  %p190_p0 = scmp.ne.s32.totalorder %s6790_s26, %s6786_s25 }
   0x7   : > { %p178_p1 = scmp.eq.s32.totalorder %s177_s9, 0  ;;  %p191_p2 = scmp.eq.s32.totalorder %s6874_s28, 1 }
   0x8   : > { %p196_p3 = scmp.ne.s32.totalorder %s6786_s25, %s6782_s24  ;;  %p197_p4 = scmp.eq.s32.totalorder %s6059_s29, 1 }
   0x9   : > { %s6889_s10 = scalar_select %p178_p1, %s6790_s26, %s180_s8  }
   0xa   : > { %p6891_p5 = por %p191_p2, %p190_p0  ;;  %p6895_p6 = por %p197_p4, %p196_p3 }
   0xb   : > { %p6060_p7 = scmp.ge.s32.totalorder %s6794_s27, 1  ;;  %p204_p8 = scmp.lt.s32.totalorder %s6794_s27, 3 }
   0xc   : > { %p6253_p9 = scmp.eq.s32.totalorder %s6874_s28, 0  ;;  %s225_s15 = sshll.u32 %s11377_s4, 4  ;;  %s226_s15 = int_to_ptr.vmem [resolvable:$true] %s225_s15 }
   0xd   : > { %p205_p10 = pnand %p6060_p7, %p204_p8  ;;  %s6796_s16 = smov [#allocation3]  }
   0xf   : > { %p6245_p11 = pneg %p205_p10  ;;  %252 = sbr.rel (%p205_p10) target bundleno = 5703 (0x1647), region = 48 }
  0x11   : > { %p6246_p12 = pnand %p6253_p9, %p6245_p11 }
  0x13   : > { %6248 = dma.vmem_to_smem (!%p6246_p12), %s226_s15, 16, %s6796_s16, [#allocation5]  }
  0x14   : > { %6773 = dma.done.wait (%p6253_p9), [#allocation5], 16  }
  0x15   : > { %6775 = vsyncadd (%p6253_p9), [#allocation5], 4294967280 }
  0x16   : > { %259 = sfence }
  0x17   : > { %v323_v0 = vld [vmem:[%s11374_s1] sm:$0xff]  ;;  %p286_p13 = scmp.lt.s32.totalorder %s6874_s28, 1  ;;  %vm324_vm0 = vcmask 64512   ;;  %s6797_s29 = smov 112   ;;  %vm1437_vm1 = vcmask 130144   ;;  %vm566_vm2 = vcmask 31744  }
  0x18   : > { %436 = vmatpush.msra.mxu0 %v323_v0  ;;  %s6798_s8 = smov 108   ;;  %vm679_vm3 = vcmask 97344   ;;  %vm1324_vm4 = vcmask 64544   ;;  %vm2577_vm9 = vcmask 1041409   ;;  %vm2580_vm15 = vcmask 1042434   ;;  %s6799_s9 = smov 120  }
  0x19   : > { %s287_s19 = scalar_select %p286_p13, %s6874_s28, 1 }
  0x1a   : > { %s6800_s13 = smov 124   ;;  %s6801_s14 = smov 8  }
  0x1b   : > { %s6204_s20 = sshll.u32 %s287_s19, 8  ;;  %s6802_s15 = smov 16  }
  0x1c   : > { %s6913_s23 = scalar_lea.vmem %s11373_s0, %s6204_s20  ;;  %s6803_s16 = smov 24  }
  0x1d   : > { %v291_v1 = vld [vmem:[%s6913_s23] sm:$0xff]  ;;  %v292_v2 = vld [vmem:[%s6913_s23 + $0x8] sm:$0xff]  ;;  %v293_v3 = vld [vmem:[%s6913_s23 + $0x10] sm:$0xff]  ;;  %s11468_s17 = smov 32   ;;  %s6805_s18 = smov 40  }
  0x1e   : > { %6068 = vmatmul.msk.f32.vlgmr.msra.gmra.mxu0 %vm324_vm0, %v291_v1  ;;  %v294_v4 = vld [vmem:[%s6913_s23 + $0x18] sm:$0xff]  ;;  %v295_v5 = vld [vmem:[%s6913_s23 + $0x20] sm:$0xff]  ;;  %v296_v6 = vld [vmem:[%s6913_s23 + $0x28] sm:$0xff]  ;;  %s6806_s19 = smov 116   ;;  %s11470_s20 = smov 48  }
  0x1f   : > { %v297_v7 = vld [vmem:[%s6913_s23 + $0x30] sm:$0xff]  ;;  %v298_v8 = vld [vmem:[%s6913_s23 + $0x38] sm:$0xff]  ;;  %v299_v9 = vld [vmem:[%s6913_s23 + $0x40] sm:$0xff]  ;;  %s6808_s21 = smov 56   ;;  %s1024_s22 = sld [smem:[#allocation3]] }
  0x20   : > { %v300_v10 = vld [vmem:[%s6913_s23 + $0x48] sm:$0xff]  ;;  %v301_v11 = vld [vmem:[%s6913_s23 + $0x50] sm:$0xff]  ;;  %v302_v12 = vld [vmem:[%s6913_s23 + $0x58] sm:$0xff] }
  0x21   : > { %v303_v13 = vld [vmem:[%s6913_s23 + $0x60] sm:$0xff]  ;;  %v304_v14 = vld [vmem:[%s6913_s23 + $0x68] sm:$0xff]  ;;  %v305_v15 = vld [vmem:[%s6913_s23 + $0x70] sm:$0xff] }
  0x22   : > { %v306_v16 = vld [vmem:[%s6913_s23 + $0x78] sm:$0xff]  ;;  %v6950_v18 = vld [vmem:[%s6913_s23 + $0x80] sm:$0xff]  ;;  %v6963_v21 = vld [vmem:[%s6913_s23 + $0x88] sm:$0xff] }
  0x23   : > { %v6982_v27 = vld [vmem:[%s6913_s23 + $0x90] sm:$0xff]  ;;  %v6999_v32 = vld [vmem:[%s6913_s23 + $0x98] sm:$0xff]  ;;  %v7016_v37 = vld [vmem:[%s6913_s23 + $0xa0] sm:$0xff] }
  0x24   : > { %v7033_v42 = vld [vmem:[%s6913_s23 + $0xa8] sm:$0xff]  ;;  %v7050_v47 = vld [vmem:[%s6913_s23 + $0xb0] sm:$0xff]  ;;  %v7067_v52 = vld [vmem:[%s6913_s23 + $0xb8] sm:$0xff] }
  0x25   : > { %11482 = vst [vmem:[#allocation9_spill] sm:$0xff] %v7067_v52  ;;  %v315_v57 = vld [vmem:[%s6913_s23 + $0xc0] sm:$0xff]  ;;  %v7098_v62 = vld [vmem:[%s6913_s23 + $0xc8] sm:$0xff] }
  0x26   : > { %6069 = vmatmul.msk.f32.gmra.mxu0 %vm324_vm0, %v292_v2  ;;  %11485 = vst [vmem:[#allocation12_spill] sm:$0xff] %v7098_v62 }
  0x2e   : > { %6070 = vmatmul.msk.f32.gmra.mxu0 %vm324_vm0, %v293_v3  ;;  %v317_v3 = vld [vmem:[%s6913_s23 + $0xd0] sm:$0xff] }
  0x36   : > { %6071 = vmatmul.msk.f32.gmra.mxu0 %vm324_vm0, %v294_v4 }
  0x3e   : > { %6072 = vmatmul.msk.f32.gmra.mxu0 %vm324_vm0, %v295_v5 }
  0x46   : > { %6073 = vmatmul.msk.f32.gmra.mxu0 %vm324_vm0, %v296_v6 }
  0x4e   : > { %6074 = vmatmul.msk.f32.gmra.mxu0 %vm324_vm0, %v297_v7 }
  0x56   : > { %6075 = vmatmul.msk.f32.gmra.mxu0 %vm324_vm0, %v298_v8  ;;  %v318_v8 = vld [vmem:[%s6913_s23 + $0xd8] sm:$0xff] }
  0x5e   : > { %6076 = vmatmul.msk.f32.gmra.mxu0 %vm324_vm0, %v299_v9 }
  0x66   : > { %6077 = vmatmul.msk.f32.gmra.mxu0 %vm324_vm0, %v300_v10 }
  0x6e   : > { %6078 = vmatmul.msk.f32.gmra.mxu0 %vm324_vm0, %v301_v11 }
  0x76   : > { %6079 = vmatmul.msk.f32.gmra.mxu0 %vm324_vm0, %v302_v12 }
  0x7e   : > { %6080 = vmatmul.msk.f32.gmra.mxu0 %vm324_vm0, %v303_v13  ;;  %v319_v13 = vld [vmem:[%s6913_s23 + $0xe0] sm:$0xff] }
  0x86   : > { %6081 = vmatmul.msk.f32.gmra.mxu0 %vm324_vm0, %v304_v14 }
  0x8e   : > { %6082 = vmatmul.msk.f32.gmra.mxu0 %vm324_vm0, %v305_v15 }
  0x96   : > { %6083 = vmatmul.msk.f32.gmra.mxu0 %vm324_vm0, %v306_v16 }
  0x9b   : > { %v6947_v17 = vpop.f32.mrf.mxu0 }
  0x9c   : > { %1079 = vrot.lane.b32.xlu1 %v6947_v17, %s6797_s29  ;;  %v6958_v19 = vmul.f32 %v6947_v17, %v6947_v17 }
  0x9e   : > { %6084 = vmatmul.msk.f32.gmra.mxu0 %vm324_vm0, %v6950_v18  ;;  %v1438_v23 = vsel %vm1437_vm1, %v6958_v19, 0.0 }
  0xa3   : > { %v6960_v20 = vpop.f32.mrf.mxu0 }
  0xa4   : > { %v6967_v22 = vmul.f32 %v6960_v20, %v6960_v20  ;;  %1932 = vrot.lane.b32.xlu1 %v6947_v17, %s6798_s8  ;;  %1081 = vrot.lane.b32.xlu2 %v6960_v20, %s6797_s29 }
  0xa6   : > { %v1439_v24 = vsel %vm1437_vm1, %v6967_v22, 0.0  ;;  %6085 = vmatmul.msk.f32.gmra.mxu0 %vm324_vm0, %v6963_v21 }
  0xa7   : > { %v1440_v25 = vadd.f32 %v1439_v24, %v1438_v23  ;;  %v320_v24 = vld [vmem:[%s6913_s23 + $0xe8] sm:$0xff] }
  0xab   : > { %v6979_v26 = vpop.f32.mrf.mxu0 }
  0xac   : > { %v6986_v28 = vmul.f32 %v6979_v26, %v6979_v26  ;;  %1934 = vrot.lane.b32.xlu2 %v6960_v20, %s6798_s8  ;;  %1083 = vrot.lane.b32.xlu1 %v6979_v26, %s6797_s29 }
  0xae   : > { %v1441_v29 = vsel %vm1437_vm1, %v6986_v28, 0.0  ;;  %6086 = vmatmul.msk.f32.gmra.mxu0 %vm324_vm0, %v6982_v27 }
  0xaf   : > { %v1442_v30 = vadd.f32 %v1441_v29, %v1440_v25 }
  0xb3   : > { %v6996_v31 = vpop.f32.mrf.mxu0 }
  0xb4   : > { %v7003_v33 = vmul.f32 %v6996_v31, %v6996_v31  ;;  %1936 = vrot.lane.b32.xlu1 %v6979_v26, %s6798_s8  ;;  %1085 = vrot.lane.b32.xlu2 %v6996_v31, %s6797_s29 }
  0xb6   : > { %v1443_v34 = vsel %vm1437_vm1, %v7003_v33, 0.0  ;;  %6087 = vmatmul.msk.f32.gmra.mxu0 %vm324_vm0, %v6999_v32 }
  0xb7   : > { %v1444_v35 = vadd.f32 %v1443_v34, %v1442_v30 }
  0xbb   : > { %v7013_v36 = vpop.f32.mrf.mxu0 }
  0xbc   : > { %v7020_v38 = vmul.f32 %v7013_v36, %v7013_v36  ;;  %1938 = vrot.lane.b32.xlu2 %v6996_v31, %s6798_s8  ;;  %1087 = vrot.lane.b32.xlu1 %v7013_v36, %s6797_s29 }
  0xbe   : > { %v1445_v39 = vsel %vm1437_vm1, %v7020_v38, 0.0  ;;  %6088 = vmatmul.msk.f32.gmra.mxu0 %vm324_vm0, %v7016_v37 }
  0xbf   : > { %v1446_v40 = vadd.f32 %v1445_v39, %v1444_v35  ;;  %v321_v35 = vld [vmem:[%s6913_s23 + $0xf0] sm:$0xff] }
  0xc3   : > { %v7030_v41 = vpop.f32.mrf.mxu0 }
  0xc4   : > { %v7037_v43 = vmul.f32 %v7030_v41, %v7030_v41  ;;  %1940 = vrot.lane.b32.xlu1 %v7013_v36, %s6798_s8  ;;  %1089 = vrot.lane.b32.xlu2 %v7030_v41, %s6797_s29 }
  0xc6   : > { %v1447_v44 = vsel %vm1437_vm1, %v7037_v43, 0.0  ;;  %6089 = vmatmul.msk.f32.gmra.mxu0 %vm324_vm0, %v7033_v42 }
  0xc7   : > { %v1448_v45 = vadd.f32 %v1447_v44, %v1446_v40 }
  0xcb   : > { %v7047_v46 = vpop.f32.mrf.mxu0 }
  0xcc   : > { %v7054_v48 = vmul.f32 %v7047_v46, %v7047_v46  ;;  %1942 = vrot.lane.b32.xlu2 %v7030_v41, %s6798_s8  ;;  %1091 = vrot.lane.b32.xlu1 %v7047_v46, %s6797_s29 }
  0xce   : > { %v1449_v49 = vsel %vm1437_vm1, %v7054_v48, 0.0  ;;  %6090 = vmatmul.msk.f32.gmra.mxu0 %vm324_vm0, %v7050_v47 }
  0xcf   : > { %v1450_v50 = vadd.f32 %v1449_v49, %v1448_v45  ;;  %v322_v49 = vld [vmem:[%s6913_s23 + $0xf8] sm:$0xff] }
  0xd3   : > { %v7064_v51 = vpop.f32.mrf.mxu0 }
  0xd4   : > { %v7071_v53 = vmul.f32 %v7064_v51, %v7064_v51  ;;  %1944 = vrot.lane.b32.xlu1 %v7047_v46, %s6798_s8  ;;  %1093 = vrot.lane.b32.xlu2 %v7064_v51, %s6797_s29 }
  0xd6   : > { %v1451_v54 = vsel %vm1437_vm1, %v7071_v53, 0.0  ;;  %6091 = vmatmul.msk.f32.gmra.mxu0 %vm324_vm0, %v7067_v52 }
  0xd7   : > { %v1452_v55 = vadd.f32 %v1451_v54, %v1450_v50 }
  0xdb   : > { %v7081_v56 = vpop.f32.mrf.mxu0 }
  0xdc   : > { %11483 = vst [vmem:[#allocation10_spill] sm:$0xff] %v7081_v56  ;;  %v7086_v58 = vmul.f32 %v7081_v56, %v7081_v56  ;;  %1946 = vrot.lane.b32.xlu2 %v7064_v51, %s6798_s8  ;;  %1095 = vrot.lane.b32.xlu1 %v7081_v56, %s6797_s29 }
  0xde   : > { %v1453_v59 = vsel %vm1437_vm1, %v7086_v58, 0.0  ;;  %6092 = vmatmul.msk.f32.gmra.mxu0 %vm324_vm0, %v315_v57 }
  0xdf   : > { %v1454_v60 = vadd.f32 %v1453_v59, %v1452_v55 }
  0xe3   : > { %v7095_v61 = vpop.f32.mrf.mxu0 }
  0xe4   : > { %11484 = vst [vmem:[#allocation11_spill] sm:$0xff] %v7095_v61  ;;  %v7102_v63 = vmul.f32 %v7095_v61, %v7095_v61  ;;  %1948 = vrot.lane.b32.xlu1 %v7081_v56, %s6798_s8  ;;  %1097 = vrot.lane.b32.xlu2 %v7095_v61, %s6797_s29 }
  0xe6   : > { %v1455_v0 = vsel %vm1437_vm1, %v7102_v63, 0.0  ;;  %6093 = vmatmul.msk.f32.gmra.mxu0 %vm324_vm0, %v7098_v62  ;;  %v1330_v62 = vsel %vm1324_vm4, %v7003_v33, 0.0 }
  0xe7   : > { %v1456_v1 = vadd.f32 %v1455_v0, %v1454_v60 }
  0xeb   : > { %v7112_v2 = vpop.f32.mrf.mxu0 }
  0xec   : > { %v7117_v4 = vmul.f32 %v7112_v2, %v7112_v2  ;;  %1950 = vrot.lane.b32.xlu2 %v7095_v61, %s6798_s8  ;;  %1099 = vrot.lane.b32.xlu1 %v7112_v2, %s6797_s29 }
  0xee   : > { %v1457_v5 = vsel %vm1437_vm1, %v7117_v4, 0.0  ;;  %6094 = vmatmul.msk.f32.gmra.mxu0 %vm324_vm0, %v317_v3 }
  0xef   : > { %v1458_v6 = vadd.f32 %v1457_v5, %v1456_v1 }
  0xf3   : > { %v7126_v7 = vpop.f32.mrf.mxu0 }
  0xf4   : > { %v7131_v9 = vmul.f32 %v7126_v7, %v7126_v7  ;;  %1952 = vrot.lane.b32.xlu1 %v7112_v2, %s6798_s8  ;;  %1101 = vrot.lane.b32.xlu2 %v7126_v7, %s6797_s29 }
  0xf6   : > { %6095 = vmatmul.msk.f32.gmra.mxu0 %vm324_vm0, %v318_v8  ;;  %v1459_v10 = vsel %vm1437_vm1, %v7131_v9, 0.0 }
  0xf7   : > { %v1460_v11 = vadd.f32 %v1459_v10, %v1458_v6 }
  0xfb   : > { %v7140_v12 = vpop.f32.mrf.mxu0 }
  0xfc   : > { %v7145_v14 = vmul.f32 %v7140_v12, %v7140_v12  ;;  %1954 = vrot.lane.b32.xlu2 %v7126_v7, %s6798_s8  ;;  %1103 = vrot.lane.b32.xlu1 %v7140_v12, %s6797_s29 }
  0xfe   : > { %v1461_v15 = vsel %vm1437_vm1, %v7145_v14, 0.0  ;;  %6096 = vmatmul.msk.f32.gmra.mxu0 %vm324_vm0, %v319_v13  ;;  %v7222_v8 = vpop.permute.xlu2 %1081 }
  0xff   : > { %v1462_v16 = vadd.f32 %v1461_v15, %v1460_v11  ;;  %11488 = vst [vmem:[#allocation15_spill] sm:$0xff] %v7222_v8 }
 0x103   : > { %v7154_v23 = vpop.f32.mrf.mxu0 }
 0x104   : > { %v7159_v25 = vmul.f32 %v7154_v23, %v7154_v23  ;;  %1956 = vrot.lane.b32.xlu1 %v7140_v12, %s6798_s8  ;;  %1105 = vrot.lane.b32.xlu2 %v7154_v23, %s6797_s29 }
 0x106   : > { %v1463_v29 = vsel %vm1437_vm1, %v7159_v25, 0.0  ;;  %6097 = vmatmul.msk.f32.gmra.mxu0 %vm324_vm0, %v320_v24 }
 0x107   : > { %v1464_v30 = vadd.f32 %v1463_v29, %v1462_v16  ;;  %v7240_v29 = vpop.permute.xlu2 %1934 }
 0x108   : > { %11492 = vst [vmem:[#allocation19_spill] sm:$0xff] %v7240_v29 }
 0x10b   : > { %v7168_v34 = vpop.f32.mrf.mxu0 }
 0x10c   : > { %v7173_v39 = vmul.f32 %v7168_v34, %v7168_v34  ;;  %1958 = vrot.lane.b32.xlu2 %v7154_v23, %s6798_s8  ;;  %1107 = vrot.lane.b32.xlu1 %v7168_v34, %s6797_s29 }
 0x10e   : > { %v1465_v40 = vsel %vm1437_vm1, %v7173_v39, 0.0  ;;  %6098 = vmatmul.msk.f32.gmra.mxu0 %vm324_vm0, %v321_v35  ;;  %v7236_v15 = vpop.permute.xlu1 %1079 }
 0x10f   : > { %v1466_v44 = vadd.f32 %v1465_v40, %v1464_v30  ;;  %11490 = vst [vmem:[#allocation17_spill] sm:$0xff] %v7236_v15  ;;  %v1326_v15 = vsel %vm1324_vm4, %v6967_v22, 0.0 }
 0x113   : > { %v7182_v45 = vpop.f32.mrf.mxu0 }
 0x114   : > { %v7187_v50 = vmul.f32 %v7182_v45, %v7182_v45  ;;  %1960 = vrot.lane.b32.xlu1 %v7168_v34, %s6798_s8  ;;  %1109 = vrot.lane.b32.xlu2 %v7182_v45, %s6797_s29 }
 0x116   : > { %v1467_v54 = vsel %vm1437_vm1, %v7187_v50, 0.0  ;;  %6099 = vmatmul.msk.f32.gmra.mxu0 %vm324_vm0, %v322_v49 }
 0x117   : > { %v1468_v55 = vadd.f32 %v1467_v54, %v1466_v44  ;;  %v7252_v44 = vpop.permute.xlu1 %1932 }
 0x118   : > { %11493 = vst [vmem:[#allocation20_spill] sm:$0xff] %v7252_v44 }
 0x11b   : > { %v7196_v57 = vpop.f32.mrf.mxu0 }
 0x11c   : > { %11486 = vst [vmem:[#allocation13_spill] sm:$0xff] %v7196_v57  ;;  %v7200_v59 = vmul.f32 %v7196_v57, %v7196_v57  ;;  %1962 = vrot.lane.b32.xlu2 %v7182_v45, %s6798_s8  ;;  %1964 = vrot.lane.b32.xlu1 %v7196_v57, %s6798_s8 }
 0x11d   : > { %1111 = vrot.lane.b32.xlu0 %v7196_v57, %s6797_s29 }
 0x11e   : > { %v1469_v60 = vsel %vm1437_vm1, %v7200_v59, 0.0 }
 0x11f   : > { %v1470_v0 = vadd.f32 %v1469_v60, %v1468_v55  ;;  %v7264_v55 = vpop.permute.xlu2 %1085 }
 0x120   : > { %11495 = vst [vmem:[#allocation22_spill] sm:$0xff] %v7264_v55 }
 0x123   : > { %v7210_v1 = vpop.f32.mrf.mxu0 }
 0x124   : > { %11487 = vst [vmem:[#allocation14_spill] sm:$0xff] %v7210_v1  ;;  %v7214_v3 = vmul.f32 %v7210_v1, %v7210_v1  ;;  %1966 = vrot.lane.b32.xlu2 %v7210_v1, %s6798_s8  ;;  %1113 = vrot.lane.b32.xlu1 %v7210_v1, %s6797_s29 }
 0x126   : > { %v1471_v5 = vsel %vm1437_vm1, %v7214_v3, 0.0 }
 0x127   : > { %v1472_v6 = vadd.f32 %v1471_v5, %v1470_v0  ;;  %v7268_v5 = vpop.permute.xlu1 %1083  ;;  %v7280_v29 = vpop.permute.xlu2 %1938 }
 0x128   : > { %11496 = vst [vmem:[#allocation23_spill] sm:$0xff] %v7268_v5 }
 0x129   : > { %11498 = vst [vmem:[#allocation25_spill] sm:$0xff] %v7280_v29 }
 0x12b   : > { %v7224_v10 = vpop.f32.mrf.mxu0 }
 0x12c   : > { %11489 = vst [vmem:[#allocation16_spill] sm:$0xff] %v7224_v10  ;;  %v7228_v11 = vmul.f32 %v7224_v10, %v7224_v10  ;;  %1968 = vrot.lane.b32.xlu1 %v7224_v10, %s6798_s8  ;;  %1115 = vrot.lane.b32.xlu2 %v7224_v10, %s6797_s29  ;;  %v572_v10 = vsel %vm566_vm2, %v7003_v33, 0.0 }
 0x12e   : > { %v1473_v13 = vsel %vm1437_vm1, %v7228_v11, 0.0 }
 0x12f   : > { %v1474_v16 = vadd.f32 %v1473_v13, %v1472_v6  ;;  %v7294_v8 = vpop.permute.xlu2 %1089 }
 0x130   : > { %11501 = vst [vmem:[#allocation28_spill] sm:$0xff] %v7294_v8  ;;  %v681_v8 = vsel %vm679_vm3, %v6967_v22, 0.0 }
 0x133   : > { %v7238_v24 = vpop.f32.mrf.mxu0 }
 0x134   : > { %11491 = vst [vmem:[#allocation18_spill] sm:$0xff] %v7238_v24  ;;  %v7244_v30 = vmul.f32 %v7238_v24, %v7238_v24  ;;  %1970 = vrot.lane.b32.xlu2 %v7238_v24, %s6798_s8  ;;  %1117 = vrot.lane.b32.xlu1 %v7238_v24, %s6797_s29 }
 0x136   : > { %v1475_v35 = vsel %vm1437_vm1, %v7244_v30, 0.0 }
 0x137   : > { %v1476_v40 = vadd.f32 %v1475_v35, %v1474_v16  ;;  %v7334_v56 = vpop.permute.xlu2 %1942 }
 0x138   : > { %11504 = vst [vmem:[#allocation31_spill] sm:$0xff] %v7334_v56 }
 0x13b   : > { %v7254_v49 = vpop.f32.mrf.mxu0 }
 0x13c   : > { %11494 = vst [vmem:[#allocation21_spill] sm:$0xff] %v7254_v49  ;;  %v7258_v54 = vmul.f32 %v7254_v49, %v7254_v49  ;;  %1972 = vrot.lane.b32.xlu1 %v7254_v49, %s6798_s8  ;;  %1119 = vrot.lane.b32.xlu2 %v7254_v49, %s6797_s29  ;;  %v680_v49 = vsel %vm679_vm3, %v6958_v19, 0.0 }
 0x13e   : > { %v1477_v60 = vsel %vm1437_vm1, %v7258_v54, 0.0 }
 0x13f   : > { %v1478_v0 = vadd.f32 %v1477_v60, %v1476_v40  ;;  %v7290_v60 = vpop.permute.xlu1 %1936 }
 0x140   : > { %11500 = vst [vmem:[#allocation27_spill] sm:$0xff] %v7290_v60 }
 0x143   : > { %v7270_v6 = vpop.f32.mrf.mxu0 }
 0x144   : > { %11497 = vst [vmem:[#allocation24_spill] sm:$0xff] %v7270_v6  ;;  %v7274_v13 = vmul.f32 %v7270_v6, %v7270_v6  ;;  %1121 = vrot.lane.b32.xlu1 %v7270_v6, %s6797_s29  ;;  %v567_v6 = vsel %vm566_vm2, %v6958_v19, 0.0 }
 0x146   : > { %v1479_v16 = vsel %vm1437_vm1, %v7274_v13, 0.0 }
 0x147   : > { %v1480_v35 = vadd.f32 %v1479_v16, %v1478_v0  ;;  %v7306_v60 = vpop.permute.xlu1 %1087 }
 0x148   : > { %11503 = vst [vmem:[#allocation30_spill] sm:$0xff] %v7306_v60  ;;  %v1328_v60 = vsel %vm1324_vm4, %v6986_v28, 0.0 }
 0x14b   : > { %v7282_v44 = vpop.f32.mrf.mxu0 }
 0x14c   : > { %11499 = vst [vmem:[#allocation26_spill] sm:$0xff] %v7282_v44  ;;  %v7286_v40 = vmul.f32 %v7282_v44, %v7282_v44  ;;  %1123 = vrot.lane.b32.xlu2 %v7282_v44, %s6797_s29 }
 0x14e   : > { %v1481_v55 = vsel %vm1437_vm1, %v7286_v40, 0.0 }
 0x14f   : > { %v1482_v5 = vadd.f32 %v1481_v55, %v1480_v35  ;;  %v568_v35 = vsel %vm566_vm2, %v6967_v22, 0.0  ;;  %v682_v22 = vadd.f32 %v681_v8, %v680_v49  ;;  %v574_v49 = vsel %vm566_vm2, %v7020_v38, 0.0 }
 0x150   : > { %v569_v1 = vadd.f32 %v568_v35, %v567_v6  ;;  %v687_v6 = vsel %vm679_vm3, %v7020_v38, 0.0 }
 0x153   : > { %v7296_v0 = vpop.f32.mrf.mxu0 }
 0x154   : > { %11502 = vst [vmem:[#allocation29_spill] sm:$0xff] %v7296_v0  ;;  %v7300_v16 = vmul.f32 %v7296_v0, %v7296_v0  ;;  %1125 = vrot.lane.b32.xlu1 %v7296_v0, %s6797_s29  ;;  %v1325_v0 = vsel %vm1324_vm4, %v6958_v19, 0.0  ;;  %v685_v19 = vsel %vm679_vm3, %v7003_v33, 0.0  ;;  %v1332_v33 = vsel %vm1324_vm4, %v7020_v38, 0.0  ;;  %v7356_v38 = vpop.permute.xlu1 %1940 }
 0x155   : > { %v1327_v57 = vadd.f32 %v1326_v15, %v1325_v0  ;;  %11505 = vst [vmem:[#allocation32_spill] sm:$0xff] %v7356_v38 }
 0x156   : > { %v1483_v29 = vsel %vm1437_vm1, %v7300_v16, 0.0 }
 0x157   : > { %v1484_v55 = vadd.f32 %v1483_v29, %v1482_v5  ;;  %v570_v29 = vsel %vm566_vm2, %v6986_v28, 0.0  ;;  %v683_v5 = vsel %vm679_vm3, %v6986_v28, 0.0  ;;  %v1329_v15 = vadd.f32 %v1328_v60, %v1327_v57 }
 0x158   : > { %v571_v28 = vadd.f32 %v570_v29, %v569_v1  ;;  %v684_v8 = vadd.f32 %v683_v5, %v682_v22  ;;  %v576_v1 = vsel %vm566_vm2, %v7037_v43, 0.0  ;;  %v689_v57 = vsel %vm679_vm3, %v7037_v43, 0.0 }
 0x159   : > { %v1331_v44 = vadd.f32 %v1330_v62, %v1329_v15  ;;  %v1334_v60 = vsel %vm1324_vm4, %v7037_v43, 0.0  ;;  %v691_v62 = vsel %vm679_vm3, %v7054_v48, 0.0  ;;  %v580_v43 = vsel %vm566_vm2, %v7071_v53, 0.0 }
 0x15a   : > { %v573_v35 = vadd.f32 %v572_v10, %v571_v28  ;;  %v686_v56 = vadd.f32 %v685_v19, %v684_v8  ;;  %v578_v10 = vsel %vm566_vm2, %v7054_v48, 0.0 }
 0x15b   : > { %v7326_v24 = vpop.f32.mrf.mxu0  ;;  %v1333_v22 = vadd.f32 %v1332_v33, %v1331_v44  ;;  %v1338_v44 = vsel %vm1324_vm4, %v7071_v53, 0.0 }
 0x15c   : > { %v7338_v52 = vmul.f32 %v7326_v24, %v7326_v24  ;;  %1127 = vrot.lane.b32.xlu2 %v7326_v24, %s6797_s29  ;;  %v575_v29 = vadd.f32 %v574_v49, %v573_v35  ;;  %v688_v5 = vadd.f32 %v687_v6, %v686_v56  ;;  %v693_v56 = vsel %vm679_vm3, %v7071_v53, 0.0  ;;  %v7384_v53 = vpop.permute.xlu2 %1093 }
 0x15d   : > { %v1335_v8 = vadd.f32 %v1334_v60, %v1333_v22  ;;  %v695_v35 = vsel %vm679_vm3, %v7086_v58, 0.0  ;;  %11506 = vst [vmem:[#allocation33_spill] sm:$0xff] %v7384_v53 }
 0x15e   : > { %v1485_v0 = vsel %vm1437_vm1, %v7338_v52, 0.0  ;;  %v577_v19 = vadd.f32 %v576_v1, %v575_v29  ;;  %v690_v28 = vadd.f32 %v689_v57, %v688_v5  ;;  %v1340_v1 = vsel %vm1324_vm4, %v7086_v58, 0.0 }
 0x15f   : > { %v1486_v61 = vadd.f32 %v1485_v0, %v1484_v55  ;;  %v1336_v55 = vsel %vm1324_vm4, %v7054_v48, 0.0  ;;  %v582_v0 = vsel %vm566_vm2, %v7086_v58, 0.0 }
 0x160   : > { %v579_v48 = vadd.f32 %v578_v10, %v577_v19  ;;  %v692_v6 = vadd.f32 %v691_v62, %v690_v28  ;;  %v1337_v33 = vadd.f32 %v1336_v55, %v1335_v8  ;;  %v584_v10 = vsel %vm566_vm2, %v7102_v63, 0.0 }
 0x161   : > { %v697_v62 = vsel %vm679_vm3, %v7102_v63, 0.0  ;;  %v1342_v55 = vsel %vm1324_vm4, %v7102_v63, 0.0  ;;  %v586_v8 = vsel %vm566_vm2, %v7117_v4, 0.0  ;;  %v588_v63 = vsel %vm566_vm2, %v7131_v9, 0.0 }
 0x162   : > { %v581_v60 = vadd.f32 %v580_v43, %v579_v48  ;;  %v694_v29 = vadd.f32 %v693_v56, %v692_v6  ;;  %v1339_v5 = vadd.f32 %v1338_v44, %v1337_v33  ;;  %v699_v43 = vsel %vm679_vm3, %v7117_v4, 0.0  ;;  %v7400_v6 = vpop.permute.xlu1 %1091 }
 0x163   : > { %v7364_v15 = vpop.f32.mrf.mxu0  ;;  %11507 = vst [vmem:[#allocation34_spill] sm:$0xff] %v7400_v6 }
 0x164   : > { %v7374_v49 = vmul.f32 %v7364_v15, %v7364_v15  ;;  %1129 = vrot.lane.b32.xlu1 %v7364_v15, %s6797_s29  ;;  %v583_v19 = vadd.f32 %v582_v0, %v581_v60  ;;  %v696_v58 = vadd.f32 %v695_v35, %v694_v29  ;;  %v1341_v28 = vadd.f32 %v1340_v1, %v1339_v5 }
 0x165   : > { %v701_v0 = vsel %vm679_vm3, %v7131_v9, 0.0  ;;  %v1346_v35 = vsel %vm1324_vm4, %v7131_v9, 0.0  ;;  %v590_v29 = vsel %vm566_vm2, %v7145_v14, 0.0  ;;  %v703_v5 = vsel %vm679_vm3, %v7145_v14, 0.0 }
 0x166   : > { %v1487_v57 = vsel %vm1437_vm1, %v7374_v49, 0.0  ;;  %v585_v56 = vadd.f32 %v584_v10, %v583_v19  ;;  %v698_v44 = vadd.f32 %v697_v62, %v696_v58  ;;  %v1343_v48 = vadd.f32 %v1342_v55, %v1341_v28 }
 0x167   : > { %v1488_v22 = vadd.f32 %v1487_v57, %v1486_v61  ;;  %v1344_v61 = vsel %vm1324_vm4, %v7117_v4, 0.0  ;;  %v1348_v10 = vsel %vm1324_vm4, %v7145_v14, 0.0  ;;  %v592_v28 = vsel %vm566_vm2, %v7159_v25, 0.0 }
 0x168   : > { %v587_v4 = vadd.f32 %v586_v8, %v585_v56  ;;  %v700_v57 = vadd.f32 %v699_v43, %v698_v44  ;;  %v1345_v60 = vadd.f32 %v1344_v61, %v1343_v48  ;;  %v705_v8 = vsel %vm679_vm3, %v7159_v25, 0.0  ;;  %v7430_v61 = vpop.permute.xlu2 %1946 }
 0x169   : > { %v1350_v43 = vsel %vm1324_vm4, %v7159_v25, 0.0  ;;  %11508 = vst [vmem:[#allocation35_spill] sm:$0xff] %v7430_v61  ;;  %v594_v48 = vsel %vm566_vm2, %v7173_v39, 0.0  ;;  %v596_v25 = vsel %vm566_vm2, %v7187_v50, 0.0  ;;  %v7711_v61 = vld [vmem:[%s6913_s23 + $0x10] sm:$0xff] }
 0x16a   : > { %v589_v62 = vadd.f32 %v588_v63, %v587_v4  ;;  %v702_v55 = vadd.f32 %v701_v0, %v700_v57  ;;  %v1347_v19 = vadd.f32 %v1346_v35, %v1345_v60  ;;  %v1352_v63 = vsel %vm1324_vm4, %v7173_v39, 0.0 }
 0x16b   : > { %v7402_v33 = vpop.f32.mrf.mxu0  ;;  %v709_v60 = vsel %vm679_vm3, %v7187_v50, 0.0 }
 0x16c   : > { %v7412_v1 = vmul.f32 %v7402_v33, %v7402_v33  ;;  %1131 = vrot.lane.b32.xlu2 %v7402_v33, %s6797_s29  ;;  %v591_v56 = vadd.f32 %v590_v29, %v589_v62  ;;  %v704_v14 = vadd.f32 %v703_v5, %v702_v55  ;;  %v1349_v44 = vadd.f32 %v1348_v10, %v1347_v19  ;;  %v7452_v62 = vpop.permute.xlu1 %1944 }
 0x16d   : > { %v1354_v29 = vsel %vm1324_vm4, %v7187_v50, 0.0  ;;  %11509 = vst [vmem:[#allocation36_spill] sm:$0xff] %v7452_v62  ;;  %v598_v55 = vsel %vm566_vm2, %v7200_v59, 0.0  ;;  %v711_v19 = vsel %vm679_vm3, %v7200_v59, 0.0  ;;  %v1356_v50 = vsel %vm1324_vm4, %v7200_v59, 0.0 }
 0x16e   : > { %v1489_v9 = vsel %vm1437_vm1, %v7412_v1, 0.0  ;;  %v593_v0 = vadd.f32 %v592_v28, %v591_v56  ;;  %v706_v35 = vadd.f32 %v705_v8, %v704_v14  ;;  %v1351_v4 = vadd.f32 %v1350_v43, %v1349_v44 }
 0x16f   : > { %v1490_v58 = vadd.f32 %v1489_v9, %v1488_v22  ;;  %v707_v22 = vsel %vm679_vm3, %v7173_v39, 0.0  ;;  %v600_v44 = vsel %vm566_vm2, %v7214_v3, 0.0  ;;  %v602_v59 = vsel %vm566_vm2, %v7228_v11, 0.0 }
 0x170   : > { %v595_v39 = vadd.f32 %v594_v48, %v593_v0  ;;  %v708_v10 = vadd.f32 %v707_v22, %v706_v35  ;;  %v1353_v9 = vadd.f32 %v1352_v63, %v1351_v4  ;;  %v713_v48 = vsel %vm679_vm3, %v7214_v3, 0.0 }
 0x171   : > { %v1358_v22 = vsel %vm1324_vm4, %v7214_v3, 0.0  ;;  %v715_v4 = vsel %vm679_vm3, %v7228_v11, 0.0  ;;  %v604_v3 = vsel %vm566_vm2, %v7244_v30, 0.0  ;;  %v2782_v62 = vrot.slane %v7711_v61, 1 }
 0x172   : > { %v597_v8 = vadd.f32 %v596_v25, %v595_v39  ;;  %v710_v43 = vadd.f32 %v709_v60, %v708_v10  ;;  %v1355_v56 = vadd.f32 %v1354_v29, %v1353_v9  ;;  %v7474_v25 = vpop.permute.xlu2 %1097  ;;  %v717_v9 = vsel %vm679_vm3, %v7244_v30, 0.0 }
 0x173   : > { %v7438_v57 = vpop.f32.mrf.mxu0  ;;  %11510 = vst [vmem:[#allocation37_spill] sm:$0xff] %v7474_v25  ;;  %v7776_v25 = vld [vmem:[%s6913_s23 + $0x28] sm:$0xff] }
 0x174   : > { %v7448_v5 = vmul.f32 %v7438_v57, %v7438_v57  ;;  %1133 = vrot.lane.b32.xlu1 %v7438_v57, %s6797_s29  ;;  %v599_v63 = vadd.f32 %v598_v55, %v597_v8  ;;  %v712_v0 = vadd.f32 %v711_v19, %v710_v43  ;;  %v1357_v35 = vadd.f32 %v1356_v50, %v1355_v56 }
 0x175   : > { %v1362_v55 = vsel %vm1324_vm4, %v7244_v30, 0.0  ;;  %v606_v8 = vsel %vm566_vm2, %v7258_v54, 0.0  ;;  %v719_v43 = vsel %vm679_vm3, %v7258_v54, 0.0  ;;  %v1364_v56 = vsel %vm1324_vm4, %v7258_v54, 0.0  ;;  %11541 = vst [vmem:[#allocation58_spill] sm:$0xff] %v7776_v25 }
 0x176   : > { %v1491_v28 = vsel %vm1437_vm1, %v7448_v5, 0.0  ;;  %v601_v60 = vadd.f32 %v600_v44, %v599_v63  ;;  %v714_v29 = vadd.f32 %v713_v48, %v712_v0  ;;  %v1359_v39 = vadd.f32 %v1358_v22, %v1357_v35  ;;  %v7498_v63 = vpop.permute.xlu1 %1095 }
 0x177   : > { %v1492_v14 = vadd.f32 %v1491_v28, %v1490_v58  ;;  %v1360_v58 = vsel %vm1324_vm4, %v7228_v11, 0.0  ;;  %11511 = vst [vmem:[#allocation38_spill] sm:$0xff] %v7498_v63  ;;  %v608_v35 = vsel %vm566_vm2, %v7274_v13, 0.0 }
 0x178   : > { %v603_v11 = vadd.f32 %v602_v59, %v601_v60  ;;  %v716_v50 = vadd.f32 %v715_v4, %v714_v29  ;;  %v1361_v28 = vadd.f32 %v1360_v58, %v1359_v39  ;;  %v721_v59 = vsel %vm679_vm3, %v7274_v13, 0.0 }
 0x179   : > { %v1366_v4 = vsel %vm1324_vm4, %v7274_v13, 0.0  ;;  %v610_v29 = vsel %vm566_vm2, %v7286_v40, 0.0  ;;  %v723_v39 = vsel %vm679_vm3, %v7286_v40, 0.0  ;;  %v612_v13 = vsel %vm566_vm2, %v7300_v16, 0.0 }
 0x17a   : > { %v605_v44 = vadd.f32 %v604_v3, %v603_v11  ;;  %v718_v48 = vadd.f32 %v717_v9, %v716_v50  ;;  %v1363_v22 = vadd.f32 %v1362_v55, %v1361_v28  ;;  %v7514_v50 = vpop.permute.xlu2 %1950  ;;  %v725_v28 = vsel %vm679_vm3, %v7300_v16, 0.0 }
 0x17b   : > { %v7476_v10 = vpop.f32.mrf.mxu0  ;;  %11512 = vst [vmem:[#allocation39_spill] sm:$0xff] %v7514_v50 }
 0x17c   : > { %v7486_v19 = vmul.f32 %v7476_v10, %v7476_v10  ;;  %1135 = vrot.lane.b32.xlu2 %v7476_v10, %s6797_s29  ;;  %v607_v58 = vadd.f32 %v606_v8, %v605_v44  ;;  %v720_v54 = vadd.f32 %v719_v43, %v718_v48  ;;  %v1365_v60 = vadd.f32 %v1364_v56, %v1363_v22 }
 0x17d   : > { %v1370_v8 = vsel %vm1324_vm4, %v7300_v16, 0.0  ;;  %v614_v44 = vsel %vm566_vm2, %v7338_v52, 0.0  ;;  %v727_v48 = vsel %vm679_vm3, %v7338_v52, 0.0  ;;  %v1372_v22 = vsel %vm1324_vm4, %v7338_v52, 0.0 }
 0x17e   : > { %v1493_v30 = vsel %vm1437_vm1, %v7486_v19, 0.0  ;;  %v609_v3 = vadd.f32 %v608_v35, %v607_v58  ;;  %v722_v9 = vadd.f32 %v721_v59, %v720_v54  ;;  %v1367_v55 = vadd.f32 %v1366_v4, %v1365_v60 }
 0x17f   : > { %v1494_v0 = vadd.f32 %v1493_v30, %v1492_v14  ;;  %v1368_v14 = vsel %vm1324_vm4, %v7286_v40, 0.0  ;;  %v616_v54 = vsel %vm566_vm2, %v7374_v49, 0.0  ;;  %v729_v60 = vsel %vm679_vm3, %v7374_v49, 0.0 }
 0x180   : > { %v611_v40 = vadd.f32 %v610_v29, %v609_v3  ;;  %v724_v56 = vadd.f32 %v723_v39, %v722_v9  ;;  %v1369_v30 = vadd.f32 %v1368_v14, %v1367_v55  ;;  %v1374_v29 = vsel %vm1324_vm4, %v7374_v49, 0.0  ;;  %v7539_v39 = vpop.permute.xlu1 %1948 }
 0x181   : > { %11513 = vst [vmem:[#allocation40_spill] sm:$0xff] %v7539_v39  ;;  %v618_v9 = vsel %vm566_vm2, %v7412_v1, 0.0  ;;  %v1376_v55 = vsel %vm1324_vm4, %v7412_v1, 0.0  ;;  %v620_v49 = vsel %vm566_vm2, %v7448_v5, 0.0 }
 0x182   : > { %v613_v35 = vadd.f32 %v612_v13, %v611_v40  ;;  %v726_v59 = vadd.f32 %v725_v28, %v724_v56  ;;  %v1371_v4 = vadd.f32 %v1370_v8, %v1369_v30  ;;  %v733_v56 = vsel %vm679_vm3, %v7448_v5, 0.0 }
 0x183   : > { %v7512_v11 = vpop.f32.mrf.mxu0  ;;  %v1378_v30 = vsel %vm1324_vm4, %v7448_v5, 0.0  ;;  %v1380_v5 = vsel %vm1324_vm4, %v7486_v19, 0.0 }
 0x184   : > { %v563_v43 = vmul.f32 %v7512_v11, %v7512_v11  ;;  %1137 = vrot.lane.b32.xlu1 %v7512_v11, %s6797_s29  ;;  %v615_v14 = vadd.f32 %v614_v44, %v613_v35  ;;  %v728_v3 = vadd.f32 %v727_v48, %v726_v59  ;;  %v1373_v52 = vadd.f32 %v1372_v22, %v1371_v4 }
 0x185   : > { %v622_v35 = vsel %vm566_vm2, %v7486_v19, 0.0  ;;  %v735_v59 = vsel %vm679_vm3, %v7486_v19, 0.0 }
 0x186   : > { %v1495_v16 = vsel %vm1437_vm1, %v563_v43, 0.0  ;;  %v617_v13 = vadd.f32 %v616_v54, %v615_v14  ;;  %v730_v28 = vadd.f32 %v729_v60, %v728_v3  ;;  %v1375_v8 = vadd.f32 %v1374_v29, %v1373_v52 }
 0x187   : > { %v1496_v58 = vadd.f32 %v1495_v16, %v1494_v0  ;;  %v731_v0 = vsel %vm679_vm3, %v7412_v1, 0.0  ;;  %v7559_v16 = vpop.permute.xlu2 %1101  ;;  %v624_v3 = vsel %vm566_vm2, %v563_v43, 0.0  ;;  %v737_v52 = vsel %vm679_vm3, %v563_v43, 0.0 }
 0x188   : > { %v619_v1 = vadd.f32 %v618_v9, %v617_v13  ;;  %v732_v48 = vadd.f32 %v731_v0, %v730_v28  ;;  %v1377_v22 = vadd.f32 %v1376_v55, %v1375_v8  ;;  %11514 = vst [vmem:[#allocation41_spill] sm:$0xff] %v7559_v16  ;;  %v1382_v9 = vsel %vm1324_vm4, %v563_v43, 0.0  ;;  %v7574_v50 = vpop.permute.xlu1 %1099 }
 0x189   : > { %11515 = vst [vmem:[#allocation42_spill] sm:$0xff] %v7574_v50 }
 0x18a   : > { %v621_v54 = vadd.f32 %v620_v49, %v619_v1  ;;  %v734_v60 = vadd.f32 %v733_v56, %v732_v48  ;;  %v1379_v29 = vadd.f32 %v1378_v30, %v1377_v22 }
 0x18b   : > { %v7547_v40 = vpop.f32.mrf.mxu0 }
 0x18c   : > { %v564_v44 = vmul.f32 %v7547_v40, %v7547_v40  ;;  %1139 = vrot.lane.b32.xlu2 %v7547_v40, %s6797_s29  ;;  %v623_v0 = vadd.f32 %v622_v35, %v621_v54  ;;  %v736_v55 = vadd.f32 %v735_v59, %v734_v60  ;;  %v1381_v13 = vadd.f32 %v1380_v5, %v1379_v29 }
 0x18e   : > { %v1497_v4 = vsel %vm1437_vm1, %v564_v44, 0.0  ;;  %v626_v28 = vsel %vm566_vm2, %v564_v44, 0.0  ;;  %v739_v8 = vsel %vm679_vm3, %v564_v44, 0.0  ;;  %v1384_v19 = vsel %vm1324_vm4, %v564_v44, 0.0 }
 0x18f   : > { %v1498_v14 = vadd.f32 %v1497_v4, %v1496_v58  ;;  %v625_v49 = vadd.f32 %v624_v3, %v623_v0  ;;  %v738_v56 = vadd.f32 %v737_v52, %v736_v55  ;;  %v1383_v58 = vadd.f32 %v1382_v9, %v1381_v13  ;;  %v7588_v3 = vpop.permute.xlu2 %1954 }
 0x190   : > { %11516 = vst [vmem:[#allocation43_spill] sm:$0xff] %v7588_v3 }
 0x191   : > { %v627_v43 = vadd.f32 %v626_v28, %v625_v49  ;;  %v740_v48 = vadd.f32 %v739_v8, %v738_v56  ;;  %v1385_v22 = vadd.f32 %v1384_v19, %v1383_v58  ;;  %v7590_v8 = vpop.permute.xlu1 %1952 }
 0x192   : > { %11517 = vst [vmem:[#allocation44_spill] sm:$0xff] %v7590_v8 }
 0x193   : > { %v7576_v30 = vpop.f32.mrf.mxu0 }
 0x194   : > { %v565_v1 = vmul.f32 %v7576_v30, %v7576_v30  ;;  %1141 = vrot.lane.b32.xlu1 %v7576_v30, %s6797_s29 }
 0x196   : > { %v628_v35 = vsel %vm566_vm2, %v565_v1, 0.0  ;;  %v741_v44 = vsel %vm679_vm3, %v565_v1, 0.0  ;;  %v1386_v59 = vsel %vm1324_vm4, %v565_v1, 0.0  ;;  %v1499_v5 = vsel %vm1437_vm1, %v565_v1, 0.0 }
 0x197   : > { %v629_v4 = vadd.f32 %v628_v35, %v627_v43  ;;  %v742_v54 = vadd.f32 %v741_v44, %v740_v48  ;;  %v1387_v60 = vadd.f32 %v1386_v59, %v1385_v22  ;;  %v7586_v29 = vadd.f32 %v1499_v5, %v1498_v14  ;;  %v7592_v35 = vpop.permute.xlu2 %1105 }
 0x198   : > { %11518 = vst [vmem:[#allocation45_spill] sm:$0xff] %v7592_v35  ;;  %vm11464_vm1 = vcmask 1043459   ;;  %vm2586_vm3 = vcmask 1044484   ;;  %vm2589_vm4 = vcmask 1045509  }
 0x199   : > { %v630_v52 = vrot.slane %v629_v4, 4  ;;  %v743_v9 = vrot.slane %v742_v54, 4  ;;  %v1388_v0 = vrot.slane %v1387_v60, 4 }
 0x19b   : > { %v631_v55 = vadd.f32 %v630_v52, %v629_v4  ;;  %v744_v13 = vadd.f32 %v743_v9, %v742_v54  ;;  %v1389_v28 = vadd.f32 %v1388_v0, %v1387_v60  ;;  %v7594_v60 = vpop.permute.xlu1 %1103 }
 0x19c   : > { %11519 = vst [vmem:[#allocation46_spill] sm:$0xff] %v7594_v60  ;;  %v7728_v60 = vld [vmem:[%s6913_s23 + $0x70] sm:$0xff] }
 0x19d   : > { %v632_v19 = vrot.slane %v631_v55, 2  ;;  %v745_v49 = vrot.slane %v744_v13, 2  ;;  %v1390_v56 = vrot.slane %v1389_v28, 2  ;;  %v2735_v16 = vrot.slane %v7728_v60, 4 }
 0x19f   : > { %v633_v58 = vadd.f32 %v632_v19, %v631_v55  ;;  %v746_v1 = vadd.f32 %v745_v49, %v744_v13  ;;  %v1391_v43 = vadd.f32 %v1390_v56, %v1389_v28  ;;  %v7596_v52 = vpop.permute.xlu2 %1958 }
 0x1a0   : > { %11520 = vst [vmem:[#allocation47_spill] sm:$0xff] %v7596_v52 }
 0x1a1   : > { %v634_v48 = vrot.slane %v633_v58, 1  ;;  %v747_v22 = vrot.slane %v746_v1, 1  ;;  %v1392_v14 = vrot.slane %v1391_v43, 1 }
 0x1a3   : > { %v635_v44 = vadd.f32 %v634_v48, %v633_v58  ;;  %v748_v59 = vadd.f32 %v747_v22, %v746_v1  ;;  %v1393_v5 = vadd.f32 %v1392_v14, %v1391_v43  ;;  %v7598_v56 = vpop.permute.xlu1 %1956 }
 0x1a4   : > { %11521 = vst [vmem:[#allocation48_spill] sm:$0xff] %v7598_v56 }
 0x1a5   : > { %v636_v3 = vmax.f32 %v635_v44, 1e-24  ;;  %v749_v4 = vmax.f32 %v748_v59, 1e-24  ;;  %v1394_v54 = vmax.f32 %v1393_v5, 1e-24 }
 0x1a6   : > { %v2671_v59 = vrot.slane %v6950_v18, 1 }
 0x1a7   : > { %6582 = vrsqrt.f32 %v636_v3  ;;  %vm643_vm6 = vweird.f32 %v636_v3  ;;  %v7601_v5 = vpop.permute.xlu2 %1109  ;;  %vm756_vm11 = vweird.f32 %v749_v4  ;;  %vm1401_vm13 = vweird.f32 %v1394_v54 }
 0x1a8   : > { %6584 = vrsqrt.f32 %v749_v4  ;;  %11522 = vst [vmem:[#allocation49_spill] sm:$0xff] %v7601_v5 }
 0x1a9   : > { %6586 = vrsqrt.f32 %v1394_v54 }
 0x1ad   : > { %v6583_v9 = vpop.eup %6582 }
 0x1ae   : > { %v6585_v0 = vpop.eup %6584  ;;  %v638_v55 = vmul.f32 %v6583_v9, %v636_v3  ;;  %vm644_vm5 = vweird.f32 %v6583_v9  ;;  %v2673_v3 = vrot.slane %v6982_v27, 7 }
 0x1af   : > { %v6587_v13 = vpop.eup %6586  ;;  %v751_v28 = vmul.f32 %v6585_v0, %v749_v4  ;;  %vm757_vm7 = vweird.f32 %v6585_v0  ;;  %vm645_vm10 = vmor %vm643_vm6, %vm644_vm5  ;;  %vm11466_vm5 = vcmask 1046534   ;;  %vm11465_vm6 = vcmask 1047559  }
 0x1b0   : > { %v639_v19 = vmul.f32 %v6583_v9, %v638_v55  ;;  %v1396_v49 = vmul.f32 %v6587_v13, %v1394_v54  ;;  %vm1402_vm8 = vweird.f32 %v6587_v13  ;;  %vm758_vm12 = vmor %vm756_vm11, %vm757_vm7  ;;  %v7620_v54 = vpop.permute.xlu1 %1107  ;;  %vm1027_vm11 = vcmask 27648  }
 0x1b1   : > { %v752_v58 = vmul.f32 %v6585_v0, %v751_v28  ;;  %vm1403_vm14 = vmor %vm1401_vm13, %vm1402_vm8  ;;  %11523 = vst [vmem:[#allocation50_spill] sm:$0xff] %v7620_v54  ;;  %vm3123_vm13 = vcmask 130048  }
 0x1b2   : > { %v640_v1 = vmul.f32 0.5, %v639_v19  ;;  %v1397_v43 = vmul.f32 %v6587_v13, %v1396_v49 }
 0x1b3   : > { %v753_v48 = vmul.f32 0.5, %v752_v58  ;;  %v2672_v58 = vsel %vm2577_vm9, %v6963_v21, %v2671_v59  ;;  %v7636_v59 = vld [vmem:[%s6913_s23 + $0x40] sm:$0xff] }
 0x1b4   : > { %v641_v22 = vsub.f32 1.5, %v640_v1  ;;  %v1398_v14 = vmul.f32 0.5, %v1397_v43  ;;  %v2675_v43 = vrot.slane %v6999_v32, 6 }
 0x1b5   : > { %v754_v44 = vsub.f32 1.5, %v753_v48 }
 0x1b6   : > { %v642_v52 = vmul.f32 %v6583_v9, %v641_v22  ;;  %v1399_v8 = vsub.f32 1.5, %v1398_v14  ;;  %v2674_v14 = vsel %vm2580_vm15, %v2673_v3, %v2672_v58  ;;  %v2677_v3 = vrot.slane %v7016_v37, 5 }
 0x1b7   : > { %v755_v55 = vmul.f32 %v6585_v0, %v754_v44 }
 0x1b8   : > { %v7603_v28 = vsel %vm645_vm10, %v6583_v9, %v642_v52  ;;  %v1400_v19 = vmul.f32 %v6587_v13, %v1399_v8 }
 0x1b9   : > { %v7606_v49 = vsel %vm758_vm12, %v6585_v0, %v755_v55  ;;  %v662_v18 = vmul.f32 %v7603_v28, %v7182_v45  ;;  %v661_v0 = vmul.f32 %v7603_v28, %v7168_v34  ;;  %v660_v44 = vmul.f32 %v7603_v28, %v7154_v23 }
 0x1ba   : > { %v7612_v1 = vsel %vm1403_vm14, %v6587_v13, %v1400_v19  ;;  %v764_v4 = vmul.f32 %v7606_v49, %v7013_v36  ;;  %v765_v8 = vmul.f32 %v7606_v49, %v7030_v41  ;;  %v760_v27 = vmul.f32 %v7606_v49, %v6947_v17  ;;  %v7640_v19 = vld [vmem:[%s6913_s23 + $0x48] sm:$0xff] }
 0x1bb   : > { %6212 = vmatpush.lsf.msrb.mxu0 %v662_v18  ;;  %v1431_v52 = vmul.f32 %v7612_v1, %v7402_v33  ;;  %v1432_v21 = vmul.f32 %v7612_v1, %v7438_v57  ;;  %v761_v9 = vmul.f32 %v7606_v49, %v6960_v20  ;;  %v2725_v55 = vrot.slane %v7636_v59, 2  ;;  %11524 = vst [vmem:[#allocation51_spill] sm:$0xff] %v7640_v19  ;;  %v7646_v18 = vpop.permute.xlu2 %1962 }
 0x1bc   : > { %v6314_v13 = vpack.i.bf16 %v765_v8, %v764_v4  ;;  %v2726_v32 = vrot.slane %v7640_v19, 1  ;;  %11525 = vst [vmem:[#allocation52_spill] sm:$0xff] %v7646_v18  ;;  %v659_v58 = vmul.f32 %v7603_v28, %v7140_v12  ;;  %v766_v4 = vmul.f32 %v7606_v49, %v7047_v46 }
 0x1bd   : > { %v6449_v48 = vpack.i.bf16 %v1432_v21, %v1431_v52  ;;  %v6304_v22 = vpack.i.bf16 %v761_v9, %v760_v27  ;;  %6213 = vmatpush.lsf.msrb.mxu0 %v661_v0  ;;  %v767_v8 = vmul.f32 %v7606_v49, %v7064_v51  ;;  %v2676_v27 = vsel %vm11464_vm1, %v2675_v43, %v2674_v14 }
 0x1be   : > { %6315 = vrot.lane.b32.xlu2 %v6314_v13, %s6799_s9  ;;  %v762_v52 = vmul.f32 %v7606_v49, %v6979_v26  ;;  %v763_v37 = vmul.f32 %v7606_v49, %v6996_v31  ;;  %v658_v21 = vmul.f32 %v7603_v28, %v7126_v7  ;;  %v2679_v9 = vrot.slane %v7033_v42, 4 }
 0x1bf   : > { %6450 = vrot.lane.b32.xlu0 %v6449_v48, %s6800_s13  ;;  %6305 = vrot.lane.b32.xlu1 %v6304_v22, %s6799_s9  ;;  %v2727_v0 = vsel %vm2577_vm9, %v2726_v32, %v2725_v55  ;;  %v2678_v13 = vsel %vm2586_vm3, %v2677_v3, %v2676_v27  ;;  %v6319_v43 = vpack.i.bf16 %v767_v8, %v766_v4  ;;  %v7667_v22 = vld [vmem:[%s6913_s23 + $0x58] sm:$0xff]  ;;  %v2681_v42 = vrot.slane %v7050_v47, 3  ;;  %v7674_v55 = vld [vmem:[%s6913_s23 + $0x50] sm:$0xff] }
 0x1c0   : > { %6214 = vmatpush.lsf.msrb.mxu0 %v660_v44  ;;  %v657_v48 = vmul.f32 %v7603_v28, %v7112_v2  ;;  %v2729_v14 = vrot.slane %v7667_v22, 7  ;;  %v7670_v44 = vpop.permute.xlu1 %1960  ;;  %v2728_v32 = vsel %vm2580_vm15, %v7674_v55, %v2727_v0  ;;  %v11527_v3 = vld [vmem:[#allocation11_spill] sm:$0xff]  ;;  %v2680_v8 = vsel %vm2589_vm4, %v2679_v9, %v2678_v13  ;;  %v7683_v27 = vld [vmem:[%s6913_s23] sm:$0xff]  ;;  %v11532_v13 = vld [vmem:[#allocation10_spill] sm:$0xff] }
 0x1c1   : > { %11526 = vst [vmem:[#allocation53_spill] sm:$0xff] %v7670_v44  ;;  %v656_v4 = vmul.f32 %v7603_v28, %v11527_v3  ;;  %v11531_v0 = vld [vmem:[#allocation9_spill] sm:$0xff]  ;;  %v655_v18 = vmul.f32 %v7603_v28, %v11532_v13  ;;  %v770_v44 = vmul.f32 %v7606_v49, %v7112_v2  ;;  %v771_v56 = vmul.f32 %v7606_v49, %v7126_v7 }
 0x1c2   : > { %6215 = vmatpush.lsf.msrb.mxu0 %v659_v58  ;;  %v6309_v58 = vpack.i.bf16 %v763_v37, %v762_v52  ;;  %11528 = vst [vmem:[#allocation11_spill] sm:$0xff] %v7683_v27  ;;  %v2779_v52 = vrot.slane %v7683_v27, 3  ;;  %v7687_v37 = vld [vmem:[%s6913_s23 + $0x8] sm:$0xff]  ;;  %v2682_v39 = vsel %vm11466_vm5, %v2681_v42, %v2680_v8  ;;  %v654_v5 = vmul.f32 %v7603_v28, %v7064_v51 }
 0x1c3   : > { %11529 = vst [vmem:[#allocation54_spill] sm:$0xff] %v7687_v37  ;;  %v2780_v47 = vrot.slane %v7687_v37, 2  ;;  %v7714_v38 = vpop.permute.xlu2 %1966  ;;  %v6329_v35 = vpack.i.bf16 %v771_v56, %v770_v44  ;;  %v7737_v56 = vld [vmem:[%s6913_s23 + $0xc0] sm:$0xff]  ;;  %vm11463_vm12 = vcmask 1043456   ;;  %vm11475_vm14 = vcmask 195584  }
 0x1c4   : > { %6216 = vmatpush.lsf.msrb.mxu0 %v658_v21  ;;  %v11530_v21 = vld [vmem:[#allocation26_spill] sm:$0xff]  ;;  %11534 = vst [vmem:[#allocation9_spill] sm:$0xff] %v7714_v38  ;;  %v653_v38 = vmul.f32 %v7603_v28, %v7047_v46  ;;  %v2821_v44 = vrot.slane %v7737_v56, 3 }
 0x1c5   : > { %11533 = vst [vmem:[#allocation26_spill] sm:$0xff] %v7711_v61 }
 0x1c6   : > { %6320 = vrot.lane.b32.xlu2 %v6319_v43, %s6799_s9  ;;  %6217 = vmatpush.lsf.msrb.mxu0 %v657_v48  ;;  %v2683_v43 = vrot.slane %v11531_v0, 2  ;;  %v7695_v48 = vld [vmem:[%s6913_s23 + $0x60] sm:$0xff]  ;;  %v768_v0 = vmul.f32 %v7606_v49, %v11532_v13  ;;  %11535 = vst [vmem:[#allocation10_spill] sm:$0xff] %v7737_v56  ;;  %v7836_v56 = vld [vmem:[%s6913_s23 + $0xe8] sm:$0xff] }
 0x1c7   : > { %1976 = vrot.lane.b32.xlu0 %v11530_v21, %s6798_s8  ;;  %6310 = vrot.lane.b32.xlu1 %v6309_v58, %s6799_s9  ;;  %v2731_v9 = vrot.slane %v7695_v48, 6  ;;  %v2730_v58 = vsel %vm11464_vm1, %v2729_v14, %v2728_v32  ;;  %v7719_v14 = vld [vmem:[%s6913_s23 + $0x68] sm:$0xff]  ;;  %v2781_v32 = vsel %vm2577_vm9, %v2780_v47, %v2779_v52  ;;  %v11536_v52 = vld [vmem:[#allocation12_spill] sm:$0xff] }
 0x1c8   : > { %6218 = vmatpush.lsf.msrb.mxu0 %v656_v4  ;;  %v769_v4 = vmul.f32 %v7606_v49, %v11527_v3  ;;  %v2733_v42 = vrot.slane %v7719_v14, 5  ;;  %v2684_v54 = vsel %vm11465_vm6, %v2683_v43, %v2682_v39  ;;  %v2783_v50 = vsel %vm2580_vm15, %v2782_v62, %v2781_v32  ;;  %v7741_v43 = vpop.permute.xlu1 %1964 }
 0x1c9   : > { %v2732_v8 = vsel %vm2586_vm3, %v2731_v9, %v2730_v58  ;;  %v2822_v47 = vrot.slane %v11536_v52, 2  ;;  %11537 = vst [vmem:[#allocation12_spill] sm:$0xff] %v7741_v43  ;;  %v651_v58 = vmul.f32 %v7603_v28, %v7013_v36  ;;  %v650_v43 = vmul.f32 %v7603_v28, %v6996_v31 }
 0x1ca   : > { %6219 = vmatpush.lsf.msrb.mxu0 %v655_v18  ;;  %v6324_v18 = vpack.i.bf16 %v769_v4, %v768_v0  ;;  %v2734_v39 = vsel %vm2589_vm4, %v2733_v42, %v2732_v8  ;;  %v774_v0 = vmul.f32 %v7606_v49, %v7168_v34  ;;  %v7760_v4 = vld [vmem:[%s6913_s23 + $0x18] sm:$0xff]  ;;  %v772_v8 = vmul.f32 %v7606_v49, %v7140_v12 }
 0x1cb   : > { %11539 = vst [vmem:[#allocation56_spill] sm:$0xff] %v7760_v4  ;;  %v2784_v42 = vsel %vm11464_vm1, %v7760_v4, %v2783_v50  ;;  %v2736_v32 = vsel %vm11466_vm5, %v2735_v16, %v2734_v39  ;;  %v2787_v50 = vrot.slane %v7776_v25, 6  ;;  %v2823_v16 = vsel %vm2577_vm9, %v2822_v47, %v2821_v44  ;;  %v7781_v63 = vpop.permute.xlu2 %1115  ;;  %v7843_v4 = vld [vmem:[%s6913_s23 + $0x98] sm:$0xff] }
 0x1cc   : > { %6220 = vmatpush.lsf.msrb.mxu0 %v654_v5  ;;  %v652_v5 = vmul.f32 %v7603_v28, %v7030_v41  ;;  %11542 = vst [vmem:[#allocation59_spill] sm:$0xff] %v7781_v63  ;;  %v648_v47 = vmul.f32 %v7603_v28, %v6960_v20  ;;  %v11552_v63 = vld [vmem:[#allocation13_spill] sm:$0xff]  ;;  %v2880_v37 = vrot.slane %v7843_v4, 1 }
 0x1cd   : > { %11556 = vst [vmem:[#allocation65_spill] sm:$0xff] %v7843_v4 }
 0x1ce   : > { %6330 = vrot.lane.b32.xlu2 %v6329_v35, %s6799_s9  ;;  %6221 = vmatpush.lsf.msrb.mxu0 %v653_v38  ;;  %v7746_v38 = vld [vmem:[%s6913_s23 + $0x78] sm:$0xff]  ;;  %v7750_v35 = vld [vmem:[%s6913_s23 + $0x20] sm:$0xff] }
 0x1cf   : > { %2703 = vrot.lane.b32.xlu0 %v2684_v54, %s6801_s14  ;;  %6325 = vrot.lane.b32.xlu1 %v6324_v18, %s6799_s9  ;;  %v2737_v62 = vrot.slane %v7746_v38, 3  ;;  %11538 = vst [vmem:[#allocation55_spill] sm:$0xff] %v7750_v35  ;;  %v2785_v9 = vrot.slane %v7750_v35, 7  ;;  %v775_v54 = vmul.f32 %v7606_v49, %v7182_v45  ;;  %v773_v18 = vmul.f32 %v7606_v49, %v7154_v23  ;;  %v7787_v35 = vld [vmem:[%s6913_s23 + $0x30] sm:$0xff] }
 0x1d0   : > { %6222 = vmatpush.lsf.msrb.mxu0 %v652_v5  ;;  %v7770_v5 = vld [vmem:[%s6913_s23 + $0xd0] sm:$0xff]  ;;  %11543 = vst [vmem:[#allocation60_spill] sm:$0xff] %v7787_v35  ;;  %v2789_v25 = vrot.slane %v7787_v35, 5 }
 0x1d1   : > { %11540 = vst [vmem:[#allocation57_spill] sm:$0xff] %v7770_v5  ;;  %v2824_v52 = vrot.slane %v7770_v5, 1  ;;  %v2786_v39 = vsel %vm2586_vm3, %v2785_v9, %v2784_v42  ;;  %v2738_v53 = vsel %vm11465_vm6, %v2737_v62, %v2736_v32  ;;  %v6339_v6 = vpack.i.bf16 %v775_v54, %v774_v0  ;;  %v7796_v62 = vld [vmem:[%s6913_s23 + $0x80] sm:$0xff]  ;;  %v7800_v0 = vld [vmem:[%s6913_s23 + $0x88] sm:$0xff] }
 0x1d2   : > { %6223 = vmatpush.lsf.msrb.mxu0 %v651_v58  ;;  %v649_v58 = vmul.f32 %v7603_v28, %v6979_v26  ;;  %v6334_v5 = vpack.i.bf16 %v773_v18, %v772_v8  ;;  %11544 = vst [vmem:[#allocation61_spill] sm:$0xff] %v7796_v62  ;;  %v2875_v9 = vrot.slane %v7796_v62, 4  ;;  %v2876_v54 = vrot.slane %v7800_v0, 3  ;;  %v7808_v42 = vld [vmem:[%s6913_s23 + $0xe0] sm:$0xff]  ;;  %v7812_v8 = vld [vmem:[%s6913_s23 + $0x38] sm:$0xff] }
 0x1d3   : > { %v2825_v44 = vsel %vm2580_vm15, %v2824_v52, %v2823_v16  ;;  %11545 = vst [vmem:[#allocation62_spill] sm:$0xff] %v7800_v0  ;;  %v2827_v32 = vrot.slane %v7808_v42, 7  ;;  %v2791_v18 = vrot.slane %v7812_v8, 4  ;;  %v11548_v52 = vld [vmem:[#allocation16_spill] sm:$0xff]  ;;  %v7832_v0 = vld [vmem:[%s6913_s23 + $0x90] sm:$0xff]  ;;  %v7851_v27 = vpop.permute.xlu2 %1970 }
 0x1d4   : > { %6224 = vmatpush.lsf.msrb.mxu0 %v650_v43  ;;  %v2788_v43 = vsel %vm2589_vm4, %v2787_v50, %v2786_v39  ;;  %11546 = vst [vmem:[#allocation63_spill] sm:$0xff] %v7808_v42  ;;  %v778_v50 = vmul.f32 %v7606_v49, %v11548_v52  ;;  %v11553_v42 = vld [vmem:[#allocation14_spill] sm:$0xff]  ;;  %v2878_v62 = vrot.slane %v7832_v0, 2 }
 0x1d5   : > { %11547 = vst [vmem:[#allocation64_spill] sm:$0xff] %v7812_v8  ;;  %v776_v8 = vmul.f32 %v7606_v49, %v11552_v63  ;;  %v777_v35 = vmul.f32 %v7606_v49, %v11553_v42 }
 0x1d6   : > { %6340 = vrot.lane.b32.xlu2 %v6339_v6, %s6799_s9  ;;  %6225 = vmatpush.lsf.msrb.mxu0 %v649_v58  ;;  %v647_v6 = vmul.f32 %v7603_v28, %v6947_v17  ;;  %v7824_v58 = vpop.permute.xlu1 %1113  ;;  %11554 = vst [vmem:[#allocation13_spill] sm:$0xff] %v7832_v0  ;;  %v7847_v0 = vld [vmem:[%s6913_s23 + $0xf0] sm:$0xff] }
 0x1d7   : > { %2769 = vrot.lane.b32.xlu0 %v2738_v53, %s6802_s15  ;;  %6335 = vrot.lane.b32.xlu1 %v6334_v5, %s6799_s9  ;;  %v11549_v53 = vld [vmem:[#allocation18_spill] sm:$0xff]  ;;  %v7820_v5 = vld [vmem:[%s6913_s23 + $0xd8] sm:$0xff]  ;;  %11555 = vst [vmem:[#allocation14_spill] sm:$0xff] %v7836_v56  ;;  %v6344_v61 = vpack.i.bf16 %v777_v35, %v776_v8  ;;  %v782_v8 = vmul.f32 %v7606_v49, %v11530_v21 }
 0x1d8   : > { %6226 = vmatpush.lsf.msrb.mxu0 %v648_v47  ;;  %v779_v16 = vmul.f32 %v7606_v49, %v11549_v53  ;;  %11550 = vst [vmem:[#allocation16_spill] sm:$0xff] %v7820_v5  ;;  %v2826_v39 = vsel %vm11464_vm1, %v7820_v5, %v2825_v44  ;;  %v2790_v47 = vsel %vm11466_vm5, %v2789_v25, %v2788_v43  ;;  %v2829_v44 = vrot.slane %v7836_v56, 6  ;;  %v7860_v35 = vld [vmem:[%s6913_s23 + $0xf8] sm:$0xff] }
 0x1d9   : > { %11551 = vst [vmem:[#allocation18_spill] sm:$0xff] %v7824_v58  ;;  %v2877_v58 = vsel %vm2577_vm9, %v2876_v54, %v2875_v9  ;;  %v2828_v25 = vsel %vm2586_vm3, %v2827_v32, %v2826_v39  ;;  %v2792_v43 = vsel %vm11465_vm6, %v2791_v18, %v2790_v47  ;;  %v2929_v54 = vrot.slane %v7636_v59, 5  ;;  %v11560_v18 = vld [vmem:[#allocation29_spill] sm:$0xff]  ;;  %v11562_v47 = vld [vmem:[#allocation24_spill] sm:$0xff] }
 0x1da   : > { %6227 = vmatpush.lsf.msrb.mxu0 %v647_v6  ;;  %v6349_v5 = vpack.i.bf16 %v779_v16, %v778_v50  ;;  %11557 = vst [vmem:[#allocation66_spill] sm:$0xff] %v7847_v0  ;;  %v2831_v6 = vrot.slane %v7847_v0, 5  ;;  %v2879_v56 = vsel %vm2580_vm15, %v2878_v62, %v2877_v58  ;;  %v2830_v9 = vsel %vm2589_vm4, %v2829_v44, %v2828_v25  ;;  %v11561_v39 = vld [vmem:[#allocation21_spill] sm:$0xff]  ;;  %v7875_v25 = vld [vmem:[%s6913_s23 + $0xa8] sm:$0xff] }
 0x1db   : > { %6228 = vllmr.1.mxu0  ;;  %11558 = vst [vmem:[#allocation67_spill] sm:$0xff] %v7851_v27  ;;  %v2930_v32 = vrot.slane %v7640_v19, 4  ;;  %v2833_v62 = vrot.slane %v7860_v35, 4  ;;  %v783_v50 = vmul.f32 %v7606_v49, %v11560_v18  ;;  %v2881_v16 = vsel %vm11464_vm1, %v2880_v37, %v2879_v56  ;;  %v7882_v37 = vld [vmem:[%s6913_s23 + $0xa0] sm:$0xff]  ;;  %v7889_v19 = vld [vmem:[%s6913_s23 + $0xb0] sm:$0xff] }
 0x1dc   : > { %11559 = vst [vmem:[#allocation68_spill] sm:$0xff] %v7860_v35  ;;  %v780_v58 = vmul.f32 %v7606_v49, %v11561_v39  ;;  %v2932_v44 = vrot.slane %v7674_v55, 3  ;;  %v2882_v56 = vsel %vm2586_vm3, %v7882_v37, %v2881_v16  ;;  %v2934_v0 = vrot.slane %v7667_v22, 2 }
 0x1dd   : > { %11563 = vst [vmem:[#allocation29_spill] sm:$0xff] %v7875_v25  ;;  %v2931_v27 = vsel %vm2577_vm9, %v2930_v32, %v2929_v54 }
 0x1de   : > { %6350 = vrot.lane.b32.xlu2 %v6349_v5, %s6799_s9  ;;  %v2832_v5 = vsel %vm11466_vm5, %v2831_v6, %v2830_v9  ;;  %v7879_v35 = vpop.permute.xlu1 %1968  ;;  %v6359_v9 = vpack.i.bf16 %v783_v50, %v782_v8  ;;  %v2933_v54 = vsel %vm2580_vm15, %v2932_v44, %v2931_v27  ;;  %v7898_v8 = vpop.permute.xlu2 %1119  ;;  %v7901_v50 = vld [vmem:[%s6913_s23 + $0xb8] sm:$0xff]  ;;  %v787_v27 = vmul.f32 %v7606_v49, %v7438_v57 }
 0x1df   : > { %2835 = vrot.lane.b32.xlu0 %v2792_v43, %s6803_s16  ;;  %6345 = vrot.lane.b32.xlu1 %v6344_v61, %s6799_s9  ;;  %v781_v61 = vmul.f32 %v7606_v49, %v11562_v47  ;;  %v2883_v43 = vrot.slane %v7875_v25, 7  ;;  %11564 = vst [vmem:[#allocation21_spill] sm:$0xff] %v7879_v35  ;;  %v2834_v6 = vsel %vm11465_vm6, %v2833_v62, %v2832_v5  ;;  %v2885_v25 = vrot.slane %v7889_v19, 6 }
 0x1e0   : > { %v2936_v62 = vrot.slane %v7695_v48, 1  ;;  %11565 = vst [vmem:[#allocation24_spill] sm:$0xff] %v7898_v8  ;;  %v2887_v16 = vrot.slane %v7901_v50, 5  ;;  %v786_v5 = vmul.f32 %v7606_v49, %v7402_v33  ;;  %v785_v44 = vmul.f32 %v7606_v49, %v7364_v15 }
 0x1e1   : > { %v6354_v4 = vpack.i.bf16 %v781_v61, %v780_v58  ;;  %v2884_v32 = vsel %vm2589_vm4, %v2883_v43, %v2882_v56  ;;  %v2935_v58 = vsel %vm11464_vm1, %v2934_v0, %v2933_v54  ;;  %v2939_v8 = vrot.slane %v7728_v60, 7 }
 0x1e2   : > { %v2886_v61 = vsel %vm11466_vm5, %v2885_v25, %v2884_v32  ;;  %v2937_v43 = vsel %vm2586_vm3, %v2936_v62, %v2935_v58  ;;  %v2941_v54 = vrot.slane %v7746_v38, 6  ;;  %v790_v32 = vmul.f32 %v7606_v49, %v7547_v40 }
 0x1e3   : > { %v2888_v56 = vsel %vm11465_vm6, %v2887_v16, %v2886_v61  ;;  %v2938_v0 = vsel %vm2589_vm4, %v7719_v14, %v2937_v43  ;;  %v791_v62 = vmul.f32 %v7606_v49, %v7576_v30  ;;  %v1501_v61 = vrot.slane %v7586_v29, 4 }
 0x1e4   : > { %v2940_v16 = vsel %vm11466_vm5, %v2939_v8, %v2938_v0  ;;  %v1406_v43 = vmul.f32 %v7612_v1, %v6960_v20  ;;  %v1408_v0 = vmul.f32 %v7612_v1, %v6996_v31 }
 0x1e5   : > { %v6379_v58 = vpack.i.bf16 %v791_v62, %v790_v32 }
 0x1e6   : > { %6360 = vrot.lane.b32.xlu2 %v6359_v9, %s6799_s9  ;;  %v7916_v9 = vpop.permute.xlu1 %1117  ;;  %v7924_v25 = vpop.permute.xlu2 %1123 }
 0x1e7   : > { %2841 = vrot.lane.b32.xlu0 %v2834_v6, %s6803_s16  ;;  %6355 = vrot.lane.b32.xlu1 %v6354_v4, %s6799_s9  ;;  %v784_v4 = vmul.f32 %v7606_v49, %v7326_v24  ;;  %v6369_v6 = vpack.i.bf16 %v787_v27, %v786_v5  ;;  %11566 = vst [vmem:[#allocation69_spill] sm:$0xff] %v7916_v9 }
 0x1e8   : > { %11567 = vst [vmem:[#allocation70_spill] sm:$0xff] %v7924_v25  ;;  %v788_v5 = vmul.f32 %v7606_v49, %v7476_v10  ;;  %v789_v27 = vmul.f32 %v7606_v49, %v7512_v11  ;;  %v1405_v49 = vmul.f32 %v7612_v1, %v6947_v17 }
 0x1e9   : > { %v6364_v35 = vpack.i.bf16 %v785_v44, %v784_v4 }
 0x1ea   : > { %v6374_v4 = vpack.i.bf16 %v789_v27, %v788_v5  ;;  %v1409_v5 = vmul.f32 %v7612_v1, %v7013_v36 }
 0x1ee   : > { %6370 = vrot.lane.b32.xlu2 %v6369_v6, %s6799_s9  ;;  %v7939_v44 = vpop.permute.xlu1 %1972  ;;  %v7943_v8 = vpop.permute.xlu2 %1127  ;;  %v1407_v6 = vmul.f32 %v7612_v1, %v6979_v26 }
 0x1ef   : > { %2907 = vrot.lane.b32.xlu0 %v2888_v56, %s11468_s17  ;;  %6365 = vrot.lane.b32.xlu1 %v6364_v35, %s6799_s9  ;;  %v2942_v35 = vsel %vm11465_vm6, %v2941_v54, %v2940_v16  ;;  %11568 = vst [vmem:[#allocation71_spill] sm:$0xff] %v7939_v44  ;;  %v1502_v56 = vadd.f32 %v1501_v61, %v7586_v29 }
 0x1f0   : > { %11569 = vst [vmem:[#allocation72_spill] sm:$0xff] %v7943_v8  ;;  %v6384_v54 = vpack.i.bf16 %v1406_v43, %v1405_v49  ;;  %v6389_v62 = vpack.i.bf16 %v1408_v0, %v1407_v6  ;;  %v1410_v29 = vmul.f32 %v7612_v1, %v7030_v41  ;;  %v1412_v61 = vmul.f32 %v7612_v1, %v7064_v51 }
 0x1f1   : > { %v1503_v32 = vrot.slane %v1502_v56, 2  ;;  %v1414_v0 = vmul.f32 %v7612_v1, %v11527_v3  ;;  %v1421_v44 = vmul.f32 %v7612_v1, %v11552_v63 }
 0x1f3   : > { %v1504_v27 = vadd.f32 %v1503_v32, %v1502_v56  ;;  %v1413_v56 = vmul.f32 %v7612_v1, %v11532_v13 }
 0x1f5   : > { %v1505_v49 = vrot.slane %v1504_v27, 1 }
 0x1f6   : > { %6380 = vrot.lane.b32.xlu2 %v6379_v58, %s6799_s9  ;;  %v7956_v16 = vpop.permute.xlu2 %1131  ;;  %v1411_v58 = vmul.f32 %v7612_v1, %v7047_v46 }
 0x1f7   : > { %2973 = vrot.lane.b32.xlu0 %v2942_v35, %s6805_s18  ;;  %6375 = vrot.lane.b32.xlu1 %v6374_v4, %s6799_s9  ;;  %11570 = vst [vmem:[#allocation73_spill] sm:$0xff] %v7956_v16  ;;  %v7962_v35 = vpop.permute.xlu1 %1121  ;;  %v6394_v4 = vpack.i.bf16 %v1410_v29, %v1409_v5  ;;  %v1416_v5 = vmul.f32 %v7612_v1, %v7126_v7 }
 0x1f8   : > { %11571 = vst [vmem:[#allocation74_spill] sm:$0xff] %v7962_v35  ;;  %v6399_v43 = vpack.i.bf16 %v1412_v61, %v1411_v58  ;;  %v6404_v29 = vpack.i.bf16 %v1414_v0, %v1413_v56  ;;  %v1419_v56 = vmul.f32 %v7612_v1, %v7168_v34  ;;  %v1420_v0 = vmul.f32 %v7612_v1, %v7182_v45 }
 0x1f9   : > { %v664_v16 = vmul.f32 %v7603_v28, %v11553_v42 }
 0x1fe   : > { %6385 = vrot.lane.b32.xlu2 %v6384_v54, %s6800_s13  ;;  %v7970_v6 = vpop.permute.xlu2 %1135  ;;  %v1506_v54 = vadd.f32 %v1505_v49, %v1504_v27  ;;  %v1417_v27 = vmul.f32 %v7612_v1, %v7140_v12  ;;  %v1418_v49 = vmul.f32 %v7612_v1, %v7154_v23 }
 0x1ff   : > { %6390 = vrot.lane.b32.xlu1 %v6389_v62, %s6800_s13  ;;  %11572 = vst [vmem:[#allocation75_spill] sm:$0xff] %v7970_v6  ;;  %v7976_v32 = vpop.permute.xlu1 %1125  ;;  %v1415_v62 = vmul.f32 %v7612_v1, %v7112_v2 }
 0x200   : > { %11573 = vst [vmem:[#allocation76_spill] sm:$0xff] %v7976_v32  ;;  %v1507_v58 = vmax.f32 %v1506_v54, 1e-24  ;;  %v6414_v54 = vpack.i.bf16 %v1418_v49, %v1417_v27  ;;  %v1423_v27 = vmul.f32 %v7612_v1, %v11548_v52  ;;  %v1424_v49 = vmul.f32 %v7612_v1, %v11549_v53 }
 0x201   : > { %v6409_v61 = vpack.i.bf16 %v1416_v5, %v1415_v62  ;;  %v6419_v62 = vpack.i.bf16 %v1420_v0, %v1419_v56 }
 0x202   : > { %6588 = vrsqrt.f32 %v1507_v58  ;;  %vm1514_vm8 = vweird.f32 %v1507_v58 }
 0x206   : > { %6395 = vrot.lane.b32.xlu2 %v6394_v4, %s6800_s13  ;;  %v7984_v4 = vpop.permute.xlu2 %1139 }
 0x207   : > { %6400 = vrot.lane.b32.xlu1 %v6399_v43, %s6800_s13  ;;  %11574 = vst [vmem:[#allocation77_spill] sm:$0xff] %v7984_v4  ;;  %v7990_v43 = vpop.permute.xlu1 %1129  ;;  %v1422_v4 = vmul.f32 %v7612_v1, %v11553_v42 }
 0x208   : > { %11575 = vst [vmem:[#allocation78_spill] sm:$0xff] %v7990_v43  ;;  %v6589_v5 = vpop.eup %6588 }
 0x209   : > { %v1509_v56 = vmul.f32 %v6589_v5, %v1507_v58  ;;  %v6424_v0 = vpack.i.bf16 %v1422_v4, %v1421_v44  ;;  %v1427_v44 = vmul.f32 %v7612_v1, %v11530_v21  ;;  %v1428_v4 = vmul.f32 %v7612_v1, %v11560_v18 }
 0x20a   : > { %vm1515_vm7 = vweird.f32 %v6589_v5 }
 0x20b   : > { %vm1516_vm10 = vmor %vm1514_vm8, %vm1515_vm7  ;;  %vm11474_vm7 = vcmask 261120   ;;  %vm11473_vm8 = vcmask 326656  }
 0x20e   : > { %6405 = vrot.lane.b32.xlu2 %v6404_v29, %s6800_s13  ;;  %v663_v29 = vmul.f32 %v7603_v28, %v11552_v63 }
 0x20f   : > { %6410 = vrot.lane.b32.xlu1 %v6409_v61, %s6800_s13  ;;  %v8006_v6 = vpop.permute.xlu1 %1133 }
 0x210   : > { %11576 = vst [vmem:[#allocation79_spill] sm:$0xff] %v8006_v6  ;;  %v1426_v6 = vmul.f32 %v7612_v1, %v11562_v47 }
 0x216   : > { %6415 = vrot.lane.b32.xlu2 %v6414_v54, %s6800_s13  ;;  %v6429_v54 = vpack.i.bf16 %v1424_v49, %v1423_v27 }
 0x217   : > { %6420 = vrot.lane.b32.xlu1 %v6419_v62, %s6800_s13  ;;  %v1510_v62 = vmul.f32 %v6589_v5, %v1509_v56  ;;  %v8022_v8 = vpop.permute.xlu1 %1137  ;;  %v6439_v56 = vpack.i.bf16 %v1428_v4, %v1427_v44 }
 0x218   : > { %v8000_v61 = vpop.permute.xlu2 %6315  ;;  %11577 = vst [vmem:[#allocation80_spill] sm:$0xff] %v8022_v8  ;;  %v1430_v8 = vmul.f32 %v7612_v1, %v7364_v15 }
 0x219   : > { %824 = vxpose.xlu0.b32.start [1/16] (narrow) %v663_v29, 8  ;;  %v1425_v29 = vmul.f32 %v7612_v1, %v11561_v39  ;;  %v1511_v27 = vmul.f32 0.5, %v1510_v62  ;;  %v1434_v62 = vmul.f32 %v7612_v1, %v7512_v11 }
 0x21b   : > { %v6434_v49 = vpack.i.bf16 %v1426_v6, %v1425_v29  ;;  %v1433_v6 = vmul.f32 %v7612_v1, %v7476_v10 }
 0x21d   : > { %v6454_v4 = vpack.i.bf16 %v1434_v62, %v1433_v6 }
 0x21e   : > { %6425 = vrot.lane.b32.xlu2 %v6424_v0, %s6800_s13  ;;  %v1512_v0 = vsub.f32 1.5, %v1511_v27 }
 0x21f   : > { %6430 = vrot.lane.b32.xlu1 %v6429_v54, %s6800_s13  ;;  %v665_v54 = vmul.f32 %v7603_v28, %v11548_v52  ;;  %v8038_v25 = vpop.permute.xlu1 %1141 }
 0x220   : > { %v8016_v43 = vpop.permute.xlu2 %6320  ;;  %11578 = vst [vmem:[#allocation81_spill] sm:$0xff] %v8038_v25  ;;  %v1513_v29 = vmul.f32 %v6589_v5, %v1512_v0  ;;  %v1436_v0 = vmul.f32 %v7612_v1, %v7576_v30  ;;  %v11604_v25 = vld [vmem:[#allocation13_spill] sm:$0xff] }
 0x221   : > { %825 = vxpose.xlu0.b32.cont [2/16] (narrow) %v664_v16, 8  ;;  %v1429_v16 = vmul.f32 %v7612_v1, %v7326_v24 }
 0x222   : > { %v8044_v27 = vsel %vm1516_vm10, %v6589_v5, %v1513_v29  ;;  %vm11472_vm10 = vcmask 392192  }
 0x223   : > { %v6444_v44 = vpack.i.bf16 %v1430_v8, %v1429_v16  ;;  %v1518_v5 = vmul.f32 %v8044_v27, %v6947_v17  ;;  %v1519_v16 = vmul.f32 %v8044_v27, %v6960_v20  ;;  %v1520_v17 = vmul.f32 %v8044_v27, %v6979_v26 }
 0x224   : > { %v1521_v20 = vmul.f32 %v8044_v27, %v6996_v31  ;;  %v668_v26 = vmul.f32 %v7603_v28, %v11562_v47  ;;  %v1524_v31 = vmul.f32 %v8044_v27, %v7047_v46  ;;  %v669_v46 = vmul.f32 %v7603_v28, %v11530_v21 }
 0x225   : > { %v6464_v29 = vpack.i.bf16 %v1519_v16, %v1518_v5  ;;  %v1527_v16 = vmul.f32 %v8044_v27, %v11527_v3  ;;  %v1530_v3 = vmul.f32 %v8044_v27, %v7140_v12 }
 0x226   : > { %6435 = vrot.lane.b32.xlu2 %v6434_v49, %s6800_s13  ;;  %v666_v49 = vmul.f32 %v7603_v28, %v11549_v53 }
 0x227   : > { %6440 = vrot.lane.b32.xlu1 %v6439_v56, %s6800_s13 }
 0x228   : > { %v8032_v32 = vpop.permute.xlu2 %6330 }
 0x229   : > { %826 = vxpose.xlu0.b32.cont [3/16] (narrow) %v665_v54, 8  ;;  %v1435_v54 = vmul.f32 %v7612_v1, %v7547_v40  ;;  %v667_v1 = vmul.f32 %v7603_v28, %v11561_v39 }
 0x22b   : > { %v6459_v62 = vpack.i.bf16 %v1436_v0, %v1435_v54  ;;  %v6469_v54 = vpack.i.bf16 %v1521_v20, %v1520_v17  ;;  %v1531_v17 = vmul.f32 %v8044_v27, %v7154_v23  ;;  %v1532_v23 = vmul.f32 %v8044_v27, %v7168_v34 }
 0x22e   : > { %6445 = vrot.lane.b32.xlu2 %v6444_v44, %s6800_s13 }
 0x22f   : > { %6455 = vrot.lane.b32.xlu1 %v6454_v4, %s6800_s13 }
 0x230   : > { %v6341_v56 = vpop.permute.xlu2 %6340 }
 0x231   : > { %v6343_v58 = vunpack.i.h.bf16 %v6341_v56  ;;  %v8054_v8 = vpop.permute.xlu1 %6305  ;;  %827 = vxpose.xlu0.b32.cont [4/16] (narrow) %v666_v49, 8  ;;  %v6342_v6 = vunpack.i.l.bf16 %v6341_v56  ;;  %v1522_v49 = vmul.f32 %v8044_v27, %v7013_v36  ;;  %v1523_v56 = vmul.f32 %v8044_v27, %v7030_v41 }
 0x232   : > { %v1525_v36 = vmul.f32 %v8044_v27, %v7064_v51  ;;  %v1526_v41 = vmul.f32 %v8044_v27, %v11532_v13  ;;  %v1528_v51 = vmul.f32 %v8044_v27, %v7112_v2  ;;  %v1529_v13 = vmul.f32 %v8044_v27, %v7126_v7 }
 0x233   : > { %984 = vmatpush.msra.mxu0 %v6343_v58  ;;  %v6474_v0 = vpack.i.bf16 %v1523_v56, %v1522_v49  ;;  %v670_v2 = vmul.f32 %v7603_v28, %v11560_v18  ;;  %v6332_v7 = vunpack.i.l.bf16 %v8032_v32 }
 0x234   : > { %v6489_v56 = vpack.i.bf16 %v1529_v13, %v1528_v51  ;;  %v1537_v13 = vmul.f32 %v8044_v27, %v11549_v53  ;;  %v672_v53 = vmul.f32 %v7603_v28, %v7364_v15 }
 0x235   : > { %985 = vmatpush.msra.mxu0 %v6342_v6  ;;  %v6479_v6 = vpack.i.bf16 %v1525_v36, %v1524_v31 }
 0x236   : > { %6460 = vrot.lane.b32.xlu2 %v6459_v62, %s6800_s13  ;;  %v6484_v62 = vpack.i.bf16 %v1527_v16, %v1526_v41  ;;  %v1534_v41 = vmul.f32 %v8044_v27, %v11552_v63  ;;  %v1535_v16 = vmul.f32 %v8044_v27, %v11553_v42  ;;  %v671_v63 = vmul.f32 %v7603_v28, %v7326_v24 }
 0x237   : > { %6465 = vrot.lane.b32.xlu1 %v6464_v29, %s6806_s19  ;;  %v6322_v42 = vunpack.i.l.bf16 %v8016_v43 }
 0x238   : > { %v8064_v44 = vpop.permute.xlu2 %6350 }
 0x239   : > { %v8070_v4 = vpop.permute.xlu1 %6310  ;;  %828 = vxpose.xlu0.b32.cont [5/16] (narrow) %v667_v1, 8 }
 0x23e   : > { %6470 = vrot.lane.b32.xlu2 %v6469_v54, %s6806_s19  ;;  %v6494_v54 = vpack.i.bf16 %v1531_v17, %v1530_v3  ;;  %v1538_v3 = vmul.f32 %v8044_v27, %v11561_v39  ;;  %v1539_v17 = vmul.f32 %v8044_v27, %v11562_v47  ;;  %v6312_v39 = vunpack.i.l.bf16 %v8070_v4 }
 0x23f   : > { %6475 = vrot.lane.b32.xlu1 %v6474_v0, %s6806_s19  ;;  %v6333_v0 = vunpack.i.h.bf16 %v8032_v32 }
 0x240   : > { %v8080_v58 = vpop.permute.xlu2 %6360 }
 0x241   : > { %v6326_v5 = vpop.permute.xlu1 %6325  ;;  %829 = vxpose.xlu0.b32.cont [6/16] (narrow) %v668_v26, 8  ;;  %v1533_v26 = vmul.f32 %v8044_v27, %v7182_v45  ;;  %v6323_v45 = vunpack.i.h.bf16 %v8016_v43  ;;  %v6318_v43 = vunpack.i.h.bf16 %v8000_v61 }
 0x243   : > { %v6499_v34 = vpack.i.bf16 %v1533_v26, %v1532_v23  ;;  %v6308_v23 = vunpack.i.h.bf16 %v8054_v8 }
 0x246   : > { %6480 = vrot.lane.b32.xlu2 %v6479_v6, %s6806_s19  ;;  %v6328_v6 = vunpack.i.h.bf16 %v6326_v5 }
 0x247   : > { %6485 = vrot.lane.b32.xlu1 %v6484_v62, %s6806_s19  ;;  %v6327_v62 = vunpack.i.l.bf16 %v6326_v5  ;;  %v1536_v5 = vmul.f32 %v8044_v27, %v11548_v52  ;;  %v6514_v52 = vpack.i.bf16 %v1539_v17, %v1538_v3  ;;  %v674_v3 = vmul.f32 %v7603_v28, %v7438_v57 }
 0x248   : > { %v8094_v29 = vpop.permute.xlu2 %6370 }
 0x249   : > { %v6336_v1 = vpop.permute.xlu1 %6335  ;;  %830 = vxpose.xlu0.b32.cont [7/16] (narrow) %v669_v46, 8  ;;  %v6504_v46 = vpack.i.bf16 %v1535_v16, %v1534_v41  ;;  %v673_v41 = vmul.f32 %v7603_v28, %v7402_v33 }
 0x24a   : > { %v6338_v20 = vunpack.i.h.bf16 %v6336_v1  ;;  %v6337_v49 = vunpack.i.l.bf16 %v6336_v1 }
 0x24c   : > { %986 = vmatpush.msra.mxu0 %v6338_v20  ;;  %v6317_v20 = vunpack.i.l.bf16 %v8000_v61  ;;  %v1540_v61 = vmul.f32 %v8044_v27, %v11530_v21  ;;  %v8159_v21 = vpop.permute.xlu0 %1111 }
 0x24d   : > { %11579 = vst [vmem:[#allocation82_spill] sm:$0xff] %v8159_v21  ;;  %v8407_v21 = vld [vmem:[%s6913_s23 + $0x70] sm:$0xff] }
 0x24e   : > { %987 = vmatpush.msra.mxu0 %v6337_v49  ;;  %6490 = vrot.lane.b32.xlu2 %v6489_v56, %s6806_s19  ;;  %v6509_v49 = vpack.i.bf16 %v1537_v13, %v1536_v5  ;;  %v6313_v56 = vunpack.i.h.bf16 %v8070_v4  ;;  %v6307_v4 = vunpack.i.l.bf16 %v8054_v8  ;;  %v1545_v8 = vmul.f32 %v8044_v27, %v7438_v57 }
 0x24f   : > { %6495 = vrot.lane.b32.xlu1 %v6494_v54, %s6806_s19  ;;  %v6373_v5 = vunpack.i.h.bf16 %v8094_v29 }
 0x250   : > { %988 = vmatpush.msra.mxu0 %v6333_v0  ;;  %v6381_v12 = vpop.permute.xlu2 %6380  ;;  %v1541_v0 = vmul.f32 %v8044_v27, %v11560_v18 }
 0x251   : > { %v8114_v31 = vpop.permute.xlu1 %6345  ;;  %831 = vxpose.xlu0.b32.cont [8/16] (narrow) %v670_v2, 8  ;;  %v6383_v36 = vunpack.i.h.bf16 %v6381_v12  ;;  %v6382_v32 = vunpack.i.l.bf16 %v6381_v12  ;;  %v1543_v12 = vmul.f32 %v8044_v27, %v7364_v15 }
 0x252   : > { %989 = vmatpush.msra.mxu0 %v6332_v7  ;;  %v1542_v7 = vmul.f32 %v8044_v27, %v7326_v24  ;;  %v6519_v26 = vpack.i.bf16 %v1541_v0, %v1540_v61  ;;  %v6363_v61 = vunpack.i.h.bf16 %v8080_v58  ;;  %v6362_v0 = vunpack.i.l.bf16 %v8080_v58 }
 0x253   : > { %1004 = vmatpush.msra.mxu3 %v6383_v36  ;;  %v676_v58 = vmul.f32 %v7603_v28, %v7512_v11 }
 0x254   : > { %990 = vmatpush.msra.mxu0 %v6328_v6  ;;  %v6524_v36 = vpack.i.bf16 %v1543_v12, %v1542_v7  ;;  %v1544_v6 = vmul.f32 %v8044_v27, %v7402_v33  ;;  %v8176_v13 = vpop.permute.xlu0 %6450 }
 0x255   : > { %1005 = vmatpush.msra.mxu3 %v6382_v32 }
 0x256   : > { %991 = vmatpush.msra.mxu0 %v6327_v62  ;;  %6500 = vrot.lane.b32.xlu2 %v6499_v34, %s6806_s19  ;;  %v1546_v62 = vmul.f32 %v8044_v27, %v7476_v10  ;;  %v1547_v34 = vmul.f32 %v8044_v27, %v7512_v11 }
 0x257   : > { %6505 = vrot.lane.b32.xlu1 %v6504_v46, %s6806_s19 }
 0x258   : > { %992 = vmatpush.msra.mxu0 %v6323_v45  ;;  %v8126_v51 = vpop.permute.xlu2 %6385 }
 0x259   : > { %v8132_v1 = vpop.permute.xlu1 %6355  ;;  %832 = vxpose.xlu0.b32.cont [9/16] (narrow) %v671_v63, 8  ;;  %v6529_v63 = vpack.i.bf16 %v1545_v8, %v1544_v6 }
 0x25a   : > { %993 = vmatpush.msra.mxu0 %v6322_v42  ;;  %v6534_v42 = vpack.i.bf16 %v1547_v34, %v1546_v62  ;;  %v6358_v12 = vunpack.i.h.bf16 %v8132_v1  ;;  %v11584_v62 = vld [vmem:[#allocation26_spill] sm:$0xff] }
 0x25b   : > { %v2645_v34 = vrot.slane %v11584_v62, 7 }
 0x25c   : > { %994 = vmatpush.msra.mxu0 %v6318_v43  ;;  %v6372_v43 = vunpack.i.l.bf16 %v8094_v29  ;;  %v675_v29 = vmul.f32 %v7603_v28, %v7476_v10  ;;  %v8199_v7 = vpop.permute.xlu0 %1976 }
 0x25d   : > { %11580 = vst [vmem:[#allocation83_spill] sm:$0xff] %v8199_v7 }
 0x25e   : > { %995 = vmatpush.msra.mxu0 %v6317_v20  ;;  %6510 = vrot.lane.b32.xlu2 %v6509_v49, %s6806_s19  ;;  %v1548_v20 = vmul.f32 %v8044_v27, %v7547_v40  ;;  %v1549_v49 = vmul.f32 %v8044_v27, %v7576_v30 }
 0x25f   : > { %6515 = vrot.lane.b32.xlu1 %v6514_v52, %s6806_s19 }
 0x260   : > { %996 = vmatpush.msra.mxu0 %v6313_v56  ;;  %v8146_v54 = vpop.permute.xlu2 %6395 }
 0x261   : > { %v6366_v2 = vpop.permute.xlu1 %6365  ;;  %833 = vxpose.xlu0.b32.cont [10/16] (narrow) %v672_v53, 8 }
 0x262   : > { %997 = vmatpush.msra.mxu0 %v6312_v39  ;;  %v6368_v56 = vunpack.i.h.bf16 %v6366_v2  ;;  %v6367_v53 = vunpack.i.l.bf16 %v6366_v2  ;;  %v6539_v39 = vpack.i.bf16 %v1549_v49, %v1548_v20  ;;  %v11589_v20 = vld [vmem:[#allocation55_spill] sm:$0xff] }
 0x263   : > { %v2649_v49 = vrot.slane %v11589_v20, 5 }
 0x264   : > { %998 = vmatpush.msra.mxu0 %v6308_v23  ;;  %v6357_v23 = vunpack.i.l.bf16 %v8132_v1  ;;  %v6348_v1 = vunpack.i.h.bf16 %v8114_v31 }
 0x266   : > { %999 = vmatpush.msra.mxu0 %v6307_v4  ;;  %6520 = vrot.lane.b32.xlu2 %v6519_v26, %s6806_s19  ;;  %v6352_v26 = vunpack.i.l.bf16 %v8064_v44 }
 0x267   : > { %6525 = vrot.lane.b32.xlu1 %v6524_v36, %s6806_s19  ;;  %6229 = vmatmul.lmr.bf16.vlgmr.msra.gmra.1.mxu0 }
 0x268   : > { %v8164_v16 = vpop.permute.xlu2 %6405 }
 0x269   : > { %v6376_v32 = vpop.permute.xlu1 %6375  ;;  %834 = vxpose.xlu0.b32.cont [11/16] (narrow) %v673_v41, 8  ;;  %v6347_v41 = vunpack.i.l.bf16 %v8114_v31  ;;  %v11585_v31 = vld [vmem:[#allocation54_spill] sm:$0xff] }
 0x26a   : > { %v6378_v46 = vunpack.i.h.bf16 %v6376_v32  ;;  %v6377_v45 = vunpack.i.l.bf16 %v6376_v32 }
 0x26c   : > { %1006 = vmatpush.msra.mxu3 %v6378_v46 }
 0x26e   : > { %1007 = vmatpush.msra.mxu3 %v6377_v45  ;;  %6530 = vrot.lane.b32.xlu2 %v6529_v63, %s6806_s19  ;;  %v11586_v45 = vld [vmem:[#allocation56_spill] sm:$0xff] }
 0x26f   : > { %6535 = vrot.lane.b32.xlu1 %v6534_v42, %s6806_s19  ;;  %v2647_v63 = vrot.slane %v11586_v45, 6 }
 0x270   : > { %1008 = vmatpush.msra.mxu3 %v6373_v5  ;;  %v8181_v17 = vpop.permute.xlu2 %6415  ;;  %v11588_v5 = vld [vmem:[#allocation10_spill] sm:$0xff] }
 0x271   : > { %v8188_v52 = vpop.permute.xlu1 %6390  ;;  %835 = vxpose.xlu0.b32.cont [12/16] (narrow) %v674_v3, 8  ;;  %v2685_v3 = vrot.slane %v11588_v5, 1 }
 0x272   : > { %1009 = vmatpush.msra.mxu3 %v6372_v43  ;;  %v2659_v43 = vrot.slane %v7674_v55, 7  ;;  %v2661_v55 = vrot.slane %v7667_v22, 6  ;;  %v6387_v22 = vunpack.i.l.bf16 %v8126_v51 }
 0x274   : > { %1010 = vmatpush.msra.mxu3 %v6368_v56  ;;  %v11590_v56 = vld [vmem:[#allocation51_spill] sm:$0xff] }
 0x276   : > { %1011 = vmatpush.msra.mxu3 %v6367_v53  ;;  %6540 = vrot.lane.b32.xlu2 %v6539_v39, %s6806_s19  ;;  %s6133_s19 = sld [smem:[#allocation3 + $0x1]] }
 0x277   : > { %1978 = vrot.lane.b32.xlu1 %v11560_v18, %s6798_s8  ;;  %v6353_v18 = vunpack.i.h.bf16 %v8064_v44  ;;  %v677_v44 = vmul.f32 %v7603_v28, %v7547_v40 }
 0x278   : > { %1012 = vmatpush.msra.mxu3 %v6363_v61  ;;  %v8196_v27 = vpop.permute.xlu2 %6425 }
 0x279   : > { %v8201_v2 = vpop.permute.xlu1 %6400  ;;  %836 = vxpose.xlu0.b32.cont [13/16] (narrow) %v675_v29, 8  ;;  %v11592_v29 = vld [vmem:[#allocation57_spill] sm:$0xff] }
 0x27a   : > { %1013 = vmatpush.msra.mxu3 %v6362_v0  ;;  %v2687_v0 = vrot.slane %v11592_v29, 7 }
 0x27c   : > { %1014 = vmatpush.msra.mxu3 %v6358_v12  ;;  %v6427_v12 = vunpack.i.l.bf16 %v8196_v27 }
 0x27e   : > { %1015 = vmatpush.msra.mxu3 %v6357_v23  ;;  %1974 = vrot.lane.b32.xlu2 %v11562_v47, %s6798_s8  ;;  %v8218_v47 = vpop.permute.xlu0 %2703  ;;  %v11594_v23 = vld [vmem:[#allocation58_spill] sm:$0xff] }
 0x27f   : > { %1982 = vrot.lane.b32.xlu1 %v7364_v15, %s6798_s8  ;;  %11581 = vst [vmem:[#allocation84_spill] sm:$0xff] %v8218_v47  ;;  %v11582_v15 = vld [vmem:[#allocation11_spill] sm:$0xff]  ;;  %v2717_v47 = vrot.slane %v11589_v20, 6 }
 0x280   : > { %1016 = vmatpush.msra.mxu3 %v6353_v18  ;;  %v8212_v4 = vpop.permute.xlu2 %6435  ;;  %v2643_v6 = vrot.slane %v11582_v15, 1  ;;  %v2651_v18 = vrot.slane %v11594_v23, 4 }
 0x281   : > { %v8215_v36 = vpop.permute.xlu1 %6410  ;;  %837 = vxpose.xlu0.b32.cont [14/16] (narrow) %v676_v58, 8 }
 0x282   : > { %1017 = vmatpush.msra.mxu3 %v6352_v26  ;;  %v2644_v46 = vsel %vm2577_vm9, %v11585_v31, %v2643_v6  ;;  %v11596_v6 = vld [vmem:[#allocation61_spill] sm:$0xff] }
 0x284   : > { %1018 = vmatpush.msra.mxu3 %v6348_v1  ;;  %v11595_v1 = vld [vmem:[#allocation16_spill] sm:$0xff] }
 0x286   : > { %1019 = vmatpush.msra.mxu3 %v6347_v41  ;;  %1980 = vrot.lane.b32.xlu2 %v7326_v24, %s6798_s8  ;;  %v2657_v24 = vrot.slane %v7636_v59, 1  ;;  %v8237_v42 = vpop.permute.xlu0 %2769  ;;  %v678_v59 = vmul.f32 %v7603_v28, %v7576_v30  ;;  %v2689_v41 = vrot.slane %v11595_v1, 6 }
 0x287   : > { %1986 = vrot.lane.b32.xlu1 %v7438_v57, %s6798_s8  ;;  %11587 = vst [vmem:[#allocation26_spill] sm:$0xff] %v8237_v42  ;;  %v2646_v57 = vsel %vm2580_vm15, %v2645_v34, %v2644_v46  ;;  %v11597_v34 = vld [vmem:[#allocation62_spill] sm:$0xff] }
 0x288   : > { %v8228_v8 = vpop.permute.xlu2 %6445  ;;  %v2658_v53 = vsel %vm2577_vm9, %v11590_v56, %v2657_v24  ;;  %v2648_v61 = vsel %vm11464_vm1, %v2647_v63, %v2646_v57  ;;  %v2740_v46 = vrot.slane %v11597_v34, 1  ;;  %v2663_v24 = vrot.slane %v7695_v48, 5  ;;  %v11598_v57 = vld [vmem:[#allocation60_spill] sm:$0xff] }
 0x289   : > { %v8230_v32 = vpop.permute.xlu1 %6420  ;;  %838 = vxpose.xlu0.b32.cont [15/16] (narrow) %v677_v44, 8  ;;  %v2660_v58 = vsel %vm2580_vm15, %v2659_v43, %v2658_v53  ;;  %v2650_v26 = vsel %vm2586_vm3, %v2649_v49, %v2648_v61  ;;  %v2739_v44 = vrot.slane %v11596_v6, 2  ;;  %v6544_v43 = vpack.i.bf16 %v6427_v12, %v6387_v22  ;;  %v11599_v53 = vld [vmem:[#allocation63_spill] sm:$0xff] }
 0x28a   : > { %11583 = vst [vmem:[#allocation11_spill] sm:$0xff] %v8230_v32  ;;  %v2652_v49 = vsel %vm2589_vm4, %v2651_v18, %v2650_v26  ;;  %v2665_v56 = vrot.slane %v7719_v14, 4  ;;  %v2691_v61 = vrot.slane %v11599_v53, 5  ;;  %v11601_v14 = vld [vmem:[#allocation64_spill] sm:$0xff]  ;;  %v2667_v22 = vrot.slane %v7728_v60, 3 }
 0x28b   : > { %v2655_v18 = vrot.slane %v11601_v14, 2  ;;  %v6398_v32 = vunpack.i.h.bf16 %v8146_v54 }
 0x28e   : > { %1984 = vrot.lane.b32.xlu2 %v7402_v33, %s6798_s8  ;;  %v8280_v7 = vpop.permute.xlu0 %2835 }
 0x28f   : > { %1990 = vrot.lane.b32.xlu1 %v7512_v11, %s6798_s8  ;;  %v8259_v11 = vld [vmem:[%s6913_s23 + $0xc8] sm:$0xff]  ;;  %11600 = vst [vmem:[#allocation10_spill] sm:$0xff] %v8280_v7 }
 0x290   : > { %v8251_v39 = vpop.permute.xlu2 %6460  ;;  %11593 = vst [vmem:[#allocation56_spill] sm:$0xff] %v8259_v11  ;;  %v2686_v28 = vsel %vm2577_vm9, %v8259_v11, %v2685_v3  ;;  %v2653_v3 = vrot.slane %v11598_v57, 3  ;;  %v2754_v20 = vrot.slane %v8259_v11, 1 }
 0x291   : > { %11591 = vst [vmem:[#allocation54_spill] sm:$0xff] %v8251_v39  ;;  %v8255_v33 = vpop.permute.xlu1 %6430  ;;  %839 = vxpose.xlu0.b32.end [16/16] (narrow) %v678_v59, 8  ;;  %v2688_v63 = vsel %vm2580_vm15, %v2687_v0, %v2686_v28  ;;  %v2662_v59 = vsel %vm11464_vm1, %v2661_v55, %v2660_v58  ;;  %v2741_v0 = vsel %vm2577_vm9, %v2740_v46, %v2739_v44  ;;  %v2711_v55 = vrot.slane %v11582_v15, 2  ;;  %v11603_v15 = vld [vmem:[#allocation65_spill] sm:$0xff] }
 0x292   : > { %v2690_v48 = vsel %vm11464_vm1, %v2689_v41, %v2688_v63  ;;  %v6388_v28 = vunpack.i.h.bf16 %v8126_v51  ;;  %v2664_v58 = vsel %vm2586_vm3, %v2663_v24, %v2662_v59  ;;  %v11602_v41 = vld [vmem:[#allocation14_spill] sm:$0xff]  ;;  %v2743_v46 = vrot.slane %v11603_v15, 7 }
 0x293   : > { %v2693_v44 = vrot.slane %v11602_v41, 4  ;;  %v6428_v51 = vunpack.i.h.bf16 %v8196_v27  ;;  %v2692_v63 = vsel %vm2586_vm3, %v2691_v61, %v2690_v48  ;;  %v2742_v24 = vsel %vm2580_vm15, %v11604_v25, %v2741_v0 }
 0x294   : > { %v2666_v59 = vsel %vm2589_vm4, %v2665_v56, %v2664_v58  ;;  %v2715_v27 = vrot.slane %v11586_v45, 7  ;;  %v2745_v48 = vrot.slane %v7882_v37, 6  ;;  %v2669_v0 = vrot.slane %v7746_v38, 2 }
 0x295   : > { %v2694_v58 = vsel %vm2589_vm4, %v2693_v44, %v2692_v63  ;;  %v2744_v35 = vsel %vm11464_vm1, %v2743_v46, %v2742_v24  ;;  %v6546_v9 = vpack.i.bf16 %v6428_v51, %v6388_v28  ;;  %v2668_v45 = vsel %vm11466_vm5, %v2667_v22, %v2666_v59 }
 0x296   : > { %1988 = vrot.lane.b32.xlu2 %v7476_v10, %s6798_s8  ;;  %v2712_v10 = vrot.slane %v11585_v31, 1  ;;  %v2746_v51 = vsel %vm2586_vm3, %v2745_v48, %v2744_v35  ;;  %v2753_v22 = vrot.slane %v11588_v5, 2  ;;  %v8341_v24 = vpop.permute.xlu0 %2841  ;;  %v6392_v59 = vunpack.i.l.bf16 %v8188_v52 }
 0x297   : > { %1994 = vrot.lane.b32.xlu1 %v7576_v30, %s6798_s8  ;;  %v2654_v30 = vsel %vm11466_vm5, %v2653_v3, %v2652_v49  ;;  %v8310_v49 = vld [vmem:[%s6913_s23 + $0x48] sm:$0xff]  ;;  %11608 = vst [vmem:[#allocation55_spill] sm:$0xff] %v8341_v24  ;;  %v2719_v35 = vrot.slane %v11594_v23, 5  ;;  %v2721_v23 = vrot.slane %v11598_v57, 4  ;;  %v8362_v24 = vld [vmem:[%s6913_s23] sm:$0xff] }
 0x298   : > { %v8289_v12 = vpop.permute.xlu2 %6470  ;;  %v2713_v31 = vsel %vm2577_vm9, %v2712_v10, %v2711_v55  ;;  %v2794_v55 = vrot.slane %v8310_v49, 2  ;;  %v2656_v60 = vsel %vm11465_vm6, %v2655_v18, %v2654_v30  ;;  %v11605_v10 = vld [vmem:[#allocation66_spill] sm:$0xff]  ;;  %v8326_v18 = vld [vmem:[%s6913_s23 + $0x50] sm:$0xff]  ;;  %v2755_v48 = vsel %vm2577_vm9, %v2754_v20, %v2753_v22  ;;  %11609 = vst [vmem:[#allocation51_spill] sm:$0xff] %v8362_v24 }
 0x299   : > { %v8293_v26 = vpop.permute.xlu1 %6440  ;;  %6545 = vxpose.xlu0.b32.start [1/16] (narrow) %v6544_v43, 8  ;;  %v8306_v43 = vld [vmem:[%s6913_s23 + $0x40] sm:$0xff]  ;;  %v2695_v61 = vrot.slane %v11605_v10, 3  ;;  %v2714_v56 = vsel %vm2580_vm15, %v11584_v62, %v2713_v31  ;;  %v2796_v30 = vrot.slane %v8326_v18, 1  ;;  %v11606_v62 = vld [vmem:[#allocation68_spill] sm:$0xff]  ;;  %v2751_v22 = vrot.slane %v7901_v50, 3 }
 0x29a   : > { %v2793_v3 = vrot.slane %v8306_v43, 3  ;;  %v2697_v38 = vrot.slane %v11606_v62, 2  ;;  %v11607_v31 = vld [vmem:[#allocation29_spill] sm:$0xff]  ;;  %v2716_v63 = vsel %vm11464_vm1, %v2715_v27, %v2714_v56  ;;  %v6432_v27 = vunpack.i.l.bf16 %v8255_v33 }
 0x29b   : > { %v2747_v44 = vrot.slane %v11607_v31, 5  ;;  %v2696_v28 = vsel %vm11466_vm5, %v2695_v61, %v2694_v58  ;;  %v2718_v61 = vsel %vm2586_vm3, %v2717_v47, %v2716_v63  ;;  %v8356_v58 = vld [vmem:[%s6913_s23 + $0x60] sm:$0xff]  ;;  %v8366_v47 = vld [vmem:[%s6913_s23 + $0x8] sm:$0xff]  ;;  %v8373_v63 = vld [vmem:[%s6913_s23 + $0x58] sm:$0xff]  ;;  %v2759_v20 = vrot.slane %v11599_v53, 6 }
 0x29c   : > { %v2795_v46 = vsel %vm2577_vm9, %v2794_v55, %v2793_v3  ;;  %v2670_v3 = vsel %vm11465_vm6, %v2669_v0, %v2668_v45  ;;  %v2749_v55 = vrot.slane %v7889_v19, 4  ;;  %v2698_v56 = vsel %vm11465_vm6, %v2697_v38, %v2696_v28  ;;  %11610 = vst [vmem:[#allocation57_spill] sm:$0xff] %v8366_v47 }
 0x29d   : > { %v2797_v5 = vsel %vm2580_vm15, %v2796_v30, %v2795_v46  ;;  %v2799_v0 = vrot.slane %v8356_v58, 7  ;;  %v2757_v45 = vrot.slane %v11595_v1, 7  ;;  %v2847_v30 = vrot.slane %v8362_v24, 4 }
 0x29e   : > { %1992 = vrot.lane.b32.xlu2 %v7547_v40, %s6798_s8  ;;  %v2848_v38 = vrot.slane %v8366_v47, 3  ;;  %v6393_v46 = vunpack.i.h.bf16 %v8188_v52  ;;  %v2798_v1 = vsel %vm11464_vm1, %v8373_v63, %v2797_v5  ;;  %v2720_v57 = vsel %vm2589_vm4, %v2719_v35, %v2718_v61  ;;  %v8389_v5 = vld [vmem:[%s6913_s23 + $0x10] sm:$0xff]  ;;  %s11903_s8 = smov 32  }
 0x29f   : > { %2699 = vrot.lane.b32.xlu1 %v2656_v60, %s6801_s14  ;;  %v6548_v28 = vpack.i.bf16 %v6432_v27, %v6392_v59  ;;  %11611 = vst [vmem:[#allocation58_spill] sm:$0xff] %v8389_v5  ;;  %v2800_v53 = vsel %vm2586_vm3, %v2799_v0, %v2798_v1  ;;  %v2722_v27 = vsel %vm11466_vm5, %v2721_v23, %v2720_v57  ;;  %v2803_v0 = vrot.slane %v8407_v21, 5  ;;  %v8411_v23 = vld [vmem:[%s6913_s23 + $0x18] sm:$0xff] }
 0x2a0   : > { %v8335_v40 = vpop.permute.xlu2 %6480  ;;  %v2849_v61 = vsel %vm2577_vm9, %v2848_v38, %v2847_v30  ;;  %11612 = vst [vmem:[#allocation16_spill] sm:$0xff] %v8411_v23  ;;  %v2852_v30 = vrot.slane %v8411_v23, 1  ;;  %v8415_v38 = vpop.permute.xlu0 %2907  ;;  %v2763_v57 = vrot.slane %v11605_v10, 4  ;;  %v2866_v7 = vrot.slane %v8373_v63, 1 }
 0x2a1   : > { %v8344_v60 = vpop.permute.xlu1 %6455  ;;  %6547 = vxpose.xlu0.b32.cont [2/16] (narrow) %v6546_v9, 8  ;;  %v2748_v9 = vsel %vm2589_vm4, %v2747_v44, %v2746_v51  ;;  %v2756_v44 = vsel %vm2580_vm15, %v11592_v29, %v2755_v48  ;;  %v8384_v29 = vld [vmem:[%s6913_s23 + $0x68] sm:$0xff]  ;;  %v2723_v48 = vrot.slane %v11601_v14, 3  ;;  %v2761_v14 = vrot.slane %v11602_v41, 5  ;;  %11613 = vst [vmem:[#allocation61_spill] sm:$0xff] %v8415_v38 }
 0x2a2   : > { %v2750_v51 = vsel %vm11466_vm5, %v2749_v55, %v2748_v9  ;;  %v2801_v52 = vrot.slane %v8384_v29, 6  ;;  %v2758_v59 = vsel %vm11464_vm1, %v2757_v45, %v2756_v44  ;;  %v6433_v55 = vunpack.i.h.bf16 %v8255_v33 }
 0x2a3   : > { %v2807_v9 = vrot.slane %v11596_v6, 3  ;;  %v2808_v45 = vrot.slane %v11597_v34, 2  ;;  %v2810_v33 = vrot.slane %v11604_v25, 1  ;;  %v2752_v44 = vsel %vm11465_vm6, %v2751_v22, %v2750_v51 }
 0x2a4   : > { %v2760_v41 = vsel %vm2586_vm3, %v2759_v20, %v2758_v59  ;;  %v2802_v6 = vsel %vm2589_vm4, %v2801_v52, %v2800_v53  ;;  %v2724_v34 = vsel %vm11465_vm6, %v2723_v48, %v2722_v27  ;;  %v2890_v22 = vrot.slane %v8259_v11, 3  ;;  %v8432_v53 = vld [vmem:[%s6913_s23 + $0x78] sm:$0xff] }
 0x2a5   : > { %v2809_v1 = vsel %vm2577_vm9, %v2808_v45, %v2807_v9  ;;  %v6437_v52 = vunpack.i.l.bf16 %v8212_v4  ;;  %v2762_v48 = vsel %vm2589_vm4, %v2761_v14, %v2760_v41  ;;  %v2805_v10 = vrot.slane %v8432_v53, 4  ;;  %v8442_v14 = vld [vmem:[%s6913_s23 + $0xd0] sm:$0xff]  ;;  %v8448_v41 = vld [vmem:[%s6913_s23 + $0x28] sm:$0xff] }
 0x2a6   : > { %2701 = vrot.lane.b32.xlu2 %v2670_v3, %s6801_s14  ;;  %v2850_v3 = vrot.slane %v8389_v5, 2  ;;  %v2811_v20 = vsel %vm2580_vm15, %v2810_v33, %v2809_v1  ;;  %v2804_v9 = vsel %vm11466_vm5, %v2803_v0, %v2802_v6  ;;  %v2765_v45 = vrot.slane %v11606_v62, 3  ;;  %11615 = vst [vmem:[#allocation60_spill] sm:$0xff] %v8442_v14  ;;  %v8465_v1 = vld [vmem:[%s6913_s23 + $0xd8] sm:$0xff] }
 0x2a7   : > { %2705 = vrot.lane.b32.xlu1 %v2698_v56, %s6801_s14  ;;  %v2764_v0 = vsel %vm11466_vm5, %v2763_v57, %v2762_v48  ;;  %v2815_v59 = vrot.slane %v11607_v31, 6  ;;  %v2861_v57 = vrot.slane %v8306_v43, 4  ;;  %v2806_v31 = vsel %vm11465_vm6, %v2805_v10, %v2804_v9  ;;  %v8487_v10 = vld [vmem:[%s6913_s23 + $0x38] sm:$0xff] }
 0x2a8   : > { %v8394_v35 = vpop.permute.xlu2 %6490  ;;  %v2851_v25 = vsel %vm2580_vm15, %v2850_v3, %v2849_v61  ;;  %v6550_v3 = vpack.i.bf16 %v6433_v55, %v6393_v46  ;;  %v2813_v61 = vrot.slane %v7882_v37, 7  ;;  %v2892_v46 = vrot.slane %v8442_v14, 2 }
 0x2a9   : > { %v8399_v56 = vpop.permute.xlu1 %6465  ;;  %6549 = vxpose.xlu0.b32.cont [3/16] (narrow) %v6548_v28, 8  ;;  %v8423_v28 = vld [vmem:[%s6913_s23 + $0xc0] sm:$0xff]  ;;  %v2853_v27 = vsel %vm11464_vm1, %v2852_v30, %v2851_v25  ;;  %v2812_v55 = vsel %vm11464_vm1, %v11603_v15, %v2811_v20  ;;  %v2855_v37 = vrot.slane %v8448_v41, 7  ;;  %v8452_v30 = vld [vmem:[%s6913_s23 + $0x30] sm:$0xff]  ;;  %v2894_v20 = vrot.slane %v8465_v1, 1 }
 0x2aa   : > { %11614 = vst [vmem:[#allocation62_spill] sm:$0xff] %v8423_v28  ;;  %v2889_v51 = vrot.slane %v8423_v28, 4  ;;  %v8460_v25 = vld [vmem:[%s6913_s23 + $0x20] sm:$0xff]  ;;  %v2814_v38 = vsel %vm2586_vm3, %v2813_v61, %v2812_v55  ;;  %v2817_v55 = vrot.slane %v7889_v19, 5  ;;  %v2859_v9 = vrot.slane %v8487_v10, 5 }
 0x2ab   : > { %11616 = vst [vmem:[#allocation63_spill] sm:$0xff] %v8460_v25  ;;  %v2854_v15 = vsel %vm2586_vm3, %v8460_v25, %v2853_v27 }
 0x2ac   : > { %v2891_v62 = vsel %vm2577_vm9, %v2890_v22, %v2889_v51  ;;  %v2862_v51 = vrot.slane %v8310_v49, 3  ;;  %v2864_v22 = vrot.slane %v8326_v18, 2  ;;  %v2856_v61 = vsel %vm2589_vm4, %v2855_v37, %v2854_v15  ;;  %v8493_v37 = vld [vmem:[%s6913_s23 + $0x80] sm:$0xff] }
 0x2ad   : > { %v2893_v27 = vsel %vm2580_vm15, %v2892_v46, %v2891_v62  ;;  %v2819_v62 = vrot.slane %v7901_v50, 4 }
 0x2ae   : > { %2767 = vrot.lane.b32.xlu2 %v2724_v34, %s6802_s15  ;;  %v2863_v42 = vsel %vm2577_vm9, %v2862_v51, %v2861_v57  ;;  %v2895_v19 = vsel %vm11464_vm1, %v2894_v20, %v2893_v27  ;;  %v11619_v57 = vunpack.i.h.bf16 %v8212_v4 }
 0x2af   : > { %2771 = vrot.lane.b32.xlu1 %v2752_v44, %s6802_s15  ;;  %v2857_v44 = vrot.slane %v8452_v30, 6  ;;  %v2865_v46 = vsel %vm2580_vm15, %v2864_v22, %v2863_v42  ;;  %v8509_v22 = vld [vmem:[%s6913_s23 + $0xe8] sm:$0xff] }
 0x2b0   : > { %v6501_v33 = vpop.permute.xlu2 %6500  ;;  %v2867_v15 = vsel %vm11464_vm1, %v2866_v7, %v2865_v46  ;;  %v6554_v51 = vpack.i.bf16 %v11619_v57, %v6398_v32  ;;  %v8521_v7 = vld [vmem:[%s6913_s23 + $0x90] sm:$0xff]  ;;  %v2869_v32 = vrot.slane %v8384_v29, 7  ;;  %v2920_v57 = vrot.slane %v8411_v23, 2 }
 0x2b1   : > { %v8457_v6 = vpop.permute.xlu1 %6475  ;;  %6551 = vxpose.xlu0.b32.cont [4/16] (narrow) %v6550_v3, 8  ;;  %v6503_v34 = vunpack.i.h.bf16 %v6501_v33  ;;  %v6502_v48 = vunpack.i.l.bf16 %v6501_v33  ;;  %v2766_v3 = vsel %vm11465_vm6, %v2765_v45, %v2764_v0  ;;  %v6397_v33 = vunpack.i.l.bf16 %v8146_v54  ;;  %v8497_v0 = vld [vmem:[%s6913_s23 + $0x88] sm:$0xff] }
 0x2b2   : > { %v2816_v45 = vsel %vm2589_vm4, %v2815_v59, %v2814_v38  ;;  %v2943_v54 = vrot.slane %v8493_v37, 5  ;;  %v2944_v38 = vrot.slane %v8497_v0, 4  ;;  %v2858_v59 = vsel %vm11466_vm5, %v2857_v44, %v2856_v61  ;;  %v8528_v61 = vld [vmem:[%s6913_s23 + $0xf0] sm:$0xff] }
 0x2b3   : > { %1870 = vmatpush.msra.mxu1 %v6503_v34  ;;  %v8482_v34 = vpop.permute.xlu0 %2973  ;;  %v6552_v42 = vpack.i.bf16 %v6437_v52, %v6397_v33  ;;  %v8516_v52 = vld [vmem:[%s6913_s23 + $0xe0] sm:$0xff]  ;;  %v2946_v4 = vrot.slane %v8521_v7, 3  ;;  %v2915_v44 = vrot.slane %v8362_v24, 5  ;;  %v8544_v24 = vld [vmem:[%s6913_s23 + $0x98] sm:$0xff] }
 0x2b4   : > { %11617 = vst [vmem:[#allocation64_spill] sm:$0xff] %v8482_v34  ;;  %v2896_v50 = vsel %vm2586_vm3, %v8516_v52, %v2895_v19  ;;  %v2945_v33 = vsel %vm2577_vm9, %v2944_v38, %v2943_v54  ;;  %v2916_v19 = vrot.slane %v8366_v47, 4  ;;  %v2948_v54 = vrot.slane %v8544_v24, 2 }
 0x2b5   : > { %1871 = vmatpush.msra.mxu1 %v6502_v48  ;;  %v2897_v48 = vrot.slane %v8509_v22, 7  ;;  %v2871_v38 = vrot.slane %v8407_v21, 6  ;;  %v2998_v47 = vrot.slane %v8310_v49, 5 }
 0x2b6   : > { %2773 = vrot.lane.b32.xlu2 %v2766_v3, %s6802_s15  ;;  %v2818_v3 = vsel %vm11466_vm5, %v2817_v55, %v2816_v45  ;;  %v2899_v55 = vrot.slane %v8528_v61, 6  ;;  %v2868_v45 = vsel %vm2586_vm3, %v8356_v58, %v2867_v15 }
 0x2b7   : > { %2837 = vrot.lane.b32.xlu1 %v2806_v31, %s6803_s16  ;;  %v2860_v31 = vsel %vm11465_vm6, %v2859_v9, %v2858_v59  ;;  %v2820_v46 = vsel %vm11465_vm6, %v2819_v62, %v2818_v3  ;;  %v2898_v9 = vsel %vm2589_vm4, %v2897_v48, %v2896_v50  ;;  %v8540_v59 = vld [vmem:[%s6913_s23 + $0xf8] sm:$0xff]  ;;  %v2947_v62 = vsel %vm2580_vm15, %v2946_v4, %v2945_v33  ;;  %v8550_v3 = vld [vmem:[%s6913_s23 + $0xa0] sm:$0xff] }
 0x2b8   : > { %v8504_v20 = vpop.permute.xlu2 %6510  ;;  %v2901_v34 = vrot.slane %v8540_v59, 5  ;;  %v2870_v23 = vsel %vm2589_vm4, %v2869_v32, %v2868_v45  ;;  %v2917_v48 = vsel %vm2577_vm9, %v2916_v19, %v2915_v44  ;;  %v2997_v50 = vrot.slane %v8306_v43, 6 }
 0x2b9   : > { %11618 = vst [vmem:[#allocation14_spill] sm:$0xff] %v8504_v20  ;;  %v8513_v27 = vpop.permute.xlu1 %6485  ;;  %6553 = vxpose.xlu0.b32.cont [5/16] (narrow) %v6552_v42, 8  ;;  %v2918_v42 = vrot.slane %v8389_v5, 3  ;;  %v2950_v5 = vrot.slane %v8550_v3, 1  ;;  %v2922_v20 = vrot.slane %v8460_v25, 1  ;;  %v2873_v4 = vrot.slane %v8432_v53, 5 }
 0x2ba   : > { %v2957_v32 = vrot.slane %v8423_v28, 5  ;;  %v2958_v44 = vrot.slane %v8259_v11, 4  ;;  %v2949_v19 = vsel %vm11464_vm1, %v2948_v54, %v2947_v62 }
 0x2bb   : > { %v2919_v39 = vsel %vm2580_vm15, %v2918_v42, %v2917_v48  ;;  %v2872_v42 = vsel %vm11466_vm5, %v2871_v38, %v2870_v23  ;;  %v6442_v48 = vunpack.i.l.bf16 %v8293_v26  ;;  %v2951_v38 = vsel %vm2586_vm3, %v2950_v5, %v2949_v19 }
 0x2bc   : > { %v2921_v33 = vsel %vm11464_vm1, %v2920_v57, %v2919_v39  ;;  %v3000_v39 = vrot.slane %v8326_v18, 4  ;;  %v2959_v57 = vsel %vm2577_vm9, %v2958_v44, %v2957_v32  ;;  %v2874_v62 = vsel %vm11465_vm6, %v2873_v4, %v2872_v42 }
 0x2bd   : > { %v840_v15 = vpop.trf.xlu0  ;;  %v2923_v23 = vsel %vm2586_vm3, %v2922_v20, %v2921_v33  ;;  %v3002_v32 = vrot.slane %v8373_v63, 3  ;;  %v2925_v44 = vrot.slane %v8452_v30, 7  ;;  %v2964_v4 = vrot.slane %v8516_v52, 1 }
 0x2be   : > { %1020 = vmatmul.f32.vlgmr.msra.gmra.mxu3 %v840_v15  ;;  %2839 = vrot.lane.b32.xlu2 %v2820_v46, %s6803_s16  ;;  %v2900_v46 = vsel %vm11466_vm5, %v2899_v55, %v2898_v9  ;;  %v2960_v15 = vrot.slane %v8442_v14, 3  ;;  %v6493_v55 = vunpack.i.h.bf16 %v8394_v35  ;;  %v2999_v9 = vsel %vm2577_vm9, %v2998_v47, %v2997_v50  ;;  %v8586_v50 = vld [vmem:[%s6913_s23 + $0xb0] sm:$0xff] }
 0x2bf   : > { %2903 = vrot.lane.b32.xlu1 %v2860_v31, %s11468_s17  ;;  %v6402_v31 = vunpack.i.l.bf16 %v8201_v2  ;;  %v2902_v54 = vsel %vm11465_vm6, %v2901_v34, %v2900_v46  ;;  %v2953_v20 = vrot.slane %v8586_v50, 7  ;;  %v3001_v34 = vsel %vm2580_vm15, %v3000_v39, %v2999_v9 }
 0x2c0   : > { %v8565_v45 = vpop.permute.xlu2 %6520  ;;  %v2961_v28 = vsel %vm2580_vm15, %v2960_v15, %v2959_v57  ;;  %v2924_v5 = vsel %vm2589_vm4, %v8448_v41, %v2923_v23  ;;  %v3011_v33 = vrot.slane %v8493_v37, 6  ;;  %v3012_v46 = vrot.slane %v8497_v0, 5 }
 0x2c1   : > { %v6496_v25 = vpop.permute.xlu1 %6495  ;;  %6555 = vxpose.xlu0.b32.cont [6/16] (narrow) %v6554_v51, 8  ;;  %v2962_v51 = vrot.slane %v8465_v1, 2  ;;  %v6556_v47 = vpack.i.bf16 %v6442_v48, %v6402_v31  ;;  %v6492_v19 = vunpack.i.l.bf16 %v8394_v35  ;;  %v3004_v42 = vrot.slane %v8356_v58, 2  ;;  %v8609_v48 = vld [vmem:[%s6913_s23 + $0xb8] sm:$0xff] }
 0x2c2   : > { %v6498_v11 = vunpack.i.h.bf16 %v6496_v25  ;;  %v6497_v14 = vunpack.i.l.bf16 %v6496_v25  ;;  %v2955_v39 = vrot.slane %v8609_v48, 6  ;;  %v3003_v57 = vsel %vm11464_vm1, %v3002_v32, %v3001_v34 }
 0x2c3   : > { %v2963_v15 = vsel %vm11464_vm1, %v2962_v51, %v2961_v28  ;;  %v2926_v9 = vsel %vm11466_vm5, %v2925_v44, %v2924_v5  ;;  %v3014_v23 = vrot.slane %v8521_v7, 4  ;;  %v3013_v28 = vsel %vm2577_vm9, %v3012_v46, %v3011_v33 }
 0x2c4   : > { %1872 = vmatpush.msra.mxu1 %v6498_v11  ;;  %v8593_v11 = vld [vmem:[%s6913_s23 + $0xa8] sm:$0xff]  ;;  %v6443_v51 = vunpack.i.h.bf16 %v8293_v26  ;;  %v3005_v32 = vsel %vm2586_vm3, %v3004_v42, %v3003_v57  ;;  %v3016_v34 = vrot.slane %v8544_v24, 3  ;;  %v2967_v5 = vrot.slane %v8528_v61, 7 }
 0x2c5   : > { %v2952_v25 = vsel %vm2589_vm4, %v8593_v11, %v2951_v38  ;;  %v3006_v38 = vrot.slane %v8384_v29, 1  ;;  %v6403_v33 = vunpack.i.h.bf16 %v8201_v2  ;;  %v3066_v42 = vrot.slane %v8310_v49, 6 }
 0x2c6   : > { %1873 = vmatpush.msra.mxu1 %v6497_v14  ;;  %2905 = vrot.lane.b32.xlu2 %v2874_v62, %s11468_s17  ;;  %v2927_v14 = vrot.slane %v8487_v10, 6  ;;  %v2965_v62 = vsel %vm2586_vm3, %v2964_v4, %v2963_v15  ;;  %v6483_v4 = vunpack.i.h.bf16 %v8335_v40  ;;  %v2969_v2 = vrot.slane %v8540_v59, 6 }
 0x2c7   : > { %2909 = vrot.lane.b32.xlu1 %v2902_v54, %s11468_s17  ;;  %v2954_v54 = vsel %vm11466_vm5, %v2953_v20, %v2952_v25  ;;  %v3015_v25 = vsel %vm2580_vm15, %v3014_v23, %v3013_v28  ;;  %v2966_v26 = vsel %vm2589_vm4, %v8509_v22, %v2965_v62  ;;  %v3007_v46 = vsel %vm2589_vm4, %v3006_v38, %v3005_v32 }
 0x2c8   : > { %1874 = vmatpush.msra.mxu1 %v6493_v55  ;;  %v8606_v31 = vpop.permute.xlu2 %6530  ;;  %v6488_v55 = vunpack.i.h.bf16 %v8513_v27  ;;  %v2928_v44 = vsel %vm11465_vm6, %v2927_v14, %v2926_v9  ;;  %v2956_v20 = vsel %vm11465_vm6, %v2955_v39, %v2954_v54  ;;  %v6558_v14 = vpack.i.bf16 %v6443_v51, %v6403_v33 }
 0x2c9   : > { %v8615_v35 = vpop.permute.xlu1 %6505  ;;  %6557 = vxpose.xlu0.b32.cont [7/16] (narrow) %v6556_v47, 8  ;;  %v6487_v47 = vunpack.i.l.bf16 %v8513_v27  ;;  %v3018_v27 = vrot.slane %v8550_v3, 2  ;;  %v3017_v15 = vsel %vm11464_vm1, %v3016_v34, %v3015_v25  ;;  %v6482_v57 = vunpack.i.l.bf16 %v8335_v40 }
 0x2ca   : > { %1875 = vmatpush.msra.mxu1 %v6492_v19  ;;  %v3065_v19 = vrot.slane %v8306_v43, 7  ;;  %v3009_v9 = vrot.slane %v8432_v53, 7  ;;  %v2968_v23 = vsel %vm11466_vm5, %v2967_v5, %v2966_v26  ;;  %v3068_v54 = vrot.slane %v8326_v18, 5 }
 0x2cb   : > { %v3008_v38 = vsel %vm11466_vm5, %v8407_v21, %v3007_v46  ;;  %v3020_v62 = vrot.slane %v8593_v11, 1  ;;  %v6478_v40 = vunpack.i.h.bf16 %v8457_v6  ;;  %v3019_v32 = vsel %vm2586_vm3, %v3018_v27, %v3017_v15 }
 0x2cc   : > { %1876 = vmatpush.msra.mxu1 %v6488_v55  ;;  %v3067_v51 = vsel %vm2577_vm9, %v3066_v42, %v3065_v19  ;;  %v6477_v5 = vunpack.i.l.bf16 %v8457_v6  ;;  %v3010_v25 = vsel %vm11465_vm6, %v3009_v9, %v3008_v38  ;;  %v6473_v46 = vunpack.i.h.bf16 %v8289_v12 }
 0x2cd   : > { %v3069_v33 = vsel %vm2580_vm15, %v3068_v54, %v3067_v51  ;;  %v3021_v26 = vsel %vm2589_vm4, %v3020_v62, %v3019_v32  ;;  %v3072_v27 = vrot.slane %v8356_v58, 3  ;;  %v3023_v19 = vrot.slane %v8609_v48, 7 }
 0x2ce   : > { %1877 = vmatpush.msra.mxu1 %v6487_v47  ;;  %2971 = vrot.lane.b32.xlu2 %v2928_v44, %s6805_s18  ;;  %v6447_v44 = vunpack.i.l.bf16 %v8228_v8  ;;  %v2970_v47 = vsel %vm11465_vm6, %v2969_v2, %v2968_v23  ;;  %v3022_v2 = vsel %vm11466_vm5, %v8586_v50, %v3021_v26  ;;  %v6448_v23 = vunpack.i.h.bf16 %v8228_v8 }
 0x2cf   : > { %2975 = vrot.lane.b32.xlu1 %v2956_v20, %s6805_s18  ;;  %v3070_v20 = vrot.slane %v8373_v63, 4  ;;  %v3024_v54 = vsel %vm11465_vm6, %v3023_v19, %v3022_v2  ;;  %v6408_v38 = vunpack.i.h.bf16 %v8164_v16  ;;  %v6453_v26 = vunpack.i.h.bf16 %v8176_v13 }
 0x2d0   : > { %1878 = vmatpush.msra.mxu1 %v6483_v4  ;;  %v6541_v39 = vpop.permute.xlu2 %6540  ;;  %v6407_v4 = vunpack.i.l.bf16 %v8164_v16  ;;  %v6452_v16 = vunpack.i.l.bf16 %v8176_v13  ;;  %v6457_v19 = vunpack.i.l.bf16 %v8344_v60  ;;  %v11620_v13 = vld [vmem:[#allocation14_spill] sm:$0xff] }
 0x2d1   : > { %v8646_v28 = vpop.permute.xlu1 %6515  ;;  %6559 = vxpose.xlu0.b32.cont [8/16] (narrow) %v6558_v14, 8  ;;  %v6543_v55 = vunpack.i.h.bf16 %v6541_v39  ;;  %v6542_v34 = vunpack.i.l.bf16 %v6541_v39  ;;  %v3071_v42 = vsel %vm11464_vm1, %v3070_v20, %v3069_v33  ;;  %v6472_v14 = vunpack.i.l.bf16 %v8289_v12 }
 0x2d2   : > { %1879 = vmatpush.msra.mxu1 %v6482_v57  ;;  %v6560_v6 = vpack.i.bf16 %v6447_v44, %v6407_v4  ;;  %v3074_v39 = vrot.slane %v8384_v29, 2  ;;  %v6468_v57 = vunpack.i.h.bf16 %v8399_v56  ;;  %v3073_v9 = vsel %vm2586_vm3, %v3072_v27, %v3071_v42 }
 0x2d3   : > { %1890 = vmatpush.msra.mxu2 %v6543_v55  ;;  %v6467_v55 = vunpack.i.l.bf16 %v8399_v56  ;;  %v3076_v12 = vrot.slane %v8407_v21, 1  ;;  %v6562_v51 = vpack.i.bf16 %v6448_v23, %v6408_v38  ;;  %v6412_v44 = vunpack.i.l.bf16 %v8215_v36  ;;  %v11621_v23 = vld [vmem:[#allocation54_spill] sm:$0xff] }
 0x2d4   : > { %1880 = vmatpush.msra.mxu1 %v6478_v40  ;;  %v3075_v62 = vsel %vm2589_vm4, %v3074_v39, %v3073_v9  ;;  %v6413_v33 = vunpack.i.h.bf16 %v8215_v36  ;;  %v6517_v36 = vunpack.i.l.bf16 %v8646_v28  ;;  %v6417_v42 = vunpack.i.l.bf16 %v8181_v17 }
 0x2d5   : > { %1891 = vmatpush.msra.mxu2 %v6542_v34  ;;  %v3077_v40 = vsel %vm11466_vm5, %v3076_v12, %v3075_v62  ;;  %v6564_v20 = vpack.i.bf16 %v6452_v16, %v6412_v44  ;;  %v6458_v39 = vunpack.i.h.bf16 %v8344_v60  ;;  %v6463_v62 = vunpack.i.h.bf16 %v11621_v23 }
 0x2d6   : > { %1881 = vmatpush.msra.mxu1 %v6477_v5  ;;  %2977 = vrot.lane.b32.xlu2 %v2970_v47, %s6805_s18  ;;  %v3078_v56 = vsel %vm11465_vm6, %v8432_v53, %v3077_v40  ;;  %v6533_v47 = vunpack.i.h.bf16 %v8606_v31  ;;  %v6532_v5 = vunpack.i.l.bf16 %v8606_v31  ;;  %v6566_v27 = vpack.i.bf16 %v6453_v26, %v6413_v33 }
 0x2d7   : > { %3041 = vrot.lane.b32.xlu1 %v3010_v25, %s11470_s20  ;;  %v6518_v31 = vunpack.i.h.bf16 %v8646_v28  ;;  %v6568_v2 = vpack.i.bf16 %v6457_v19, %v6417_v42  ;;  %v6418_v28 = vunpack.i.h.bf16 %v8181_v17 }
 0x2d8   : > { %1882 = vmatpush.msra.mxu1 %v6473_v46  ;;  %v6523_v46 = vunpack.i.h.bf16 %v8565_v45  ;;  %v8707_v60 = vpop.permute.xlu2 %1974 }
 0x2d9   : > { %v6526_v15 = vpop.permute.xlu1 %6525  ;;  %6561 = vxpose.xlu0.b32.cont [9/16] (narrow) %v6560_v6, 8  ;;  %v6522_v6 = vunpack.i.l.bf16 %v8565_v45  ;;  %v6508_v45 = vunpack.i.h.bf16 %v8615_v35  ;;  %v6570_v9 = vpack.i.bf16 %v6458_v39, %v6418_v28 }
 0x2da   : > { %1883 = vmatpush.msra.mxu1 %v6472_v14  ;;  %v6528_v25 = vunpack.i.h.bf16 %v6526_v15  ;;  %v6527_v4 = vunpack.i.l.bf16 %v6526_v15  ;;  %v6513_v14 = vunpack.i.h.bf16 %v11620_v13  ;;  %v6512_v15 = vunpack.i.l.bf16 %v11620_v13 }
 0x2dc   : > { %1884 = vmatpush.msra.mxu1 %v6468_v57  ;;  %v6507_v57 = vunpack.i.l.bf16 %v8615_v35 }
 0x2de   : > { %1885 = vmatpush.msra.mxu1 %v6467_v55  ;;  %3043 = vrot.lane.b32.xlu2 %v3024_v54, %s11470_s20  ;;  %v6462_v54 = vunpack.i.l.bf16 %v11621_v23  ;;  %v11622_v55 = vld [vmem:[#allocation11_spill] sm:$0xff] }
 0x2df   : > { %v6422_v12 = vunpack.i.l.bf16 %v11622_v55 }
 0x2e0   : > { %v8711_v17 = vpop.permute.xlu2 %1980 }
 0x2e1   : > { %v6536_v32 = vpop.permute.xlu1 %6535  ;;  %6563 = vxpose.xlu0.b32.cont [10/16] (narrow) %v6562_v51, 8  ;;  %v6572_v38 = vpack.i.bf16 %v6462_v54, %v6422_v12  ;;  %v6423_v51 = vunpack.i.h.bf16 %v11622_v55 }
 0x2e2   : > { %v6538_v8 = vunpack.i.h.bf16 %v6536_v32  ;;  %v6537_v34 = vunpack.i.l.bf16 %v6536_v32 }
 0x2e3   : > { %v6574_v40 = vpack.i.bf16 %v6463_v62, %v6423_v51  ;;  %v11629_v51 = vld [vmem:[#allocation57_spill] sm:$0xff] }
 0x2e4   : > { %1892 = vmatpush.msra.mxu2 %v6538_v8 }
 0x2e6   : > { %1893 = vmatpush.msra.mxu2 %v6537_v34  ;;  %3109 = vrot.lane.b32.xlu2 %v3078_v56, %s6808_s21 }
 0x2e8   : > { %1894 = vmatpush.msra.mxu2 %v6533_v47  ;;  %v8715_v8 = vpop.permute.xlu2 %1984 }
 0x2e9   : > { %6565 = vxpose.xlu0.b32.cont [11/16] (narrow) %v6564_v20, 8  ;;  %v8709_v35 = vpop.permute.xlu1 %1978 }
 0x2ea   : > { %1895 = vmatpush.msra.mxu2 %v6532_v5  ;;  %v1001_v5 = vpop.f32.mrf.mxu0 }
 0x2ec   : > { %1896 = vmatpush.msra.mxu2 %v6528_v25 }
 0x2ee   : > { %1897 = vmatpush.msra.mxu2 %v6527_v4  ;;  %v1025_v4 = vstv %s1024_s22  ;;  %s6810_s22 = smov 4  }
 0x2f0   : > { %1898 = vmatpush.msra.mxu2 %v6523_v46  ;;  %v8719_v56 = vpop.permute.xlu2 %1988 }
 0x2f1   : > { %6567 = vxpose.xlu0.b32.cont [12/16] (narrow) %v6566_v27, 8  ;;  %v8713_v32 = vpop.permute.xlu1 %1982  ;;  %11624 = vst [vmem:[#allocation13_spill] sm:$0xff] %v8719_v56 }
 0x2f2   : > { %1899 = vmatpush.msra.mxu2 %v6522_v6 }
 0x2f4   : > { %1900 = vmatpush.msra.mxu2 %v6518_v31 }
 0x2f6   : > { %1901 = vmatpush.msra.mxu2 %v6517_v36 }
 0x2f8   : > { %1902 = vmatpush.msra.mxu2 %v6513_v14  ;;  %v8723_v16 = vpop.permute.xlu2 %1992 }
 0x2f9   : > { %6569 = vxpose.xlu0.b32.cont [13/16] (narrow) %v6568_v2, 8  ;;  %v8717_v44 = vpop.permute.xlu1 %1986  ;;  %11626 = vst [vmem:[#allocation68_spill] sm:$0xff] %v8723_v16 }
 0x2fa   : > { %1903 = vmatpush.msra.mxu2 %v6512_v15  ;;  %11623 = vst [vmem:[#allocation65_spill] sm:$0xff] %v8717_v44 }
 0x2fc   : > { %1904 = vmatpush.msra.mxu2 %v6508_v45 }
 0x2fe   : > { %1905 = vmatpush.msra.mxu2 %v6507_v57 }
 0x300   : > { %v8727_v27 = vpop.permute.xlu2 %2701 }
 0x301   : > { %6571 = vxpose.xlu0.b32.cont [14/16] (narrow) %v6570_v9, 8  ;;  %v8721_v34 = vpop.permute.xlu1 %1990 }
 0x302   : > { %11625 = vst [vmem:[#allocation66_spill] sm:$0xff] %v8721_v34 }
 0x308   : > { %v8732_v14 = vpop.permute.xlu2 %2767 }
 0x309   : > { %6573 = vxpose.xlu0.b32.cont [15/16] (narrow) %v6572_v38, 8  ;;  %v8725_v25 = vpop.permute.xlu1 %1994  ;;  %v11628_v38 = vld [vmem:[#allocation51_spill] sm:$0xff] }
 0x30a   : > { %11627 = vst [vmem:[#allocation29_spill] sm:$0xff] %v8725_v25  ;;  %v3051_v62 = vrot.slane %v11628_v38, 7  ;;  %v2983_v25 = vrot.slane %v11628_v38, 6  ;;  %v11635_v38 = vld [vmem:[#allocation60_spill] sm:$0xff] }
 0x310   : > { %v8736_v9 = vpop.permute.xlu2 %2773 }
 0x311   : > { %6575 = vxpose.xlu0.b32.end [16/16] (narrow) %v6574_v40, 8  ;;  %v8730_v42 = vpop.permute.xlu1 %2699  ;;  %v3052_v40 = vrot.slane %v11629_v51, 6 }
 0x319   : > { %v8734_v57 = vpop.permute.xlu1 %2705 }
 0x321   : > { %v8738_v54 = vpop.permute.xlu1 %2771 }
 0x33d   : > { %v6576_v47 = vpop.trf.xlu0 }
 0x33e   : > { %v6580_v20 = vunpack.i.h.bf16 %v6576_v47  ;;  %v6577_v6 = vunpack.i.l.bf16 %v6576_v47  ;;  %v11630_v47 = vld [vmem:[#allocation58_spill] sm:$0xff] }
 0x340   : > { %1906 = vmatmul.f32.vlgmr.msra.gmra.mxu2 %v6580_v20  ;;  %1886 = vmatmul.f32.vlgmr.msra.gmra.mxu1 %v6577_v6  ;;  %v3054_v20 = vrot.slane %v11630_v47, 5 }
 0x341   : > { %v1021_v33 = vpop.f32.mrf.mxu3 }
 0x342   : > { %v1022_v26 = vadd.f32 %v1021_v33, %v1001_v5  ;;  %v11631_v5 = vld [vmem:[#allocation16_spill] sm:$0xff] }
 0x343   : > { %v3056_v33 = vrot.slane %v11631_v5, 4 }
 0x344   : > { %v1026_v46 = vmul.f32 %v1025_v4, %v1022_v26  ;;  %v11632_v4 = vld [vmem:[#allocation63_spill] sm:$0xff] }
 0x345   : > { %v3058_v26 = vrot.slane %v11632_v4, 3 }
 0x346   : > { %v1028_v31 = vsel %vm1027_vm11, %v1026_v46, -inf }
 0x347   : > { %v1029_v19 = vrot.slane %v1028_v31, 4 }
 0x349   : > { %v1030_v36 = vmax.f32 %v1028_v31, %v1029_v19  ;;  %v3053_v31 = vsel %vm2577_vm9, %v3052_v40, %v3051_v62  ;;  %v3060_v19 = vrot.slane %v8448_v41, 2 }
 0x34b   : > { %v1031_v13 = vrot.slane %v1030_v36, 2 }
 0x34d   : > { %v1032_v2 = vmax.f32 %v1030_v36, %v1031_v13  ;;  %v3055_v36 = vsel %vm2580_vm15, %v3054_v20, %v3053_v31  ;;  %v3062_v13 = vrot.slane %v8452_v30, 1  ;;  %v8760_v20 = vpop.permute.xlu1 %2837 }
 0x34f   : > { %v1033_v15 = vrot.slane %v1032_v2, 1 }
 0x351   : > { %v1034_v45 = vmax.f32 %v1032_v2, %v1033_v15  ;;  %v3057_v15 = vsel %vm11464_vm1, %v3056_v33, %v3055_v36  ;;  %v11633_v33 = vld [vmem:[#allocation62_spill] sm:$0xff] }
 0x352   : > { %v3093_v31 = vrot.slane %v11633_v33, 7 }
 0x353   : > { %v1035_v39 = vsub.f32 %v1026_v46, %v1034_v45  ;;  %v8746_v46 = vpop.permute.xlu2 %2839  ;;  %v3059_v45 = vsel %vm2586_vm3, %v3058_v26, %v3057_v15  ;;  %v11634_v26 = vld [vmem:[#allocation56_spill] sm:$0xff]  ;;  %v3098_v15 = vrot.slane %v8465_v1, 4 }
 0x355   : > { %v1036_v28 = vmul.f32 1.442695, %v1035_v39 }
 0x357   : > { %6590 = vpow2.f32 %v1036_v28  ;;  %v3061_v28 = vsel %vm2589_vm4, %v3060_v19, %v3059_v45  ;;  %v2986_v19 = vrot.slane %v11630_v47, 4 }
 0x35d   : > { %v6591_v23 = vpop.eup %6590 }
 0x35e   : > { %v1038_v55 = vsel %vm1027_vm11, %v6591_v23, 0.0 }
 0x35f   : > { %v1039_v12 = vrot.slane %v1038_v55, 4 }
 0x361   : > { %v1040_v6 = vadd.f32 %v1039_v12, %v1038_v55  ;;  %v2984_v55 = vrot.slane %v11629_v51, 5  ;;  %v3063_v12 = vsel %vm11466_vm5, %v3062_v13, %v3061_v28  ;;  %v3100_v28 = vrot.slane %v8516_v52, 3 }
 0x362   : > { %v3064_v40 = vsel %vm11465_vm6, %v8487_v10, %v3063_v12  ;;  %v3102_v12 = vrot.slane %v8509_v22, 2 }
 0x363   : > { %v1041_v2 = vrot.slane %v1040_v6, 2  ;;  %3107 = vrot.lane.b32.xlu1 %v3064_v40, %s6808_s21  ;;  %v2985_v13 = vsel %vm2577_vm9, %v2984_v55, %v2983_v25  ;;  %v8772_v40 = vpop.permute.xlu2 %2905  ;;  %v3025_v55 = vrot.slane %v11633_v33, 6 }
 0x364   : > { %v2987_v56 = vsel %vm2580_vm15, %v2986_v19, %v2985_v13  ;;  %v2992_v13 = vrot.slane %v8448_v41, 1 }
 0x365   : > { %v1042_v39 = vadd.f32 %v1041_v2, %v1040_v6  ;;  %v3094_v6 = vrot.slane %v11634_v26, 6  ;;  %v3096_v2 = vrot.slane %v11635_v38, 5 }
 0x367   : > { %v1043_v62 = vrot.slane %v1042_v39, 1  ;;  %v3095_v45 = vsel %vm2577_vm9, %v3094_v6, %v3093_v31  ;;  %v3026_v31 = vrot.slane %v11634_v26, 5  ;;  %v2599_v26 = vrot.slane %v8326_v18, 6 }
 0x368   : > { %v3097_v16 = vsel %vm2580_vm15, %v3096_v2, %v3095_v45  ;;  %v2990_v2 = vrot.slane %v11632_v4, 2  ;;  %v2601_v18 = vrot.slane %v8373_v63, 5  ;;  %v3032_v63 = vrot.slane %v8516_v52, 2 }
 0x369   : > { %v1044_v36 = vadd.f32 %v1043_v62, %v1042_v39  ;;  %v3104_v39 = vrot.slane %v8528_v61, 1  ;;  %v2988_v62 = vrot.slane %v11631_v5, 3  ;;  %v3099_v34 = vsel %vm11464_vm1, %v3098_v15, %v3097_v16  ;;  %v8792_v15 = vpop.permute.xlu1 %2903 }
 0x36a   : > { %v3101_v25 = vsel %vm2586_vm3, %v3100_v28, %v3099_v34  ;;  %v3028_v34 = vrot.slane %v11635_v38, 4  ;;  %v3027_v28 = vsel %vm2577_vm9, %v3026_v31, %v3025_v55  ;;  %v3079_v31 = vrot.slane %v8493_v37, 7 }
 0x36b   : > { %6592 = vrcp.f32 %v1044_v36  ;;  %v3103_v6 = vsel %vm2589_vm4, %v3102_v12, %v3101_v25  ;;  %v2597_v36 = vrot.slane %v8310_v49, 7  ;;  %v2989_v44 = vsel %vm11464_vm1, %v2988_v62, %v2987_v56  ;;  %v8803_v62 = vpop.permute.xlu2 %2971  ;;  %v11637_v25 = vld [vmem:[#allocation15_spill] sm:$0xff] }
 0x36c   : > { %v3105_v45 = vsel %vm11466_vm5, %v3104_v39, %v3103_v6  ;;  %v2991_v12 = vsel %vm2586_vm3, %v2990_v2, %v2989_v44  ;;  %v3030_v39 = vrot.slane %v8465_v1, 3  ;;  %v3080_v6 = vrot.slane %v8497_v0, 6 }
 0x36d   : > { %v3106_v16 = vsel %vm11465_vm6, %v8540_v59, %v3105_v45  ;;  %v2598_v56 = vsel %vm2577_vm9, %v2597_v36, %v8306_v43  ;;  %v3029_v43 = vsel %vm2580_vm15, %v3028_v34, %v3027_v28  ;;  %v2993_v55 = vsel %vm2589_vm4, %v2992_v13, %v2991_v12 }
 0x36e   : > { %3113 = vrot.lane.b32.xlu1 %v3106_v16, %s6808_s21  ;;  %v2600_v44 = vsel %vm2580_vm15, %v2599_v26, %v2598_v56  ;;  %v2603_v36 = vrot.slane %v8356_v58, 4  ;;  %v2995_v2 = vrot.slane %v8487_v10, 7  ;;  %v3031_v45 = vsel %vm11464_vm1, %v3030_v39, %v3029_v43 }
 0x36f   : > { %v2602_v16 = vsel %vm11464_vm1, %v2601_v18, %v2600_v44  ;;  %v3082_v34 = vrot.slane %v8521_v7, 5  ;;  %v3034_v26 = vrot.slane %v8509_v22, 1  ;;  %v2605_v13 = vrot.slane %v8384_v29, 3  ;;  %v11638_v18 = vld [vmem:[#allocation23_spill] sm:$0xff] }
 0x370   : > { %v3033_v28 = vsel %vm2586_vm3, %v3032_v63, %v3031_v45  ;;  %v2604_v58 = vsel %vm2586_vm3, %v2603_v36, %v2602_v16  ;;  %v3084_v39 = vrot.slane %v8544_v24, 4  ;;  %v2609_v63 = vrot.slane %v8432_v53, 1 }
 0x371   : > { %v6593_v19 = vpop.eup %6592  ;;  %v8827_v56 = vpop.permute.xlu1 %2909  ;;  %v3035_v43 = vsel %vm2589_vm4, %v3034_v26, %v3033_v28  ;;  %v2606_v29 = vsel %vm2589_vm4, %v2605_v13, %v2604_v58  ;;  %v3090_v26 = vrot.slane %v8586_v50, 1 }
 0x372   : > { %v1046_v49 = vmul.f32 %v6593_v19, %v6591_v23  ;;  %v11636_v23 = vld [vmem:[#allocation17_spill] sm:$0xff]  ;;  %v2994_v19 = vsel %vm11466_vm5, %v8452_v30, %v2993_v55  ;;  %v3086_v55 = vrot.slane %v8550_v3, 3  ;;  %v3036_v36 = vsel %vm11466_vm5, %v8528_v61, %v3035_v43 }
 0x373   : > { %v2996_v12 = vsel %vm11465_vm6, %v2995_v2, %v2994_v19  ;;  %v8837_v44 = vpop.permute.xlu2 %2977  ;;  %v3088_v2 = vrot.slane %v8593_v11, 2 }
 0x374   : > { %6100 = vmatpush.msk.msra.mxu0 %vm11463_vm12, %v1046_v49  ;;  %6206 = vmatpush.msk.msrb.mxu3 %vm11463_vm12, %v1046_v49  ;;  %v3081_v49 = vsel %vm2577_vm9, %v3080_v6, %v3079_v31  ;;  %v3037_v31 = vrot.slane %v8540_v59, 7  ;;  %vm11467_vm12 = vcmask 457728  }
 0x375   : > { %6101 = vmatmul.msk.f32.vlgmr.msra.gmra.mxu0 %vm566_vm2, %v11636_v23  ;;  %6102 = vmatmul.msk.f32.vlgmr.msrb.gmra.mxu3 %vm566_vm2, %v11637_v25  ;;  %v3083_v23 = vsel %vm2580_vm15, %v3082_v34, %v3081_v49  ;;  %v2607_v25 = vrot.slane %v8407_v21, 2  ;;  %v11639_v34 = vld [vmem:[#allocation22_spill] sm:$0xff] }
 0x376   : > { %v3085_v6 = vsel %vm11464_vm1, %v3084_v39, %v3083_v23  ;;  %v3038_v16 = vsel %vm11465_vm6, %v3037_v31, %v3036_v36 }
 0x377   : > { %v2608_v21 = vsel %vm11466_vm5, %v2607_v25, %v2606_v29  ;;  %v3087_v45 = vsel %vm2586_vm3, %v3086_v55, %v3085_v6  ;;  %v11641_v25 = vld [vmem:[#allocation30_spill] sm:$0xff]  ;;  %v11642_v29 = vld [vmem:[#allocation64_spill] sm:$0xff] }
 0x378   : > { %v2610_v19 = vsel %vm11465_vm6, %v2609_v63, %v2608_v21  ;;  %v3089_v53 = vsel %vm2589_vm4, %v3088_v2, %v3087_v45  ;;  %v11643_v6 = vld [vmem:[#allocation28_spill] sm:$0xff]  ;;  %v11644_v21 = vld [vmem:[#allocation34_spill] sm:$0xff]  ;;  %v11645_v2 = vld [vmem:[#allocation33_spill] sm:$0xff] }
 0x379   : > { %v8854_v49 = vpop.permute.xlu1 %2975  ;;  %v3120_v13 = vsel %vm324_vm0, %v2610_v19, %v8727_v27  ;;  %v3091_v58 = vsel %vm11466_vm5, %v3090_v26, %v3089_v53  ;;  %v11646_v45 = vld [vmem:[#allocation38_spill] sm:$0xff]  ;;  %v1911_v53 = vstv %s6133_s19 }
 0x37a   : > { %v3092_v23 = vsel %vm11465_vm6, %v8609_v48, %v3091_v58  ;;  %v11648_v19 = vld [vmem:[#allocation42_spill] sm:$0xff]  ;;  %v11649_v58 = vld [vmem:[#allocation41_spill] sm:$0xff] }
 0x37b   : > { %v8860_v28 = vpop.permute.xlu2 %3043 }
 0x37d   : > { %6103 = vmatmul.msk.f32.gmra.mxu3 %vm566_vm2, %v11638_v18 }
 0x37f   : > { %3039 = vrot.lane.b32.xlu0 %v2996_v12, %s11470_s20  ;;  %v11640_v12 = vld [vmem:[#allocation26_spill] sm:$0xff] }
 0x380   : > { %v3125_v39 = vsel %vm3123_vm13, %v3120_v13, %v11640_v12 }
 0x381   : > { %v3130_v18 = vsel %vm11475_vm14, %v3125_v39, %v8760_v20  ;;  %v3042_v43 = vpop.permute.xlu1 %3041 }
 0x382   : > { %v3135_v27 = vsel %vm11474_vm7, %v3130_v18, %v8772_v40  ;;  %v8884_v40 = vld [vmem:[%s11378_s5] sm:$0x7] }
 0x383   : > { %v3140_v55 = vsel %vm11473_vm8, %v3135_v27, %v11642_v29  ;;  %v3110_v31 = vpop.permute.xlu2 %3109  ;;  %v3455_v36 = vperm.slane %v8884_v40, 1  ;;  %v2576_v27 = vrot.slane %v11629_v51, 7  ;;  %v2585_v51 = vrot.slane %v11632_v4, 4 }
 0x384   : > { %v3145_v20 = vsel %vm11472_vm10, %v3140_v55, %v3042_v43  ;;  %v2579_v55 = vrot.slane %v11630_v47, 6 }
 0x385   : > { %6104 = vmatmul.msk.f32.gmra.mxu3 %vm566_vm2, %v11639_v34  ;;  %v3150_v63 = vsel %vm11467_vm12, %v3145_v20, %v3110_v31  ;;  %v6677_v20 = vld [vmem:[%s6913_s23] sm:$0xff] }
 0x386   : > { %v2578_v31 = vsel %vm2577_vm9, %v2576_v27, %v6677_v20 }
 0x387   : > { %3045 = vrot.lane.b32.xlu0 %v3038_v16, %s11470_s20  ;;  %v11647_v16 = vld [vmem:[#allocation37_spill] sm:$0xff] }
 0x38d   : > { %6105 = vmatmul.msk.f32.gmra.mxu3 %vm566_vm2, %v11641_v25  ;;  %v11650_v25 = vld [vmem:[#allocation46_spill] sm:$0xff] }
 0x38f   : > { %3111 = vrot.lane.b32.xlu0 %v3092_v23, %s6808_s21 }
 0x395   : > { %6106 = vmatmul.msk.f32.gmra.mxu3 %vm566_vm2, %v11643_v6 }
 0x397   : > { %3159 = vrot.lane.b32.xlu0 %v3150_v63, %s6801_s14  ;;  %v2582_v63 = vrot.slane %v11631_v5, 5 }
 0x39d   : > { %6107 = vmatmul.msk.f32.gmra.mxu3 %vm566_vm2, %v11644_v21  ;;  %v2581_v21 = vsel %vm2580_vm15, %v2579_v55, %v2578_v31  ;;  %v2635_v31 = vrot.slane %v8528_v61, 2 }
 0x39f   : > { %3457 = vrot.lane.b32.xlu0 %v3455_v36, %s6801_s14 }
 0x3a5   : > { %6108 = vmatmul.msk.f32.gmra.mxu3 %vm566_vm2, %v11645_v2  ;;  %v11651_v2 = vld [vmem:[#allocation45_spill] sm:$0xff] }
 0x3ad   : > { %6109 = vmatmul.msk.f32.gmra.mxu3 %vm566_vm2, %v11646_v45  ;;  %v6678_v45 = vld [vmem:[%s6913_s23 + $0xc8] sm:$0xff] }
 0x3b5   : > { %6110 = vmatmul.msk.f32.gmra.mxu3 %vm566_vm2, %v11647_v16  ;;  %v2625_v16 = vrot.slane %v6678_v45, 7  ;;  %v2619_v45 = vrot.slane %v8593_v11, 3 }
 0x3b7   : > { %v2626_v5 = vsel %vm2577_vm9, %v2625_v16, %v11633_v33  ;;  %v2613_v33 = vrot.slane %v8521_v7, 6  ;;  %v6809_v16 = vmov 0.0  }
 0x3b8   : > { %2568 = vst.msk [vmem:[#allocation2 + $0x21] sm:$0xff] %vm324_vm0, %v6809_v16 }
 0x3b9   : > { %2567 = vst.msk [vmem:[#allocation2 + $0x11] sm:$0xff] %vm324_vm0, %v6809_v16 }
 0x3ba   : > { %2569 = vst.msk [vmem:[#allocation2 + $0x31] sm:$0xff] %vm324_vm0, %v6809_v16 }
 0x3bb   : > { %2570 = vst.msk [vmem:[#allocation2 + $0x41] sm:$0xff] %vm324_vm0, %v6809_v16 }
 0x3bd   : > { %6111 = vmatmul.msk.f32.gmra.mxu3 %vm566_vm2, %v11648_v19  ;;  %v1887_v26 = vpop.f32.mrf.mxu1 }
 0x3c3   : > { %v1907_v34 = vpop.f32.mrf.mxu2 }
 0x3c4   : > { %v1908_v13 = vadd.f32 %v1907_v34, %v1887_v26  ;;  %v2584_v34 = vsel %vm11464_vm1, %v2582_v63, %v2581_v21  ;;  %v2627_v26 = vrot.slane %v11635_v38, 6  ;;  %v2637_v21 = vrot.slane %v8540_v59, 1 }
 0x3c5   : > { %6112 = vmatmul.msk.f32.gmra.mxu3 %vm566_vm2, %v11649_v58  ;;  %v2629_v58 = vrot.slane %v8465_v1, 5  ;;  %v2621_v59 = vrot.slane %v8586_v50, 2 }
 0x3c6   : > { %v1912_v12 = vmul.f32 %v1911_v53, %v1908_v13  ;;  %v2588_v53 = vrot.slane %v8448_v41, 3  ;;  %v2587_v13 = vsel %vm2586_vm3, %v2585_v51, %v2584_v34  ;;  %v2628_v4 = vsel %vm2580_vm15, %v2627_v26, %v2626_v5  ;;  %v11655_v26 = vld [vmem:[#allocation82_spill] sm:$0xff] }
 0x3c7   : > { %v2631_v41 = vrot.slane %v8516_v52, 4  ;;  %v2630_v1 = vsel %vm11464_vm1, %v2629_v58, %v2628_v4  ;;  %v2615_v52 = vrot.slane %v8544_v24, 5  ;;  %v2623_v5 = vrot.slane %v8609_v48, 1 }
 0x3c8   : > { %v1913_v39 = vsel %vm1027_vm11, %v1912_v12, -inf  ;;  %v2590_v38 = vsel %vm2589_vm4, %v2588_v53, %v2587_v13 }
 0x3c9   : > { %v1914_v18 = vrot.slane %v1913_v39, 4  ;;  %v2632_v55 = vsel %vm2586_vm3, %v2631_v41, %v2630_v1 }
 0x3cb   : > { %v1915_v23 = vmax.f32 %v1913_v39, %v1914_v18  ;;  %v2611_v39 = vrot.slane %v8497_v0, 7  ;;  %v11652_v18 = vld [vmem:[#allocation50_spill] sm:$0xff] }
 0x3cd   : > { %6113 = vmatmul.msk.f32.gmra.mxu3 %vm566_vm2, %v11650_v25  ;;  %v1916_v43 = vrot.slane %v1915_v23, 2  ;;  %v2594_v25 = vrot.slane %v8487_v10, 1 }
 0x3cf   : > { %v1917_v29 = vmax.f32 %v1915_v23, %v1916_v43  ;;  %v2633_v43 = vrot.slane %v8509_v22, 3 }
 0x3d1   : > { %v1918_v6 = vrot.slane %v1917_v29, 1  ;;  %v2634_v63 = vsel %vm2589_vm4, %v2633_v43, %v2632_v55  ;;  %v11663_v55 = vld [vmem:[#allocation61_spill] sm:$0xff] }
 0x3d2   : > { %v2636_v61 = vsel %vm11466_vm5, %v2635_v31, %v2634_v63  ;;  %v11667_v63 = vld [vmem:[#allocation25_spill] sm:$0xff] }
 0x3d3   : > { %v1919_v36 = vmax.f32 %v1917_v29, %v1918_v6  ;;  %v2617_v6 = vrot.slane %v8550_v3, 4  ;;  %v2638_v11 = vsel %vm11465_vm6, %v2637_v21, %v2636_v61  ;;  %v11670_v61 = vld [vmem:[#allocation74_spill] sm:$0xff] }
 0x3d4   : > { %v3122_v13 = vsel %vm324_vm0, %v2638_v11, %v8734_v57  ;;  %v11675_v11 = vld [vmem:[#allocation35_spill] sm:$0xff] }
 0x3d5   : > { %6114 = vmatmul.msk.f32.gmra.mxu3 %vm566_vm2, %v11651_v2  ;;  %v1920_v19 = vsub.f32 %v1912_v12, %v1919_v36  ;;  %v2591_v12 = vrot.slane %v8452_v30, 2  ;;  %v2612_v30 = vsel %vm2577_vm9, %v2611_v39, %v8493_v37  ;;  %v11653_v37 = vld [vmem:[#allocation49_spill] sm:$0xff]  ;;  %v3108_v53 = vpop.permute.xlu1 %3107  ;;  %v3127_v48 = vsel %vm3123_vm13, %v3122_v13, %v8736_v9  ;;  %v11684_v13 = vld [vmem:[#allocation44_spill] sm:$0xff] }
 0x3d6   : > { %v2614_v7 = vsel %vm2580_vm15, %v2613_v33, %v2612_v30  ;;  %v11658_v33 = vld [vmem:[#allocation84_spill] sm:$0xff] }
 0x3d7   : > { %v1921_v47 = vmul.f32 1.442695, %v1920_v19  ;;  %v2593_v0 = vsel %vm11466_vm5, %v2591_v12, %v2590_v38  ;;  %v2616_v36 = vsel %vm11464_vm1, %v2615_v52, %v2614_v7  ;;  %vm2571_vm1 = vcmask 654912   ;;  %v11657_v38 = vld [vmem:[#allocation18_spill] sm:$0xff] }
 0x3d8   : > { %v2596_v10 = vsel %vm11465_vm6, %v2594_v25, %v2593_v0  ;;  %v2618_v3 = vsel %vm2586_vm3, %v2617_v6, %v2616_v36  ;;  %2573 = vst.msk [vmem:[#allocation2 + $0x21] sm:$0xff] %vm2571_vm1, %v6809_v16  ;;  %v11662_v0 = vld [vmem:[#allocation19_spill] sm:$0xff]  ;;  %v11666_v6 = vld [vmem:[#allocation69_spill] sm:$0xff] }
 0x3d9   : > { %6594 = vpow2.f32 %v1921_v47  ;;  %v3119_v24 = vsel %vm324_vm0, %v2596_v10, %v8730_v42  ;;  %v2620_v34 = vsel %vm2589_vm4, %v2619_v45, %v2618_v3  ;;  %v11654_v47 = vld [vmem:[#allocation10_spill] sm:$0xff]  ;;  %2572 = vst.msk [vmem:[#allocation2 + $0x11] sm:$0xff] %vm2571_vm1, %v6809_v16  ;;  %v11664_v10 = vld [vmem:[#allocation59_spill] sm:$0xff] }
 0x3da   : > { %v3124_v19 = vsel %vm3123_vm13, %v3119_v24, %v8732_v14  ;;  %v2622_v58 = vsel %vm11466_vm5, %v2621_v59, %v2620_v34  ;;  %2574 = vst.msk [vmem:[#allocation2 + $0x31] sm:$0xff] %vm2571_vm1, %v6809_v16  ;;  %v11671_v3 = vld [vmem:[#allocation31_spill] sm:$0xff]  ;;  %v11674_v59 = vld [vmem:[#allocation76_spill] sm:$0xff] }
 0x3db   : > { %v3129_v14 = vsel %vm11475_vm14, %v3124_v19, %v11654_v47  ;;  %v2624_v12 = vsel %vm11465_vm6, %v2623_v5, %v2622_v58  ;;  %vm11659_vm6 = vcmask 1043456   ;;  %2575 = vst.msk [vmem:[#allocation2 + $0x41] sm:$0xff] %vm2571_vm1, %v6809_v16  ;;  %vm3169_vm1 = vcmask 588864   ;;  %v11672_v19 = vld [vmem:[#allocation70_spill] sm:$0xff]  ;;  %v11677_v34 = vld [vmem:[#allocation72_spill] sm:$0xff]  ;;  %v11683_v5 = vld [vmem:[#allocation73_spill] sm:$0xff] }
 0x3dc   : > { %v3134_v50 = vsel %vm11474_vm7, %v3129_v14, %v8792_v15  ;;  %v3121_v25 = vsel %vm324_vm0, %v2624_v12, %v11658_v33  ;;  %vm11660_vm5 = vmmov %vm11659_vm6  ;;  %v11678_v47 = vld [vmem:[#allocation40_spill] sm:$0xff]  ;;  %v11685_v58 = vld [vmem:[#allocation79_spill] sm:$0xff] }
 0x3dd   : > { %6115 = vmatmul.msk.f32.gmra.mxu3 %vm566_vm2, %v11652_v18  ;;  %v3139_v15 = vsel %vm11473_vm8, %v3134_v50, %v8803_v62  ;;  %v11656_v18 = vld [vmem:[#allocation55_spill] sm:$0xff]  ;;  %v3126_v30 = vsel %vm3123_vm13, %v3121_v25, %v8738_v54  ;;  %v11689_v12 = vld [vmem:[#allocation48_spill] sm:$0xff]  ;;  %v9121_v25 = vld [vmem:[%s11378_s5 + $0x4] sm:$0x7] }
 0x3de   : > { %v3132_v9 = vsel %vm11475_vm14, %v3127_v48, %v11656_v18  ;;  %v3131_v43 = vsel %vm11475_vm14, %v3126_v30, %v8746_v46  ;;  %v11681_v50 = vld [vmem:[#allocation39_spill] sm:$0xff]  ;;  %v3484_v30 = vperm.slane %v9121_v25, 1 }
 0x3df   : > { %v8927_v23 = vpop.eup %6594  ;;  %v3137_v1 = vsel %vm11474_vm7, %v3132_v9, %v8827_v56  ;;  %v3136_v7 = vsel %vm11474_vm7, %v3131_v43, %v11663_v55  ;;  %v11688_v48 = vld [vmem:[#allocation75_spill] sm:$0xff]  ;;  %v11701_v55 = vld [vmem:[#allocation21_spill] sm:$0xff] }
 0x3e0   : > { %v1923_v27 = vsel %vm1027_vm11, %v8927_v23, 0.0  ;;  %vm2558_vm11 = vcmask 647168   ;;  %v3114_v56 = vpop.permute.xlu1 %3113  ;;  %v3142_v54 = vsel %vm11473_vm8, %v3137_v1, %v8837_v44  ;;  %v3141_v44 = vsel %vm11473_vm8, %v3136_v7, %v8854_v49  ;;  %v11668_v49 = vld [vmem:[#allocation24_spill] sm:$0xff]  ;;  %v11694_v1 = vld [vmem:[#allocation77_spill] sm:$0xff]  ;;  %v11702_v7 = vld [vmem:[#allocation67_spill] sm:$0xff] }
 0x3e1   : > { %v1924_v29 = vrot.slane %v1923_v27, 4  ;;  %2560 = vst.msk [vmem:[#allocation2 + $0x20] sm:$0x1] %vm2558_vm11, %v6809_v16  ;;  %v3146_v46 = vsel %vm11472_vm10, %v3141_v44, %v8860_v28  ;;  %v11669_v28 = vld [vmem:[#allocation32_spill] sm:$0xff]  ;;  %v11704_v44 = vld [vmem:[#allocation83_spill] sm:$0xff] }
 0x3e2   : > { %2561 = vst.msk [vmem:[#allocation2 + $0x30] sm:$0x1] %vm2558_vm11, %v6809_v16 }
 0x3e3   : > { %v1925_v20 = vadd.f32 %v1924_v29, %v1923_v27  ;;  %2564 = vst.msk [vmem:[#allocation2 + $0x29] sm:$0x1] %vm2558_vm11, %v6809_v16 }
 0x3e4   : > { %2559 = vst.msk [vmem:[#allocation2 + $0x10] sm:$0x1] %vm2558_vm11, %v6809_v16 }
 0x3e5   : > { %6116 = vmatmul.msk.f32.gmra.mxu3 %vm566_vm2, %v11653_v37  ;;  %v1926_v22 = vrot.slane %v1925_v20, 2  ;;  %2562 = vst.msk [vmem:[#allocation2 + $0x40] sm:$0x1] %vm2558_vm11, %v6809_v16 }
 0x3e6   : > { %2563 = vst.msk [vmem:[#allocation2 + $0x19] sm:$0x1] %vm2558_vm11, %v6809_v16 }
 0x3e7   : > { %v1927_v2 = vadd.f32 %v1926_v22, %v1925_v20  ;;  %2565 = vst.msk [vmem:[#allocation2 + $0x39] sm:$0x1] %vm2558_vm11, %v6809_v16  ;;  %v11665_v20 = vld [vmem:[#allocation27_spill] sm:$0xff] }
 0x3e8   : > { %2566 = vst.msk [vmem:[#allocation2 + $0x49] sm:$0x1] %vm2558_vm11, %v6809_v16  ;;  %vm2550_vm11 = vcmask 654336  }
 0x3e9   : > { %v1928_v51 = vrot.slane %v1927_v2, 1  ;;  %2551 = vst.msk [vmem:[#allocation2] sm:$0xff] %vm2550_vm11, %v6809_v16 }
 0x3ea   : > { %2555 = vst.msk [vmem:[#allocation2 + $0x50] sm:$0xff] %vm2550_vm11, %v6809_v16  ;;  %vm3268_vm11 = vcmask 1045504  }
 0x3eb   : > { %v1929_v42 = vadd.f32 %v1928_v51, %v1927_v2  ;;  %v11673_v51 = vld [vmem:[#allocation36_spill] sm:$0xff] }
 0x3ed   : > { %6117 = vmatmul.msk.f32.gmra.mxu3 %vm566_vm2, %v11655_v26  ;;  %6596 = vrcp.f32 %v1929_v42  ;;  %v11680_v26 = vld [vmem:[#allocation78_spill] sm:$0xff] }
 0x3f0   : > { %v9054_v36 = vld [vmem:[#allocation2] sm:$0xff] }
 0x3f1   : > { %v3040_v39 = vpop.permute.xlu0 %3039 }
 0x3f2   : > { %v3144_v57 = vsel %vm11472_vm10, %v3139_v15, %v3040_v39  ;;  %v11687_v39 = vld [vmem:[#allocation43_spill] sm:$0xff] }
 0x3f3   : > { %v3149_v4 = vsel %vm11467_vm12, %v3144_v57, %v3108_v53  ;;  %v6597_v62 = vpop.eup %6596 }
 0x3f4   : > { %3157 = vrot.lane.b32.xlu2 %v3149_v4, %s6801_s14  ;;  %v1931_v41 = vmul.f32 %v6597_v62, %v8927_v23  ;;  %v11661_v23 = vld [vmem:[#allocation20_spill] sm:$0xff] }
 0x3f5   : > { %6118 = vmatmul.msk.f32.gmra.mxu3 %vm566_vm2, %v11657_v38  ;;  %v11691_v62 = vld [vmem:[#allocation80_spill] sm:$0xff] }
 0x3f6   : > { %6134 = vmatpush.msk.msra.mxu0 %vm11659_vm6, %v1931_v41  ;;  %6207 = vmatpush.msk.msrb.mxu1 %vm11660_vm5, %v1931_v41  ;;  %v11692_v41 = vld [vmem:[#allocation47_spill] sm:$0xff]  ;;  %vm2552_vm5 = vcmask 648192   ;;  %vm3230_vm6 = vcmask 1046528  }
 0x3f7   : > { %6135 = vmatmul.msk.f32.vlgmr.msra.gmra.mxu0 %vm566_vm2, %v11661_v23  ;;  %6136 = vmatmul.msk.f32.vlgmr.msrb.gmra.mxu1 %vm566_vm2, %v11662_v0  ;;  %v11695_v23 = vld [vmem:[#allocation53_spill] sm:$0xff]  ;;  %2553 = vst.msk [vmem:[#allocation2 + $0x8] sm:$0x3] %vm2552_vm5, %v6809_v16 }
 0x3f8   : > { %v9076_v42 = vpop.f32.mrf.mxu3  ;;  %2556 = vst.msk [vmem:[#allocation2 + $0x58] sm:$0x3] %vm2552_vm5, %v6809_v16 }
 0x3f9   : > { %v3046_v27 = vpop.permute.xlu0 %3045  ;;  %11676 = vst [vmem:[#allocation14_spill] sm:$0xff] %v9076_v42 }
 0x3fa   : > { %v3147_v29 = vsel %vm11472_vm10, %v3142_v54, %v3046_v27  ;;  %v11698_v54 = vld [vmem:[#allocation52_spill] sm:$0xff] }
 0x3fb   : > { %v3152_v52 = vsel %vm11467_vm12, %v3147_v29, %v3114_v56  ;;  %v11697_v56 = vld [vmem:[#allocation81_spill] sm:$0xff]  ;;  %v11699_v27 = vld [vmem:[#allocation12_spill] sm:$0xff] }
 0x3fc   : > { %3163 = vrot.lane.b32.xlu2 %v3152_v52, %s6801_s14  ;;  %v11700_v29 = vld [vmem:[#allocation9_spill] sm:$0xff] }
 0x3fd   : > { %6119 = vmatmul.msk.f32.gmra.mxu3 %vm566_vm2, %v11664_v10  ;;  %v11703_v10 = vld [vmem:[#allocation71_spill] sm:$0xff] }
 0x3ff   : > { %6137 = vmatmul.msk.f32.gmra.mxu1 %vm566_vm2, %v11665_v20 }
 0x400   : > { %v9082_v14 = vpop.f32.mrf.mxu3 }
 0x401   : > { %v3112_v31 = vpop.permute.xlu0 %3111  ;;  %11679 = vst [vmem:[#allocation54_spill] sm:$0xff] %v9082_v14 }
 0x402   : > { %v3151_v37 = vsel %vm11467_vm12, %v3146_v46, %v3112_v31 }
 0x403   : > { %3161 = vrot.lane.b32.xlu1 %v3151_v37, %s6801_s14 }
 0x405   : > { %6120 = vmatmul.msk.f32.gmra.mxu3 %vm566_vm2, %v11666_v6 }
 0x407   : > { %6138 = vmatmul.msk.f32.gmra.mxu1 %vm566_vm2, %v11667_v63 }
 0x408   : > { %v9088_v53 = vpop.f32.mrf.mxu3 }
 0x409   : > { %v3160_v22 = vpop.permute.xlu0 %3159  ;;  %11682 = vst [vmem:[#allocation11_spill] sm:$0xff] %v9088_v53 }
 0x40a   : > { %3171 = vst.msk [vmem:[#allocation2 + $0x21] sm:$0xff] %vm3169_vm1, %v3160_v22 }
 0x40d   : > { %6121 = vmatmul.msk.f32.gmra.mxu3 %vm566_vm2, %v11668_v49 }
 0x40f   : > { %6139 = vmatmul.msk.f32.gmra.mxu1 %vm566_vm2, %v11669_v28 }
 0x410   : > { %v9096_v15 = vpop.f32.mrf.mxu3 }
 0x411   : > { %v9058_v24 = vld [vmem:[#allocation2 + $0x20] sm:$0xff]  ;;  %v3458_v21 = vpop.permute.xlu0 %3457  ;;  %11686 = vst [vmem:[#allocation51_spill] sm:$0xff] %v9096_v15  ;;  %v9168_v37 = vld [vmem:[#allocation2 + $0x28] sm:$0x3] }
 0x412   : > { %v3462_v2 = vmul.f32 %v3458_v21, %v9058_v24  ;;  %v3460_v45 = vmul.f32 %v3458_v21, %v9054_v36 }
 0x414   : > { %3472 = vrot.lane.b32.xlu0 %v3462_v2, %s6799_s9  ;;  %3468 = vrot.lane.b32.xlu1 %v3460_v45, %s6799_s9 }
 0x415   : > { %6122 = vmatmul.msk.f32.gmra.mxu3 %vm566_vm2, %v11670_v61 }
 0x417   : > { %6140 = vmatmul.msk.f32.gmra.mxu1 %vm566_vm2, %v11671_v3 }
 0x418   : > { %v9105_v4 = vpop.f32.mrf.mxu3 }
 0x419   : > { %11690 = vst [vmem:[#allocation57_spill] sm:$0xff] %v9105_v4  ;;  %v9378_v4 = vld [vmem:[#allocation2 + $0x58] sm:$0x3] }
 0x41d   : > { %6123 = vmatmul.msk.f32.gmra.mxu3 %vm566_vm2, %v11672_v19 }
 0x41f   : > { %6141 = vmatmul.msk.f32.gmra.mxu1 %vm566_vm2, %v11673_v51 }
 0x420   : > { %v9116_v33 = vpop.f32.mrf.mxu3 }
 0x421   : > { %11693 = vst [vmem:[#allocation58_spill] sm:$0xff] %v9116_v33 }
 0x425   : > { %6124 = vmatmul.msk.f32.gmra.mxu3 %vm566_vm2, %v11674_v59 }
 0x427   : > { %6142 = vmatmul.msk.f32.gmra.mxu1 %vm566_vm2, %v11675_v11 }
 0x428   : > { %v9131_v0 = vpop.f32.mrf.mxu3 }
 0x429   : > { %11696 = vst [vmem:[#allocation16_spill] sm:$0xff] %v9131_v0 }
 0x42d   : > { %6125 = vmatmul.msk.f32.gmra.mxu3 %vm566_vm2, %v11677_v34 }
 0x42f   : > { %6143 = vmatmul.msk.f32.gmra.mxu1 %vm566_vm2, %v11678_v47 }
 0x435   : > { %6126 = vmatmul.msk.f32.gmra.mxu3 %vm566_vm2, %v11680_v26 }
 0x437   : > { %6144 = vmatmul.msk.f32.gmra.mxu1 %vm566_vm2, %v11681_v50 }
 0x43d   : > { %6127 = vmatmul.msk.f32.gmra.mxu3 %vm566_vm2, %v11683_v5 }
 0x43f   : > { %6145 = vmatmul.msk.f32.gmra.mxu1 %vm566_vm2, %v11684_v13 }
 0x445   : > { %6128 = vmatmul.msk.f32.gmra.mxu3 %vm566_vm2, %v11685_v58 }
 0x447   : > { %6146 = vmatmul.msk.f32.gmra.mxu1 %vm566_vm2, %v11687_v39  ;;  %v11707_v39 = vld [vmem:[#allocation65_spill] sm:$0xff] }
 0x44d   : > { %6129 = vmatmul.msk.f32.gmra.mxu3 %vm566_vm2, %v11688_v48 }
 0x44e   : > { %v3158_v57 = vpop.permute.xlu2 %3157 }
 0x44f   : > { %3170 = vst.msk [vmem:[#allocation2 + $0x11] sm:$0xff] %vm3169_vm1, %v3158_v57  ;;  %6147 = vmatmul.msk.f32.gmra.mxu1 %vm566_vm2, %v11689_v12  ;;  %v11709_v12 = vld [vmem:[#allocation13_spill] sm:$0xff] }
 0x455   : > { %6130 = vmatmul.msk.f32.gmra.mxu3 %vm566_vm2, %v11691_v62 }
 0x456   : > { %v9109_v18 = vld [vmem:[#allocation2 + $0x10] sm:$0xff]  ;;  %v3164_v9 = vpop.permute.xlu2 %3163  ;;  %v9172_v63 = vld [vmem:[#allocation2 + $0x18] sm:$0x3] }
 0x457   : > { %3173 = vst.msk [vmem:[#allocation2 + $0x41] sm:$0xff] %vm3169_vm1, %v3164_v9  ;;  %v3461_v38 = vmul.f32 %v3458_v21, %v9109_v18  ;;  %6148 = vmatmul.msk.f32.gmra.mxu1 %vm566_vm2, %v11692_v41  ;;  %v11711_v9 = vld [vmem:[#allocation66_spill] sm:$0xff]  ;;  %v11713_v41 = vld [vmem:[#allocation68_spill] sm:$0xff] }
 0x459   : > { %3470 = vrot.lane.b32.xlu2 %v3461_v38, %s6799_s9 }
 0x45d   : > { %6131 = vmatmul.msk.f32.gmra.mxu3 %vm566_vm2, %v11694_v1 }
 0x45f   : > { %6149 = vmatmul.msk.f32.gmra.mxu1 %vm566_vm2, %v11695_v23 }
 0x461   : > { %3486 = vrot.lane.b32.xlu2 %v3484_v30, %s6801_s14  ;;  %v11715_v30 = vld [vmem:[#allocation29_spill] sm:$0xff] }
 0x465   : > { %6132 = vmatmul.msk.f32.gmra.mxu3 %vm566_vm2, %v11697_v56 }
 0x467   : > { %6150 = vmatmul.msk.f32.gmra.mxu1 %vm566_vm2, %v11698_v54 }
 0x46f   : > { %6151 = vmatmul.msk.f32.gmra.mxu1 %vm566_vm2, %v11699_v27 }
 0x474   : > { %v9158_v20 = vpop.f32.mrf.mxu1 }
 0x475   : > { %v3162_v43 = vpop.permute.xlu1 %3161 }
 0x476   : > { %3172 = vst.msk [vmem:[#allocation2 + $0x31] sm:$0xff] %vm3169_vm1, %v3162_v43 }
 0x477   : > { %6152 = vmatmul.msk.f32.gmra.mxu1 %vm566_vm2, %v11700_v29 }
 0x47c   : > { %v9164_v31 = vpop.f32.mrf.mxu1 }
 0x47d   : > { %v9142_v52 = vld [vmem:[#allocation2 + $0x30] sm:$0xff]  ;;  %v9180_v3 = vld [vmem:[#allocation2 + $0x38] sm:$0x3] }
 0x47e   : > { %v3463_v16 = vmul.f32 %v3458_v21, %v9142_v52 }
 0x47f   : > { %6153 = vmatmul.msk.f32.gmra.mxu1 %vm566_vm2, %v11701_v55 }
 0x480   : > { %3474 = vrot.lane.b32.xlu1 %v3463_v16, %s6799_s9 }
 0x484   : > { %v9182_v59 = vpop.f32.mrf.mxu1 }
 0x485   : > { %11706 = vst [vmem:[#allocation62_spill] sm:$0xff] %v9182_v59 }
 0x486   : > { %v9221_v23 = vpop.permute.xlu1 %3468 }
 0x487   : > { %6154 = vmatmul.msk.f32.gmra.mxu1 %vm566_vm2, %v11702_v7 }
 0x48c   : > { %v9204_v57 = vpop.f32.mrf.mxu1 }
 0x48d   : > { %11708 = vst [vmem:[#allocation56_spill] sm:$0xff] %v9204_v57 }
 0x48f   : > { %6155 = vmatmul.msk.f32.gmra.mxu1 %vm566_vm2, %v11703_v10 }
 0x494   : > { %v9209_v62 = vpop.f32.mrf.mxu1 }
 0x495   : > { %11710 = vst [vmem:[#allocation60_spill] sm:$0xff] %v9209_v62 }
 0x497   : > { %6156 = vmatmul.msk.f32.gmra.mxu1 %vm566_vm2, %v8707_v60  ;;  %v9170_v60 = vld [vmem:[#allocation2 + $0x8] sm:$0x3] }
 0x49c   : > { %v9213_v38 = vpop.f32.mrf.mxu1 }
 0x49d   : > { %11712 = vst [vmem:[#allocation17_spill] sm:$0xff] %v9213_v38 }
 0x49f   : > { %6157 = vmatmul.msk.f32.gmra.mxu1 %vm566_vm2, %v11704_v44 }
 0x4a4   : > { %v9217_v1 = vpop.f32.mrf.mxu1 }
 0x4a5   : > { %11714 = vst [vmem:[#allocation15_spill] sm:$0xff] %v9217_v1 }
 0x4a7   : > { %6158 = vmatmul.msk.f32.gmra.mxu1 %vm566_vm2, %v8709_v35 }
 0x4af   : > { %6159 = vmatmul.msk.f32.gmra.mxu1 %vm566_vm2, %v8711_v17 }
 0x4b3   : > { %v9162_v46 = vpop.permute.xlu2 %3470 }
 0x4b4   : > { %11705 = vst [vmem:[#allocation63_spill] sm:$0xff] %v9162_v46 }
 0x4b7   : > { %6160 = vmatmul.msk.f32.gmra.mxu1 %vm566_vm2, %v8713_v32 }
 0x4bb   : > { %v3487_v6 = vpop.permute.xlu2 %3486 }
 0x4bc   : > { %v3493_v35 = vmul.f32 %v3487_v6, %v9058_v24  ;;  %v3494_v22 = vmul.f32 %v3487_v6, %v9168_v37  ;;  %v3489_v17 = vmul.f32 %v3487_v6, %v9054_v36  ;;  %v3490_v49 = vmul.f32 %v3487_v6, %v9170_v60 }
 0x4bd   : > { %v3491_v28 = vmul.f32 %v3487_v6, %v9109_v18  ;;  %v3492_v21 = vmul.f32 %v3487_v6, %v9172_v63  ;;  %v3495_v47 = vmul.f32 %v3487_v6, %v9142_v52  ;;  %v3496_v26 = vmul.f32 %v3487_v6, %v9180_v3 }
 0x4be   : > { %v3511_v32 = vrot.slane %v3493_v35, 1  ;;  %v3512_v2 = vrot.slane %v3494_v22, 1  ;;  %v3505_v45 = vrot.slane %v3489_v17, 1  ;;  %v3506_v61 = vrot.slane %v3490_v49, 1 }
 0x4bf   : > { %v3508_v19 = vrot.slane %v3491_v28, 1  ;;  %v3509_v51 = vrot.slane %v3492_v21, 1  ;;  %6161 = vmatmul.msk.f32.gmra.mxu1 %vm566_vm2, %v8715_v8  ;;  %v3514_v5 = vrot.slane %v3495_v47, 1  ;;  %v3515_v13 = vrot.slane %v3496_v26, 1  ;;  %v9197_v8 = vld [vmem:[%s11378_s5 + $0x8] sm:$0x7]  ;;  %v9250_v47 = vpop.permute.xlu0 %3472 }
 0x4c0   : > { %v3513_v11 = vsel %vm3230_vm6, %v3511_v32, %v3512_v2  ;;  %v3507_v34 = vsel %vm3230_vm6, %v3505_v45, %v3506_v61  ;;  %v3533_v58 = vperm.slane %v9197_v8, 1  ;;  %v9244_v61 = vld [vmem:[%s11378_s5 + $0xc] sm:$0x7] }
 0x4c1   : > { %3521 = vrot.lane.b32.xlu2 %v3513_v11, %s6799_s9  ;;  %3517 = vrot.lane.b32.xlu0 %v3507_v34, %s6799_s9  ;;  %v3510_v50 = vsel %vm3230_vm6, %v3508_v19, %v3509_v51  ;;  %v3516_v48 = vsel %vm3230_vm6, %v3514_v5, %v3515_v13  ;;  %v3582_v19 = vperm.slane %v9244_v61, 1 }
 0x4c2   : > { %3519 = vrot.lane.b32.xlu1 %v3510_v50, %s6799_s9 }
 0x4c7   : > { %6162 = vmatmul.msk.f32.gmra.mxu1 %vm566_vm2, %v11707_v39 }
 0x4c9   : > { %3523 = vrot.lane.b32.xlu0 %v3516_v48, %s6799_s9 }
 0x4ca   : > { %3535 = vrot.lane.b32.xlu1 %v3533_v58, %s6801_s14 }
 0x4cf   : > { %6163 = vmatmul.msk.f32.gmra.mxu1 %vm566_vm2, %v11709_v12  ;;  %v9267_v12 = vld [vmem:[%s11378_s5 + $0x10] sm:$0x7] }
 0x4d7   : > { %6164 = vmatmul.msk.f32.gmra.mxu1 %vm566_vm2, %v11711_v9  ;;  %v9269_v9 = vld [vmem:[#allocation2 + $0x40] sm:$0xff] }
 0x4df   : > { %6165 = vmatmul.msk.f32.gmra.mxu1 %vm566_vm2, %v11713_v41  ;;  %v3611_v41 = vperm.slane %v9267_v12, 1 }
 0x4e7   : > { %6166 = vmatmul.msk.f32.gmra.mxu1 %vm566_vm2, %v11715_v30 }
 0x4f2   : > { %v9223_v56 = vpop.permute.xlu1 %3474 }
 0x533   : > { %v9252_v26 = vpop.permute.xlu0 %3517 }
 0x534   : > { %v9225_v54 = vpop.permute.xlu1 %3519 }
 0x535   : > { %11716 = vst [vmem:[#allocation23_spill] sm:$0xff] %v9225_v54 }
 0x53b   : > { %v9254_v50 = vpop.permute.xlu0 %3523 }
 0x53c   : > { %v3536_v27 = vpop.permute.xlu1 %3535 }
 0x53d   : > { %v3542_v43 = vmul.f32 %v3536_v27, %v9058_v24  ;;  %v3543_v29 = vmul.f32 %v3536_v27, %v9168_v37  ;;  %v3540_v16 = vmul.f32 %v3536_v27, %v9109_v18  ;;  %v3541_v55 = vmul.f32 %v3536_v27, %v9172_v63 }
 0x53e   : > { %v3538_v7 = vmul.f32 %v3536_v27, %v9054_v36  ;;  %v3539_v10 = vmul.f32 %v3536_v27, %v9170_v60  ;;  %v3544_v2 = vmul.f32 %v3536_v27, %v9142_v52  ;;  %v3545_v45 = vmul.f32 %v3536_v27, %v9180_v3  ;;  %v9275_v27 = vpop.permute.xlu2 %3521 }
 0x53f   : > { %v3560_v44 = vrot.slane %v3542_v43, 2  ;;  %v3561_v6 = vrot.slane %v3543_v29, 2  ;;  %v3557_v35 = vrot.slane %v3540_v16, 2  ;;  %v3558_v22 = vrot.slane %v3541_v55, 2  ;;  %11718 = vst [vmem:[#allocation26_spill] sm:$0xff] %v9275_v27 }
 0x540   : > { %v3554_v17 = vrot.slane %v3538_v7, 2  ;;  %v3555_v49 = vrot.slane %v3539_v10, 2  ;;  %v3563_v51 = vrot.slane %v3544_v2, 2  ;;  %v3564_v11 = vrot.slane %v3545_v45, 2  ;;  %v9289_v45 = vld [vmem:[#allocation2 + $0x48] sm:$0x3] }
 0x541   : > { %v3562_v28 = vsel %vm3268_vm11, %v3560_v44, %v3561_v6  ;;  %v3559_v21 = vsel %vm3268_vm11, %v3557_v35, %v3558_v22 }
 0x542   : > { %3570 = vrot.lane.b32.xlu1 %v3562_v28, %s6799_s9  ;;  %3568 = vrot.lane.b32.xlu0 %v3559_v21, %s6799_s9  ;;  %v3556_v32 = vsel %vm3268_vm11, %v3554_v17, %v3555_v49  ;;  %v3565_v34 = vsel %vm3268_vm11, %v3563_v51, %v3564_v11 }
 0x543   : > { %3566 = vrot.lane.b32.xlu2 %v3556_v32, %s6799_s9 }
 0x54a   : > { %3584 = vrot.lane.b32.xlu0 %v3582_v19, %s6801_s14 }
 0x54b   : > { %3572 = vrot.lane.b32.xlu2 %v3565_v34, %s6799_s9 }
 0x59d   : > { %v9277_v43 = vpop.permute.xlu2 %3566 }
 0x5a5   : > { %v9279_v29 = vpop.permute.xlu2 %3572 }
 0x5b4   : > { %v9256_v5 = vpop.permute.xlu0 %3568 }
 0x5b5   : > { %11717 = vst [vmem:[#allocation22_spill] sm:$0xff] %v9256_v5 }
 0x5bc   : > { %v3585_v13 = vpop.permute.xlu0 %3584 }
 0x5bd   : > { %v3589_v58 = vmul.f32 %v3585_v13, %v9142_v52  ;;  %v3587_v39 = vmul.f32 %v3585_v13, %v9109_v18  ;;  %v3588_v48 = vmul.f32 %v3585_v13, %v9058_v24  ;;  %v3590_v30 = vmul.f32 %v3585_v13, %v9269_v9 }
 0x5bf   : > { %3599 = vrot.lane.b32.xlu0 %v3589_v58, %s6799_s9  ;;  %3595 = vrot.lane.b32.xlu1 %v3587_v39, %s6799_s9  ;;  %v9302_v58 = vld [vmem:[%s11378_s5 + $0x14] sm:$0x7] }
 0x5c0   : > { %3597 = vrot.lane.b32.xlu2 %v3588_v48, %s6799_s9  ;;  %v3660_v39 = vperm.slane %v9302_v58, 1 }
 0x5c7   : > { %3601 = vrot.lane.b32.xlu1 %v3590_v30, %s6799_s9 }
 0x5c8   : > { %3613 = vrot.lane.b32.xlu2 %v3611_v41, %s6801_s14 }
 0x61a   : > { %v9281_v16 = vpop.permute.xlu2 %3597 }
 0x61b   : > { %11719 = vst [vmem:[#allocation30_spill] sm:$0xff] %v9281_v16 }
 0x622   : > { %v3614_v55 = vpop.permute.xlu2 %3613 }
 0x623   : > { %v3620_v7 = vmul.f32 %v3614_v55, %v9142_v52  ;;  %v3621_v10 = vmul.f32 %v3614_v55, %v9180_v3  ;;  %v3618_v44 = vmul.f32 %v3614_v55, %v9058_v24  ;;  %v3619_v6 = vmul.f32 %v3614_v55, %v9168_v37 }
 0x624   : > { %v3616_v35 = vmul.f32 %v3614_v55, %v9109_v18  ;;  %v3617_v22 = vmul.f32 %v3614_v55, %v9172_v63  ;;  %v3622_v34 = vmul.f32 %v3614_v55, %v9269_v9  ;;  %v3623_v13 = vmul.f32 %v3614_v55, %v9289_v45 }
 0x625   : > { %v3638_v17 = vrot.slane %v3620_v7, 1  ;;  %v3639_v49 = vrot.slane %v3621_v10, 1  ;;  %v3635_v28 = vrot.slane %v3618_v44, 1  ;;  %v3636_v21 = vrot.slane %v3619_v6, 1  ;;  %v9308_v7 = vpop.permute.xlu1 %3570 }
 0x626   : > { %v3632_v32 = vrot.slane %v3616_v35, 1  ;;  %v3633_v2 = vrot.slane %v3617_v22, 1  ;;  %v3641_v48 = vrot.slane %v3622_v34, 1  ;;  %v3642_v41 = vrot.slane %v3623_v13, 1  ;;  %11720 = vst [vmem:[#allocation64_spill] sm:$0xff] %v9308_v7 }
 0x627   : > { %v3640_v19 = vsel %vm3230_vm6, %v3638_v17, %v3639_v49  ;;  %v3637_v51 = vsel %vm3230_vm6, %v3635_v28, %v3636_v21 }
 0x628   : > { %3648 = vrot.lane.b32.xlu2 %v3640_v19, %s6799_s9  ;;  %3646 = vrot.lane.b32.xlu1 %v3637_v51, %s6799_s9  ;;  %v3634_v11 = vsel %vm3230_vm6, %v3632_v32, %v3633_v2  ;;  %v3643_v30 = vsel %vm3230_vm6, %v3641_v48, %v3642_v41 }
 0x629   : > { %3644 = vrot.lane.b32.xlu0 %v3634_v11, %s6799_s9 }
 0x630   : > { %3662 = vrot.lane.b32.xlu1 %v3660_v39, %s6801_s14 }
 0x631   : > { %3650 = vrot.lane.b32.xlu0 %v3643_v30, %s6799_s9  ;;  %v9310_v55 = vpop.permute.xlu1 %3595 }
 0x639   : > { %v9312_v10 = vpop.permute.xlu1 %3601 }
 0x69a   : > { %v9314_v44 = vpop.permute.xlu1 %3646 }
 0x69b   : > { %11721 = vst [vmem:[#allocation28_spill] sm:$0xff] %v9314_v44 }
 0x6a2   : > { %v3663_v6 = vpop.permute.xlu1 %3662 }
 0x6a3   : > { %v3669_v35 = vmul.f32 %v3663_v6, %v9142_v52  ;;  %v3670_v22 = vmul.f32 %v3663_v6, %v9180_v3  ;;  %v3665_v17 = vmul.f32 %v3663_v6, %v9109_v18  ;;  %v3666_v49 = vmul.f32 %v3663_v6, %v9172_v63 }
 0x6a4   : > { %v3667_v28 = vmul.f32 %v3663_v6, %v9058_v24  ;;  %v3668_v21 = vmul.f32 %v3663_v6, %v9168_v37  ;;  %v3671_v48 = vmul.f32 %v3663_v6, %v9269_v9  ;;  %v3672_v41 = vmul.f32 %v3663_v6, %v9289_v45  ;;  %v9339_v6 = vpop.permute.xlu0 %3599 }
 0x6a5   : > { %v3687_v32 = vrot.slane %v3669_v35, 2  ;;  %v3688_v2 = vrot.slane %v3670_v22, 2  ;;  %v3681_v19 = vrot.slane %v3665_v17, 2  ;;  %v3682_v51 = vrot.slane %v3666_v49, 2  ;;  %v9333_v17 = vld [vmem:[%s11378_s5 + $0x18] sm:$0x7] }
 0x6a6   : > { %v3684_v11 = vrot.slane %v3667_v28, 2  ;;  %v3685_v34 = vrot.slane %v3668_v21, 2  ;;  %v3690_v35 = vrot.slane %v3671_v48, 2  ;;  %v3691_v22 = vrot.slane %v3672_v41, 2  ;;  %11722 = vst [vmem:[#allocation34_spill] sm:$0xff] %v9339_v6  ;;  %v9359_v48 = vld [vmem:[#allocation2 + $0x50] sm:$0xff] }
 0x6a7   : > { %v3689_v13 = vsel %vm3268_vm11, %v3687_v32, %v3688_v2  ;;  %v3683_v39 = vsel %vm3268_vm11, %v3681_v19, %v3682_v51  ;;  %v3709_v49 = vperm.slane %v9333_v17, 1 }
 0x6a8   : > { %3697 = vrot.lane.b32.xlu1 %v3689_v13, %s6799_s9  ;;  %3693 = vrot.lane.b32.xlu2 %v3683_v39, %s6799_s9  ;;  %v3686_v30 = vsel %vm3268_vm11, %v3684_v11, %v3685_v34  ;;  %v3692_v28 = vsel %vm3268_vm11, %v3690_v35, %v3691_v22  ;;  %v9356_v13 = vld [vmem:[%s11378_s5 + $0x1c] sm:$0x7] }
 0x6a9   : > { %3695 = vrot.lane.b32.xlu0 %v3686_v30, %s6799_s9  ;;  %v3738_v39 = vperm.slane %v9356_v13, 1  ;;  %v9364_v30 = vpop.permute.xlu2 %3648 }
 0x6aa   : > { %11724 = vst [vmem:[#allocation38_spill] sm:$0xff] %v9364_v30 }
 0x6ac   : > { %v9341_v21 = vpop.permute.xlu0 %3644 }
 0x6b0   : > { %3699 = vrot.lane.b32.xlu2 %v3692_v28, %s6799_s9 }
 0x6b1   : > { %3711 = vrot.lane.b32.xlu0 %v3709_v49, %s6801_s14 }
 0x6b4   : > { %v9343_v32 = vpop.permute.xlu0 %3650 }
 0x702   : > { %v9366_v35 = vpop.permute.xlu2 %3693 }
 0x70a   : > { %v9368_v22 = vpop.permute.xlu2 %3699 }
 0x70b   : > { %11725 = vst [vmem:[#allocation37_spill] sm:$0xff] %v9368_v22 }
 0x71b   : > { %v9345_v2 = vpop.permute.xlu0 %3695 }
 0x71c   : > { %11723 = vst [vmem:[#allocation33_spill] sm:$0xff] %v9345_v2 }
 0x723   : > { %v3712_v19 = vpop.permute.xlu0 %3711 }
 0x724   : > { %v3716_v51 = vmul.f32 %v3712_v19, %v9269_v9  ;;  %v3715_v11 = vmul.f32 %v3712_v19, %v9142_v52  ;;  %v3714_v34 = vmul.f32 %v3712_v19, %v9058_v24  ;;  %v3717_v41 = vmul.f32 %v3712_v19, %v9359_v48 }
 0x726   : > { %3726 = vrot.lane.b32.xlu0 %v3716_v51, %s6799_s9  ;;  %3724 = vrot.lane.b32.xlu2 %v3715_v11, %s6799_s9 }
 0x727   : > { %3722 = vrot.lane.b32.xlu1 %v3714_v34, %s6799_s9 }
 0x72e   : > { %3740 = vrot.lane.b32.xlu2 %v3738_v39, %s6801_s14 }
 0x72f   : > { %3728 = vrot.lane.b32.xlu1 %v3717_v41, %s6799_s9 }
 0x780   : > { %v9370_v49 = vpop.permute.xlu2 %3724 }
 0x781   : > { %11726 = vst [vmem:[#allocation42_spill] sm:$0xff] %v9370_v49 }
 0x788   : > { %v3741_v28 = vpop.permute.xlu2 %3740 }
 0x789   : > { %v3747_v51 = vmul.f32 %v3741_v28, %v9269_v9  ;;  %v3748_v11 = vmul.f32 %v3741_v28, %v9289_v45  ;;  %v3743_v34 = vmul.f32 %v3741_v28, %v9058_v24  ;;  %v3744_v19 = vmul.f32 %v3741_v28, %v9168_v37 }
 0x78a   : > { %v3745_v39 = vmul.f32 %v3741_v28, %v9142_v52  ;;  %v3746_v41 = vmul.f32 %v3741_v28, %v9180_v3  ;;  %v3749_v57 = vmul.f32 %v3741_v28, %v9359_v48  ;;  %v3750_v14 = vmul.f32 %v3741_v28, %v9378_v4 }
 0x78b   : > { %v3765_v0 = vrot.slane %v3747_v51, 1  ;;  %v3766_v33 = vrot.slane %v3748_v11, 1  ;;  %v3759_v38 = vrot.slane %v3743_v34, 1  ;;  %v3760_v1 = vrot.slane %v3744_v19, 1 }
 0x78c   : > { %v3762_v15 = vrot.slane %v3745_v39, 1  ;;  %v3763_v53 = vrot.slane %v3746_v41, 1  ;;  %v3768_v11 = vrot.slane %v3749_v57, 1  ;;  %v3769_v34 = vrot.slane %v3750_v14, 1 }
 0x78d   : > { %v3767_v62 = vsel %vm3230_vm6, %v3765_v0, %v3766_v33  ;;  %v3761_v59 = vsel %vm3230_vm6, %v3759_v38, %v3760_v1  ;;  %v9391_v33 = vld [vmem:[%s11378_s5 + $0x20] sm:$0x7] }
 0x78e   : > { %3775 = vrot.lane.b32.xlu2 %v3767_v62, %s6799_s9  ;;  %3771 = vrot.lane.b32.xlu0 %v3761_v59, %s6799_s9  ;;  %v3764_v51 = vsel %vm3230_vm6, %v3762_v15, %v3763_v53  ;;  %v3787_v0 = vperm.slane %v9391_v33, 1  ;;  %v3770_v38 = vsel %vm3230_vm6, %v3768_v11, %v3769_v34  ;;  %v9397_v59 = vpop.permute.xlu1 %3697 }
 0x78f   : > { %3773 = vrot.lane.b32.xlu1 %v3764_v51, %s6799_s9  ;;  %11727 = vst [vmem:[#allocation41_spill] sm:$0xff] %v9397_v59 }
 0x796   : > { %3777 = vrot.lane.b32.xlu0 %v3770_v38, %s6799_s9 }
 0x797   : > { %3789 = vrot.lane.b32.xlu1 %v3787_v0, %s6801_s14 }
 0x799   : > { %v9399_v53 = vpop.permute.xlu1 %3722 }
 0x7a1   : > { %v9401_v15 = vpop.permute.xlu1 %3728 }
 0x7a2   : > { %11728 = vst [vmem:[#allocation46_spill] sm:$0xff] %v9401_v15 }
 0x801   : > { %v9403_v14 = vpop.permute.xlu1 %3773 }
 0x802   : > { %11729 = vst [vmem:[#allocation45_spill] sm:$0xff] %v9403_v14 }
 0x809   : > { %v3790_v57 = vpop.permute.xlu1 %3789 }
 0x80a   : > { %v3796_v62 = vmul.f32 %v3790_v57, %v9269_v9  ;;  %v3797_v1 = vmul.f32 %v3790_v57, %v9289_v45  ;;  %v3794_v28 = vmul.f32 %v3790_v57, %v9142_v52  ;;  %v3795_v19 = vmul.f32 %v3790_v57, %v9180_v3 }
 0x80b   : > { %v3792_v39 = vmul.f32 %v3790_v57, %v9058_v24  ;;  %v3793_v41 = vmul.f32 %v3790_v57, %v9168_v37  ;;  %v3798_v44 = vmul.f32 %v3790_v57, %v9359_v48  ;;  %v3799_v16 = vmul.f32 %v3790_v57, %v9378_v4 }
 0x80c   : > { %v3814_v51 = vrot.slane %v3796_v62, 2  ;;  %v3815_v11 = vrot.slane %v3797_v1, 2  ;;  %v3811_v34 = vrot.slane %v3794_v28, 2  ;;  %v3812_v0 = vrot.slane %v3795_v19, 2 }
 0x80d   : > { %v3808_v38 = vrot.slane %v3792_v39, 2  ;;  %v3809_v42 = vrot.slane %v3793_v41, 2  ;;  %v3836_v62 = vperm.slane %v8884_v40, 2  ;;  %v3817_v1 = vrot.slane %v3798_v44, 2 }
 0x80e   : > { %v3816_v14 = vsel %vm3268_vm11, %v3814_v51, %v3815_v11  ;;  %v3813_v49 = vsel %vm3268_vm11, %v3811_v34, %v3812_v0  ;;  %v3818_v28 = vrot.slane %v3799_v16, 2  ;;  %v3865_v44 = vperm.slane %v9121_v25, 2  ;;  %v9441_v51 = vpop.permute.xlu2 %3775 }
 0x80f   : > { %3824 = vrot.lane.b32.xlu1 %v3816_v14, %s6799_s9  ;;  %3822 = vrot.lane.b32.xlu0 %v3813_v49, %s6799_s9  ;;  %v3810_v2 = vsel %vm3268_vm11, %v3808_v38, %v3809_v42  ;;  %v9423_v14 = vpop.permute.xlu0 %3726  ;;  %11733 = vst [vmem:[#allocation82_spill] sm:$0xff] %v9441_v51 }
 0x810   : > { %3820 = vrot.lane.b32.xlu2 %v3810_v2, %s6799_s9  ;;  %v3819_v19 = vsel %vm3268_vm11, %v3817_v1, %v3818_v28  ;;  %11730 = vst [vmem:[#allocation50_spill] sm:$0xff] %v9423_v14 }
 0x817   : > { %3838 = vrot.lane.b32.xlu0 %v3836_v62, %s6802_s15  ;;  %v9425_v49 = vpop.permute.xlu0 %3771 }
 0x818   : > { %3826 = vrot.lane.b32.xlu2 %v3819_v19, %s6799_s9 }
 0x81f   : > { %v9427_v42 = vpop.permute.xlu0 %3777 }
 0x820   : > { %11731 = vst [vmem:[#allocation49_spill] sm:$0xff] %v9427_v42 }
 0x86a   : > { %v9443_v11 = vpop.permute.xlu2 %3820 }
 0x872   : > { %v9445_v34 = vpop.permute.xlu2 %3826 }
 0x873   : > { %11734 = vst [vmem:[#allocation55_spill] sm:$0xff] %v9445_v34 }
 0x881   : > { %v9429_v39 = vpop.permute.xlu0 %3822 }
 0x882   : > { %11732 = vst [vmem:[#allocation10_spill] sm:$0xff] %v9429_v39 }
 0x889   : > { %v3839_v57 = vpop.permute.xlu0 %3838 }
 0x88a   : > { %v3843_v2 = vmul.f32 %v3839_v57, %v9058_v24  ;;  %v3841_v40 = vmul.f32 %v3839_v57, %v9054_v36  ;;  %v3842_v16 = vmul.f32 %v3839_v57, %v9109_v18  ;;  %v3844_v41 = vmul.f32 %v3839_v57, %v9142_v52 }
 0x88c   : > { %3853 = vrot.lane.b32.xlu0 %v3843_v2, %s6797_s29  ;;  %3849 = vrot.lane.b32.xlu1 %v3841_v40, %s6797_s29 }
 0x88d   : > { %3851 = vrot.lane.b32.xlu2 %v3842_v16, %s6797_s29 }
 0x894   : > { %3855 = vrot.lane.b32.xlu1 %v3844_v41, %s6797_s29 }
 0x895   : > { %3867 = vrot.lane.b32.xlu2 %v3865_v44, %s6802_s15 }
 0x8e7   : > { %v9447_v0 = vpop.permute.xlu2 %3851 }
 0x8e8   : > { %11735 = vst [vmem:[#allocation18_spill] sm:$0xff] %v9447_v0 }
 0x8ef   : > { %v3868_v38 = vpop.permute.xlu2 %3867 }
 0x8f0   : > { %v3874_v62 = vmul.f32 %v3868_v38, %v9058_v24  ;;  %v3875_v1 = vmul.f32 %v3868_v38, %v9168_v37  ;;  %v3872_v28 = vmul.f32 %v3868_v38, %v9109_v18  ;;  %v3873_v19 = vmul.f32 %v3868_v38, %v9172_v63 }
 0x8f1   : > { %v3870_v57 = vmul.f32 %v3868_v38, %v9054_v36  ;;  %v3871_v2 = vmul.f32 %v3868_v38, %v9170_v60  ;;  %v3876_v46 = vmul.f32 %v3868_v38, %v9142_v52  ;;  %v3877_v14 = vmul.f32 %v3868_v38, %v9180_v3 }
 0x8f2   : > { %v3892_v40 = vrot.slane %v3874_v62, 1  ;;  %v3893_v16 = vrot.slane %v3875_v1, 1  ;;  %v3889_v44 = vrot.slane %v3872_v28, 1  ;;  %v3890_v41 = vrot.slane %v3873_v19, 1 }
 0x8f3   : > { %v3886_v39 = vrot.slane %v3870_v57, 1  ;;  %v3887_v5 = vrot.slane %v3871_v2, 1  ;;  %v3914_v62 = vperm.slane %v9197_v8, 2  ;;  %v3895_v1 = vrot.slane %v3876_v46, 1 }
 0x8f4   : > { %v3894_v0 = vsel %vm3230_vm6, %v3892_v40, %v3893_v16  ;;  %v3891_v54 = vsel %vm3230_vm6, %v3889_v44, %v3890_v41  ;;  %v3896_v28 = vrot.slane %v3877_v14, 1 }
 0x8f5   : > { %3902 = vrot.lane.b32.xlu2 %v3894_v0, %s6797_s29  ;;  %3900 = vrot.lane.b32.xlu1 %v3891_v54, %s6797_s29  ;;  %v3888_v51 = vsel %vm3230_vm6, %v3886_v39, %v3887_v5  ;;  %v9467_v0 = vpop.permute.xlu1 %3824 }
 0x8f6   : > { %3898 = vrot.lane.b32.xlu0 %v3888_v51, %s6797_s29  ;;  %v3897_v19 = vsel %vm3230_vm6, %v3895_v1, %v3896_v28  ;;  %11736 = vst [vmem:[#allocation84_spill] sm:$0xff] %v9467_v0 }
 0x8fd   : > { %3916 = vrot.lane.b32.xlu1 %v3914_v62, %s6802_s15 }
 0x8fe   : > { %3904 = vrot.lane.b32.xlu0 %v3897_v19, %s6797_s29  ;;  %v9469_v54 = vpop.permute.xlu1 %3849 }
 0x8ff   : > { %11737 = vst [vmem:[#allocation20_spill] sm:$0xff] %v9469_v54 }
 0x906   : > { %v9471_v5 = vpop.permute.xlu1 %3855 }
 0x907   : > { %11738 = vst [vmem:[#allocation19_spill] sm:$0xff] %v9471_v5 }
 0x967   : > { %v9473_v39 = vpop.permute.xlu1 %3900 }
 0x968   : > { %11739 = vst [vmem:[#allocation61_spill] sm:$0xff] %v9473_v39 }
 0x96f   : > { %v3917_v38 = vpop.permute.xlu1 %3916 }
 0x970   : > { %v3923_v51 = vmul.f32 %v3917_v38, %v9058_v24  ;;  %v3924_v46 = vmul.f32 %v3917_v38, %v9168_v37  ;;  %v3919_v14 = vmul.f32 %v3917_v38, %v9054_v36  ;;  %v3920_v57 = vmul.f32 %v3917_v38, %v9170_v60 }
 0x971   : > { %v3921_v2 = vmul.f32 %v3917_v38, %v9109_v18  ;;  %v3922_v40 = vmul.f32 %v3917_v38, %v9172_v63  ;;  %v3925_v0 = vmul.f32 %v3917_v38, %v9142_v52  ;;  %v3926_v36 = vmul.f32 %v3917_v38, %v9180_v3 }
 0x972   : > { %v3941_v16 = vrot.slane %v3923_v51, 2  ;;  %v3942_v44 = vrot.slane %v3924_v46, 2  ;;  %v3935_v41 = vrot.slane %v3919_v14, 2  ;;  %v3936_v62 = vrot.slane %v3920_v57, 2 }
 0x973   : > { %v3938_v1 = vrot.slane %v3921_v2, 2  ;;  %v3939_v28 = vrot.slane %v3922_v40, 2  ;;  %v3944_v51 = vrot.slane %v3925_v0, 2  ;;  %v3945_v46 = vrot.slane %v3926_v36, 2  ;;  %v9493_v2 = vpop.permute.xlu0 %3853 }
 0x974   : > { %v3943_v19 = vsel %vm3268_vm11, %v3941_v16, %v3942_v44  ;;  %v3937_v39 = vsel %vm3268_vm11, %v3935_v41, %v3936_v62  ;;  %v3963_v14 = vperm.slane %v9244_v61, 2  ;;  %11740 = vst [vmem:[#allocation59_spill] sm:$0xff] %v9493_v2  ;;  %v3992_v41 = vperm.slane %v9267_v12, 2 }
 0x975   : > { %3951 = vrot.lane.b32.xlu1 %v3943_v19, %s6797_s29  ;;  %3947 = vrot.lane.b32.xlu2 %v3937_v39, %s6797_s29  ;;  %v3940_v59 = vsel %vm3268_vm11, %v3938_v1, %v3939_v28  ;;  %v3946_v57 = vsel %vm3268_vm11, %v3944_v51, %v3945_v46  ;;  %v9511_v1 = vpop.permute.xlu2 %3902 }
 0x976   : > { %3949 = vrot.lane.b32.xlu0 %v3940_v59, %s6797_s29  ;;  %11744 = vst [vmem:[#allocation24_spill] sm:$0xff] %v9511_v1 }
 0x97b   : > { %v9495_v38 = vpop.permute.xlu0 %3898 }
 0x97c   : > { %11741 = vst [vmem:[#allocation27_spill] sm:$0xff] %v9495_v38  ;;  %v6686_v38 = vld [vmem:[#allocation2 + $0x18] sm:$0x3] }
 0x97d   : > { %3953 = vrot.lane.b32.xlu2 %v3946_v57, %s6797_s29 }
 0x97e   : > { %3965 = vrot.lane.b32.xlu0 %v3963_v14, %s6802_s15 }
 0x983   : > { %v9497_v40 = vpop.permute.xlu0 %3904 }
 0x984   : > { %11742 = vst [vmem:[#allocation69_spill] sm:$0xff] %v9497_v40 }
 0x9cf   : > { %v9513_v28 = vpop.permute.xlu2 %3947 }
 0x9d0   : > { %11745 = vst [vmem:[#allocation32_spill] sm:$0xff] %v9513_v28 }
 0x9d7   : > { %v9515_v19 = vpop.permute.xlu2 %3953 }
 0x9d8   : > { %11746 = vst [vmem:[#allocation74_spill] sm:$0xff] %v9515_v19 }
 0x9e8   : > { %v9499_v39 = vpop.permute.xlu0 %3949 }
 0x9e9   : > { %11743 = vst [vmem:[#allocation25_spill] sm:$0xff] %v9499_v39 }
 0x9f0   : > { %v3966_v16 = vpop.permute.xlu0 %3965 }
 0x9f1   : > { %v3970_v59 = vmul.f32 %v3966_v16, %v9142_v52  ;;  %v3969_v0 = vmul.f32 %v3966_v16, %v9058_v24  ;;  %v3968_v44 = vmul.f32 %v3966_v16, %v9109_v18  ;;  %v3971_v62 = vmul.f32 %v3966_v16, %v9269_v9 }
 0x9f3   : > { %3980 = vrot.lane.b32.xlu0 %v3970_v59, %s6797_s29  ;;  %3978 = vrot.lane.b32.xlu2 %v3969_v0, %s6797_s29 }
 0x9f4   : > { %3976 = vrot.lane.b32.xlu1 %v3968_v44, %s6797_s29 }
 0x9fb   : > { %3994 = vrot.lane.b32.xlu2 %v3992_v41, %s6802_s15 }
 0x9fc   : > { %3982 = vrot.lane.b32.xlu1 %v3971_v62, %s6797_s29 }
 0xa4d   : > { %v9517_v36 = vpop.permute.xlu2 %3978 }
 0xa4e   : > { %11747 = vst [vmem:[#allocation31_spill] sm:$0xff] %v9517_v36 }
 0xa55   : > { %v3995_v51 = vpop.permute.xlu2 %3994 }
 0xa56   : > { %v4001_v46 = vmul.f32 %v3995_v51, %v9142_v52  ;;  %v4002_v14 = vmul.f32 %v3995_v51, %v9180_v3  ;;  %v3997_v57 = vmul.f32 %v3995_v51, %v9109_v18  ;;  %v3998_v16 = vmul.f32 %v3995_v51, %v9172_v63 }
 0xa57   : > { %v3999_v59 = vmul.f32 %v3995_v51, %v9058_v24  ;;  %v4000_v0 = vmul.f32 %v3995_v51, %v9168_v37  ;;  %v4003_v40 = vmul.f32 %v3995_v51, %v9269_v9  ;;  %v4004_v5 = vmul.f32 %v3995_v51, %v9289_v45 }
 0xa58   : > { %v4019_v44 = vrot.slane %v4001_v46, 1  ;;  %v4020_v41 = vrot.slane %v4002_v14, 1  ;;  %v4013_v62 = vrot.slane %v3997_v57, 1  ;;  %v4014_v39 = vrot.slane %v3998_v16, 1 }
 0xa59   : > { %v4016_v1 = vrot.slane %v3999_v59, 1  ;;  %v4017_v2 = vrot.slane %v4000_v0, 1  ;;  %v4022_v46 = vrot.slane %v4003_v40, 1  ;;  %v4023_v14 = vrot.slane %v4004_v5, 1 }
 0xa5a   : > { %v4021_v36 = vsel %vm3230_vm6, %v4019_v44, %v4020_v41  ;;  %v4015_v19 = vsel %vm3230_vm6, %v4013_v62, %v4014_v39  ;;  %v4041_v57 = vperm.slane %v9302_v58, 2  ;;  %v9537_v39 = vpop.permute.xlu1 %3951 }
 0xa5b   : > { %4029 = vrot.lane.b32.xlu2 %v4021_v36, %s6797_s29  ;;  %4025 = vrot.lane.b32.xlu0 %v4015_v19, %s6797_s29  ;;  %v4018_v30 = vsel %vm3230_vm6, %v4016_v1, %v4017_v2  ;;  %v4024_v16 = vsel %vm3230_vm6, %v4022_v46, %v4023_v14  ;;  %11748 = vst [vmem:[#allocation70_spill] sm:$0xff] %v9537_v39 }
 0xa5c   : > { %4027 = vrot.lane.b32.xlu1 %v4018_v30, %s6797_s29 }
 0xa63   : > { %4031 = vrot.lane.b32.xlu0 %v4024_v16, %s6797_s29 }
 0xa64   : > { %4043 = vrot.lane.b32.xlu1 %v4041_v57, %s6802_s15 }
 0xa66   : > { %v9539_v51 = vpop.permute.xlu1 %3976 }
 0xa67   : > { %11749 = vst [vmem:[#allocation36_spill] sm:$0xff] %v9539_v51 }
 0xa6e   : > { %v9541_v36 = vpop.permute.xlu1 %3982 }
 0xa6f   : > { %11750 = vst [vmem:[#allocation76_spill] sm:$0xff] %v9541_v36 }
 0xace   : > { %v9543_v19 = vpop.permute.xlu1 %4027 }
 0xacf   : > { %11751 = vst [vmem:[#allocation35_spill] sm:$0xff] %v9543_v19 }
 0xad6   : > { %v4044_v2 = vpop.permute.xlu1 %4043 }
 0xad7   : > { %v4050_v30 = vmul.f32 %v4044_v2, %v9142_v52  ;;  %v4051_v5 = vmul.f32 %v4044_v2, %v9180_v3  ;;  %v4048_v40 = vmul.f32 %v4044_v2, %v9058_v24  ;;  %v4049_v1 = vmul.f32 %v4044_v2, %v9168_v37 }
 0xad8   : > { %v4046_v59 = vmul.f32 %v4044_v2, %v9109_v18  ;;  %v4047_v0 = vmul.f32 %v4044_v2, %v9172_v63  ;;  %v4052_v18 = vmul.f32 %v4044_v2, %v9269_v9  ;;  %v4053_v36 = vmul.f32 %v4044_v2, %v9289_v45 }
 0xad9   : > { %v4068_v44 = vrot.slane %v4050_v30, 2  ;;  %v4069_v41 = vrot.slane %v4051_v5, 2  ;;  %v4065_v62 = vrot.slane %v4048_v40, 2  ;;  %v4066_v46 = vrot.slane %v4049_v1, 2 }
 0xada   : > { %v4062_v14 = vrot.slane %v4046_v59, 2  ;;  %v4063_v57 = vrot.slane %v4047_v0, 2  ;;  %v4090_v30 = vperm.slane %v9333_v17, 2  ;;  %v4071_v5 = vrot.slane %v4052_v18, 2  ;;  %v9563_v59 = vpop.permute.xlu0 %3980 }
 0xadb   : > { %v4070_v16 = vsel %vm3268_vm11, %v4068_v44, %v4069_v41  ;;  %v4067_v19 = vsel %vm3268_vm11, %v4065_v62, %v4066_v46  ;;  %v4072_v40 = vrot.slane %v4053_v36, 2  ;;  %11752 = vst [vmem:[#allocation72_spill] sm:$0xff] %v9563_v59  ;;  %v4119_v62 = vperm.slane %v9356_v13, 2 }
 0xadc   : > { %4078 = vrot.lane.b32.xlu1 %v4070_v16, %s6797_s29  ;;  %4076 = vrot.lane.b32.xlu0 %v4067_v19, %s6797_s29  ;;  %v4064_v39 = vsel %vm3268_vm11, %v4062_v14, %v4063_v57  ;;  %v9581_v14 = vpop.permute.xlu2 %4029 }
 0xadd   : > { %4074 = vrot.lane.b32.xlu2 %v4064_v39, %s6797_s29  ;;  %v4073_v1 = vsel %vm3268_vm11, %v4071_v5, %v4072_v40  ;;  %11756 = vst [vmem:[#allocation73_spill] sm:$0xff] %v9581_v14 }
 0xae2   : > { %v9565_v19 = vpop.permute.xlu0 %4025 }
 0xae3   : > { %11753 = vst [vmem:[#allocation40_spill] sm:$0xff] %v9565_v19 }
 0xae4   : > { %4092 = vrot.lane.b32.xlu0 %v4090_v30, %s6802_s15 }
 0xae5   : > { %4080 = vrot.lane.b32.xlu2 %v4073_v1, %s6797_s29 }
 0xaea   : > { %v9567_v0 = vpop.permute.xlu0 %4031 }
 0xaeb   : > { %11754 = vst [vmem:[#allocation78_spill] sm:$0xff] %v9567_v0 }
 0xb37   : > { %v9583_v57 = vpop.permute.xlu2 %4074 }
 0xb38   : > { %11757 = vst [vmem:[#allocation44_spill] sm:$0xff] %v9583_v57 }
 0xb3f   : > { %v9585_v16 = vpop.permute.xlu2 %4080 }
 0xb40   : > { %11758 = vst [vmem:[#allocation79_spill] sm:$0xff] %v9585_v16 }
 0xb4e   : > { %v9569_v44 = vpop.permute.xlu0 %4076 }
 0xb4f   : > { %11755 = vst [vmem:[#allocation39_spill] sm:$0xff] %v9569_v44 }
 0xb56   : > { %v4093_v2 = vpop.permute.xlu0 %4092 }
 0xb57   : > { %v4097_v39 = vmul.f32 %v4093_v2, %v9269_v9  ;;  %v4095_v41 = vmul.f32 %v4093_v2, %v9058_v24  ;;  %v4096_v36 = vmul.f32 %v4093_v2, %v9142_v52  ;;  %v4098_v46 = vmul.f32 %v4093_v2, %v9359_v48 }
 0xb59   : > { %4107 = vrot.lane.b32.xlu0 %v4097_v39, %s6797_s29  ;;  %4103 = vrot.lane.b32.xlu1 %v4095_v41, %s6797_s29 }
 0xb5a   : > { %4105 = vrot.lane.b32.xlu2 %v4096_v36, %s6797_s29 }
 0xb61   : > { %4109 = vrot.lane.b32.xlu1 %v4098_v46, %s6797_s29 }
 0xb62   : > { %4121 = vrot.lane.b32.xlu2 %v4119_v62, %s6802_s15 }
 0xbb4   : > { %v9587_v18 = vpop.permute.xlu2 %4105 }
 0xbb5   : > { %11759 = vst [vmem:[#allocation43_spill] sm:$0xff] %v9587_v18 }
 0xbbc   : > { %v4122_v30 = vpop.permute.xlu2 %4121 }
 0xbbd   : > { %v4128_v5 = vmul.f32 %v4122_v30, %v9269_v9  ;;  %v4129_v40 = vmul.f32 %v4122_v30, %v9289_v45  ;;  %v4126_v1 = vmul.f32 %v4122_v30, %v9142_v52  ;;  %v4127_v2 = vmul.f32 %v4122_v30, %v9180_v3 }
 0xbbe   : > { %v4124_v39 = vmul.f32 %v4122_v30, %v9058_v24  ;;  %v4125_v41 = vmul.f32 %v4122_v30, %v9168_v37  ;;  %v4130_v24 = vmul.f32 %v4122_v30, %v9359_v48  ;;  %v4131_v57 = vmul.f32 %v4122_v30, %v9378_v4 }
 0xbbf   : > { %v4146_v36 = vrot.slane %v4128_v5, 1  ;;  %v4147_v62 = vrot.slane %v4129_v40, 1  ;;  %v4143_v46 = vrot.slane %v4126_v1, 1  ;;  %v4144_v44 = vrot.slane %v4127_v2, 1 }
 0xbc0   : > { %v4140_v14 = vrot.slane %v4124_v39, 1  ;;  %v4141_v59 = vrot.slane %v4125_v41, 1  ;;  %v4168_v5 = vperm.slane %v9391_v33, 2  ;;  %v4149_v40 = vrot.slane %v4130_v24, 1 }
 0xbc1   : > { %v4148_v18 = vsel %vm3230_vm6, %v4146_v36, %v4147_v62  ;;  %v4145_v16 = vsel %vm3230_vm6, %v4143_v46, %v4144_v44  ;;  %v4150_v1 = vrot.slane %v4131_v57, 1  ;;  %v9617_v57 = vld [vmem:[#allocation2 + $0x20] sm:$0xff] }
 0xbc2   : > { %4156 = vrot.lane.b32.xlu2 %v4148_v18, %s6797_s29  ;;  %4154 = vrot.lane.b32.xlu1 %v4145_v16, %s6797_s29  ;;  %v4142_v0 = vsel %vm3230_vm6, %v4140_v14, %v4141_v59  ;;  %v9607_v18 = vpop.permute.xlu1 %4078 }
 0xbc3   : > { %4152 = vrot.lane.b32.xlu0 %v4142_v0, %s6797_s29  ;;  %v4151_v44 = vsel %vm3230_vm6, %v4149_v40, %v4150_v1  ;;  %11760 = vst [vmem:[#allocation75_spill] sm:$0xff] %v9607_v18 }
 0xbca   : > { %4170 = vrot.lane.b32.xlu1 %v4168_v5, %s6802_s15 }
 0xbcb   : > { %4158 = vrot.lane.b32.xlu0 %v4151_v44, %s6797_s29  ;;  %v9609_v16 = vpop.permute.xlu1 %4103 }
 0xbcc   : > { %11761 = vst [vmem:[#allocation48_spill] sm:$0xff] %v9609_v16 }
 0xbd3   : > { %v9611_v59 = vpop.permute.xlu1 %4109 }
 0xbd4   : > { %11762 = vst [vmem:[#allocation80_spill] sm:$0xff] %v9611_v59 }
 0xc34   : > { %v9613_v14 = vpop.permute.xlu1 %4154 }
 0xc35   : > { %11763 = vst [vmem:[#allocation47_spill] sm:$0xff] %v9613_v14 }
 0xc3c   : > { %v4171_v30 = vpop.permute.xlu1 %4170 }
 0xc3d   : > { %v4177_v0 = vmul.f32 %v4171_v30, %v9269_v9  ;;  %v4178_v2 = vmul.f32 %v4171_v30, %v9289_v45  ;;  %v4173_v39 = vmul.f32 %v9617_v57, %v4171_v30  ;;  %v4174_v41 = vmul.f32 %v4171_v30, %v9168_v37 }
 0xc3e   : > { %v4175_v36 = vmul.f32 %v4171_v30, %v9142_v52  ;;  %v4176_v62 = vmul.f32 %v4171_v30, %v9180_v3  ;;  %v4179_v59 = vmul.f32 %v4171_v30, %v9359_v48  ;;  %v4180_v16 = vmul.f32 %v4171_v30, %v9378_v4 }
 0xc3f   : > { %v4195_v46 = vrot.slane %v4177_v0, 2  ;;  %v4196_v24 = vrot.slane %v4178_v2, 2  ;;  %v4189_v5 = vrot.slane %v4173_v39, 2  ;;  %v4190_v40 = vrot.slane %v4174_v41, 2  ;;  %v9631_v39 = vpop.f32.mrf.mxu0 }
 0xc40   : > { %v4192_v1 = vrot.slane %v4175_v36, 2  ;;  %v4193_v44 = vrot.slane %v4176_v62, 2  ;;  %v4198_v0 = vrot.slane %v4179_v59, 2  ;;  %v4199_v2 = vrot.slane %v4180_v16, 2  ;;  %11764 = vst [vmem:[#allocation77_spill] sm:$0xff] %v9631_v39 }
 0xc41   : > { %v4197_v14 = vsel %vm3268_vm11, %v4195_v46, %v4196_v24  ;;  %v4191_v18 = vsel %vm3268_vm11, %v4189_v5, %v4190_v40  ;;  %v9647_v59 = vperm.slane %v9197_v8, 0  ;;  %v6681_v46 = vld [vmem:[%s11378_s5] sm:$0x7] }
 0xc42   : > { %4205 = vrot.lane.b32.xlu1 %v4197_v14, %s6797_s29  ;;  %4201 = vrot.lane.b32.xlu2 %v4191_v18, %s6797_s29  ;;  %v4194_v19 = vsel %vm3268_vm11, %v4192_v1, %v4193_v44  ;;  %v4200_v41 = vsel %vm3268_vm11, %v4198_v0, %v4199_v2  ;;  %v9639_v18 = vperm.slane %v9121_v25, 0  ;;  %v6680_v14 = vld [vmem:[#allocation2] sm:$0xff]  ;;  %v9655_v24 = vperm.slane %v6681_v46, 0  ;;  %v9666_v2 = vld [vmem:[#allocation2 + $0x10] sm:$0xff] }
 0xc43   : > { %4203 = vrot.lane.b32.xlu0 %v4194_v19, %s6797_s29  ;;  %v3252_v62 = vmul.f32 %v6680_v14, %v9647_v59  ;;  %v3253_v25 = vmul.f32 %v9647_v59, %v9170_v60 }
 0xc44   : > { %v3214_v19 = vmul.f32 %v6680_v14, %v9639_v18  ;;  %v3215_v16 = vmul.f32 %v9639_v18, %v9170_v60  ;;  %v3205_v5 = vmul.f32 %v6680_v14, %v9655_v24  ;;  %v3220_v1 = vmul.f32 %v9639_v18, %v9142_v52 }
 0xc45   : > { %v3269_v40 = vrot.slane %v3252_v62, 2  ;;  %v3270_v8 = vrot.slane %v3253_v25, 2  ;;  %v3221_v44 = vmul.f32 %v9639_v18, %v9180_v3  ;;  %v9664_v60 = vperm.slane %v9267_v12, 0 }
 0xc46   : > { %v3231_v36 = vrot.slane %v3214_v19, 1  ;;  %v3240_v19 = vrot.slane %v3220_v1, 1  ;;  %v3258_v12 = vmul.f32 %v9647_v59, %v9142_v52  ;;  %v3218_v62 = vmul.f32 %v9617_v57, %v9639_v18  ;;  %v9694_v1 = vld [vmem:[#allocation2 + $0x30] sm:$0xff] }
 0xc47   : > { %v2080_v30 = vpop.f32.mrf.mxu0  ;;  %v3300_v14 = vmul.f32 %v9664_v60, %v9172_v63  ;;  %v9683_v25 = vperm.slane %v9302_v58, 0  ;;  %v3208_v58 = vmul.f32 %v9694_v1, %v9655_v24  ;;  %v3305_v28 = vmul.f32 %v9664_v60, %v9269_v9 }
 0xc48   : > { %v3216_v7 = vmul.f32 %v9666_v2, %v9639_v18  ;;  %v3217_v15 = vmul.f32 %v6686_v38, %v9639_v18 }
 0xc4a   : > { %4207 = vrot.lane.b32.xlu2 %v4200_v41, %s6797_s29  ;;  %2210 = vrot.lane.b32.xlu1 %v9158_v20, %s6810_s22  ;;  %v3232_v20 = vrot.slane %v3215_v16, 1  ;;  %v3299_v41 = vmul.f32 %v9666_v2, %v9664_v60  ;;  %v3241_v16 = vrot.slane %v3221_v44, 1  ;;  %v3278_v44 = vrot.slane %v3258_v12, 2 }
 0xc4b   : > { %v9709_v12 = vperm.slane %v9356_v13, 0 }
 0xc4c   : > { %v3242_v52 = vsel %vm3230_vm6, %v3240_v19, %v3241_v16  ;;  %v3237_v16 = vrot.slane %v3218_v62, 1  ;;  %v3207_v62 = vmul.f32 %v9617_v57, %v9655_v24 }
 0xc4d   : > { %v3250_v19 = vadd.f32 %v3242_v52, %v3208_v58  ;;  %v3389_v54 = vmul.f32 %v9709_v12, %v9378_v4 }
 0xc52   : > { %2208 = vrot.lane.b32.xlu2 %v2080_v30, %s6810_s22  ;;  %v3271_v30 = vsel %vm3268_vm11, %v3269_v40, %v3270_v8  ;;  %v3316_v40 = vrot.slane %v3300_v14, 1  ;;  %v3337_v8 = vmul.f32 %v9683_v25, %v9172_v63  ;;  %v9705_v63 = vperm.slane %v9333_v17, 0 }
 0xc54   : > { %v3353_v34 = vrot.slane %v3337_v8, 2  ;;  %v3373_v52 = vmul.f32 %v9617_v57, %v9705_v63  ;;  %v3382_v8 = vmul.f32 %v9617_v57, %v9709_v12 }
 0xc5a   : > { %2212 = vrot.lane.b32.xlu2 %v9164_v31, %s6810_s22  ;;  %v3233_v31 = vsel %vm3230_vm6, %v3231_v36, %v3232_v20  ;;  %v9674_v36 = vperm.slane %v9244_v61, 0  ;;  %v3259_v20 = vmul.f32 %v9647_v59, %v9180_v3  ;;  %v3219_v61 = vmul.f32 %v9639_v18, %v9168_v37 }
 0xc5b   : > { %v3247_v0 = vadd.f32 %v3233_v31, %v3205_v5  ;;  %v3315_v31 = vrot.slane %v3299_v41, 1  ;;  %v3336_v3 = vmul.f32 %v9666_v2, %v9683_v25  ;;  %v3256_v37 = vmul.f32 %v9617_v57, %v9647_v59  ;;  %v9700_v41 = vld [vmem:[#allocation2 + $0x28] sm:$0x3] }
 0xc5c   : > { %v3290_v5 = vmul.f32 %v9666_v2, %v9674_v36  ;;  %v3238_v39 = vrot.slane %v3219_v61, 1  ;;  %v3383_v58 = vmul.f32 %v9700_v41, %v9709_v12  ;;  %v3340_v18 = vmul.f32 %v9694_v1, %v9683_v25 }
 0xc5d   : > { %v3285_v46 = vadd.f32 %v3271_v30, %v3247_v0  ;;  %v3279_v0 = vrot.slane %v3259_v20, 2  ;;  %v3257_v30 = vmul.f32 %v9700_v41, %v9647_v59  ;;  %v3317_v51 = vsel %vm3230_vm6, %v3315_v31, %v3316_v40 }
 0xc5e   : > { %v3352_v20 = vrot.slane %v3336_v3, 2  ;;  %v3275_v17 = vrot.slane %v3256_v37, 2  ;;  %v3239_v31 = vsel %vm3230_vm6, %v3237_v16, %v3238_v39  ;;  %v9720_v40 = vperm.slane %v9391_v33, 0 }
 0xc5f   : > { %v3294_v14 = vadd.f32 %v3290_v5, %v3285_v46  ;;  %v3280_v6 = vsel %vm3268_vm11, %v3278_v44, %v3279_v0  ;;  %v3306_v46 = vmul.f32 %v9664_v60, %v9289_v45  ;;  %v3276_v13 = vrot.slane %v3257_v30, 2  ;;  %v9737_v0 = vld [vmem:[#allocation2 + $0x38] sm:$0x3] }
 0xc60   : > { %v3288_v61 = vadd.f32 %v3280_v6, %v3250_v19  ;;  %v3354_v3 = vsel %vm3268_vm11, %v3352_v20, %v3353_v34  ;;  %v3293_v6 = vmul.f32 %v9674_v36, %v9269_v9  ;;  %v3342_v33 = vmul.f32 %v9683_v25, %v9269_v9 }
 0xc61   : > { %v3331_v5 = vadd.f32 %v3317_v51, %v3294_v14  ;;  %v3324_v51 = vrot.slane %v3305_v28, 1  ;;  %v3325_v39 = vrot.slane %v3306_v46, 1  ;;  %v3343_v44 = vmul.f32 %v9683_v25, %v9289_v45 }
 0xc62   : > { %v3303_v34 = vmul.f32 %v9694_v1, %v9664_v60  ;;  %v3304_v37 = vmul.f32 %v9737_v0, %v9664_v60  ;;  %v3297_v14 = vadd.f32 %v3293_v6, %v3288_v61  ;;  %v3249_v19 = vadd.f32 %v3239_v31, %v3207_v62 }
 0xc63   : > { %v3368_v30 = vadd.f32 %v3354_v3, %v3331_v5  ;;  %v3277_v28 = vsel %vm3268_vm11, %v3275_v17, %v3276_v13  ;;  %v3419_v16 = vmul.f32 %v9617_v57, %v9720_v40  ;;  %v3420_v20 = vmul.f32 %v9700_v41, %v9720_v40 }
 0xc64   : > { %v3398_v46 = vrot.slane %v3382_v8, 1  ;;  %v3399_v42 = vrot.slane %v3383_v58, 1  ;;  %v3292_v5 = vmul.f32 %v9694_v1, %v9674_v36  ;;  %v3326_v62 = vsel %vm3230_vm6, %v3324_v51, %v3325_v39 }
 0xc65   : > { %v3361_v17 = vrot.slane %v3342_v33, 2  ;;  %v3362_v61 = vrot.slane %v3343_v44, 2  ;;  %v3321_v31 = vrot.slane %v3303_v34, 1  ;;  %v3322_v13 = vrot.slane %v3304_v37, 1 }
 0xc66   : > { %v3377_v3 = vadd.f32 %v3373_v52, %v3368_v30  ;;  %v3334_v6 = vadd.f32 %v3326_v62, %v3297_v14  ;;  %v3287_v27 = vadd.f32 %v3277_v28, %v3249_v19  ;;  %v3435_v8 = vrot.slane %v3419_v16, 2 }
 0xc67   : > { %v3388_v58 = vmul.f32 %v9709_v12, %v9359_v48  ;;  %v3341_v51 = vmul.f32 %v9737_v0, %v9683_v25  ;;  %v3400_v39 = vsel %vm3230_vm6, %v3398_v46, %v3399_v42  ;;  %v3436_v33 = vrot.slane %v3420_v20, 2 }
 0xc68   : > { %v3296_v44 = vadd.f32 %v3292_v5, %v3287_v27  ;;  %v3234_v52 = vrot.slane %v3216_v7, 1  ;;  %v3235_v34 = vrot.slane %v3217_v15, 1  ;;  %v3363_v37 = vsel %vm3268_vm11, %v3361_v17, %v3362_v61 }
 0xc69   : > { %v3323_v30 = vsel %vm3230_vm6, %v3321_v31, %v3322_v13  ;;  %v3414_v14 = vadd.f32 %v3400_v39, %v3377_v3  ;;  %v3371_v19 = vadd.f32 %v3363_v37, %v3334_v6  ;;  %v3376_v28 = vmul.f32 %v9705_v63, %v9359_v48 }
 0xc6a   : > { %v3407_v16 = vrot.slane %v3388_v58, 1  ;;  %v3408_v62 = vrot.slane %v3389_v54, 1  ;;  %v3425_v22 = vmul.f32 %v9720_v40, %v9359_v48  ;;  %v3426_v42 = vmul.f32 %v9720_v40, %v9378_v4 }
 0xc6b   : > { %v3358_v27 = vrot.slane %v3340_v18, 2  ;;  %v3359_v7 = vrot.slane %v3341_v51, 2  ;;  %v3333_v15 = vadd.f32 %v3323_v30, %v3296_v44  ;;  %v3437_v20 = vsel %vm3268_vm11, %v3435_v8, %v3436_v33  ;;  %v6687_v44 = vld [vmem:[#allocation2 + $0x40] sm:$0xff] }
 0xc6c   : > { %v3254_v46 = vmul.f32 %v9666_v2, %v9647_v59  ;;  %v3255_v5 = vmul.f32 %v6686_v38, %v9647_v59  ;;  %v3386_v17 = vmul.f32 %v9709_v12, %v9269_v9  ;;  %v3387_v54 = vmul.f32 %v9709_v12, %v9289_v45 }
 0xc6d   : > { %v3451_v48 = vadd.f32 %v3437_v20, %v3414_v14  ;;  %v3380_v61 = vadd.f32 %v3376_v28, %v3371_v19  ;;  %v3236_v4 = vsel %vm3230_vm6, %v3234_v52, %v3235_v34  ;;  %v3409_v31 = vsel %vm3230_vm6, %v3407_v16, %v3408_v62 }
 0xc6e   : > { %v3444_v13 = vrot.slane %v3425_v22, 2  ;;  %v3445_v3 = vrot.slane %v3426_v42, 2  ;;  %v3360_v6 = vsel %vm3268_vm11, %v3358_v27, %v3359_v7  ;;  %v3206_v38 = vmul.f32 %v9666_v2, %v9655_v24 }
 0xc6f   : > { %v3480_v8 = vadd.f32 %v9221_v23, %v3451_v48  ;;  %v3370_v59 = vadd.f32 %v3360_v6, %v3333_v15  ;;  %v3272_v9 = vrot.slane %v3254_v46, 2  ;;  %v3273_v58 = vrot.slane %v3255_v5, 2 }
 0xc70   : > { %v3301_v18 = vmul.f32 %v9617_v57, %v9664_v60  ;;  %v3248_v51 = vadd.f32 %v3236_v4, %v3206_v38  ;;  %v3302_v39 = vmul.f32 %v9700_v41, %v9664_v60  ;;  %v3417_v33 = vadd.f32 %v3409_v31, %v3380_v61  ;;  %v11765_v38 = vld [vmem:[#allocation37_spill] sm:$0xff] }
 0xc71   : > { %v3529_v22 = vadd.f32 %v9252_v26, %v3480_v8  ;;  %v3375_v52 = vmul.f32 %v6687_v44, %v9705_v63  ;;  %v3404_v23 = vrot.slane %v3386_v17, 1  ;;  %v3405_v34 = vrot.slane %v3387_v54, 1 }
 0xc72   : > { %v3446_v24 = vsel %vm3268_vm11, %v3444_v13, %v3445_v3  ;;  %v3423_v2 = vmul.f32 %v6687_v44, %v9720_v40  ;;  %v3424_v37 = vmul.f32 %v9720_v40, %v9289_v45  ;;  %v3274_v60 = vsel %vm3268_vm11, %v3272_v9, %v3273_v58  ;;  %v2336_v13 = vld [vmem:[%s11375_s2] sm:$0xff]  ;;  %v11766_v9 = vld [vmem:[#allocation20_spill] sm:$0xff]  ;;  %v11769_v44 = vld [vmem:[#allocation27_spill] sm:$0xff] }
 0xc73   : > { %v3578_v30 = vadd.f32 %v9277_v43, %v3529_v22  ;;  %v3379_v14 = vadd.f32 %v3375_v52, %v3370_v59  ;;  %v3286_v19 = vadd.f32 %v3274_v60, %v3248_v51  ;;  %v3291_v26 = vmul.f32 %v9617_v57, %v9674_v36  ;;  %2452 = vmatpush.msra.mxu0 %v2336_v13 }
 0xc74   : > { %v3454_v28 = vadd.f32 %v3446_v24, %v3417_v33  ;;  %v3406_v62 = vsel %vm3230_vm6, %v3404_v23, %v3405_v34  ;;  %v3318_v42 = vrot.slane %v3301_v18, 1  ;;  %v3319_v27 = vrot.slane %v3302_v39, 1  ;;  %6208 = vmatpush.msrb.mxu2 %v2336_v13  ;;  %v9828_v18 = vpop.permute.xlu2 %4156  ;;  %v11768_v33 = vld [vmem:[#allocation46_spill] sm:$0xff]  ;;  %v11770_v34 = vld [vmem:[#allocation64_spill] sm:$0xff] }
 0xc75   : > { %v3607_v16 = vadd.f32 %v9310_v55, %v3578_v30  ;;  %v3338_v7 = vmul.f32 %v9617_v57, %v9683_v25  ;;  %v3441_v45 = vrot.slane %v3423_v2, 2  ;;  %v3442_v15 = vrot.slane %v3424_v37, 2  ;;  %v11771_v2 = vld [vmem:[#allocation49_spill] sm:$0xff]  ;;  %v11772_v30 = vld [vmem:[#allocation32_spill] sm:$0xff]  ;;  %v11786_v13 = vld [vmem:[#allocation82_spill] sm:$0xff] }
 0xc76   : > { %v3483_v43 = vadd.f32 %v9223_v56, %v3454_v28  ;;  %v3416_v46 = vadd.f32 %v3406_v62, %v3379_v14  ;;  %v3339_v36 = vmul.f32 %v9700_v41, %v9683_v25  ;;  %v3295_v5 = vadd.f32 %v3291_v26, %v3286_v19  ;;  %v11773_v19 = vld [vmem:[#allocation34_spill] sm:$0xff]  ;;  %v11774_v26 = vld [vmem:[#allocation55_spill] sm:$0xff] }
 0xc77   : > { %v3656_v20 = vadd.f32 %v9341_v21, %v3607_v16  ;;  %v3355_v54 = vrot.slane %v3338_v7, 2  ;;  %v3443_v48 = vsel %vm3268_vm11, %v3441_v45, %v3442_v15  ;;  %v3320_v57 = vsel %vm3230_vm6, %v3318_v42, %v3319_v27  ;;  %v11775_v16 = vld [vmem:[#allocation36_spill] sm:$0xff]  ;;  %v11776_v42 = vld [vmem:[#allocation38_spill] sm:$0xff]  ;;  %v11777_v7 = vld [vmem:[#allocation19_spill] sm:$0xff] }
 0xc78   : > { %v3532_v55 = vadd.f32 %v9254_v50, %v3483_v43  ;;  %v3453_v4 = vadd.f32 %v3443_v48, %v3416_v46  ;;  %v3356_v21 = vrot.slane %v3339_v36, 2  ;;  %v3384_v31 = vmul.f32 %v9694_v1, %v9709_v12  ;;  %v11778_v15 = vld [vmem:[#allocation40_spill] sm:$0xff]  ;;  %v11779_v36 = vld [vmem:[#allocation41_spill] sm:$0xff] }
 0xc79   : > { %v3705_v17 = vadd.f32 %v9366_v35, %v3656_v20  ;;  %v3385_v25 = vmul.f32 %v9737_v0, %v9709_v12  ;;  %v3332_v50 = vadd.f32 %v3320_v57, %v3295_v5  ;;  %v11781_v57 = vld [vmem:[#allocation44_spill] sm:$0xff] }
 0xc7a   : > { %v3581_v61 = vadd.f32 %v9279_v29, %v3532_v55  ;;  %v3374_v29 = vmul.f32 %v9694_v1, %v9705_v63  ;;  %v3482_v12 = vadd.f32 %v9250_v47, %v3453_v4  ;;  %v3357_v6 = vsel %vm3268_vm11, %v3355_v54, %v3356_v21  ;;  %v11767_v63 = vld [vmem:[#allocation26_spill] sm:$0xff]  ;;  %v4108_v47 = vpop.permute.xlu0 %4107  ;;  %v11780_v54 = vld [vmem:[#allocation69_spill] sm:$0xff]  ;;  %v11783_v21 = vld [vmem:[#allocation63_spill] sm:$0xff] }
 0xc7b   : > { %v3734_v56 = vadd.f32 %v9399_v53, %v3705_v17  ;;  %v3402_v8 = vrot.slane %v3385_v25, 1  ;;  %v11784_v25 = vld [vmem:[#allocation74_spill] sm:$0xff] }
 0xc7c   : > { %v3610_v35 = vadd.f32 %v9312_v10, %v3581_v61  ;;  %v3401_v10 = vrot.slane %v3384_v31, 1  ;;  %v3531_v51 = vadd.f32 %v11767_v63, %v3482_v12  ;;  %v11788_v12 = vld [vmem:[#allocation76_spill] sm:$0xff]  ;;  %v11792_v63 = vld [vmem:[#allocation59_spill] sm:$0xff] }
 0xc7d   : > { %v3783_v41 = vadd.f32 %v9425_v49, %v3734_v56  ;;  %v3369_v49 = vadd.f32 %v3357_v6, %v3332_v50  ;;  %v11782_v56 = vld [vmem:[#allocation50_spill] sm:$0xff] }
 0xc7e   : > { %v3659_v53 = vadd.f32 %v9343_v32, %v3610_v35  ;;  %v3421_v32 = vmul.f32 %v9694_v1, %v9720_v40  ;;  %v3403_v23 = vsel %vm3230_vm6, %v3401_v10, %v3402_v8  ;;  %v3580_v24 = vadd.f32 %v11770_v34, %v3531_v51  ;;  %v11785_v35 = vld [vmem:[#allocation48_spill] sm:$0xff] }
 0xc7f   : > { %v3832_v3 = vadd.f32 %v9443_v11, %v3783_v41  ;;  %v3422_v11 = vmul.f32 %v9737_v0, %v9720_v40  ;;  %v3378_v39 = vadd.f32 %v3374_v29, %v3369_v49  ;;  %v11789_v8 = vld [vmem:[#allocation84_spill] sm:$0xff] }
 0xc80   : > { %v3708_v59 = vadd.f32 %v11765_v38, %v3659_v53  ;;  %v3438_v1 = vrot.slane %v3421_v32, 2  ;;  %v3609_v40 = vadd.f32 %v11773_v19, %v3580_v24  ;;  %v11787_v53 = vld [vmem:[#allocation23_spill] sm:$0xff]  ;;  %v11790_v38 = vld [vmem:[#allocation22_spill] sm:$0xff]  ;;  %v11796_v24 = vld [vmem:[#allocation28_spill] sm:$0xff] }
 0xc81   : > { %v3861_v58 = vadd.f32 %v11766_v9, %v3832_v3  ;;  %v3439_v60 = vrot.slane %v3422_v11, 2  ;;  %v3415_v0 = vadd.f32 %v3403_v23, %v3378_v39  ;;  %v11791_v9 = vld [vmem:[#allocation78_spill] sm:$0xff]  ;;  %v11799_v19 = vld [vmem:[#allocation33_spill] sm:$0xff] }
 0xc82   : > { %v3737_v22 = vadd.f32 %v11768_v33, %v3708_v59  ;;  %v3658_v27 = vadd.f32 %v11776_v42, %v3609_v40  ;;  %v4153_v55 = vpop.permute.xlu0 %4152  ;;  %v11793_v39 = vld [vmem:[#allocation30_spill] sm:$0xff] }
 0xc83   : > { %v3910_v52 = vadd.f32 %v11769_v44, %v3861_v58  ;;  %v3440_v46 = vsel %vm3268_vm11, %v3438_v1, %v3439_v60  ;;  %v11798_v1 = vld [vmem:[#allocation70_spill] sm:$0xff] }
 0xc84   : > { %v3786_v37 = vadd.f32 %v11771_v2, %v3737_v22  ;;  %v3707_v5 = vadd.f32 %v11779_v36, %v3658_v27  ;;  %v3452_v17 = vadd.f32 %v3440_v46, %v3415_v0  ;;  %v11794_v22 = vld [vmem:[#allocation79_spill] sm:$0xff]  ;;  %v11804_v46 = vld [vmem:[#allocation45_spill] sm:$0xff] }
 0xc85   : > { %v3959_v14 = vadd.f32 %v11772_v30, %v3910_v52  ;;  %v11795_v52 = vld [vmem:[#allocation24_spill] sm:$0xff] }
 0xc86   : > { %v3835_v28 = vadd.f32 %v11774_v26, %v3786_v37  ;;  %v3736_v4 = vadd.f32 %v11782_v56, %v3707_v5  ;;  %v3481_v31 = vadd.f32 %v11783_v21, %v3452_v17  ;;  %v11797_v37 = vld [vmem:[#allocation80_spill] sm:$0xff]  ;;  %v11805_v5 = vld [vmem:[#allocation75_spill] sm:$0xff]  ;;  %v11806_v17 = vld [vmem:[#allocation10_spill] sm:$0xff] }
 0xc87   : > { %v3988_v62 = vadd.f32 %v11775_v16, %v3959_v14  ;;  %v11800_v26 = vld [vmem:[#allocation72_spill] sm:$0xff]  ;;  %v11801_v16 = vld [vmem:[#allocation42_spill] sm:$0xff] }
 0xc88   : > { %v3864_v45 = vadd.f32 %v11777_v7, %v3835_v28  ;;  %v3785_v29 = vadd.f32 %v11786_v13, %v3736_v4  ;;  %v3530_v3 = vadd.f32 %v11787_v53, %v3481_v31  ;;  %v11807_v56 = vld [vmem:[#allocation18_spill] sm:$0xff]  ;;  %v11808_v31 = vld [vmem:[#allocation61_spill] sm:$0xff] }
 0xc89   : > { %v4037_v43 = vadd.f32 %v11778_v15, %v3988_v62 }
 0xc8a   : > { %v3913_v48 = vadd.f32 %v11780_v54, %v3864_v45  ;;  %v3834_v49 = vadd.f32 %v11789_v8, %v3785_v29  ;;  %v3579_v59 = vadd.f32 %v11790_v38, %v3530_v3  ;;  %v4159_v34 = vpop.permute.xlu0 %4158  ;;  %v11802_v45 = vld [vmem:[#allocation73_spill] sm:$0xff]  ;;  %v11812_v38 = vld [vmem:[#allocation39_spill] sm:$0xff] }
 0xc8b   : > { %v4086_v61 = vadd.f32 %v11781_v57, %v4037_v43  ;;  %v11803_v43 = vld [vmem:[#allocation77_spill] sm:$0xff] }
 0xc8c   : > { %v3962_v50 = vadd.f32 %v11784_v25, %v3913_v48  ;;  %v3863_v51 = vadd.f32 %v11792_v63, %v3834_v49  ;;  %v3608_v33 = vadd.f32 %v11793_v39, %v3579_v59  ;;  %v11809_v29 = vld [vmem:[#allocation25_spill] sm:$0xff]  ;;  %v11813_v63 = vld [vmem:[#allocation43_spill] sm:$0xff] }
 0xc8d   : > { %v4115_v41 = vadd.f32 %v11785_v35, %v4086_v61 }
 0xc8e   : > { %v3991_v6 = vadd.f32 %v11788_v12, %v3962_v50  ;;  %v3912_v23 = vadd.f32 %v11795_v52, %v3863_v51  ;;  %v3657_v2 = vadd.f32 %v11796_v24, %v3608_v33  ;;  %v11810_v12 = vld [vmem:[#allocation31_spill] sm:$0xff] }
 0xc8f   : > { %v4164_v10 = vadd.f32 %v4153_v55, %v4115_v41  ;;  %v11814_v33 = vld [vmem:[#allocation47_spill] sm:$0xff] }
 0xc90   : > { %v4040_v58 = vadd.f32 %v11791_v9, %v3991_v6  ;;  %v3961_v60 = vadd.f32 %v11798_v1, %v3912_v23  ;;  %v3706_v40 = vadd.f32 %v11799_v19, %v3657_v2 }
 0xc92   : > { %v4089_v44 = vadd.f32 %v11794_v22, %v4040_v58  ;;  %v3990_v28 = vadd.f32 %v11800_v26, %v3961_v60  ;;  %v3735_v62 = vadd.f32 %v11801_v16, %v3706_v40 }
 0xc94   : > { %v4118_v30 = vadd.f32 %v11797_v37, %v4089_v44  ;;  %v4039_v15 = vadd.f32 %v11802_v45, %v3990_v28  ;;  %v3784_v36 = vadd.f32 %v11804_v46, %v3735_v62 }
 0xc96   : > { %v4167_v0 = vadd.f32 %v4159_v34, %v4118_v30  ;;  %v4088_v55 = vadd.f32 %v11805_v5, %v4039_v15  ;;  %v3833_v54 = vadd.f32 %v11806_v17, %v3784_v36 }
 0xc98   : > { %v4117_v61 = vadd.f32 %v4108_v47, %v4088_v55  ;;  %v3862_v4 = vadd.f32 %v11807_v56, %v3833_v54  ;;  %v11815_v56 = vld [vmem:[#allocation14_spill] sm:$0xff] }
 0xc9a   : > { %v4166_v21 = vadd.f32 %v9828_v18, %v4117_v61  ;;  %v3911_v25 = vadd.f32 %v11808_v31, %v3862_v4  ;;  %v11811_v18 = vld [vmem:[#allocation35_spill] sm:$0xff] }
 0xc9c   : > { %v4202_v20 = vpop.permute.xlu2 %4201  ;;  %v3960_v53 = vadd.f32 %v11809_v29, %v3911_v25 }
 0xc9d   : > { %v9861_v32 = vadd.f32 %v4202_v20, %v4164_v10 }
 0xc9e   : > { %v3989_v6 = vadd.f32 %v11810_v12, %v3960_v53 }
 0xc9f   : > { %v9870_v14 = vmul.f32 0.70710677, %v9861_v32 }
 0xca0   : > { %v4038_v8 = vadd.f32 %v11811_v18, %v3989_v6 }
 0xca1   : > { %v4221_v42 = vand.u32 2147483647, %v9870_v14  ;;  %vm4297_vm5 = vcmp.lt.f32.partialorder %v9870_v14, 0.0 }
 0xca2   : > { %v4087_v59 = vadd.f32 %v11812_v38, %v4038_v8 }
 0xca3   : > { %v4225_v48 = vmul.f32 0.3275911, %v4221_v42  ;;  %v4273_v39 = vsub.f32 0.0, %v4221_v42 }
 0xca4   : > { %v4208_v11 = vpop.permute.xlu2 %4207  ;;  %v4116_v51 = vadd.f32 %v11813_v63, %v4087_v59 }
 0xca5   : > { %v9877_v27 = vadd.f32 %v4208_v11, %v4167_v0  ;;  %v4229_v50 = vadd.f32 1.0, %v4225_v48  ;;  %v4277_v34 = vmul.f32 %v4273_v39, %v4221_v42 }
 0xca6   : > { %v4165_v22 = vadd.f32 %v11814_v33, %v4116_v51  ;;  %v11816_v33 = vld [vmem:[#allocation54_spill] sm:$0xff] }
 0xca7   : > { %v9887_v57 = vmul.f32 0.70710677, %v9877_v27  ;;  %6598 = vrcp.f32 %v4229_v50  ;;  %v4281_v0 = vmul.f32 1.442695, %v4277_v34 }
 0xca9   : > { %v4224_v35 = vand.u32 2147483647, %v9887_v57 }
 0xcab   : > { %v4228_v47 = vmul.f32 0.3275911, %v4224_v35  ;;  %v4276_v28 = vsub.f32 0.0, %v4224_v35 }
 0xcac   : > { %v2209_v7 = vpop.permute.xlu2 %2208 }
 0xcad   : > { %v2304_v20 = vsel %vm566_vm2, %v11803_v43, %v2209_v7  ;;  %v4232_v9 = vadd.f32 1.0, %v4228_v47  ;;  %v6599_v11 = vpop.eup %6598  ;;  %v4280_v36 = vmul.f32 %v4276_v28, %v4224_v35 }
 0xcae   : > { %6167 = vmatmul.msk.f32.vlgmr.msra.gmra.mxu0 %vm324_vm0, %v2304_v20  ;;  %v4237_v52 = vmul.f32 1.0614054, %v6599_v11 }
 0xcaf   : > { %v4287_v25 = vmul.f32 1.442695, %v4280_v36  ;;  %v4312_v36 = vmul.f32 0.5, %v9877_v27 }
 0xcb0   : > { %v4241_v24 = vadd.f32 -1.4531521, %v4237_v52 }
 0xcb2   : > { %v4245_v1 = vmul.f32 %v6599_v11, %v4241_v24 }
 0xcb4   : > { %v4206_v41 = vpop.permute.xlu1 %4205  ;;  %v4249_v26 = vadd.f32 1.4214138, %v4245_v1 }
 0xcb5   : > { %v9893_v13 = vadd.f32 %v4206_v41, %v4166_v21  ;;  %v4204_v44 = vpop.permute.xlu0 %4203 }
 0xcb6   : > { %v9905_v23 = vadd.f32 %v4204_v44, %v4165_v22  ;;  %v4253_v45 = vmul.f32 %v6599_v11, %v4249_v26 }
 0xcb7   : > { %v9897_v3 = vmul.f32 0.70710677, %v9893_v13 }
 0xcb8   : > { %v9908_v2 = vmul.f32 0.70710677, %v9905_v23  ;;  %v4257_v20 = vadd.f32 -0.28449672, %v4253_v45 }
 0xcb9   : > { %v4223_v10 = vand.u32 2147483647, %v9897_v3  ;;  %vm4299_vm12 = vcmp.lt.f32.partialorder %v9897_v3, 0.0 }
 0xcba   : > { %v4222_v40 = vand.u32 2147483647, %v9908_v2  ;;  %v4261_v17 = vmul.f32 %v6599_v11, %v4257_v20 }
 0xcbb   : > { %v4227_v49 = vmul.f32 0.3275911, %v4223_v10  ;;  %v4275_v30 = vsub.f32 0.0, %v4223_v10 }
 0xcbc   : > { %v4226_v62 = vmul.f32 0.3275911, %v4222_v40  ;;  %v2211_v61 = vpop.permute.xlu1 %2210  ;;  %v4265_v21 = vadd.f32 0.2548296, %v4261_v17  ;;  %v4274_v6 = vsub.f32 0.0, %v4222_v40 }
 0xcbd   : > { %v4231_v58 = vadd.f32 1.0, %v4227_v49  ;;  %v4279_v7 = vmul.f32 %v4275_v30, %v4223_v10  ;;  %v2305_v4 = vsel %vm566_vm2, %v11815_v56, %v2211_v61  ;;  %v2213_v49 = vpop.permute.xlu2 %2212  ;;  %v4310_v56 = vmul.f32 0.5, %v9905_v23 }
 0xcbe   : > { %v4230_v43 = vadd.f32 1.0, %v4226_v62  ;;  %6168 = vmatmul.msk.f32.vlgmr.msrb.gmra.mxu2 %vm324_vm0, %v2305_v4  ;;  %v4269_v29 = vmul.f32 %v6599_v11, %v4265_v21  ;;  %v4278_v63 = vmul.f32 %v4274_v6, %v4222_v40  ;;  %v2306_v11 = vsel %vm566_vm2, %v11816_v33, %v2213_v49  ;;  %v11818_v21 = vld [vmem:[#allocation62_spill] sm:$0xff]  ;;  %v11821_v49 = vld [vmem:[#allocation51_spill] sm:$0xff] }
 0xcbf   : > { %6600 = vrcp.f32 %v4231_v58  ;;  %v4285_v55 = vmul.f32 1.442695, %v4279_v7 }
 0xcc0   : > { %6602 = vrcp.f32 %v4232_v9  ;;  %v4283_v40 = vmul.f32 1.442695, %v4278_v63 }
 0xcc1   : > { %6604 = vpow2.f32 %v4281_v0 }
 0xcc2   : > { %6606 = vrcp.f32 %v4230_v43 }
 0xcc3   : > { %6608 = vpow2.f32 %v4285_v55 }
 0xcc4   : > { %6610 = vpow2.f32 %v4287_v25  ;;  %v11819_v25 = vld [vmem:[#allocation60_spill] sm:$0xff] }
 0xcc5   : > { %v6601_v37 = vpop.eup %6600  ;;  %6612 = vpow2.f32 %v4283_v40 }
 0xcc6   : > { %v6603_v60 = vpop.eup %6602  ;;  %v4239_v19 = vmul.f32 1.0614054, %v6601_v37  ;;  %6169 = vmatmul.msk.f32.gmra.mxu2 %vm324_vm0, %v2306_v11  ;;  %v11822_v11 = vld [vmem:[#allocation57_spill] sm:$0xff] }
 0xcc7   : > { %v4240_v15 = vmul.f32 1.0614054, %v6603_v60  ;;  %v6605_v41 = vpop.eup %6604 }
 0xcc8   : > { %v4243_v16 = vadd.f32 -1.4531521, %v4239_v19  ;;  %v6607_v53 = vpop.eup %6606  ;;  %v4289_v10 = vmul.f32 %v6605_v41, %v4269_v29  ;;  %v4309_v19 = vmul.f32 0.5, %v9861_v32 }
 0xcc9   : > { %v4244_v46 = vadd.f32 -1.4531521, %v4240_v15  ;;  %v4238_v47 = vmul.f32 1.0614054, %v6607_v53  ;;  %v6609_v51 = vpop.eup %6608 }
 0xcca   : > { %v4247_v42 = vmul.f32 %v6601_v37, %v4243_v16  ;;  %v4293_v59 = vsub.f32 1.0, %v4289_v10  ;;  %v6611_v1 = vpop.eup %6610 }
 0xccb   : > { %v4248_v54 = vmul.f32 %v6603_v60, %v4244_v46  ;;  %v4242_v38 = vadd.f32 -1.4531521, %v4238_v47  ;;  %v6613_v55 = vpop.eup %6612 }
 0xccc   : > { %v4251_v5 = vadd.f32 1.4214138, %v4247_v42  ;;  %v4301_v22 = vsub.f32 0.0, %v4293_v59 }
 0xccd   : > { %v4252_v31 = vadd.f32 1.4214138, %v4248_v54  ;;  %v4246_v39 = vmul.f32 %v6607_v53, %v4242_v38 }
 0xcce   : > { %v4255_v48 = vmul.f32 %v6601_v37, %v4251_v5  ;;  %v4305_v24 = vsel %vm4297_vm5, %v4301_v22, %v4293_v59  ;;  %vm4300_vm5 = vcmp.lt.f32.partialorder %v9887_v57, 0.0  ;;  %v11817_v57 = vld [vmem:[#allocation56_spill] sm:$0xff] }
 0xccf   : > { %v4256_v35 = vmul.f32 %v6603_v60, %v4252_v31  ;;  %v4250_v34 = vadd.f32 1.4214138, %v4246_v39  ;;  %v4313_v0 = vadd.f32 1.0, %v4305_v24  ;;  %v9936_v31 = vld [vmem:[%s11379_s6] sm:$0x7] }
 0xcd0   : > { %v4259_v50 = vadd.f32 -0.28449672, %v4255_v48 }
 0xcd1   : > { %v4260_v18 = vadd.f32 -0.28449672, %v4256_v35  ;;  %v4254_v26 = vmul.f32 %v6607_v53, %v4250_v34  ;;  %v4317_v62 = vmul.f32 %v4313_v0, %v4309_v19  ;;  %v9981_v34 = vld [vmem:[%s11376_s3] ss:$0 sm:$0xff] }
 0xcd2   : > { %v4263_v12 = vmul.f32 %v6601_v37, %v4259_v50 }
 0xcd3   : > { %v4264_v9 = vmul.f32 %v6603_v60, %v4260_v18  ;;  %v4258_v7 = vadd.f32 -0.28449672, %v4254_v26  ;;  %4325 = vrot.lane.b32.xlu0 %v4317_v62, %s6801_s14 }
 0xcd4   : > { %v4267_v8 = vadd.f32 0.2548296, %v4263_v12 }
 0xcd5   : > { %v4268_v44 = vadd.f32 0.2548296, %v4264_v9  ;;  %v4262_v42 = vmul.f32 %v6607_v53, %v4258_v7  ;;  %v2104_v7 = vpop.f32.mrf.mxu1 }
 0xcd6   : > { %v4271_v58 = vmul.f32 %v6601_v37, %v4267_v8  ;;  %v9953_v8 = vld [vmem:[#allocation2] sm:$0xff] }
 0xcd7   : > { %v4272_v30 = vmul.f32 %v6603_v60, %v4268_v44  ;;  %v4311_v60 = vmul.f32 0.5, %v9893_v13  ;;  %v4266_v20 = vadd.f32 0.2548296, %v4262_v42  ;;  %v11823_v44 = vld [vmem:[#allocation15_spill] sm:$0xff] }
 0xcd8   : > { %v4291_v52 = vmul.f32 %v6609_v51, %v4271_v58  ;;  %v9967_v51 = vld [vmem:[%s11379_s6 + $0x4] sm:$0x7] }
 0xcd9   : > { %v4292_v28 = vmul.f32 %v6611_v1, %v4272_v30  ;;  %v4270_v3 = vmul.f32 %v6607_v53, %v4266_v20  ;;  %v11820_v53 = vld [vmem:[#allocation11_spill] sm:$0xff]  ;;  %v4631_v39 = vperm.slane %v9967_v51, 1 }
 0xcda   : > { %v4295_v37 = vsub.f32 1.0, %v4291_v52  ;;  %v11824_v52 = vld [vmem:[#allocation17_spill] sm:$0xff] }
 0xcdb   : > { %v4296_v14 = vsub.f32 1.0, %v4292_v28  ;;  %v4290_v54 = vmul.f32 %v6613_v55, %v4270_v3  ;;  %v10017_v55 = vld [vmem:[#allocation2 + $0x8] sm:$0x3] }
 0xcdc   : > { %v4303_v16 = vsub.f32 0.0, %v4295_v37 }
 0xcdd   : > { %v4304_v32 = vsub.f32 0.0, %v4296_v14  ;;  %v4294_v13 = vsub.f32 1.0, %v4290_v54  ;;  %v2107_v20 = vpop.f32.mrf.mxu1 }
 0xcde   : > { %v4307_v45 = vsel %vm4299_vm12, %v4303_v16, %v4295_v37  ;;  %vm4298_vm12 = vcmp.lt.f32.partialorder %v9908_v2, 0.0  ;;  %v4602_v2 = vperm.slane %v9936_v31, 1 }
 0xcdf   : > { %v4315_v15 = vadd.f32 1.0, %v4307_v45  ;;  %v4308_v46 = vsel %vm4300_vm5, %v4304_v32, %v4296_v14  ;;  %v4302_v48 = vsub.f32 0.0, %v4294_v13  ;;  %vm11828_vm5 = vcmask 1046534  }
 0xce0   : > { %v4316_v5 = vadd.f32 1.0, %v4308_v46 }
 0xce1   : > { %v4319_v43 = vmul.f32 %v4315_v15, %v4311_v60  ;;  %v4306_v61 = vsel %vm4298_vm12, %v4302_v48, %v4294_v13  ;;  %v11825_v60 = vld [vmem:[#allocation58_spill] sm:$0xff]  ;;  %vm11829_vm12 = vcmask 1047559  }
 0xce2   : > { %v4320_v17 = vmul.f32 %v4316_v5, %v4312_v36  ;;  %v4314_v27 = vadd.f32 1.0, %v4306_v61 }
 0xce3   : > { %4329 = vrot.lane.b32.xlu2 %v4319_v43, %s6801_s14 }
 0xce4   : > { %4331 = vrot.lane.b32.xlu0 %v4320_v17, %s6801_s14  ;;  %v4318_v4 = vmul.f32 %v4314_v27, %v4310_v56  ;;  %v11826_v17 = vld [vmem:[#allocation16_spill] sm:$0xff] }
 0xce6   : > { %4327 = vrot.lane.b32.xlu1 %v4318_v4, %s6801_s14 }
 0xceb   : > { %2216 = vrot.lane.b32.xlu2 %v11817_v57, %s6810_s22 }
 0xcee   : > { %2214 = vrot.lane.b32.xlu1 %v11818_v21, %s6810_s22 }
 0xcf6   : > { %4604 = vrot.lane.b32.xlu1 %v4602_v2, %s6801_s14 }
 0xcfe   : > { %2218 = vrot.lane.b32.xlu1 %v11819_v25, %s6810_s22 }
 0xd2b   : > { %v2454_v19 = vpop.f32.mrf.mxu0 }
 0xd2c   : > { %v9994_v0 = vadd.f32 %v9981_v34, %v2454_v19 }
 0xd3d   : > { %v4330_v23 = vpop.permute.xlu2 %4329 }
 0xd3e   : > { %4339 = vst.msk [vmem:[#allocation2 + $0x31] sm:$0xff] %vm3169_vm1, %v4330_v23 }
 0xd41   : > { %v2457_v63 = vpop.f32.mrf.mxu2 }
 0xd42   : > { %v9986_v1 = vadd.f32 %v9981_v34, %v2457_v63 }
 0xd44   : > { %v5396_v26 = vrot.slane %v9986_v1, 7 }
 0xd45   : > { %v4326_v50 = vpop.permute.xlu0 %4325  ;;  %v2217_v6 = vpop.permute.xlu2 %2216  ;;  %v9983_v30 = vld [vmem:[#allocation2 + $0x30] sm:$0xff] }
 0xd46   : > { %4337 = vst.msk [vmem:[#allocation2 + $0x11] sm:$0xff] %vm3169_vm1, %v4326_v50  ;;  %v2308_v38 = vsel %vm566_vm2, %v11821_v49, %v2217_v6  ;;  %v5397_v16 = vsel %vm2577_vm9, %v5396_v26, %v9994_v0  ;;  %v10036_v49 = vld [vmem:[#allocation2 + $0x38] sm:$0x3] }
 0xd49   : > { %v2460_v24 = vpop.f32.mrf.mxu2 }
 0xd4a   : > { %v9989_v37 = vadd.f32 %v9981_v34, %v2460_v24 }
 0xd4c   : > { %v5398_v28 = vrot.slane %v9989_v37, 6 }
 0xd4d   : > { %v9949_v47 = vld [vmem:[#allocation2 + $0x10] sm:$0xff]  ;;  %v10015_v3 = vld [vmem:[#allocation2 + $0x18] sm:$0x3] }
 0xd4e   : > { %v5399_v62 = vsel %vm2580_vm15, %v5398_v28, %v5397_v16 }
 0xd56   : > { %v4332_v41 = vpop.permute.xlu0 %4331 }
 0xd57   : > { %4340 = vst.msk [vmem:[#allocation2 + $0x41] sm:$0xff] %vm3169_vm1, %v4332_v41 }
 0xd58   : > { %v4328_v29 = vpop.permute.xlu1 %4327 }
 0xd59   : > { %4338 = vst.msk [vmem:[#allocation2 + $0x21] sm:$0xff] %vm3169_vm1, %v4328_v29  ;;  %vm11827_vm1 = vcmask 1043459  }
 0xd5a   : > { %vm11833_vm10 = vmmov %vm11827_vm1 }
 0xd5b   : > { %vm11834_vm8 = vmmov %vm11827_vm1 }
 0xd5c   : > { %vm11835_vm7 = vmmov %vm11827_vm1 }
 0xd60   : > { %v2215_v35 = vpop.permute.xlu1 %2214  ;;  %v9951_v10 = vld [vmem:[#allocation2 + $0x20] sm:$0xff]  ;;  %v10013_v46 = vld [vmem:[#allocation2 + $0x28] sm:$0x3] }
 0xd61   : > { %v2307_v12 = vsel %vm566_vm2, %v11820_v53, %v2215_v35 }
 0xd62   : > { %6170 = vmatmul.msk.f32.gmra.mxu2 %vm324_vm0, %v2307_v12  ;;  %v1252_v12 = vpop.f32.mrf.mxu3 }
 0xd68   : > { %v4605_v18 = vpop.permute.xlu1 %4604 }
 0xd69   : > { %v4608_v59 = vmul.f32 %v4605_v18, %v9949_v47  ;;  %v4609_v9 = vmul.f32 %v4605_v18, %v9951_v10  ;;  %v4607_v58 = vmul.f32 %v4605_v18, %v9953_v8  ;;  %v4610_v40 = vmul.f32 %v4605_v18, %v9983_v30  ;;  %v2110_v18 = vpop.f32.mrf.mxu1 }
 0xd6a   : > { %6171 = vmatmul.msk.f32.gmra.mxu2 %vm324_vm0, %v2308_v38 }
 0xd6b   : > { %4617 = vrot.lane.b32.xlu0 %v4608_v59, %s6799_s9  ;;  %4619 = vrot.lane.b32.xlu1 %v4609_v9, %s6799_s9 }
 0xd6c   : > { %4615 = vrot.lane.b32.xlu2 %v4607_v58, %s6799_s9  ;;  %v3185_v58 = vld [vmem:[%s11379_s6 + $0x8] sm:$0x7] }
 0xd70   : > { %v2219_v33 = vpop.permute.xlu1 %2218 }
 0xd71   : > { %v2309_v22 = vsel %vm566_vm2, %v11822_v11, %v2219_v33  ;;  %v4680_v33 = vperm.slane %v3185_v58, 1  ;;  %v2113_v11 = vpop.f32.mrf.mxu1 }
 0xd72   : > { %6172 = vmatmul.msk.f32.gmra.mxu2 %vm324_vm0, %v2309_v22 }
 0xd73   : > { %4633 = vrot.lane.b32.xlu0 %v4631_v39, %s6801_s14  ;;  %2222 = vrot.lane.b32.xlu1 %v11823_v44, %s6810_s22 }
 0xd74   : > { %2220 = vrot.lane.b32.xlu2 %v11824_v52, %s6810_s22 }
 0xd79   : > { %v2116_v26 = vpop.f32.mrf.mxu1 }
 0xd7c   : > { %4621 = vrot.lane.b32.xlu2 %v4610_v40, %s6799_s9 }
 0xd84   : > { %2224 = vrot.lane.b32.xlu2 %v2104_v7, %s6810_s22 }
 0xdc6   : > { %v10002_v14 = vpop.permute.xlu2 %4615 }
 0xdce   : > { %v2221_v45 = vpop.permute.xlu2 %2220 }
 0xdcf   : > { %v2310_v15 = vsel %vm566_vm2, %v11825_v60, %v2221_v45 }
 0xdd0   : > { %6173 = vmatmul.msk.f32.gmra.mxu2 %vm324_vm0, %v2310_v15  ;;  %v10068_v15 = vperm.slane %v9967_v51, 0 }
 0xdd6   : > { %v10011_v43 = vpop.permute.xlu2 %4621 }
 0xddd   : > { %v10007_v42 = vpop.permute.xlu0 %4617  ;;  %v10009_v32 = vpop.permute.xlu1 %4619 }
 0xdde   : > { %v2225_v29 = vpop.permute.xlu2 %2224 }
 0xddf   : > { %v2312_v6 = vsel %vm566_vm2, %v1252_v12, %v2225_v29 }
 0xde5   : > { %v4634_v36 = vpop.permute.xlu0 %4633  ;;  %v2223_v5 = vpop.permute.xlu1 %2222 }
 0xde6   : > { %v2311_v54 = vsel %vm566_vm2, %v11826_v17, %v2223_v5  ;;  %v4640_v13 = vmul.f32 %v4634_v36, %v9951_v10  ;;  %v4641_v48 = vmul.f32 %v4634_v36, %v10013_v46  ;;  %v4636_v61 = vmul.f32 %v4634_v36, %v9953_v8  ;;  %v2463_v38 = vpop.f32.mrf.mxu2 }
 0xde7   : > { %6174 = vmatmul.msk.f32.gmra.mxu2 %vm324_vm0, %v2311_v54  ;;  %v4637_v57 = vmul.f32 %v4634_v36, %v10017_v55  ;;  %v4638_v56 = vmul.f32 %v4634_v36, %v9949_v47  ;;  %v4639_v27 = vmul.f32 %v4634_v36, %v10015_v3  ;;  %v4642_v59 = vmul.f32 %v4634_v36, %v9983_v30 }
 0xde8   : > { %v4658_v4 = vrot.slane %v4640_v13, 1  ;;  %v4659_v21 = vrot.slane %v4641_v48, 1  ;;  %v4652_v2 = vrot.slane %v4636_v61, 1  ;;  %v4643_v9 = vmul.f32 %v4634_v36, %v10036_v49  ;;  %v10079_v13 = vld [vmem:[%s11379_s6 + $0x10] sm:$0x7] }
 0xde9   : > { %v4653_v25 = vrot.slane %v4637_v57, 1  ;;  %v4655_v23 = vrot.slane %v4638_v56, 1  ;;  %v4656_v50 = vrot.slane %v4639_v27, 1  ;;  %v4661_v63 = vrot.slane %v4642_v59, 1  ;;  %v10091_v57 = vld [vmem:[%s11379_s6 + $0xc] sm:$0x7] }
 0xdea   : > { %v4660_v41 = vsel %vm3230_vm6, %v4658_v4, %v4659_v21  ;;  %v4662_v39 = vrot.slane %v4643_v9, 1  ;;  %v10046_v22 = vadd.f32 %v9981_v34, %v2463_v38  ;;  %v4366_v36 = vmul.f32 %v10068_v15, %v10015_v3  ;;  %v3190_v9 = vld [vmem:[%s11379_s6 + $0x1c] sm:$0x7] }
 0xdeb   : > { %4668 = vrot.lane.b32.xlu0 %v4660_v41, %s6799_s9  ;;  %v4654_v35 = vsel %vm3230_vm6, %v4652_v2, %v4653_v25  ;;  %v4657_v53 = vsel %vm3230_vm6, %v4655_v23, %v4656_v50  ;;  %v10074_v5 = vperm.slane %v3185_v58, 0  ;;  %v10086_v61 = vperm.slane %v9936_v31, 0  ;;  %v10106_v23 = vld [vmem:[%s11379_s6 + $0x14] sm:$0x7] }
 0xdec   : > { %4664 = vrot.lane.b32.xlu1 %v4654_v35, %s6799_s9  ;;  %4666 = vrot.lane.b32.xlu2 %v4657_v53, %s6799_s9  ;;  %v4663_v44 = vsel %vm3230_vm6, %v4661_v63, %v4662_v39  ;;  %v5400_v24 = vrot.slane %v10046_v22, 5  ;;  %v4383_v54 = vrot.slane %v4366_v36, 1  ;;  %v10094_v56 = vperm.slane %v10079_v13, 0  ;;  %v10128_v39 = vld [vmem:[%s11379_s6 + $0x18] sm:$0x7] }
 0xded   : > { %v4402_v48 = vmul.f32 %v10074_v5, %v9949_v47  ;;  %v4403_v51 = vmul.f32 %v10074_v5, %v10015_v3  ;;  %v4355_v4 = vmul.f32 %v10086_v61, %v9949_v47  ;;  %v10109_v50 = vperm.slane %v10091_v57, 0 }
 0xdee   : > { %v2466_v52 = vpop.f32.mrf.mxu2  ;;  %v5401_v19 = vsel %vm11827_vm1, %v5400_v24, %v5399_v62  ;;  %v4448_v25 = vmul.f32 %v10094_v56, %v9951_v10  ;;  %v4449_v31 = vmul.f32 %v10094_v56, %v10013_v46  ;;  %v10114_v35 = vperm.slane %v10106_v23, 0 }
 0xdef   : > { %6175 = vmatmul.msk.f32.gmra.mxu2 %vm324_vm0, %v2312_v6  ;;  %v10054_v40 = vadd.f32 %v9981_v34, %v2466_v52  ;;  %v4419_v21 = vrot.slane %v4402_v48, 2  ;;  %v4420_v2 = vrot.slane %v4403_v51, 2  ;;  %v4438_v29 = vmul.f32 %v10109_v50, %v9951_v10  ;;  %v3191_v52 = vld [vmem:[%s11379_s6 + $0x20] sm:$0x7] }
 0xdf0   : > { %v4465_v12 = vrot.slane %v4448_v25, 1  ;;  %v4466_v6 = vrot.slane %v4449_v31, 1  ;;  %v4485_v38 = vmul.f32 %v10114_v35, %v9951_v10  ;;  %v4486_v59 = vmul.f32 %v10114_v35, %v10013_v46 }
 0xdf1   : > { %v5402_v28 = vrot.slane %v10054_v40, 4  ;;  %v4421_v53 = vsel %vm3268_vm11, %v4419_v21, %v4420_v2  ;;  %v4369_v31 = vmul.f32 %v10068_v15, %v9983_v30 }
 0xdf2   : > { %v4467_v63 = vsel %vm3230_vm6, %v4465_v12, %v4466_v6 }
 0xdf3   : > { %v5403_v7 = vsel %vm2586_vm3, %v5402_v28, %v5401_v19  ;;  %v10136_v19 = vperm.slane %v10128_v39, 0  ;;  %v4388_v6 = vrot.slane %v4369_v31, 1 }
 0xdf4   : > { %2226 = vrot.lane.b32.xlu1 %v2107_v20, %s6810_s22  ;;  %2228 = vrot.lane.b32.xlu2 %v2110_v18, %s6810_s22  ;;  %v4365_v20 = vmul.f32 %v10068_v15, %v9949_v47 }
 0xdf6   : > { %v2469_v16 = vpop.f32.mrf.mxu2  ;;  %v4382_v17 = vrot.slane %v4365_v20, 1  ;;  %v4521_v20 = vmul.f32 %v10136_v19, %v9983_v30 }
 0xdf7   : > { %v10061_v45 = vadd.f32 %v9981_v34, %v2469_v16 }
 0xdf8   : > { %v4384_v27 = vsel %vm3230_vm6, %v4382_v17, %v4383_v54 }
 0xdf9   : > { %v5404_v60 = vrot.slane %v10061_v45, 3  ;;  %v4396_v41 = vadd.f32 %v4384_v27, %v4355_v4 }
 0xdfb   : > { %v10065_v62 = vsel %vm2589_vm4, %v5404_v60, %v5403_v7  ;;  %v4433_v18 = vadd.f32 %v4421_v53, %v4396_v41  ;;  %v4370_v41 = vmul.f32 %v10068_v15, %v10036_v49 }
 0xdfc   : > { %4670 = vrot.lane.b32.xlu1 %v4663_v44, %s6799_s9  ;;  %4682 = vrot.lane.b32.xlu2 %v4680_v33, %s6801_s14  ;;  %v10130_v33 = vperm.slane %v3190_v9, 0  ;;  %v4503_v44 = vrot.slane %v4486_v59, 2  ;;  %v4406_v59 = vmul.f32 %v10074_v5, %v9983_v30  ;;  %v4407_v9 = vmul.f32 %v10074_v5, %v10036_v49 }
 0xdfd   : > { %v4442_v58 = vadd.f32 %v4438_v29, %v4433_v18  ;;  %v4389_v18 = vrot.slane %v4370_v41, 1 }
 0xdfe   : > { %v4531_v16 = vmul.f32 %v10130_v33, %v9983_v30  ;;  %v4532_v7 = vmul.f32 %v10130_v33, %v10036_v49 }
 0xdff   : > { %v4479_v24 = vadd.f32 %v4467_v63, %v4442_v58  ;;  %v4390_v58 = vsel %vm3230_vm6, %v4388_v6, %v4389_v18  ;;  %v4357_v63 = vmul.f32 %v10086_v61, %v9983_v30 }
 0xe00   : > { %v4548_v36 = vrot.slane %v4531_v16, 1  ;;  %v4549_v17 = vrot.slane %v4532_v7, 1 }
 0xe02   : > { %v4550_v27 = vsel %vm3230_vm6, %v4548_v36, %v4549_v17 }
 0xe04   : > { %2230 = vrot.lane.b32.xlu1 %v2113_v11, %s6810_s22  ;;  %2232 = vrot.lane.b32.xlu2 %v2116_v26, %s6810_s22  ;;  %v4502_v11 = vrot.slane %v4485_v38, 2  ;;  %v10138_v26 = vperm.slane %v3191_v52, 0  ;;  %v4426_v52 = vrot.slane %v4407_v9, 2 }
 0xe06   : > { %v4504_v28 = vsel %vm3268_vm11, %v4502_v11, %v4503_v44  ;;  %v4568_v54 = vmul.f32 %v10138_v26, %v9983_v30  ;;  %v4569_v48 = vmul.f32 %v10138_v26, %v10036_v49  ;;  %v10167_v11 = vld [vmem:[#allocation2 + $0x40] sm:$0xff]  ;;  %v10169_v44 = vld [vmem:[#allocation2 + $0x48] sm:$0x3] }
 0xe07   : > { %v4516_v60 = vadd.f32 %v4504_v28, %v4479_v24  ;;  %v4398_v24 = vadd.f32 %v4390_v58, %v4357_v63  ;;  %v4452_v16 = vmul.f32 %v10094_v56, %v10167_v11  ;;  %v4453_v7 = vmul.f32 %v10094_v56, %v10169_v44 }
 0xe08   : > { %v4585_v4 = vrot.slane %v4568_v54, 2  ;;  %v4586_v21 = vrot.slane %v4569_v48, 2  ;;  %v4440_v36 = vmul.f32 %v10109_v50, %v10167_v11  ;;  %v4489_v48 = vmul.f32 %v10114_v35, %v10167_v11 }
 0xe09   : > { %v4525_v51 = vadd.f32 %v4521_v20, %v4516_v60  ;;  %v4471_v17 = vrot.slane %v4452_v16, 1  ;;  %v4472_v54 = vrot.slane %v4453_v7, 1 }
 0xe0a   : > { %v4587_v25 = vsel %vm3268_vm11, %v4585_v4, %v4586_v21  ;;  %v10184_v21 = vld [vmem:[#allocation2 + $0x50] sm:$0xff] }
 0xe0b   : > { %v4562_v2 = vadd.f32 %v4550_v27, %v4525_v51  ;;  %v4490_v27 = vmul.f32 %v10114_v35, %v10169_v44 }
 0xe0d   : > { %v4599_v29 = vadd.f32 %v4587_v25, %v4562_v2 }
 0xe0f   : > { %v4628_v53 = vadd.f32 %v10007_v42, %v4599_v29  ;;  %v4425_v42 = vrot.slane %v4406_v59, 2  ;;  %v4352_v29 = vld [vmem:[#allocation2 + $0x58] sm:$0x3]  ;;  %v2119_v59 = vpop.f32.mrf.mxu1 }
 0xe11   : > { %v4427_v60 = vsel %vm3268_vm11, %v4425_v42, %v4426_v52  ;;  %v4509_v52 = vrot.slane %v4490_v27, 2 }
 0xe12   : > { %v4435_v20 = vadd.f32 %v4427_v60, %v4398_v24  ;;  %v4535_v24 = vmul.f32 %v10130_v33, %v10184_v21 }
 0xe14   : > { %v4444_v51 = vadd.f32 %v4440_v36, %v4435_v20  ;;  %v4536_v20 = vmul.f32 %v10130_v33, %v4352_v29 }
 0xe46   : > { %v4667_v12 = vpop.permute.xlu2 %4666 }
 0xe47   : > { %v10158_v38 = vadd.f32 %v4667_v12, %v4628_v53  ;;  %v4473_v53 = vsel %vm3230_vm6, %v4471_v17, %v4472_v54  ;;  %v4508_v12 = vrot.slane %v4489_v48, 2 }
 0xe48   : > { %v4481_v60 = vadd.f32 %v4473_v53, %v4444_v51  ;;  %v4555_v53 = vrot.slane %v4536_v20, 1 }
 0xe49   : > { %v4510_v51 = vsel %vm3268_vm11, %v4508_v12, %v4509_v52 }
 0xe4e   : > { %v10171_v28 = vpop.permute.xlu2 %2228 }
 0xe56   : > { %v4683_v4 = vpop.permute.xlu2 %4682 }
 0xe57   : > { %v4689_v2 = vmul.f32 %v4683_v4, %v9951_v10  ;;  %v4690_v25 = vmul.f32 %v4683_v4, %v10013_v46  ;;  %v4687_v31 = vmul.f32 %v4683_v4, %v9949_v47  ;;  %v4688_v41 = vmul.f32 %v4683_v4, %v10015_v3 }
 0xe58   : > { %v4685_v6 = vmul.f32 %v4683_v4, %v9953_v8  ;;  %v4686_v18 = vmul.f32 %v4683_v4, %v10017_v55  ;;  %v4691_v48 = vmul.f32 %v4683_v4, %v9983_v30  ;;  %v4692_v27 = vmul.f32 %v4683_v4, %v10036_v49 }
 0xe59   : > { %v4707_v9 = vrot.slane %v4689_v2, 2  ;;  %v4708_v58 = vrot.slane %v4690_v25, 2  ;;  %v4704_v63 = vrot.slane %v4687_v31, 2  ;;  %v4705_v42 = vrot.slane %v4688_v41, 2 }
 0xe5a   : > { %v4701_v16 = vrot.slane %v4685_v6, 2  ;;  %v4702_v7 = vrot.slane %v4686_v18, 2  ;;  %v4518_v25 = vadd.f32 %v4510_v51, %v4481_v60  ;;  %v4523_v31 = vmul.f32 %v10136_v19, %v10184_v21  ;;  %v1255_v6 = vpop.f32.mrf.mxu3 }
 0xe5b   : > { %v4709_v36 = vsel %vm3268_vm11, %v4707_v9, %v4708_v58  ;;  %v4706_v17 = vsel %vm3268_vm11, %v4704_v63, %v4705_v42  ;;  %v4554_v41 = vrot.slane %v4535_v24, 1  ;;  %v4572_v18 = vmul.f32 %v10138_v26, %v10184_v21  ;;  %v2122_v63 = vpop.f32.mrf.mxu1 }
 0xe5c   : > { %4717 = vrot.lane.b32.xlu2 %v4709_v36, %s6799_s9  ;;  %4715 = vrot.lane.b32.xlu1 %v4706_v17, %s6799_s9  ;;  %v4703_v54 = vsel %vm3268_vm11, %v4701_v16, %v4702_v7  ;;  %v4573_v9 = vmul.f32 %v10138_v26, %v4352_v29  ;;  %v4710_v58 = vrot.slane %v4691_v48, 2  ;;  %v4711_v4 = vrot.slane %v4692_v27, 2  ;;  %v2472_v7 = vpop.f32.mrf.mxu2 }
 0xe5d   : > { %4713 = vrot.lane.b32.xlu0 %v4703_v54, %s6799_s9  ;;  %v4527_v42 = vadd.f32 %v4523_v31, %v4518_v25  ;;  %v4556_v12 = vsel %vm3230_vm6, %v4554_v41, %v4555_v53  ;;  %v4591_v52 = vrot.slane %v4572_v18, 2  ;;  %v10218_v29 = vadd.f32 %v9981_v34, %v2472_v7 }
 0xe5e   : > { %v10205_v2 = vpop.permute.xlu1 %4664  ;;  %v4592_v16 = vrot.slane %v4573_v9, 2  ;;  %v4712_v24 = vsel %vm3268_vm11, %v4710_v58, %v4711_v4  ;;  %v4729_v54 = vperm.slane %v10091_v57, 1 }
 0xe5f   : > { %v4564_v20 = vadd.f32 %v4556_v12, %v4527_v42  ;;  %v4367_v12 = vmul.f32 %v10068_v15, %v9951_v10 }
 0xe60   : > { %v4593_v17 = vsel %vm3268_vm11, %v4591_v52, %v4592_v16  ;;  %v4368_v52 = vmul.f32 %v10068_v15, %v10013_v46 }
 0xe61   : > { %v4601_v27 = vadd.f32 %v4593_v17, %v4564_v20  ;;  %v4385_v16 = vrot.slane %v4367_v12, 1  ;;  %v4533_v12 = vmul.f32 %v10130_v33, %v10167_v11 }
 0xe62   : > { %v1258_v48 = vpop.f32.mrf.mxu3  ;;  %v4386_v7 = vrot.slane %v4368_v52, 1  ;;  %v4534_v52 = vmul.f32 %v10130_v33, %v10169_v44 }
 0xe63   : > { %v4630_v51 = vadd.f32 %v10011_v43, %v4601_v27  ;;  %v2314_v53 = vsel %vm566_vm2, %v1258_v48, %v10171_v28  ;;  %v2125_v57 = vpop.f32.mrf.mxu1  ;;  %v2233_v43 = vpop.permute.xlu2 %2232 }
 0xe64   : > { %2236 = vrot.lane.b32.xlu2 %v2122_v63, %s6810_s22  ;;  %2234 = vrot.lane.b32.xlu1 %v2119_v59, %s6810_s22  ;;  %v5406_v59 = vrot.slane %v10218_v29, 2  ;;  %v4387_v20 = vsel %vm3230_vm6, %v4385_v16, %v4386_v7  ;;  %v4364_v7 = vmul.f32 %v10068_v15, %v10017_v55 }
 0xe65   : > { %4719 = vrot.lane.b32.xlu0 %v4712_v24, %s6799_s9  ;;  %v4404_v24 = vmul.f32 %v10074_v5, %v9951_v10 }
 0xe66   : > { %v2227_v60 = vpop.permute.xlu1 %2226  ;;  %v5407_v25 = vsel %vm11828_vm5, %v5406_v59, %v10065_v62  ;;  %v4450_v59 = vmul.f32 %v10094_v56, %v9983_v30  ;;  %vm11831_vm5 = vmmov %vm11827_vm1 }
 0xe67   : > { %v2313_v36 = vsel %vm566_vm2, %v1255_v6, %v2227_v60  ;;  %v4405_v60 = vmul.f32 %v10074_v5, %v10013_v46  ;;  %v4422_v17 = vrot.slane %v4404_v24, 2 }
 0xe68   : > { %6176 = vmatmul.msk.f32.gmra.mxu2 %vm324_vm0, %v2313_v36  ;;  %v4356_v36 = vmul.f32 %v10086_v61, %v9951_v10 }
 0xe6a   : > { %v1261_v6 = vpop.f32.mrf.mxu3  ;;  %v2475_v58 = vpop.f32.mrf.mxu2  ;;  %v4397_v48 = vadd.f32 %v4387_v20, %v4356_v36  ;;  %v4522_v20 = vmul.f32 %v10136_v19, %v10167_v11  ;;  %v4551_v36 = vrot.slane %v4533_v12, 1 }
 0xe6b   : > { %v10238_v4 = vadd.f32 %v9981_v34, %v2475_v58 }
 0xe6c   : > { %4731 = vrot.lane.b32.xlu1 %v4729_v54, %s6801_s14  ;;  %v4423_v54 = vrot.slane %v4405_v60, 2 }
 0xe6d   : > { %v5408_v28 = vrot.slane %v10238_v4, 1 }
 0xe6e   : > { %v4671_v31 = vpop.permute.xlu1 %4670  ;;  %v4424_v27 = vsel %vm3268_vm11, %v4422_v17, %v4423_v54  ;;  %v4552_v17 = vrot.slane %v4534_v52, 1  ;;  %v4570_v54 = vmul.f32 %v10138_v26, %v10167_v11  ;;  %v4437_v52 = vmul.f32 %v10109_v50, %v9949_v47 }
 0xe6f   : > { %v10229_v41 = vadd.f32 %v4671_v31, %v4630_v51  ;;  %v10244_v42 = vsel %vm11829_vm12, %v5408_v28, %v5407_v25  ;;  %v4451_v51 = vmul.f32 %v10094_v56, %v10036_v49  ;;  %v4434_v25 = vadd.f32 %v4424_v27, %v4397_v48  ;;  %vm11832_vm12 = vmmov %vm11827_vm1 }
 0xe70   : > { %6177 = vmatmul.msk.f32.gmra.mxu2 %vm324_vm0, %v2314_v53  ;;  %11830 = vst [vmem:[#allocation53_spill] sm:$0xff] %v10244_v42  ;;  %v4439_v31 = vmul.f32 %v10109_v50, %v9983_v30  ;;  %v4468_v53 = vrot.slane %v4450_v59, 1  ;;  %v4363_v28 = vmul.f32 %v10068_v15, %v9953_v8  ;;  %v4571_v48 = vmul.f32 %v10138_v26, %v10169_v44 }
 0xe71   : > { %v4380_v27 = vrot.slane %v4364_v7, 1  ;;  %v4400_v59 = vmul.f32 %v10074_v5, %v9953_v8  ;;  %v4401_v15 = vmul.f32 %v10074_v5, %v10017_v55  ;;  %v4446_v55 = vmul.f32 %v10094_v56, %v9949_v47 }
 0xe72   : > { %v1264_v62 = vpop.f32.mrf.mxu3  ;;  %v4379_v60 = vrot.slane %v4363_v28, 1  ;;  %v4529_v50 = vmul.f32 %v10130_v33, %v9951_v10 }
 0xe73   : > { %v2316_v63 = vsel %vm566_vm2, %v1264_v62, %v2233_v43 }
 0xe74   : > { %2238 = vrot.lane.b32.xlu1 %v2125_v57, %s6810_s22  ;;  %v4469_v57 = vrot.slane %v4451_v51, 1 }
 0xe76   : > { %v2231_v18 = vpop.permute.xlu1 %2230  ;;  %v4470_v43 = vsel %vm3230_vm6, %v4468_v53, %v4469_v57  ;;  %v4588_v53 = vrot.slane %v4570_v54, 2  ;;  %v4589_v57 = vrot.slane %v4571_v48, 2 }
 0xe77   : > { %v2315_v9 = vsel %vm566_vm2, %v1261_v6, %v2231_v18  ;;  %v4487_v6 = vmul.f32 %v10114_v35, %v9983_v30  ;;  %v4488_v18 = vmul.f32 %v10114_v35, %v10036_v49 }
 0xe78   : > { %6178 = vmatmul.msk.f32.gmra.mxu2 %vm324_vm0, %v2315_v9  ;;  %v4443_v9 = vadd.f32 %v4439_v31, %v4434_v25  ;;  %v4354_v25 = vmul.f32 %v10086_v61, %v9953_v8  ;;  %v4553_v31 = vsel %vm3230_vm6, %v4551_v36, %v4552_v17  ;;  %v4447_v8 = vmul.f32 %v10094_v56, %v10015_v3  ;;  %v4669_v61 = vpop.permute.xlu0 %4668 }
 0xe79   : > { %v4505_v58 = vrot.slane %v4487_v6, 2  ;;  %v4506_v62 = vrot.slane %v4488_v18, 2  ;;  %v4381_v6 = vsel %vm3230_vm6, %v4379_v60, %v4380_v27  ;;  %v4416_v18 = vrot.slane %v4400_v59, 2 }
 0xe7a   : > { %v4463_v7 = vrot.slane %v4447_v8, 1  ;;  %v4484_v36 = vmul.f32 %v10114_v35, %v10015_v3  ;;  %v4530_v27 = vmul.f32 %v10130_v33, %v10013_v46 }
 0xe7b   : > { %v4507_v16 = vsel %vm3268_vm11, %v4505_v58, %v4506_v62  ;;  %v4395_v58 = vadd.f32 %v4381_v6, %v4354_v25  ;;  %v4590_v62 = vsel %vm3268_vm11, %v4588_v53, %v4589_v57  ;;  %v4566_v53 = vmul.f32 %v10138_v26, %v9951_v10 }
 0xe7c   : > { %v4500_v48 = vrot.slane %v4484_v36, 2  ;;  %v4546_v25 = vrot.slane %v4530_v27, 1  ;;  %v4567_v57 = vmul.f32 %v10138_v26, %v10013_v46  ;;  %v1267_v26 = vpop.f32.mrf.mxu3 }
 0xe7e   : > { %v4583_v33 = vrot.slane %v4567_v57, 2 }
 0xe80   : > { %6179 = vmatmul.msk.f32.gmra.mxu2 %vm324_vm0, %v2316_v63  ;;  %v4480_v63 = vadd.f32 %v4470_v43, %v4443_v9  ;;  %v4417_v9 = vrot.slane %v4401_v15, 2  ;;  %v4520_v15 = vmul.f32 %v10136_v19, %v9951_v10 }
 0xe82   : > { %v4517_v24 = vadd.f32 %v4507_v16, %v4480_v63  ;;  %v4418_v63 = vsel %vm3268_vm11, %v4416_v18, %v4417_v9  ;;  %v4462_v16 = vrot.slane %v4446_v55, 1  ;;  %v4582_v9 = vrot.slane %v4566_v53, 2 }
 0xe83   : > { %v4432_v12 = vadd.f32 %v4418_v63, %v4395_v58 }
 0xe84   : > { %v4526_v51 = vadd.f32 %v4522_v20, %v4517_v24  ;;  %v4483_v20 = vmul.f32 %v10114_v35, %v9949_v47  ;;  %v4464_v54 = vsel %vm3230_vm6, %v4462_v16, %v4463_v7  ;;  %v4545_v35 = vrot.slane %v4529_v50, 1  ;;  %v2128_v7 = vpop.f32.mrf.mxu1 }
 0xe85   : > { %v4441_v56 = vadd.f32 %v4437_v52, %v4432_v12  ;;  %v4584_v58 = vsel %vm3268_vm11, %v4582_v9, %v4583_v33  ;;  %v1270_v52 = vpop.f32.mrf.mxu3 }
 0xe86   : > { %v4563_v43 = vadd.f32 %v4553_v31, %v4526_v51  ;;  %v4547_v18 = vsel %vm3230_vm6, %v4545_v35, %v4546_v25 }
 0xe87   : > { %v4478_v59 = vadd.f32 %v4464_v54, %v4441_v56  ;;  %v4758_v56 = vperm.slane %v10079_v13, 1 }
 0xe88   : > { %v4600_v5 = vadd.f32 %v4590_v62, %v4563_v43 }
 0xe8a   : > { %v4629_v28 = vadd.f32 %v10009_v32, %v4600_v5  ;;  %v4499_v32 = vrot.slane %v4483_v20, 2 }
 0xe8c   : > { %v4678_v24 = vadd.f32 %v4669_v61, %v4629_v28  ;;  %v4501_v51 = vsel %vm3268_vm11, %v4499_v32, %v4500_v48  ;;  %v2131_v32 = vpop.f32.mrf.mxu1  ;;  %v2478_v48 = vpop.f32.mrf.mxu2 }
 0xe8d   : > { %v4515_v31 = vadd.f32 %v4501_v51, %v4478_v59  ;;  %v1273_v20 = vpop.f32.mrf.mxu3 }
 0xe8f   : > { %v4524_v6 = vadd.f32 %v4520_v15, %v4515_v31  ;;  %v2479_v15 = vadd.f32 %v9981_v34, %v2478_v48 }
 0xe91   : > { %v4561_v43 = vadd.f32 %v4547_v18, %v4524_v6  ;;  %v5470_v31 = vrot.slane %v2479_v15, 1  ;;  %v5674_v33 = vrot.slane %v2479_v15, 4 }
 0xe93   : > { %v4598_v19 = vadd.f32 %v4584_v58, %v4561_v43  ;;  %v5538_v43 = vrot.slane %v2479_v15, 2  ;;  %v5606_v58 = vrot.slane %v2479_v15, 3 }
 0xe94   : > { %v2134_v59 = vpop.f32.mrf.mxu1 }
 0xe95   : > { %v4627_v62 = vadd.f32 %v10002_v14, %v4598_v19  ;;  %v5742_v19 = vrot.slane %v2479_v15, 5 }
 0xe97   : > { %v4676_v63 = vadd.f32 %v10205_v2, %v4627_v62 }
 0xeb6   : > { %v4718_v60 = vpop.permute.xlu2 %4717 }
 0xeb7   : > { %v10305_v17 = vadd.f32 %v4718_v60, %v4678_v24 }
 0xebe   : > { %v2237_v16 = vpop.permute.xlu2 %2236 }
 0xebf   : > { %v2318_v60 = vsel %vm566_vm2, %v1270_v52, %v2237_v16 }
 0xece   : > { %v4716_v55 = vpop.permute.xlu1 %4715 }
 0xecf   : > { %v10324_v8 = vadd.f32 %v4716_v55, %v10158_v38  ;;  %v4714_v5 = vpop.permute.xlu0 %4713  ;;  %v5810_v55 = vrot.slane %v2479_v15, 6 }
 0xed0   : > { %v10326_v61 = vadd.f32 %v4714_v5, %v4676_v63  ;;  %v5878_v5 = vrot.slane %v2479_v15, 7 }
 0xed6   : > { %v2235_v28 = vpop.permute.xlu1 %2234 }
 0xed7   : > { %v2317_v12 = vsel %vm566_vm2, %v1267_v26, %v2235_v28 }
 0xed8   : > { %6180 = vmatmul.msk.f32.gmra.mxu2 %vm324_vm0, %v2317_v12 }
 0xede   : > { %v4732_v24 = vpop.permute.xlu1 %4731 }
 0xedf   : > { %v4734_v14 = vmul.f32 %v4732_v24, %v9949_v47  ;;  %v4735_v2 = vmul.f32 %v4732_v24, %v9951_v10  ;;  %v4736_v38 = vmul.f32 %v4732_v24, %v9983_v30  ;;  %v4737_v50 = vmul.f32 %v4732_v24, %v10167_v11 }
 0xee0   : > { %6181 = vmatmul.msk.f32.gmra.mxu2 %vm324_vm0, %v2318_v60 }
 0xee1   : > { %4746 = vrot.lane.b32.xlu1 %v4736_v38, %s6799_s9  ;;  %4742 = vrot.lane.b32.xlu2 %v4734_v14, %s6799_s9 }
 0xee2   : > { %4744 = vrot.lane.b32.xlu0 %v4735_v2, %s6799_s9 }
 0xee6   : > { %v2239_v36 = vpop.permute.xlu1 %2238 }
 0xee7   : > { %v2319_v54 = vsel %vm566_vm2, %v1273_v20, %v2239_v36 }
 0xee8   : > { %6182 = vmatmul.msk.f32.gmra.mxu2 %vm324_vm0, %v2319_v54 }
 0xee9   : > { %2242 = vrot.lane.b32.xlu1 %v2131_v32, %s6810_s22  ;;  %2240 = vrot.lane.b32.xlu2 %v2128_v7, %s6810_s22 }
 0xeea   : > { %4760 = vrot.lane.b32.xlu0 %v4758_v56, %s6801_s14 }
 0xeeb   : > { %v2481_v27 = vpop.f32.mrf.mxu2 }
 0xeec   : > { %v2482_v51 = vadd.f32 %v9981_v34, %v2481_v27 }
 0xeee   : > { %v5675_v53 = vrot.slane %v2482_v51, 3  ;;  %v5539_v57 = vrot.slane %v2482_v51, 1  ;;  %v5607_v6 = vrot.slane %v2482_v51, 2  ;;  %v5743_v18 = vrot.slane %v2482_v51, 4 }
 0xeef   : > { %v5811_v9 = vrot.slane %v2482_v51, 5  ;;  %v5471_v63 = vsel %vm2577_vm9, %v2482_v51, %v5470_v31  ;;  %v5879_v12 = vrot.slane %v2482_v51, 6  ;;  %v5410_v52 = vrot.slane %v2482_v51, 7 }
 0xef0   : > { %v5676_v28 = vsel %vm2577_vm9, %v5675_v53, %v5674_v33  ;;  %v5540_v16 = vsel %vm2577_vm9, %v5539_v57, %v5538_v43  ;;  %v5608_v7 = vsel %vm2577_vm9, %v5607_v6, %v5606_v58  ;;  %v5744_v24 = vsel %vm2577_vm9, %v5743_v18, %v5742_v19 }
 0xef1   : > { %4748 = vrot.lane.b32.xlu2 %v4737_v50, %s6799_s9  ;;  %v5812_v14 = vsel %vm2577_vm9, %v5811_v9, %v5810_v55  ;;  %v5880_v27 = vsel %vm2577_vm9, %v5879_v12, %v5878_v5 }
 0xef3   : > { %v2484_v13 = vpop.f32.mrf.mxu2 }
 0xef4   : > { %v2485_v35 = vadd.f32 %v9981_v34, %v2484_v13 }
 0xef6   : > { %v5472_v26 = vrot.slane %v2485_v35, 7  ;;  %v5677_v38 = vrot.slane %v2485_v35, 2  ;;  %v5541_v60 = vsel %vm2580_vm15, %v2485_v35, %v5540_v16  ;;  %v5609_v20 = vrot.slane %v2485_v35, 1 }
 0xef7   : > { %v5745_v36 = vrot.slane %v2485_v35, 3  ;;  %v5813_v56 = vrot.slane %v2485_v35, 4  ;;  %v5881_v54 = vrot.slane %v2485_v35, 5  ;;  %v5412_v32 = vrot.slane %v2485_v35, 6 }
 0xef8   : > { %v5473_v2 = vsel %vm2580_vm15, %v5472_v26, %v5471_v63  ;;  %v5678_v48 = vsel %vm2580_vm15, %v5677_v38, %v5676_v28  ;;  %v5610_v50 = vsel %vm2580_vm15, %v5609_v20, %v5608_v7  ;;  %v4720_v38 = vpop.permute.xlu0 %4719 }
 0xef9   : > { %2244 = vrot.lane.b32.xlu2 %v2134_v59, %s6810_s22  ;;  %v5411_v59 = vsel %vm2577_vm9, %v5410_v52, %v2479_v15  ;;  %v5746_v13 = vsel %vm2580_vm15, %v5745_v36, %v5744_v24  ;;  %v5814_v51 = vsel %vm2580_vm15, %v5813_v56, %v5812_v14  ;;  %v1276_v24 = vpop.f32.mrf.mxu3 }
 0xefa   : > { %v5413_v31 = vsel %vm2580_vm15, %v5412_v32, %v5411_v59 }
 0xefb   : > { %v2487_v25 = vpop.f32.mrf.mxu2 }
 0xefc   : > { %v2488_v62 = vadd.f32 %v9981_v34, %v2487_v25  ;;  %v5882_v25 = vsel %vm2580_vm15, %v5881_v54, %v5880_v27 }
 0xefe   : > { %v5474_v53 = vrot.slane %v2488_v62, 6  ;;  %v5679_v35 = vrot.slane %v2488_v62, 1  ;;  %v5542_v6 = vrot.slane %v2488_v62, 7  ;;  %v10371_v18 = vsel %vm11831_vm5, %v2488_v62, %v5610_v50  ;;  %vm11836_vm5 = vmmov %vm11827_vm1 }
 0xeff   : > { %v5747_v9 = vrot.slane %v2488_v62, 2  ;;  %v5815_v33 = vrot.slane %v2488_v62, 3  ;;  %v5883_v15 = vrot.slane %v2488_v62, 4  ;;  %v5414_v43 = vrot.slane %v2488_v62, 5 }
 0xf00   : > { %v10368_v57 = vsel %vm11827_vm1, %v5474_v53, %v5473_v2  ;;  %v10374_v19 = vsel %vm11832_vm12, %v5679_v35, %v5678_v48  ;;  %v10377_v63 = vsel %vm11833_vm10, %v5542_v6, %v5541_v60  ;;  %v4728_v60 = vadd.f32 %v4720_v38, %v10229_v41 }
 0xf01   : > { %v10380_v55 = vsel %vm11834_vm8, %v5747_v9, %v5746_v13  ;;  %v10383_v5 = vsel %vm11827_vm1, %v5815_v33, %v5814_v51  ;;  %v10386_v26 = vsel %vm11835_vm7, %v5883_v15, %v5882_v25  ;;  %v5415_v28 = vsel %vm11836_vm5, %v5414_v43, %v5413_v31  ;;  %v1279_v48 = vpop.f32.mrf.mxu3  ;;  %v2137_v13 = vpop.f32.mrf.mxu1 }
 0xf02   : > { %vm11837_vm7 = vcmask 1046534  }
 0xf03   : > { %v2490_v58 = vpop.f32.mrf.mxu2  ;;  %vm11838_vm8 = vmmov %vm11837_vm7 }
 0xf04   : > { %v10390_v62 = vadd.f32 %v9981_v34, %v2490_v58  ;;  %vm11839_vm10 = vmmov %vm11837_vm7 }
 0xf05   : > { %vm11840_vm12 = vmmov %vm11837_vm7 }
 0xf06   : > { %v5416_v12 = vrot.slane %v10390_v62, 4  ;;  %vm11841_vm1 = vmmov %vm11837_vm7 }
 0xf07   : > { %vm11842_vm5 = vmmov %vm11841_vm1 }
 0xf08   : > { %v10394_v52 = vsel %vm2586_vm3, %v5416_v12, %v5415_v28  ;;  %v4807_v12 = vperm.slane %v10106_v23, 1  ;;  %v5612_v23 = vrot.slane %v10390_v62, 7 }
 0xf3b   : > { %v4743_v16 = vpop.permute.xlu2 %4742 }
 0xf3c   : > { %v10397_v7 = vadd.f32 %v4743_v16, %v10326_v61 }
 0xf43   : > { %v2241_v14 = vpop.permute.xlu2 %2240 }
 0xf44   : > { %v2320_v2 = vsel %vm566_vm2, %v1276_v24, %v2241_v14  ;;  %v2140_v14 = vpop.f32.mrf.mxu1 }
 0xf45   : > { %6183 = vmatmul.msk.f32.gmra.mxu2 %vm324_vm0, %v2320_v2 }
 0xf4b   : > { %v4749_v20 = vpop.permute.xlu2 %4748 }
 0xf4c   : > { %v10402_v36 = vadd.f32 %v4749_v20, %v4728_v60  ;;  %v5476_v20 = vrot.slane %v10390_v62, 5 }
 0xf53   : > { %v4747_v56 = vpop.permute.xlu1 %4746  ;;  %v2245_v43 = vpop.permute.xlu2 %2244 }
 0xf54   : > { %v10405_v54 = vadd.f32 %v4747_v56, %v10305_v17  ;;  %v4745_v32 = vpop.permute.xlu0 %4744  ;;  %v5544_v56 = vrot.slane %v10390_v62, 6 }
 0xf55   : > { %v10408_v61 = vadd.f32 %v4745_v32, %v10324_v8  ;;  %v5749_v32 = vrot.slane %v10390_v62, 1 }
 0xf5b   : > { %v2243_v50 = vpop.permute.xlu1 %2242  ;;  %v2493_v2 = vpop.f32.mrf.mxu2 }
 0xf5c   : > { %v4761_v27 = vpop.permute.xlu0 %4760  ;;  %v2321_v59 = vsel %vm566_vm2, %v1279_v48, %v2243_v50  ;;  %v2494_v60 = vadd.f32 %v9981_v34, %v2493_v2  ;;  %v5817_v48 = vrot.slane %v10390_v62, 2  ;;  %v5885_v50 = vrot.slane %v10390_v62, 3 }
 0xf5d   : > { %6184 = vmatmul.msk.f32.gmra.mxu2 %vm324_vm0, %v2321_v59  ;;  %v4767_v41 = vmul.f32 %v4761_v27, %v9983_v30  ;;  %v4768_v51 = vmul.f32 %v4761_v27, %v10036_v49  ;;  %v4765_v25 = vmul.f32 %v4761_v27, %v9951_v10  ;;  %v4766_v17 = vmul.f32 %v4761_v27, %v10013_v46 }
 0xf5e   : > { %v4763_v31 = vmul.f32 %v4761_v27, %v9949_v47  ;;  %v4764_v8 = vmul.f32 %v4761_v27, %v10015_v3  ;;  %v4769_v47 = vmul.f32 %v4761_v27, %v10167_v11  ;;  %v4770_v46 = vmul.f32 %v4761_v27, %v10169_v44  ;;  %v1282_v3 = vpop.f32.mrf.mxu3 }
 0xf5f   : > { %v4785_v53 = vrot.slane %v4767_v41, 1  ;;  %v4786_v35 = vrot.slane %v4768_v51, 1  ;;  %v4782_v6 = vrot.slane %v4765_v25, 1  ;;  %v4783_v9 = vrot.slane %v4766_v17, 1  ;;  %v2143_v41 = vpop.f32.mrf.mxu1 }
 0xf60   : > { %v4779_v33 = vrot.slane %v4763_v31, 1  ;;  %v4780_v15 = vrot.slane %v4764_v8, 1  ;;  %v2322_v28 = vsel %vm566_vm2, %v1282_v3, %v2245_v43  ;;  %v4788_v16 = vrot.slane %v4769_v47, 1 }
 0xf61   : > { %v4787_v58 = vsel %vm3230_vm6, %v4785_v53, %v4786_v35  ;;  %v4784_v30 = vsel %vm3230_vm6, %v4782_v6, %v4783_v9  ;;  %v4789_v24 = vrot.slane %v4770_v46, 1  ;;  %v5477_v27 = vsel %vm2586_vm3, %v5476_v20, %v10368_v57 }
 0xf62   : > { %4795 = vrot.lane.b32.xlu0 %v4787_v58, %s6799_s9  ;;  %4793 = vrot.lane.b32.xlu2 %v4784_v30, %s6799_s9  ;;  %v4781_v10 = vsel %vm3230_vm6, %v4779_v33, %v4780_v15  ;;  %v5478_v59 = vrot.slane %v2494_v60, 4  ;;  %v5681_v34 = vsel %vm2586_vm3, %v10390_v62, %v10374_v19  ;;  %v5613_v25 = vsel %vm2586_vm3, %v5612_v23, %v10371_v18 }
 0xf63   : > { %4791 = vrot.lane.b32.xlu1 %v4781_v10, %s6799_s9  ;;  %v4790_v38 = vsel %vm3230_vm6, %v4788_v16, %v4789_v24  ;;  %v2496_v51 = vpop.f32.mrf.mxu2  ;;  %v5750_v17 = vsel %vm2586_vm3, %v5749_v32, %v10380_v55  ;;  %v5818_v31 = vsel %vm2586_vm3, %v5817_v48, %v10383_v5  ;;  %v5886_v57 = vsel %vm2586_vm3, %v5885_v50, %v10386_v26  ;;  %v10462_v5 = vld [vmem:[%s11376_s3] ss:$0 sm:$0xff] }
 0xf64   : > { %v5479_v19 = vsel %vm2589_vm4, %v5478_v59, %v5477_v27  ;;  %v5682_v62 = vrot.slane %v2494_v60, 7  ;;  %v5614_v8 = vrot.slane %v2494_v60, 6  ;;  %v5751_v18 = vsel %vm2589_vm4, %v2494_v60, %v5750_v17  ;;  %v10511_v17 = vld [vmem:[#allocation2 + $0x28] sm:$0x3] }
 0xf65   : > { %6185 = vmatmul.msk.f32.gmra.mxu2 %vm324_vm0, %v2322_v28  ;;  %v5819_v53 = vrot.slane %v2494_v60, 1  ;;  %v5887_v35 = vrot.slane %v2494_v60, 2  ;;  %v5418_v55 = vrot.slane %v2494_v60, 3  ;;  %v2497_v26 = vadd.f32 %v10462_v5, %v2496_v51  ;;  %v10508_v51 = vld [vmem:[#allocation2 + $0x20] sm:$0xff] }
 0xf66   : > { %v5683_v6 = vsel %vm2589_vm4, %v5682_v62, %v5681_v34  ;;  %v5615_v33 = vsel %vm2589_vm4, %v5614_v8, %v5613_v25  ;;  %v10504_v34 = vld [vmem:[#allocation2 + $0x30] sm:$0xff] }
 0xf67   : > { %v5820_v15 = vsel %vm2589_vm4, %v5819_v53, %v5818_v31  ;;  %v5888_v43 = vsel %vm2589_vm4, %v5887_v35, %v5886_v57  ;;  %v5419_v58 = vsel %vm2589_vm4, %v5418_v55, %v10394_v52  ;;  %v5480_v30 = vrot.slane %v2497_v26, 3  ;;  %v10514_v57 = vld [vmem:[#allocation2 + $0x10] sm:$0xff] }
 0xf68   : > { %v5684_v47 = vrot.slane %v2497_v26, 6  ;;  %v5548_v46 = vrot.slane %v2497_v26, 4  ;;  %v5616_v3 = vrot.slane %v2497_v26, 5  ;;  %v5752_v28 = vrot.slane %v2497_v26, 7 }
 0xf69   : > { %v10473_v10 = vsel %vm11837_vm7, %v5480_v30, %v5479_v19  ;;  %v5889_v16 = vrot.slane %v2497_v26, 1  ;;  %v5420_v24 = vrot.slane %v2497_v26, 2  ;;  %vm11843_vm7 = vmmov %vm11841_vm1  ;;  %v10517_v19 = vld [vmem:[#allocation2 + $0x18] sm:$0x3]  ;;  %v2146_v30 = vpop.f32.mrf.mxu1 }
 0xf6a   : > { %2246 = vrot.lane.b32.xlu0 %v2137_v13, %s6810_s22  ;;  %4809 = vrot.lane.b32.xlu2 %v4807_v12, %s6801_s14  ;;  %v5545_v13 = vsel %vm2586_vm3, %v5544_v56, %v10377_v63  ;;  %v5546_v63 = vrot.slane %v2494_v60, 5  ;;  %v10476_v12 = vsel %vm11838_vm8, %v2497_v26, %v5820_v15  ;;  %v10479_v2 = vsel %vm11839_vm10, %v5684_v47, %v5683_v6  ;;  %vm11845_vm8 = vmmov %vm11841_vm1 }
 0xf6b   : > { %4797 = vrot.lane.b32.xlu1 %v4790_v38, %s6799_s9  ;;  %v10485_v52 = vsel %vm11841_vm1, %v5616_v3, %v5615_v33  ;;  %v10488_v60 = vsel %vm11842_vm5, %v5752_v28, %v5751_v18  ;;  %v10491_v20 = vsel %vm11843_vm7, %v5889_v16, %v5888_v43  ;;  %v5421_v56 = vsel %vm11845_vm8, %v5420_v24, %v5419_v58  ;;  %v1285_v16 = vpop.f32.mrf.mxu3 }
 0xf6c   : > { %v5547_v9 = vsel %vm2589_vm4, %v5546_v63, %v5545_v13  ;;  %11844 = vst [vmem:[#allocation81_spill] sm:$0xff] %v10491_v20  ;;  %vm11846_vm10 = vcmask 1047559   ;;  %v4856_v15 = vperm.slane %v10128_v39, 1 }
 0xf6d   : > { %v10482_v38 = vsel %vm11840_vm12, %v5548_v46, %v5547_v9  ;;  %vm11849_vm12 = vcmask 1043459  }
 0xf6e   : > { %vm11850_vm1 = vmmov %vm11849_vm12 }
 0xf6f   : > { %vm11851_vm5 = vmmov %vm11850_vm1 }
 0xf70   : > { %vm11852_vm7 = vmmov %vm11850_vm1 }
 0xf71   : > { %v2149_v24 = vpop.f32.mrf.mxu1  ;;  %vm11853_vm8 = vmmov %vm11850_vm1 }
 0xf72   : > { %2250 = vrot.lane.b32.xlu2 %v2143_v41, %s6810_s22  ;;  %vm11856_vm14 = vmmov %vm11850_vm1 }
 0xf73   : > { %2248 = vrot.lane.b32.xlu1 %v2140_v14, %s6810_s22  ;;  %v2499_v14 = vpop.f32.mrf.mxu2 }
 0xf74   : > { %v10495_v23 = vadd.f32 %v10462_v5, %v2499_v14 }
 0xf76   : > { %v5422_v32 = vrot.slane %v10495_v23, 1 }
 0xf78   : > { %v10499_v48 = vsel %vm11846_vm10, %v5422_v32, %v5421_v56  ;;  %vm11854_vm10 = vmmov %vm11850_vm1 }
 0xf79   : > { %11847 = vst [vmem:[#allocation52_spill] sm:$0xff] %v10499_v48 }
 0xfbc   : > { %v4794_v50 = vpop.permute.xlu2 %4793 }
 0xfbd   : > { %v10502_v27 = vadd.f32 %v4794_v50, %v10408_v61  ;;  %v1288_v50 = vpop.f32.mrf.mxu3 }
 0xfc4   : > { %v4810_v59 = vpop.permute.xlu2 %4809 }
 0xfc5   : > { %v4816_v13 = vmul.f32 %v10504_v34, %v4810_v59  ;;  %v4817_v41 = vmul.f32 %v4810_v59, %v10036_v49  ;;  %v4814_v25 = vmul.f32 %v10508_v51, %v4810_v59  ;;  %v4815_v31 = vmul.f32 %v10511_v17, %v4810_v59 }
 0xfc6   : > { %v4812_v61 = vmul.f32 %v10514_v57, %v4810_v59  ;;  %v4813_v62 = vmul.f32 %v10517_v19, %v4810_v59  ;;  %v4818_v9 = vmul.f32 %v4810_v59, %v10167_v11  ;;  %v4819_v33 = vmul.f32 %v4810_v59, %v10169_v44 }
 0xfc7   : > { %v4834_v63 = vrot.slane %v4816_v13, 2  ;;  %v4835_v8 = vrot.slane %v4817_v41, 2  ;;  %v4831_v18 = vrot.slane %v4814_v25, 2  ;;  %v4832_v49 = vrot.slane %v4815_v31, 2  ;;  %v1291_v41 = vpop.f32.mrf.mxu3 }
 0xfc8   : > { %v4828_v53 = vrot.slane %v4812_v61, 2  ;;  %v4829_v35 = vrot.slane %v4813_v62, 2  ;;  %v4837_v43 = vrot.slane %v4818_v9, 2  ;;  %v4838_v58 = vrot.slane %v4819_v33, 2  ;;  %v2502_v13 = vpop.f32.mrf.mxu2 }
 0xfc9   : > { %v4836_v55 = vsel %vm3268_vm11, %v4834_v63, %v4835_v8  ;;  %v4833_v26 = vsel %vm3268_vm11, %v4831_v18, %v4832_v49  ;;  %v2503_v61 = vadd.f32 %v10462_v5, %v2502_v13 }
 0xfca   : > { %4844 = vrot.lane.b32.xlu2 %v4836_v55, %s6799_s9  ;;  %4842 = vrot.lane.b32.xlu1 %v4833_v26, %s6799_s9  ;;  %v4830_v6 = vsel %vm3268_vm11, %v4828_v53, %v4829_v35  ;;  %v4839_v47 = vsel %vm3268_vm11, %v4837_v43, %v4838_v58 }
 0xfcb   : > { %4840 = vrot.lane.b32.xlu0 %v4830_v6, %s6799_s9  ;;  %v5620_v62 = vrot.slane %v2503_v61, 3  ;;  %v5824_v63 = vrot.slane %v2503_v61, 6  ;;  %v5484_v8 = vrot.slane %v2503_v61, 1  ;;  %v5552_v18 = vrot.slane %v2503_v61, 2 }
 0xfcc   : > { %v5688_v49 = vrot.slane %v2503_v61, 4  ;;  %v5756_v53 = vrot.slane %v2503_v61, 5  ;;  %v5892_v35 = vrot.slane %v2503_v61, 7 }
 0xfd2   : > { %4858 = vrot.lane.b32.xlu1 %v4856_v15, %s6801_s14 }
 0xfd3   : > { %4846 = vrot.lane.b32.xlu0 %v4839_v47, %s6799_s9 }
 0xfd4   : > { %v4796_v46 = vpop.permute.xlu0 %4795 }
 0xfd5   : > { %v10533_v3 = vadd.f32 %v4796_v46, %v10405_v54  ;;  %v4792_v28 = vpop.permute.xlu1 %4791 }
 0xfd6   : > { %v4803_v44 = vadd.f32 %v4792_v28, %v10397_v7  ;;  %v2251_v7 = vpop.permute.xlu2 %2250 }
 0xfd7   : > { %v2325_v25 = vsel %vm566_vm2, %v1291_v41, %v2251_v7 }
 0xfda   : > { %2254 = vrot.lane.b32.xlu1 %v2149_v24, %s6810_s22 }
 0xfdb   : > { %2252 = vrot.lane.b32.xlu0 %v2146_v30, %s6810_s22 }
 0xfdc   : > { %v2247_v39 = vpop.permute.xlu0 %2246 }
 0xfdd   : > { %v4798_v14 = vpop.permute.xlu1 %4797  ;;  %v2323_v56 = vsel %vm566_vm2, %v1285_v16, %v2247_v39 }
 0xfde   : > { %v4806_v32 = vadd.f32 %v4798_v14, %v10402_v36  ;;  %6186 = vmatmul.msk.f32.gmra.mxu2 %vm324_vm0, %v2323_v56 }
 0xfe0   : > { %v2505_v31 = vpop.f32.mrf.mxu2 }
 0xfe1   : > { %v2506_v36 = vadd.f32 %v10462_v5, %v2505_v31 }
 0xfe3   : > { %v5621_v55 = vrot.slane %v2506_v36, 2  ;;  %v5825_v26 = vrot.slane %v2506_v36, 5  ;;  %v5485_v6 = vsel %vm2577_vm9, %v2506_v36, %v5484_v8  ;;  %v5553_v9 = vrot.slane %v2506_v36, 1 }
 0xfe4   : > { %v5689_v33 = vrot.slane %v2506_v36, 3  ;;  %v5757_v15 = vrot.slane %v2506_v36, 4  ;;  %v5893_v43 = vrot.slane %v2506_v36, 6  ;;  %v5424_v58 = vrot.slane %v2506_v36, 7 }
 0xfe5   : > { %v2249_v54 = vpop.permute.xlu1 %2248  ;;  %v5622_v47 = vsel %vm2577_vm9, %v5621_v55, %v5620_v62  ;;  %v5826_v46 = vsel %vm2577_vm9, %v5825_v26, %v5824_v63  ;;  %v5554_v28 = vsel %vm2577_vm9, %v5553_v9, %v5552_v18  ;;  %v2152_v18 = vpop.f32.mrf.mxu1 }
 0xfe6   : > { %v2324_v59 = vsel %vm566_vm2, %v1288_v50, %v2249_v54  ;;  %v5690_v16 = vsel %vm2577_vm9, %v5689_v33, %v5688_v49  ;;  %v5758_v24 = vsel %vm2577_vm9, %v5757_v15, %v5756_v53  ;;  %v5894_v39 = vsel %vm2577_vm9, %v5893_v43, %v5892_v35 }
 0xfe7   : > { %6187 = vmatmul.msk.f32.gmra.mxu2 %vm324_vm0, %v2324_v59  ;;  %v5425_v14 = vsel %vm2577_vm9, %v5424_v58, %v2503_v61 }
 0xfe8   : > { %v2508_v30 = vpop.f32.mrf.mxu2 }
 0xfe9   : > { %v2509_v56 = vadd.f32 %v10462_v5, %v2508_v30 }
 0xfeb   : > { %v5426_v50 = vrot.slane %v2509_v56, 6  ;;  %v5623_v33 = vrot.slane %v2509_v56, 1  ;;  %v5827_v15 = vrot.slane %v2509_v56, 4  ;;  %v5486_v43 = vrot.slane %v2509_v56, 7 }
 0xfec   : > { %v5691_v58 = vrot.slane %v2509_v56, 2  ;;  %v5759_v30 = vrot.slane %v2509_v56, 3 }
 0xfed   : > { %v5427_v54 = vsel %vm2580_vm15, %v5426_v50, %v5425_v14  ;;  %v2155_v26 = vpop.f32.mrf.mxu1  ;;  %v5624_v50 = vsel %vm2580_vm15, %v5623_v33, %v5622_v47 }
 0xfef   : > { %6188 = vmatmul.msk.f32.gmra.mxu2 %vm324_vm0, %v2325_v25 }
0x103c   : > { %v4843_v59 = vpop.permute.xlu1 %4842 }
0x103d   : > { %v10558_v13 = vadd.f32 %v4843_v59, %v10502_v27  ;;  %v4841_v7 = vpop.permute.xlu0 %4840  ;;  %v1294_v27 = vpop.f32.mrf.mxu3  ;;  %v5895_v59 = vrot.slane %v2509_v56, 5 }
0x103e   : > { %v10560_v41 = vadd.f32 %v4841_v7, %v4803_v44  ;;  %v10573_v44 = vld [vmem:[%s11379_s6 + $0x1c] sm:$0x7]  ;;  %v5828_v7 = vsel %vm2580_vm15, %v5827_v15, %v5826_v46 }
0x103f   : > { %v4885_v8 = vperm.slane %v10573_v44, 1 }
0x1044   : > { %v4859_v25 = vpop.permute.xlu1 %4858 }
0x1045   : > { %v4861_v31 = vmul.f32 %v10508_v51, %v4859_v25  ;;  %v4862_v36 = vmul.f32 %v10504_v34, %v4859_v25  ;;  %v4863_v62 = vmul.f32 %v4859_v25, %v10167_v11  ;;  %v4847_v61 = vpop.permute.xlu0 %4846  ;;  %v1297_v53 = vpop.f32.mrf.mxu3  ;;  %v4864_v35 = vmul.f32 %v4859_v25, %v10184_v21 }
0x1046   : > { %v10565_v63 = vadd.f32 %v4847_v61, %v4806_v32  ;;  %v5555_v21 = vsel %vm2580_vm15, %v2509_v56, %v5554_v28  ;;  %v5487_v25 = vsel %vm2580_vm15, %v5486_v43, %v5485_v6 }
0x1047   : > { %4873 = vrot.lane.b32.xlu1 %v4863_v62, %s6799_s9  ;;  %4869 = vrot.lane.b32.xlu2 %v4861_v31, %s6799_s9  ;;  %v5692_v31 = vsel %vm2580_vm15, %v5691_v58, %v5690_v16  ;;  %v5896_v16 = vsel %vm2580_vm15, %v5895_v59, %v5894_v39 }
0x1048   : > { %11848 = vst [vmem:[#allocation12_spill] sm:$0xff] %v10565_v63  ;;  %4871 = vrot.lane.b32.xlu0 %v4862_v36, %s6799_s9  ;;  %v5760_v36 = vsel %vm2580_vm15, %v5759_v30, %v5758_v24 }
0x104c   : > { %v2255_v32 = vpop.permute.xlu1 %2254 }
0x104d   : > { %v2253_v49 = vpop.permute.xlu0 %2252  ;;  %v2327_v55 = vsel %vm566_vm2, %v1297_v53, %v2255_v32 }
0x104e   : > { %v2326_v11 = vsel %vm566_vm2, %v1294_v27, %v2253_v49 }
0x104f   : > { %6189 = vmatmul.msk.f32.gmra.mxu2 %vm324_vm0, %v2326_v11  ;;  %2256 = vrot.lane.b32.xlu2 %v2152_v18, %s6810_s22 }
0x1050   : > { %4887 = vrot.lane.b32.xlu0 %v4885_v8, %s6801_s14 }
0x1057   : > { %6190 = vmatmul.msk.f32.gmra.mxu2 %vm324_vm0, %v2327_v55  ;;  %4875 = vrot.lane.b32.xlu2 %v4864_v35, %s6799_s9 }
0x1058   : > { %2258 = vrot.lane.b32.xlu0 %v2155_v26, %s6810_s22 }
0x1061   : > { %v2511_v9 = vpop.f32.mrf.mxu2 }
0x1062   : > { %v2512_v14 = vadd.f32 %v10462_v5, %v2511_v9 }
0x1064   : > { %v5625_v61 = vsel %vm11849_vm12, %v2512_v14, %v5624_v50  ;;  %v5829_v27 = vrot.slane %v2512_v14, 3  ;;  %v5488_v8 = vrot.slane %v2512_v14, 6  ;;  %v5556_v18 = vrot.slane %v2512_v14, 7  ;;  %vm11855_vm12 = vmmov %vm11850_vm1 }
0x1065   : > { %v5693_v49 = vrot.slane %v2512_v14, 1  ;;  %v5761_v11 = vrot.slane %v2512_v14, 2  ;;  %v5897_v47 = vrot.slane %v2512_v14, 4  ;;  %v5428_v32 = vrot.slane %v2512_v14, 5 }
0x1066   : > { %v5830_v28 = vsel %vm11850_vm1, %v5829_v27, %v5828_v7  ;;  %v5489_v46 = vsel %vm11851_vm5, %v5488_v8, %v5487_v25  ;;  %v5557_v6 = vsel %vm11852_vm7, %v5556_v18, %v5555_v21  ;;  %v10629_v27 = vpop.permute.xlu2 %4844  ;;  %vm11859_vm1 = vcmask 1047559  }
0x1067   : > { %v5694_v24 = vsel %vm11853_vm8, %v5693_v49, %v5692_v31  ;;  %v5762_v56 = vsel %vm11854_vm10, %v5761_v11, %v5760_v36  ;;  %v5898_v53 = vsel %vm11855_vm12, %v5897_v47, %v5896_v16  ;;  %v5429_v35 = vsel %vm11856_vm14, %v5428_v32, %v5427_v54  ;;  %v1300_v49 = vpop.f32.mrf.mxu3  ;;  %vm11869_vm7 = vmmov %vm11859_vm1 }
0x1068   : > { %vm11858_vm14 = vcmask 1046534   ;;  %vm11881_vm8 = vmmov %vm11851_vm5 }
0x1069   : > { %vm11883_vm12 = vmmov %vm11859_vm1 }
0x106a   : > { %v2514_v62 = vpop.f32.mrf.mxu2 }
0x106b   : > { %v2515_v55 = vadd.f32 %v10462_v5, %v2514_v62 }
0x106d   : > { %v5626_v26 = vrot.slane %v2515_v55, 7  ;;  %v5831_v9 = vrot.slane %v2515_v55, 2  ;;  %v5490_v33 = vrot.slane %v2515_v55, 5  ;;  %v5558_v15 = vrot.slane %v2515_v55, 6 }
0x106e   : > { %v10603_v43 = vsel %vm2586_vm3, %v2515_v55, %v5694_v24  ;;  %v5763_v58 = vrot.slane %v2515_v55, 1  ;;  %v5899_v30 = vrot.slane %v2515_v55, 3  ;;  %v5430_v39 = vrot.slane %v2515_v55, 4  ;;  %v10640_v24 = vld [vmem:[#allocation2 + $0x48] sm:$0x3] }
0x106f   : > { %v10606_v50 = vsel %vm2586_vm3, %v5626_v26, %v5625_v61  ;;  %v10609_v21 = vsel %vm2586_vm3, %v5831_v9, %v5830_v28  ;;  %v10612_v54 = vsel %vm2586_vm3, %v5490_v33, %v5489_v46  ;;  %v10615_v59 = vsel %vm2586_vm3, %v5558_v15, %v5557_v6  ;;  %v10637_v6 = vld [vmem:[#allocation2 + $0x40] sm:$0xff] }
0x1070   : > { %v10618_v7 = vsel %vm2586_vm3, %v5763_v58, %v5762_v56  ;;  %v10621_v25 = vsel %vm2586_vm3, %v5899_v30, %v5898_v53  ;;  %v5431_v31 = vsel %vm2586_vm3, %v5430_v39, %v5429_v35  ;;  %v10644_v53 = vld [vmem:[#allocation2 + $0x38] sm:$0x3] }
0x1071   : > { %11857 = vst [vmem:[#allocation9_spill] sm:$0xff] %v10621_v25 }
0x1072   : > { %v2517_v14 = vpop.f32.mrf.mxu2 }
0x1073   : > { %v10625_v36 = vadd.f32 %v10462_v5, %v2517_v14 }
0x1075   : > { %v5432_v62 = vrot.slane %v10625_v36, 3 }
0x1077   : > { %v5433_v61 = vsel %vm2589_vm4, %v5432_v62, %v5431_v31 }
0x10a1   : > { %v4870_v8 = vpop.permute.xlu2 %4869 }
0x10a2   : > { %v10632_v18 = vadd.f32 %v4870_v8, %v10560_v41  ;;  %v1303_v8 = vpop.f32.mrf.mxu3 }
0x10a9   : > { %v2257_v11 = vpop.permute.xlu2 %2256 }
0x10aa   : > { %v2328_v47 = vsel %vm566_vm2, %v1300_v49, %v2257_v11 }
0x10ab   : > { %6191 = vmatmul.msk.f32.gmra.mxu2 %vm324_vm0, %v2328_v47 }
0x10ba   : > { %v4872_v32 = vpop.permute.xlu0 %4871 }
0x10bb   : > { %v4882_v28 = vadd.f32 %v4872_v32, %v10558_v13  ;;  %v2158_v13 = vpop.f32.mrf.mxu1  ;;  %v10658_v32 = vld [vmem:[#allocation2 + $0x50] sm:$0xff] }
0x10c2   : > { %v4888_v46 = vpop.permute.xlu0 %4887 }
0x10c3   : > { %v4894_v16 = vmul.f32 %v10637_v6, %v4888_v46  ;;  %v4895_v56 = vmul.f32 %v10640_v24, %v4888_v46  ;;  %v4892_v41 = vmul.f32 %v10504_v34, %v4888_v46  ;;  %v4893_v35 = vmul.f32 %v10644_v53, %v4888_v46  ;;  %v2161_v47 = vpop.f32.mrf.mxu1 }
0x10c4   : > { %v4890_v55 = vmul.f32 %v10508_v51, %v4888_v46  ;;  %v4891_v26 = vmul.f32 %v10511_v17, %v4888_v46 }
0x10c5   : > { %v4912_v9 = vrot.slane %v4894_v16, 1  ;;  %v4913_v33 = vrot.slane %v4895_v56, 1  ;;  %v4909_v15 = vrot.slane %v4892_v41, 1  ;;  %v4910_v58 = vrot.slane %v4893_v35, 1  ;;  %v10661_v56 = vld [vmem:[#allocation2 + $0x58] sm:$0x3] }
0x10c6   : > { %v4906_v30 = vrot.slane %v4890_v55, 1  ;;  %v4907_v39 = vrot.slane %v4891_v26, 1  ;;  %v4896_v16 = vmul.f32 %v10658_v32, %v4888_v46  ;;  %v4897_v41 = vmul.f32 %v10661_v56, %v4888_v46  ;;  %v10668_v35 = vld [vmem:[%s11379_s6 + $0x20] sm:$0x7] }
0x10c7   : > { %v4914_v14 = vsel %vm3230_vm6, %v4912_v9, %v4913_v33  ;;  %v4911_v31 = vsel %vm3230_vm6, %v4909_v15, %v4910_v58  ;;  %v4934_v55 = vperm.slane %v10668_v35, 1 }
0x10c8   : > { %4922 = vrot.lane.b32.xlu0 %v4914_v14, %s6799_s9  ;;  %4920 = vrot.lane.b32.xlu2 %v4911_v31, %s6799_s9  ;;  %v4908_v62 = vsel %vm3230_vm6, %v4906_v30, %v4907_v39  ;;  %v4915_v26 = vrot.slane %v4896_v16, 1  ;;  %v4916_v9 = vrot.slane %v4897_v41, 1  ;;  %v4874_v41 = vpop.permute.xlu1 %4873 }
0x10c9   : > { %4918 = vrot.lane.b32.xlu1 %v4908_v62, %s6799_s9  ;;  %v10686_v62 = vpop.permute.xlu2 %4875 }
0x10ca   : > { %v2259_v49 = vpop.permute.xlu0 %2258  ;;  %v4917_v33 = vsel %vm3230_vm6, %v4915_v26, %v4916_v9  ;;  %11861 = vst [vmem:[#allocation67_spill] sm:$0xff] %v10686_v62 }
0x10cb   : > { %v2329_v11 = vsel %vm566_vm2, %v1303_v8, %v2259_v49 }
0x10cc   : > { %6192 = vmatmul.msk.f32.gmra.mxu2 %vm324_vm0, %v2329_v11 }
0x10d0   : > { %2262 = vrot.lane.b32.xlu2 %v2161_v47, %s6810_s22  ;;  %v2164_v47 = vpop.f32.mrf.mxu1 }
0x10d1   : > { %2260 = vrot.lane.b32.xlu1 %v2158_v13, %s6810_s22 }
0x10d2   : > { %v2520_v15 = vpop.f32.mrf.mxu2 }
0x10d3   : > { %v10675_v46 = vadd.f32 %v10462_v5, %v2520_v15 }
0x10d5   : > { %v5434_v13 = vrot.slane %v10675_v46, 2 }
0x10d7   : > { %v5435_v30 = vsel %vm11858_vm14, %v5434_v13, %v5433_v61 }
0x10d8   : > { %4936 = vrot.lane.b32.xlu2 %v4934_v55, %s6801_s14  ;;  %v2167_v13 = vpop.f32.mrf.mxu1 }
0x10d9   : > { %4924 = vrot.lane.b32.xlu1 %v4917_v33, %s6799_s9 }
0x10da   : > { %v2523_v58 = vpop.f32.mrf.mxu2 }
0x10db   : > { %v10680_v39 = vadd.f32 %v10462_v5, %v2523_v58 }
0x10dd   : > { %v5436_v14 = vrot.slane %v10680_v39, 1 }
0x10df   : > { %v10684_v31 = vsel %vm11859_vm1, %v5436_v14, %v5435_v30 }
0x10e0   : > { %11860 = vst [vmem:[#allocation21_spill] sm:$0xff] %v10684_v31 }
0x1122   : > { %v4921_v8 = vpop.permute.xlu2 %4920 }
0x1123   : > { %v4931_v49 = vadd.f32 %v4921_v8, %v4882_v28 }
0x112a   : > { %v2263_v11 = vpop.permute.xlu2 %2262 }
0x1132   : > { %v4937_v16 = vpop.permute.xlu2 %4936 }
0x1133   : > { %v4943_v55 = vmul.f32 %v10637_v6, %v4937_v16  ;;  %v4944_v61 = vmul.f32 %v10640_v24, %v4937_v16  ;;  %v4941_v26 = vmul.f32 %v10504_v34, %v4937_v16  ;;  %v4942_v9 = vmul.f32 %v10644_v53, %v4937_v16 }
0x1134   : > { %v4939_v33 = vmul.f32 %v10508_v51, %v4937_v16  ;;  %v4940_v15 = vmul.f32 %v10511_v17, %v4937_v16 }
0x1135   : > { %v4961_v58 = vrot.slane %v4943_v55, 2  ;;  %v4962_v30 = vrot.slane %v4944_v61, 2  ;;  %v4958_v28 = vrot.slane %v4941_v26, 2  ;;  %v4959_v14 = vrot.slane %v4942_v9, 2  ;;  %v2170_v61 = vpop.f32.mrf.mxu1 }
0x1136   : > { %v4955_v8 = vrot.slane %v4939_v33, 2  ;;  %v4956_v31 = vrot.slane %v4940_v15, 2  ;;  %v4945_v26 = vmul.f32 %v10658_v32, %v4937_v16  ;;  %v4946_v9 = vmul.f32 %v10661_v56, %v4937_v16  ;;  %v1306_v33 = vpop.f32.mrf.mxu3 }
0x1137   : > { %v4963_v48 = vsel %vm3268_vm11, %v4961_v58, %v4962_v30  ;;  %v4960_v42 = vsel %vm3268_vm11, %v4958_v28, %v4959_v14 }
0x1138   : > { %4971 = vrot.lane.b32.xlu2 %v4963_v48, %s6799_s9  ;;  %4969 = vrot.lane.b32.xlu1 %v4960_v42, %s6799_s9  ;;  %v4957_v62 = vsel %vm3268_vm11, %v4955_v8, %v4956_v31  ;;  %v6701_v31 = vld [vmem:[%s11379_s6] sm:$0x7] }
0x1139   : > { %4967 = vrot.lane.b32.xlu0 %v4957_v62, %s6799_s9  ;;  %v4965_v62 = vrot.slane %v4946_v9, 2 }
0x113b   : > { %v4919_v63 = vpop.permute.xlu1 %4918 }
0x113c   : > { %v4930_v55 = vadd.f32 %v4919_v63, %v10632_v18  ;;  %v4983_v63 = vperm.slane %v6701_v31, 2  ;;  %v4964_v18 = vrot.slane %v4945_v26, 2  ;;  %v4923_v26 = vpop.permute.xlu0 %4922 }
0x113e   : > { %v4966_v15 = vsel %vm3268_vm11, %v4964_v18, %v4965_v62  ;;  %v1309_v16 = vpop.f32.mrf.mxu3 }
0x1140   : > { %2268 = vrot.lane.b32.xlu2 %v2170_v61, %s6810_s22  ;;  %2266 = vrot.lane.b32.xlu1 %v2167_v13, %s6810_s22  ;;  %v2526_v13 = vpop.f32.mrf.mxu2  ;;  %v4854_v61 = vadd.f32 %v10629_v27, %v10533_v3 }
0x1141   : > { %2264 = vrot.lane.b32.xlu0 %v2164_v47, %s6810_s22  ;;  %v2331_v47 = vsel %vm566_vm2, %v1309_v16, %v2263_v11  ;;  %v10720_v28 = vadd.f32 %v10462_v5, %v2526_v13 }
0x1142   : > { %v4883_v11 = vadd.f32 %v4874_v41, %v4854_v61  ;;  %v10733_v41 = vld [vmem:[#allocation2] sm:$0xff] }
0x1143   : > { %v2261_v42 = vpop.permute.xlu1 %2260 }
0x1144   : > { %v2330_v48 = vsel %vm566_vm2, %v1306_v33, %v2261_v42  ;;  %v4932_v9 = vadd.f32 %v4923_v26, %v4883_v11 }
0x1145   : > { %6193 = vmatmul.msk.f32.gmra.mxu2 %vm324_vm0, %v2330_v48 }
0x1148   : > { %4985 = vrot.lane.b32.xlu1 %v4983_v63, %s6802_s15 }
0x1149   : > { %4973 = vrot.lane.b32.xlu0 %v4966_v15, %s6799_s9  ;;  %v1312_v15 = vpop.f32.mrf.mxu3 }
0x114b   : > { %v10729_v48 = vpop.permute.xlu1 %4924 }
0x114c   : > { %11863 = vst [vmem:[#allocation83_spill] sm:$0xff] %v10729_v48 }
0x114d   : > { %6194 = vmatmul.msk.f32.gmra.mxu2 %vm324_vm0, %v2331_v47 }
0x114f   : > { %v2529_v58 = vpop.f32.mrf.mxu2 }
0x1150   : > { %v10717_v30 = vadd.f32 %v10462_v5, %v2529_v58 }
0x1151   : > { %v1315_v3 = vpop.f32.mrf.mxu3 }
0x1152   : > { %v5438_v14 = vrot.slane %v10717_v30, 7 }
0x1154   : > { %v5439_v8 = vsel %vm2577_vm9, %v5438_v14, %v10720_v28 }
0x1159   : > { %v1318_v26 = vpop.f32.mrf.mxu3 }
0x1192   : > { %v4972_v33 = vpop.permute.xlu2 %4971 }
0x1193   : > { %v10727_v42 = vadd.f32 %v4972_v33, %v4932_v9  ;;  %v2173_v33 = vpop.f32.mrf.mxu1 }
0x1195   : > { %11862 = vst [vmem:[#allocation71_spill] sm:$0xff] %v10727_v42 }
0x11aa   : > { %v4970_v31 = vpop.permute.xlu1 %4969 }
0x11ab   : > { %v4980_v63 = vadd.f32 %v4970_v31, %v4931_v49  ;;  %v4968_v18 = vpop.permute.xlu0 %4967  ;;  %v6703_v31 = vld [vmem:[%s11379_s6 + $0x4] sm:$0x7] }
0x11ac   : > { %v4979_v62 = vadd.f32 %v4968_v18, %v4930_v55  ;;  %v2269_v55 = vpop.permute.xlu2 %2268  ;;  %v5012_v18 = vperm.slane %v6703_v31, 2 }
0x11ad   : > { %v2334_v11 = vsel %vm566_vm2, %v1318_v26, %v2269_v55 }
0x11b2   : > { %v2267_v16 = vpop.permute.xlu1 %2266 }
0x11b3   : > { %v2265_v47 = vpop.permute.xlu0 %2264  ;;  %v2333_v49 = vsel %vm566_vm2, %v1315_v3, %v2267_v16 }
0x11b4   : > { %v2332_v13 = vsel %vm566_vm2, %v1312_v15, %v2265_v47 }
0x11b5   : > { %6195 = vmatmul.msk.f32.gmra.mxu2 %vm324_vm0, %v2332_v13 }
0x11ba   : > { %v4986_v27 = vpop.permute.xlu1 %4985 }
0x11bb   : > { %v4988_v58 = vmul.f32 %v10733_v41, %v4986_v27  ;;  %v4989_v14 = vmul.f32 %v10514_v57, %v4986_v27  ;;  %v4990_v61 = vmul.f32 %v10508_v51, %v4986_v27  ;;  %v4991_v9 = vmul.f32 %v10504_v34, %v4986_v27  ;;  %v10764_v55 = vpop.permute.xlu0 %4973 }
0x11bc   : > { %11865 = vst [vmem:[#allocation13_spill] sm:$0xff] %v10764_v55 }
0x11bd   : > { %6196 = vmatmul.msk.f32.gmra.mxu2 %vm324_vm0, %v2333_v49  ;;  %5000 = vrot.lane.b32.xlu1 %v4990_v61, %s6797_s29 }
0x11be   : > { %4996 = vrot.lane.b32.xlu2 %v4988_v58, %s6797_s29  ;;  %4998 = vrot.lane.b32.xlu0 %v4989_v14, %s6797_s29 }
0x11c5   : > { %6197 = vmatmul.msk.f32.gmra.mxu2 %vm324_vm0, %v2334_v11 }
0x11c6   : > { %5002 = vrot.lane.b32.xlu2 %v4991_v9, %s6797_s29  ;;  %2270 = vrot.lane.b32.xlu0 %v2173_v33, %s6810_s22  ;;  %v1321_v9 = vpop.f32.mrf.mxu3 }
0x11c8   : > { %v2532_v15 = vpop.f32.mrf.mxu2 }
0x11c9   : > { %v10753_v16 = vadd.f32 %v10462_v5, %v2532_v15 }
0x11cb   : > { %11864 = vst [vmem:[#allocation65_spill] sm:$0xff] %v10753_v16  ;;  %v5440_v47 = vrot.slane %v10753_v16, 6 }
0x11cd   : > { %v5441_v3 = vsel %vm2580_vm15, %v5440_v47, %v5439_v8 }
0x11ce   : > { %5014 = vrot.lane.b32.xlu0 %v5012_v18, %s6802_s15 }
0x11d0   : > { %v2535_v13 = vpop.f32.mrf.mxu2 }
0x11d1   : > { %v10758_v27 = vadd.f32 %v10462_v5, %v2535_v13 }
0x11d3   : > { %v5442_v58 = vrot.slane %v10758_v27, 5 }
0x11d5   : > { %v5443_v14 = vsel %vm11851_vm5, %v5442_v58, %v5441_v3  ;;  %v6704_v58 = vld [vmem:[#allocation2 + $0x8] sm:$0x3] }
0x1218   : > { %v4997_v61 = vpop.permute.xlu2 %4996 }
0x1219   : > { %v10762_v49 = vadd.f32 %v4997_v61, %v4979_v62 }
0x1230   : > { %v4999_v26 = vpop.permute.xlu0 %4998 }
0x1231   : > { %v5009_v11 = vadd.f32 %v4999_v26, %v4980_v63 }
0x1238   : > { %v2271_v33 = vpop.permute.xlu0 %2270  ;;  %v2538_v13 = vpop.f32.mrf.mxu2 }
0x1239   : > { %v2335_v31 = vsel %vm566_vm2, %v1321_v9, %v2271_v33  ;;  %vm11867_vm2 = vmmov %vm11858_vm14 }
0x123a   : > { %6198 = vmatmul.msk.f32.gmra.mxu2 %vm324_vm0, %v2335_v31  ;;  %vm11882_vm10 = vmmov %vm11867_vm2 }
0x123b   : > { %vm11884_vm14 = vmmov %vm11867_vm2 }
0x1240   : > { %v5015_v8 = vpop.permute.xlu0 %5014 }
0x1241   : > { %v5021_v18 = vmul.f32 %v10508_v51, %v5015_v8  ;;  %v5022_v15 = vmul.f32 %v10511_v17, %v5015_v8  ;;  %v5019_v47 = vmul.f32 %v10514_v57, %v5015_v8  ;;  %v5020_v62 = vmul.f32 %v10517_v19, %v5015_v8 }
0x1242   : > { %v5017_v3 = vmul.f32 %v10733_v41, %v5015_v8  ;;  %v5018_v63 = vmul.f32 %v6704_v58, %v5015_v8  ;;  %v5023_v20 = vmul.f32 %v10504_v34, %v5015_v8  ;;  %v5024_v16 = vmul.f32 %v10644_v53, %v5015_v8 }
0x1243   : > { %v5039_v61 = vrot.slane %v5021_v18, 1  ;;  %v5040_v26 = vrot.slane %v5022_v15, 1  ;;  %v5036_v55 = vrot.slane %v5019_v47, 1  ;;  %v5037_v9 = vrot.slane %v5020_v62, 1  ;;  %v2541_v62 = vpop.f32.mrf.mxu2 }
0x1244   : > { %v5033_v33 = vrot.slane %v5017_v3, 1  ;;  %v5034_v31 = vrot.slane %v5018_v63, 1  ;;  %v10782_v18 = vadd.f32 %v10462_v5, %v2538_v13  ;;  %v5042_v15 = vrot.slane %v5023_v20, 1 }
0x1245   : > { %v5041_v48 = vsel %vm3230_vm6, %v5039_v61, %v5040_v26  ;;  %v5038_v25 = vsel %vm3230_vm6, %v5036_v55, %v5037_v9  ;;  %v5043_v47 = vrot.slane %v5024_v16, 1  ;;  %v10802_v9 = vpop.permute.xlu2 %5002 }
0x1246   : > { %5049 = vrot.lane.b32.xlu0 %v5041_v48, %s6797_s29  ;;  %v5035_v42 = vsel %vm3230_vm6, %v5033_v33, %v5034_v31  ;;  %5047 = vrot.lane.b32.xlu2 %v5038_v25, %s6797_s29  ;;  %v6705_v48 = vld [vmem:[%s11379_s6 + $0x8] sm:$0x7]  ;;  %v5444_v3 = vrot.slane %v10782_v18, 4  ;;  %11868 = vst [vmem:[#allocation68_spill] sm:$0xff] %v10802_v9 }
0x1247   : > { %5045 = vrot.lane.b32.xlu1 %v5035_v42, %s6797_s29  ;;  %v5061_v55 = vperm.slane %v6705_v48, 2  ;;  %v5044_v63 = vsel %vm3230_vm6, %v5042_v15, %v5043_v47  ;;  %v10793_v42 = vadd.f32 %v10462_v5, %v2541_v62 }
0x1248   : > { %v5445_v25 = vsel %vm2586_vm3, %v5444_v3, %v5443_v14 }
0x1249   : > { %v5446_v20 = vrot.slane %v10793_v42, 3 }
0x124b   : > { %v2544_v16 = vpop.f32.mrf.mxu2  ;;  %v5447_v8 = vsel %vm2589_vm4, %v5446_v20, %v5445_v25 }
0x124c   : > { %v10798_v13 = vadd.f32 %v10462_v5, %v2544_v16 }
0x124e   : > { %5063 = vrot.lane.b32.xlu2 %v5061_v55, %s6802_s15  ;;  %11866 = vst [vmem:[#allocation66_spill] sm:$0xff] %v10798_v13  ;;  %v5448_v61 = vrot.slane %v10798_v13, 2 }
0x124f   : > { %5051 = vrot.lane.b32.xlu1 %v5044_v63, %s6797_s29 }
0x1250   : > { %v5449_v26 = vsel %vm11867_vm2, %v5448_v61, %v5447_v8  ;;  %vm11886_vm2 = vmmov %vm11851_vm5 }
0x12a0   : > { %v5048_v33 = vpop.permute.xlu2 %5047 }
0x12a1   : > { %v5058_v31 = vadd.f32 %v5048_v33, %v5009_v11 }
0x12a8   : > { %v5064_v14 = vpop.permute.xlu2 %5063 }
0x12a9   : > { %v5070_v15 = vmul.f32 %v10508_v51, %v5064_v14  ;;  %v5071_v47 = vmul.f32 %v10511_v17, %v5064_v14  ;;  %v5066_v48 = vmul.f32 %v10733_v41, %v5064_v14  ;;  %v5067_v55 = vmul.f32 %v6704_v58, %v5064_v14  ;;  %v10817_v58 = vpop.permute.xlu1 %5000 }
0x12aa   : > { %v5068_v62 = vmul.f32 %v10514_v57, %v5064_v14  ;;  %v5069_v3 = vmul.f32 %v10517_v19, %v5064_v14  ;;  %v5072_v9 = vmul.f32 %v10504_v34, %v5064_v14  ;;  %v5073_v13 = vmul.f32 %v10644_v53, %v5064_v14 }
0x12ab   : > { %v5088_v63 = vrot.slane %v5070_v15, 2  ;;  %v5089_v25 = vrot.slane %v5071_v47, 2  ;;  %v5082_v20 = vrot.slane %v5066_v48, 2  ;;  %v5083_v16 = vrot.slane %v5067_v55, 2  ;;  %v6706_v48 = vld [vmem:[%s11379_s6 + $0xc] sm:$0x7] }
0x12ac   : > { %v5085_v8 = vrot.slane %v5068_v62, 2  ;;  %v5086_v61 = vrot.slane %v5069_v3, 2  ;;  %v5091_v15 = vrot.slane %v5072_v9, 2  ;;  %v5092_v47 = vrot.slane %v5073_v13, 2 }
0x12ad   : > { %v5090_v11 = vsel %vm3268_vm11, %v5088_v63, %v5089_v25  ;;  %v5084_v33 = vsel %vm3268_vm11, %v5082_v20, %v5083_v16  ;;  %v5110_v55 = vperm.slane %v6706_v48, 2 }
0x12ae   : > { %5098 = vrot.lane.b32.xlu2 %v5090_v11, %s6797_s29  ;;  %5094 = vrot.lane.b32.xlu0 %v5084_v33, %s6797_s29  ;;  %v5087_v41 = vsel %vm3268_vm11, %v5085_v8, %v5086_v61  ;;  %v5093_v62 = vsel %vm3268_vm11, %v5091_v15, %v5092_v47 }
0x12af   : > { %5096 = vrot.lane.b32.xlu1 %v5087_v41, %s6797_s29 }
0x12b6   : > { %5100 = vrot.lane.b32.xlu0 %v5093_v62, %s6797_s29 }
0x12b7   : > { %5112 = vrot.lane.b32.xlu1 %v5110_v55, %s6802_s15 }
0x12b8   : > { %v10833_v20 = vpop.permute.xlu0 %5049 }
0x12b9   : > { %v5046_v14 = vpop.permute.xlu1 %5045 }
0x12ba   : > { %v5057_v3 = vadd.f32 %v5046_v14, %v10762_v49 }
0x12bd   : > { %v2547_v63 = vpop.f32.mrf.mxu2 }
0x12be   : > { %v10827_v25 = vadd.f32 %v10462_v5, %v2547_v63 }
0x12c0   : > { %v5450_v13 = vrot.slane %v10827_v25, 1 }
0x12c1   : > { %v10835_v16 = vpop.permute.xlu1 %5051 }
0x12c2   : > { %v10831_v9 = vsel %vm11869_vm7, %v5450_v13, %v5449_v26  ;;  %11871 = vst [vmem:[#allocation37_spill] sm:$0xff] %v10835_v16  ;;  %v6707_v26 = vld [vmem:[%s11379_s6 + $0x10] sm:$0x7]  ;;  %vm11887_vm7 = vmmov %vm11882_vm10 }
0x12c3   : > { %11870 = vst [vmem:[#allocation29_spill] sm:$0xff] %v10831_v9  ;;  %v5139_v47 = vperm.slane %v6707_v26, 2 }
0x1308   : > { %v10849_v48 = vpop.permute.xlu2 %5098 }
0x1309   : > { %11872 = vst [vmem:[#allocation20_spill] sm:$0xff] %v10849_v48 }
0x1320   : > { %v5095_v8 = vpop.permute.xlu0 %5094 }
0x1321   : > { %v5106_v61 = vadd.f32 %v5095_v8, %v5057_v3  ;;  %v5097_v11 = vpop.permute.xlu1 %5096 }
0x1322   : > { %v5107_v33 = vadd.f32 %v5097_v11, %v5058_v31 }
0x1328   : > { %v10853_v14 = vpop.permute.xlu0 %5100 }
0x1329   : > { %v5113_v41 = vpop.permute.xlu1 %5112  ;;  %11873 = vst [vmem:[#allocation26_spill] sm:$0xff] %v10853_v14 }
0x132a   : > { %v5115_v49 = vmul.f32 %v10514_v57, %v5113_v41  ;;  %v5116_v15 = vmul.f32 %v10508_v51, %v5113_v41  ;;  %v5117_v5 = vmul.f32 %v10504_v34, %v5113_v41  ;;  %v5118_v31 = vmul.f32 %v10637_v6, %v5113_v41 }
0x132c   : > { %5127 = vrot.lane.b32.xlu1 %v5117_v5, %s6797_s29  ;;  %5125 = vrot.lane.b32.xlu0 %v5116_v15, %s6797_s29 }
0x132d   : > { %5123 = vrot.lane.b32.xlu2 %v5115_v49, %s6797_s29 }
0x1334   : > { %5141 = vrot.lane.b32.xlu0 %v5139_v47, %s6802_s15 }
0x1335   : > { %5129 = vrot.lane.b32.xlu2 %v5118_v31, %s6797_s29 }
0x1387   : > { %v5124_v55 = vpop.permute.xlu2 %5123 }
0x1388   : > { %v10851_v62 = vadd.f32 %v5124_v55, %v5106_v61 }
0x139e   : > { %v5126_v3 = vpop.permute.xlu0 %5125 }
0x139f   : > { %v5136_v63 = vadd.f32 %v5126_v3, %v5107_v33 }
0x13a6   : > { %v5142_v13 = vpop.permute.xlu0 %5141 }
0x13a7   : > { %v5148_v8 = vmul.f32 %v10504_v34, %v5142_v13  ;;  %v5149_v11 = vmul.f32 %v10644_v53, %v5142_v13  ;;  %v5144_v41 = vmul.f32 %v10514_v57, %v5142_v13  ;;  %v5145_v49 = vmul.f32 %v10517_v19, %v5142_v13 }
0x13a8   : > { %v5146_v15 = vmul.f32 %v10508_v51, %v5142_v13  ;;  %v5147_v5 = vmul.f32 %v10511_v17, %v5142_v13  ;;  %v5150_v14 = vmul.f32 %v10637_v6, %v5142_v13  ;;  %v5151_v16 = vmul.f32 %v10640_v24, %v5142_v13  ;;  %v10875_v13 = vpop.permute.xlu2 %5129 }
0x13a9   : > { %v5166_v26 = vrot.slane %v5148_v8, 1  ;;  %v5167_v61 = vrot.slane %v5149_v11, 1  ;;  %v5160_v47 = vrot.slane %v5144_v41, 1  ;;  %v5161_v31 = vrot.slane %v5145_v49, 1  ;;  %v6708_v41 = vld [vmem:[%s11379_s6 + $0x14] sm:$0x7] }
0x13aa   : > { %v5163_v55 = vrot.slane %v5146_v15, 1  ;;  %v5164_v9 = vrot.slane %v5147_v5, 1  ;;  %v5169_v8 = vrot.slane %v5150_v14, 1  ;;  %v5170_v11 = vrot.slane %v5151_v16, 1  ;;  %11874 = vst [vmem:[#allocation46_spill] sm:$0xff] %v10875_v13 }
0x13ab   : > { %v5168_v33 = vsel %vm3230_vm6, %v5166_v26, %v5167_v61  ;;  %v5162_v3 = vsel %vm3230_vm6, %v5160_v47, %v5161_v31  ;;  %v5188_v49 = vperm.slane %v6708_v41, 2 }
0x13ac   : > { %5176 = vrot.lane.b32.xlu0 %v5168_v33, %s6797_s29  ;;  %5172 = vrot.lane.b32.xlu1 %v5162_v3, %s6797_s29  ;;  %v5165_v48 = vsel %vm3230_vm6, %v5163_v55, %v5164_v9  ;;  %v5171_v15 = vsel %vm3230_vm6, %v5169_v8, %v5170_v11 }
0x13ad   : > { %5174 = vrot.lane.b32.xlu2 %v5165_v48, %s6797_s29 }
0x13b4   : > { %5178 = vrot.lane.b32.xlu1 %v5171_v15, %s6797_s29 }
0x13b5   : > { %5190 = vrot.lane.b32.xlu2 %v5188_v49, %s6802_s15 }
0x1407   : > { %v5175_v5 = vpop.permute.xlu2 %5174 }
0x1408   : > { %v5185_v26 = vadd.f32 %v5175_v5, %v5136_v63  ;;  %v10890_v5 = vpop.permute.xlu1 %5127 }
0x140f   : > { %v5191_v9 = vpop.permute.xlu2 %5190 }
0x1410   : > { %v5197_v48 = vmul.f32 %v10504_v34, %v5191_v9  ;;  %v5198_v16 = vmul.f32 %v10644_v53, %v5191_v9  ;;  %v5195_v14 = vmul.f32 %v10508_v51, %v5191_v9  ;;  %v5196_v61 = vmul.f32 %v10511_v17, %v5191_v9 }
0x1411   : > { %v5193_v47 = vmul.f32 %v10514_v57, %v5191_v9  ;;  %v5194_v31 = vmul.f32 %v10517_v19, %v5191_v9  ;;  %v5199_v57 = vmul.f32 %v10637_v6, %v5191_v9  ;;  %v5200_v19 = vmul.f32 %v10640_v24, %v5191_v9 }
0x1412   : > { %v5215_v55 = vrot.slane %v5197_v48, 2  ;;  %v5216_v33 = vrot.slane %v5198_v16, 2  ;;  %v5212_v3 = vrot.slane %v5195_v14, 2  ;;  %v5213_v8 = vrot.slane %v5196_v61, 2  ;;  %v6709_v48 = vld [vmem:[%s11379_s6 + $0x18] sm:$0x7] }
0x1413   : > { %v5209_v11 = vrot.slane %v5193_v47, 2  ;;  %v5210_v41 = vrot.slane %v5194_v31, 2  ;;  %v5237_v16 = vperm.slane %v6709_v48, 2  ;;  %v5218_v14 = vrot.slane %v5199_v57, 2 }
0x1414   : > { %v5217_v63 = vsel %vm3268_vm11, %v5215_v55, %v5216_v33  ;;  %v5214_v49 = vsel %vm3268_vm11, %v5212_v3, %v5213_v8  ;;  %v5219_v61 = vrot.slane %v5200_v19, 2 }
0x1415   : > { %5225 = vrot.lane.b32.xlu2 %v5217_v63, %s6797_s29  ;;  %5223 = vrot.lane.b32.xlu1 %v5214_v49, %s6797_s29  ;;  %v5211_v15 = vsel %vm3268_vm11, %v5209_v11, %v5210_v41 }
0x1416   : > { %5221 = vrot.lane.b32.xlu0 %v5211_v15, %s6797_s29  ;;  %v5220_v47 = vsel %vm3268_vm11, %v5218_v14, %v5219_v61 }
0x141d   : > { %5239 = vrot.lane.b32.xlu1 %v5237_v16, %s6802_s15 }
0x141e   : > { %5227 = vrot.lane.b32.xlu0 %v5220_v47, %s6797_s29  ;;  %v5173_v31 = vpop.permute.xlu1 %5172  ;;  %v10902_v33 = vpop.permute.xlu0 %5176 }
0x141f   : > { %v5184_v9 = vadd.f32 %v5173_v31, %v10851_v62  ;;  %v5266_v62 = vperm.slane %v10573_v44, 2 }
0x1426   : > { %v10900_v55 = vpop.permute.xlu1 %5178 }
0x1427   : > { %11875 = vst [vmem:[#allocation27_spill] sm:$0xff] %v10900_v55 }
0x1487   : > { %v5224_v3 = vpop.permute.xlu1 %5223 }
0x1488   : > { %v5234_v8 = vadd.f32 %v5224_v3, %v5185_v26  ;;  %v5222_v11 = vpop.permute.xlu0 %5221  ;;  %v10914_v26 = vpop.permute.xlu2 %5225 }
0x1489   : > { %v5233_v41 = vadd.f32 %v5222_v11, %v5184_v9 }
0x148f   : > { %v5240_v63 = vpop.permute.xlu1 %5239 }
0x1490   : > { %v5242_v49 = vmul.f32 %v10508_v51, %v5240_v63  ;;  %v5243_v15 = vmul.f32 %v10504_v34, %v5240_v63  ;;  %v5244_v57 = vmul.f32 %v10637_v6, %v5240_v63  ;;  %v5245_v19 = vmul.f32 %v10658_v32, %v5240_v63  ;;  %v10918_v14 = vpop.permute.xlu0 %5227 }
0x1491   : > { %11877 = vst [vmem:[#allocation49_spill] sm:$0xff] %v10918_v14 }
0x1492   : > { %5254 = vrot.lane.b32.xlu1 %v5244_v57, %s6797_s29  ;;  %5250 = vrot.lane.b32.xlu2 %v5242_v49, %s6797_s29 }
0x1493   : > { %5252 = vrot.lane.b32.xlu0 %v5243_v15, %s6797_s29 }
0x149a   : > { %5256 = vrot.lane.b32.xlu2 %v5245_v19, %s6797_s29 }
0x149b   : > { %5268 = vrot.lane.b32.xlu0 %v5266_v62, %s6802_s15 }
0x14ec   : > { %v5251_v48 = vpop.permute.xlu2 %5250 }
0x14ed   : > { %v10916_v16 = vadd.f32 %v5251_v48, %v5233_v41 }
0x14ef   : > { %11876 = vst [vmem:[#allocation64_spill] sm:$0xff] %v10916_v16 }
0x1505   : > { %v5253_v61 = vpop.permute.xlu0 %5252 }
0x1506   : > { %v5263_v47 = vadd.f32 %v5253_v61, %v5234_v8 }
0x150d   : > { %v5269_v31 = vpop.permute.xlu0 %5268 }
0x150e   : > { %v5275_v9 = vmul.f32 %v10637_v6, %v5269_v31  ;;  %v5276_v44 = vmul.f32 %v10640_v24, %v5269_v31  ;;  %v5273_v3 = vmul.f32 %v10504_v34, %v5269_v31  ;;  %v5274_v11 = vmul.f32 %v10644_v53, %v5269_v31 }
0x150f   : > { %v5271_v63 = vmul.f32 %v10508_v51, %v5269_v31  ;;  %v5272_v49 = vmul.f32 %v10511_v17, %v5269_v31  ;;  %v5277_v51 = vmul.f32 %v10658_v32, %v5269_v31  ;;  %v5278_v17 = vmul.f32 %v10661_v56, %v5269_v31 }
0x1510   : > { %v5293_v15 = vrot.slane %v5275_v9, 1  ;;  %v5294_v41 = vrot.slane %v5276_v44, 1  ;;  %v5290_v57 = vrot.slane %v5273_v3, 1  ;;  %v5291_v62 = vrot.slane %v5274_v11, 1 }
0x1511   : > { %v5287_v19 = vrot.slane %v5271_v63, 1  ;;  %v5288_v48 = vrot.slane %v5272_v49, 1  ;;  %v5315_v9 = vperm.slane %v10668_v35, 2  ;;  %v5296_v44 = vrot.slane %v5277_v51, 1  ;;  %v10938_v63 = vpop.permute.xlu2 %5256 }
0x1512   : > { %v5295_v8 = vsel %vm3230_vm6, %v5293_v15, %v5294_v41  ;;  %v5292_v61 = vsel %vm3230_vm6, %v5290_v57, %v5291_v62  ;;  %v5297_v3 = vrot.slane %v5278_v17, 1  ;;  %11878 = vst [vmem:[#allocation32_spill] sm:$0xff] %v10938_v63  ;;  %v5525_v41 = vrot.slane %v9986_v1, 1 }
0x1513   : > { %5303 = vrot.lane.b32.xlu0 %v5295_v8, %s6797_s29  ;;  %5301 = vrot.lane.b32.xlu2 %v5292_v61, %s6797_s29  ;;  %v5289_v34 = vsel %vm3230_vm6, %v5287_v19, %v5288_v48  ;;  %v5524_v31 = vrot.slane %v9994_v0, 2  ;;  %v5864_v57 = vrot.slane %v9994_v0, 7  ;;  %v5865_v35 = vrot.slane %v9986_v1, 6 }
0x1514   : > { %5299 = vrot.lane.b32.xlu1 %v5289_v34, %s6797_s29  ;;  %v5298_v11 = vsel %vm3230_vm6, %v5296_v44, %v5297_v3  ;;  %v5728_v19 = vrot.slane %v9994_v0, 5  ;;  %v5592_v48 = vrot.slane %v9994_v0, 3  ;;  %v5456_v8 = vrot.slane %v9994_v0, 1  ;;  %v6710_v3 = vld [vmem:[#allocation2 + $0x20] sm:$0xff]  ;;  %vm11880_vm6 = vmmov %vm11851_vm5 }
0x1515   : > { %v5526_v62 = vsel %vm2577_vm9, %v5525_v41, %v5524_v31  ;;  %v5867_v34 = vrot.slane %v9989_v37, 5  ;;  %v6712_v31 = vld [vmem:[#allocation2 + $0x30] sm:$0xff]  ;;  %v5729_v63 = vrot.slane %v9986_v1, 4 }
0x151b   : > { %5317 = vrot.lane.b32.xlu2 %v5315_v9, %s6802_s15 }
0x151c   : > { %5305 = vrot.lane.b32.xlu1 %v5298_v11, %s6797_s29 }
0x156d   : > { %v5302_v49 = vpop.permute.xlu2 %5301 }
0x156e   : > { %v10940_v15 = vadd.f32 %v5302_v49, %v5263_v47  ;;  %v5527_v47 = vsel %vm2580_vm15, %v9989_v37, %v5526_v62  ;;  %v6711_v49 = vld [vmem:[#allocation2 + $0x28] sm:$0x3]  ;;  %v5866_v62 = vsel %vm2577_vm9, %v5865_v35, %v5864_v57 }
0x1570   : > { %11879 = vst [vmem:[#allocation34_spill] sm:$0xff] %v10940_v15 }
0x1575   : > { %v5318_v61 = vpop.permute.xlu2 %5317 }
0x1576   : > { %v5324_v9 = vmul.f32 %v10637_v6, %v5318_v61  ;;  %v5325_v44 = vmul.f32 %v10640_v24, %v5318_v61  ;;  %v5320_v11 = vmul.f32 %v6710_v3, %v5318_v61  ;;  %v5321_v41 = vmul.f32 %v6711_v49, %v5318_v61 }
0x1577   : > { %v5322_v15 = vmul.f32 %v6712_v31, %v5318_v61  ;;  %v5323_v16 = vmul.f32 %v10644_v53, %v5318_v61  ;;  %v5528_v24 = vrot.slane %v10046_v22, 7  ;;  %v5731_v3 = vrot.slane %v9989_v37, 3 }
0x1578   : > { %v5342_v14 = vrot.slane %v5324_v9, 2  ;;  %v5343_v51 = vrot.slane %v5325_v44, 2  ;;  %v5336_v55 = vrot.slane %v5320_v11, 2  ;;  %v5337_v17 = vrot.slane %v5321_v41, 2 }
0x1579   : > { %v5339_v13 = vrot.slane %v5322_v15, 2  ;;  %v5340_v6 = vrot.slane %v5323_v16, 2  ;;  %v5326_v53 = vmul.f32 %v10658_v32, %v5318_v61  ;;  %v5327_v57 = vmul.f32 %v10661_v56, %v5318_v61 }
0x157a   : > { %v5344_v49 = vsel %vm3268_vm11, %v5342_v14, %v5343_v51  ;;  %v5338_v31 = vsel %vm3268_vm11, %v5336_v55, %v5337_v17  ;;  %v5530_v16 = vrot.slane %v10054_v40, 6  ;;  %v5869_v15 = vrot.slane %v10046_v22, 4 }
0x157b   : > { %5352 = vrot.lane.b32.xlu2 %v5344_v49, %s6797_s29  ;;  %5348 = vrot.lane.b32.xlu0 %v5338_v31, %s6797_s29  ;;  %v5341_v35 = vsel %vm3268_vm11, %v5339_v13, %v5340_v6  ;;  %v5593_v9 = vrot.slane %v9986_v1, 2  ;;  %v5532_v55 = vrot.slane %v10061_v45, 5  ;;  %v5868_v32 = vsel %vm2580_vm15, %v5867_v34, %v5866_v62 }
0x157c   : > { %5350 = vrot.lane.b32.xlu1 %v5341_v35, %s6797_s29  ;;  %v5871_v56 = vrot.slane %v10054_v40, 3  ;;  %v5595_v14 = vrot.slane %v9989_v37, 1  ;;  %v5529_v61 = vsel %vm11880_vm6, %v5528_v24, %v5527_v47  ;;  %v5534_v13 = vrot.slane %v10218_v29, 4  ;;  %vm11888_vm6 = vmmov %vm11887_vm7 }
0x157d   : > { %v5873_v51 = vrot.slane %v10061_v45, 2  ;;  %v5730_v17 = vsel %vm2577_vm9, %v5729_v63, %v5728_v19  ;;  %v5536_v44 = vrot.slane %v10238_v4, 3  ;;  %v5345_v11 = vrot.slane %v5326_v53, 2 }
0x157e   : > { %v5346_v41 = vrot.slane %v5327_v57, 2  ;;  %v5875_v6 = vrot.slane %v10218_v29, 1  ;;  %v5531_v34 = vsel %vm2586_vm3, %v5530_v16, %v5529_v61  ;;  %v5870_v62 = vsel %vm11881_vm8, %v5869_v15, %v5868_v32  ;;  %vm11889_vm8 = vmmov %vm11859_vm1 }
0x157f   : > { %v5732_v49 = vsel %vm2580_vm15, %v5731_v3, %v5730_v17  ;;  %v5457_v47 = vsel %vm2577_vm9, %v9986_v1, %v5456_v8  ;;  %v5533_v24 = vsel %vm2589_vm4, %v5532_v55, %v5531_v34  ;;  %v5872_v31 = vsel %vm2586_vm3, %v5871_v56, %v5870_v62 }
0x1580   : > { %v5594_v63 = vsel %vm2577_vm9, %v5593_v9, %v5592_v48  ;;  %v5458_v19 = vrot.slane %v9989_v37, 7  ;;  %v5535_v53 = vsel %vm11882_vm10, %v5534_v13, %v5533_v24  ;;  %v5874_v57 = vsel %vm2589_vm4, %v5873_v51, %v5872_v31  ;;  %vm11890_vm10 = vmmov %vm11859_vm1 }
0x1581   : > { %v5596_v35 = vsel %vm2580_vm15, %v5595_v14, %v5594_v63  ;;  %v5797_v16 = vrot.slane %v9986_v1, 5  ;;  %v5537_v3 = vsel %vm11883_vm12, %v5536_v44, %v5535_v53  ;;  %v5347_v8 = vsel %vm3268_vm11, %v5345_v11, %v5346_v41  ;;  %vm11885_vm11 = vmmov %vm11851_vm5 }
0x1582   : > { %v5876_v15 = vsel %vm11884_vm14, %v5875_v6, %v5874_v57  ;;  %v5733_v55 = vrot.slane %v10046_v22, 2  ;;  %v5735_v9 = vrot.slane %v10054_v40, 1  ;;  %v5598_v32 = vrot.slane %v10054_v40, 7  ;;  %vm11891_vm12 = vmmov %vm11888_vm6 }
0x1583   : > { %5580 = vrot.lane.b32.xlu2 %v5537_v3, %s6802_s15  ;;  %5354 = vrot.lane.b32.xlu0 %v5347_v8, %s6797_s29  ;;  %v5877_v48 = vsel %vm11859_vm1, %v10238_v4, %v5876_v15  ;;  %v5460_v56 = vrot.slane %v10046_v22, 6  ;;  %v5600_v14 = vrot.slane %v10061_v45, 6  ;;  %v5459_v61 = vsel %vm2580_vm15, %v5458_v19, %v5457_v47  ;;  %vm11892_vm14 = vmmov %vm11859_vm1  ;;  %s11901_s29 = smov 48  }
0x1584   : > { %5920 = vrot.lane.b32.xlu1 %v5877_v48, %s6808_s21  ;;  %v5462_v13 = vrot.slane %v10054_v40, 5  ;;  %v5799_v51 = vrot.slane %v9989_v37, 4  ;;  %v5738_v17 = vrot.slane %v10218_v29, 7  ;;  %v5597_v44 = vsel %vm11885_vm11, %v10046_v22, %v5596_v35  ;;  %vm11895_vm1 = vmmov %vm11886_vm2 }
0x1585   : > { %v5602_v11 = vrot.slane %v10218_v29, 5  ;;  %v5464_v41 = vrot.slane %v10061_v45, 4  ;;  %v5734_v6 = vsel %vm11851_vm5, %v5733_v55, %v5732_v49  ;;  %v5740_v34 = vrot.slane %v10238_v4, 6  ;;  %vm11896_vm11 = vmmov %vm11895_vm1 }
0x1586   : > { %v5604_v62 = vrot.slane %v10238_v4, 4  ;;  %v5466_v47 = vrot.slane %v10218_v29, 3  ;;  %v5736_v24 = vsel %vm2586_vm3, %v5735_v9, %v5734_v6  ;;  %v5599_v31 = vsel %vm2586_vm3, %v5598_v32, %v5597_v44  ;;  %vm11897_vm5 = vmmov %vm11888_vm6 }
0x1587   : > { %v5461_v63 = vsel %vm11886_vm2, %v5460_v56, %v5459_v61  ;;  %v5468_v19 = vrot.slane %v10238_v4, 2  ;;  %v5737_v53 = vsel %vm2589_vm4, %v10061_v45, %v5736_v24  ;;  %v5601_v57 = vsel %vm2589_vm4, %v5600_v14, %v5599_v31  ;;  %vm11898_vm2 = vmmov %vm11889_vm8 }
0x1588   : > { %v5463_v49 = vsel %vm2586_vm3, %v5462_v13, %v5461_v63  ;;  %v5661_v35 = vrot.slane %v9986_v1, 3  ;;  %v5739_v3 = vsel %vm11887_vm7, %v5738_v17, %v5737_v53  ;;  %v5603_v8 = vsel %vm11888_vm6, %v5602_v11, %v5601_v57  ;;  %vm11899_vm7 = vmmov %vm11898_vm2 }
0x1589   : > { %v5465_v15 = vsel %vm2589_vm4, %v5464_v41, %v5463_v49  ;;  %v5663_v55 = vrot.slane %v9989_v37, 2  ;;  %v5741_v48 = vsel %vm11889_vm8, %v5740_v34, %v5739_v3  ;;  %v5605_v9 = vsel %vm11890_vm10, %v5604_v62, %v5603_v8  ;;  %vm11900_vm6 = vmmov %vm11897_vm5 }
0x158a   : > { %v5467_v32 = vsel %vm11891_vm12, %v5466_v47, %v5465_v15  ;;  %v5801_v56 = vrot.slane %v10046_v22, 3  ;;  %v5803_v14 = vrot.slane %v10054_v40, 2  ;;  %v5665_v61 = vrot.slane %v10046_v22, 1  ;;  %vm11902_vm8 = vmmov %vm11898_vm2 }
0x158b   : > { %5784 = vrot.lane.b32.xlu2 %v5741_v48, %s6805_s18  ;;  %5648 = vrot.lane.b32.xlu0 %v5605_v9, %s6803_s16  ;;  %v5469_v1 = vsel %vm11892_vm14, %v5468_v19, %v5467_v32  ;;  %v11893_v37 = vrot.slane %v9994_v0, 6  ;;  %v5805_v17 = vrot.slane %v10061_v45, 1  ;;  %v11894_v44 = vrot.slane %v9994_v0, 4  ;;  %vm11904_vm10 = vmmov %vm11898_vm2 }
0x158c   : > { %5512 = vrot.lane.b32.xlu1 %v5469_v1, %s6801_s14  ;;  %v5668_v34 = vrot.slane %v10061_v45, 7  ;;  %v5482_v22 = vrot.slane %v10495_v23, 2  ;;  %v5808_v47 = vrot.slane %v10238_v4, 7  ;;  %v5672_v31 = vrot.slane %v10238_v4, 5  ;;  %vm11905_vm12 = vmmov %vm11898_vm2 }
0x158d   : > { %v5798_v13 = vsel %vm2577_vm9, %v5797_v16, %v11893_v37  ;;  %v5662_v11 = vsel %vm2577_vm9, %v5661_v35, %v11894_v44  ;;  %v5670_v16 = vrot.slane %v10218_v29, 6  ;;  %v5618_v35 = vrot.slane %v10495_v23, 4  ;;  %vm11906_vm14 = vmmov %vm11898_vm2 }
0x158e   : > { %v5800_v41 = vsel %vm2580_vm15, %v5799_v51, %v5798_v13  ;;  %v5664_v6 = vsel %vm2580_vm15, %v5663_v55, %v5662_v11  ;;  %v5483_v53 = vsel %vm11898_vm2, %v5482_v22, %v10473_v10  ;;  %v5628_v15 = vrot.slane %v10625_v36, 6 }
0x158f   : > { %v5802_v62 = vsel %vm11895_vm1, %v5801_v56, %v5800_v41  ;;  %v5666_v0 = vsel %vm11896_vm11, %v5665_v61, %v5664_v6  ;;  %v5619_v8 = vsel %vm11906_vm14, %v5618_v35, %v10485_v52  ;;  %v5630_v55 = vrot.slane %v10675_v46, 5  ;;  %vm11907_vm1 = vmmov %vm11897_vm5 }
0x1590   : > { %v5804_v24 = vsel %vm2586_vm3, %v5803_v14, %v5802_v62  ;;  %v5667_v63 = vsel %vm2586_vm3, %v10054_v40, %v5666_v0  ;;  %v5686_v40 = vrot.slane %v10495_v23, 5  ;;  %v5632_v48 = vrot.slane %v10680_v39, 4  ;;  %vm11908_vm11 = vmmov %vm11898_vm2 }
0x1591   : > { %v5806_v51 = vsel %vm2589_vm4, %v5805_v17, %v5804_v24  ;;  %v5669_v19 = vsel %vm2589_vm4, %v5668_v34, %v5667_v63  ;;  %v5822_v9 = vrot.slane %v10495_v23, 7  ;;  %v5833_v1 = vrot.slane %v10625_v36, 1  ;;  %vm11915_vm14 = vmmov %vm11898_vm2 }
0x1592   : > { %v5807_v45 = vsel %vm11897_vm5, %v10218_v29, %v5806_v51  ;;  %v5671_v49 = vsel %vm11900_vm6, %v5670_v16, %v5669_v19  ;;  %v5550_v29 = vrot.slane %v10495_v23, 3  ;;  %v5687_v10 = vsel %vm11904_vm10, %v5686_v40, %v10479_v2  ;;  %vm11909_vm5 = vmmov %vm11898_vm2 }
0x1593   : > { %v5809_v57 = vsel %vm11899_vm7, %v5808_v47, %v5807_v45  ;;  %5514 = vrot.lane.b32.xlu2 %v5483_v53, %s6801_s14  ;;  %v5673_v4 = vsel %vm11902_vm8, %v5672_v31, %v5671_v49  ;;  %v5754_v2 = vrot.slane %v10495_v23, 6  ;;  %v5823_v14 = vsel %vm11898_vm2, %v5822_v9, %v10476_v12  ;;  %vm11910_vm7 = vmmov %vm11907_vm1 }
0x1594   : > { %5852 = vrot.lane.b32.xlu0 %v5809_v57, %s11901_s29  ;;  %5716 = vrot.lane.b32.xlu1 %v5673_v4, %s11903_s8  ;;  %v5551_v3 = vsel %vm11905_vm12, %v5550_v29, %v10482_v38  ;;  %v5629_v38 = vsel %vm2589_vm4, %v5628_v15, %v10606_v50  ;;  %v5492_v61 = vrot.slane %v10625_v36, 4  ;;  %v5560_v50 = vrot.slane %v10625_v36, 5  ;;  %vm11911_vm6 = vmmov %vm11907_vm1  ;;  %v11918_v29 = vld [vmem:[#allocation65_spill] sm:$0xff] }
0x1595   : > { %v5631_v32 = vsel %vm11907_vm1, %v5630_v55, %v5629_v38  ;;  %v5755_v52 = vsel %vm11909_vm5, %v5754_v2, %v10488_v60  ;;  %v5696_v37 = vrot.slane %v10625_v36, 7  ;;  %v5494_v13 = vrot.slane %v10675_v46, 3  ;;  %vm11912_vm8 = vmmov %vm11907_vm1 }
0x1596   : > { %v5633_v56 = vsel %vm11908_vm11, %v5632_v48, %v5631_v32  ;;  %v5562_v60 = vrot.slane %v10675_v46, 4  ;;  %v5834_v17 = vsel %vm2589_vm4, %v5833_v1, %v10609_v21  ;;  %v5836_v44 = vrot.slane %v10680_v39, 7  ;;  %vm11913_vm10 = vmmov %vm11898_vm2 }
0x1597   : > { %v5496_v11 = vrot.slane %v10680_v39, 2  ;;  %v5493_v12 = vsel %vm2589_vm4, %v5492_v61, %v10612_v54  ;;  %v5561_v41 = vsel %vm2589_vm4, %v5560_v50, %v10615_v59  ;;  %v5564_v6 = vrot.slane %v10680_v39, 3  ;;  %vm11914_vm12 = vmmov %vm11898_vm2 }
0x1598   : > { %v5698_v34 = vrot.slane %v10675_v46, 6  ;;  %v5567_v22 = vrot.slane %v10717_v30, 1  ;;  %v5697_v62 = vsel %vm2589_vm4, %v5696_v37, %v10603_v43  ;;  %v5700_v21 = vrot.slane %v10680_v39, 5  ;;  %vm11916_vm11 = vmmov %vm11898_vm2 }
0x1599   : > { %v5766_v47 = vrot.slane %v10675_v46, 7  ;;  %v5835_v16 = vsel %vm11910_vm7, %v10675_v46, %v5834_v17  ;;  %v5495_v54 = vsel %vm11911_vm6, %v5494_v13, %v5493_v12  ;;  %v5563_v59 = vsel %vm11912_vm8, %v5562_v60, %v5561_v41  ;;  %vm11917_vm5 = vmmov %vm11907_vm1 }
0x159a   : > { %v5768_v24 = vrot.slane %v10680_v39, 6  ;;  %v5837_v0 = vsel %vm11913_vm10, %v5836_v44, %v5835_v16  ;;  %v5497_v31 = vsel %vm11914_vm12, %v5496_v11, %v5495_v54  ;;  %v5566_v51 = vrot.slane %v10720_v28, 2  ;;  %vm11921_vm6 = vmmov %vm11907_vm1 }
0x159b   : > { %5718 = vrot.lane.b32.xlu2 %v5687_v10, %s11903_s8  ;;  %v5570_v43 = vrot.slane %v10758_v27, 7  ;;  %v5565_v63 = vsel %vm11915_vm14, %v5564_v6, %v5563_v59  ;;  %v5572_v45 = vrot.slane %v10782_v18, 6  ;;  %v5699_v19 = vsel %vm11907_vm1, %v5698_v34, %v5697_v62  ;;  %v11919_v10 = vld [vmem:[#allocation66_spill] sm:$0xff]  ;;  %vm11922_vm8 = vmmov %vm11898_vm2 }
0x159c   : > { %5582 = vrot.lane.b32.xlu0 %v5551_v3, %s6802_s15  ;;  %5650 = vrot.lane.b32.xlu1 %v5619_v8, %s6803_s16  ;;  %v5765_v53 = vsel %vm2589_vm4, %v10625_v36, %v10618_v7  ;;  %v5568_v57 = vsel %vm2577_vm9, %v5567_v22, %v5566_v51  ;;  %v5574_v49 = vrot.slane %v10793_v42, 5  ;;  %v5701_v4 = vsel %vm11916_vm11, %v5700_v21, %v5699_v19  ;;  %vm11926_vm11 = vmmov %vm11907_vm1 }
0x159d   : > { %v5767_v40 = vsel %vm11917_vm5, %v5766_v47, %v5765_v53  ;;  %v5569_v35 = vsel %vm2580_vm15, %v11918_v29, %v5568_v57  ;;  %v5576_v3 = vrot.slane %v11919_v10, 4  ;;  %v5770_v15 = vrot.slane %v10720_v28, 5  ;;  %vm11927_vm5 = vmmov %vm11898_vm2 }
0x159e   : > { %v5769_v8 = vsel %vm11898_vm2, %v5768_v24, %v5767_v40  ;;  %vm11920_vm7 = vcmask 1043459   ;;  %v5578_v55 = vrot.slane %v10827_v25, 3  ;;  %v5771_v48 = vrot.slane %v10717_v30, 4 }
0x159f   : > { %v5571_v7 = vsel %vm11920_vm7, %v5570_v43, %v5569_v35  ;;  %v5635_v2 = vrot.slane %v10717_v30, 2  ;;  %v5773_v38 = vrot.slane %v11918_v29, 3  ;;  %v5634_v32 = vrot.slane %v10720_v28, 3  ;;  %vm11923_vm10 = vmmov %vm11920_vm7 }
0x15a0   : > { %v5573_v9 = vsel %vm2586_vm3, %v5572_v45, %v5571_v7  ;;  %v5637_v1 = vrot.slane %v11918_v29, 1  ;;  %v5838_v61 = vrot.slane %v10720_v28, 6  ;;  %v5839_v13 = vrot.slane %v10717_v30, 5  ;;  %vm11924_vm12 = vmmov %vm11920_vm7 }
0x15a1   : > { %v5703_v60 = vrot.slane %v10717_v30, 3  ;;  %v5772_v44 = vsel %vm2577_vm9, %v5771_v48, %v5770_v15  ;;  %v5775_v11 = vrot.slane %v10758_v27, 2  ;;  %v5636_v12 = vsel %vm2577_vm9, %v5635_v2, %v5634_v32  ;;  %vm11925_vm14 = vmmov %vm11920_vm7 }
0x15a2   : > { %v5774_v41 = vsel %vm2580_vm15, %v5773_v38, %v5772_v44  ;;  %v5777_v6 = vrot.slane %v10782_v18, 1  ;;  %v5640_v34 = vrot.slane %v10782_v18, 7  ;;  %v5502_v22 = vrot.slane %v10758_v27, 6  ;;  %vm11928_vm7 = vmmov %vm11907_vm1 }
0x15a3   : > { %5652 = vrot.lane.b32.xlu2 %v5633_v56, %s6803_s16  ;;  %v5498_v56 = vrot.slane %v10720_v28, 1  ;;  %v5638_v62 = vsel %vm2580_vm15, %v5637_v1, %v5636_v12  ;;  %v5642_v21 = vrot.slane %v10793_v42, 6  ;;  %v5504_v16 = vrot.slane %v10782_v18, 5 }
0x15a4   : > { %5786 = vrot.lane.b32.xlu0 %v5755_v52, %s6805_s18  ;;  %5854 = vrot.lane.b32.xlu1 %v5823_v14, %s11901_s29  ;;  %v5575_v52 = vsel %vm2589_vm4, %v5574_v49, %v5573_v9  ;;  %v5500_v14 = vrot.slane %v11918_v29, 7  ;;  %v5780_v54 = vrot.slane %v11919_v10, 7  ;;  %v5639_v59 = vsel %vm11923_vm10, %v10758_v27, %v5638_v62 }
0x15a5   : > { %v5577_v50 = vsel %vm11921_vm6, %v5576_v3, %v5575_v52  ;;  %v5499_v37 = vsel %vm2577_vm9, %v10717_v30, %v5498_v56  ;;  %v5644_v24 = vrot.slane %v11919_v10, 5  ;;  %v5782_v51 = vrot.slane %v10827_v25, 6  ;;  %vm11929_vm6 = vmmov %vm11898_vm2 }
0x15a6   : > { %v5579_v17 = vsel %vm11922_vm8, %v5578_v55, %v5577_v50  ;;  %v5501_v47 = vsel %vm2580_vm15, %v5500_v14, %v5499_v37  ;;  %v5646_v43 = vrot.slane %v10827_v25, 4  ;;  %v5641_v19 = vsel %vm2586_vm3, %v5640_v34, %v5639_v59  ;;  %vm11930_vm8 = vmmov %vm11923_vm10 }
0x15a7   : > { %v5503_v53 = vsel %vm11925_vm14, %v5502_v22, %v5501_v47  ;;  %v5510_v57 = vrot.slane %v10827_v25, 2  ;;  %v5841_v35 = vrot.slane %v11918_v29, 4  ;;  %v5705_v7 = vrot.slane %v11918_v29, 2  ;;  %vm11931_vm10 = vmmov %vm11930_vm8  ;;  %v11933_v47 = vld [vmem:[#allocation81_spill] sm:$0xff] }
0x15a8   : > { %v5505_v40 = vsel %vm2586_vm3, %v5504_v16, %v5503_v53  ;;  %v5843_v9 = vrot.slane %v10758_v27, 3  ;;  %v5845_v32 = vrot.slane %v10782_v18, 2  ;;  %v5702_v56 = vrot.slane %v10720_v28, 4  ;;  %vm11934_vm14 = vmmov %vm11898_vm2 }
0x15a9   : > { %v5707_v52 = vrot.slane %v10758_v27, 1  ;;  %v5840_v1 = vsel %vm2577_vm9, %v5839_v13, %v5838_v61  ;;  %v5847_v14 = vrot.slane %v10793_v42, 1  ;;  %v5714_v13 = vrot.slane %v10827_v25, 5 }
0x15aa   : > { %v5842_v50 = vsel %vm2580_vm15, %v5841_v35, %v5840_v1  ;;  %v5704_v37 = vsel %vm2577_vm9, %v5703_v60, %v5702_v56  ;;  %v5891_v16 = vsel %vm11934_vm14, %v10495_v23, %v11933_v47  ;;  %v5901_v23 = vrot.slane %v10625_v36, 2  ;;  %v11940_v36 = vld [vmem:[#allocation9_spill] sm:$0xff]  ;;  %v11946_v56 = vld [vmem:[#allocation67_spill] sm:$0xff]  ;;  %v11955_v47 = vld [vmem:[#allocation32_spill] sm:$0xff] }
0x15ab   : > { %5856 = vrot.lane.b32.xlu2 %v5837_v0, %s11901_s29  ;;  %v5506_v0 = vrot.slane %v10793_v42, 4  ;;  %v5844_v44 = vsel %vm11930_vm8, %v5843_v9, %v5842_v50  ;;  %v5706_v12 = vsel %vm2580_vm15, %v5705_v7, %v5704_v37  ;;  %v5304_v7 = vpop.permute.xlu0 %5303  ;;  %v11948_v1 = vld [vmem:[#allocation13_spill] sm:$0xff]  ;;  %vm5964_vm14 = vcmask 523264  }
0x15ac   : > { %5516 = vrot.lane.b32.xlu0 %v5497_v31, %s6801_s14  ;;  %5584 = vrot.lane.b32.xlu1 %v5565_v63, %s6802_s15  ;;  %v5776_v31 = vsel %vm11924_vm12, %v5775_v11, %v5774_v41  ;;  %v5508_v63 = vrot.slane %v11919_v10, 3  ;;  %v5850_v11 = vrot.slane %v10827_v25, 7  ;;  %v5712_v41 = vrot.slane %v11919_v10, 6  ;;  %vm11932_vm12 = vmmov %vm11907_vm1 }
0x15ad   : > { %v5778_v45 = vsel %vm2586_vm3, %v5777_v6, %v5776_v31  ;;  %v5507_v15 = vsel %vm2589_vm4, %v5506_v0, %v5505_v40  ;;  %v5846_v6 = vsel %vm2586_vm3, %v5845_v32, %v5844_v44  ;;  %v5708_v61 = vsel %vm11931_vm10, %v5707_v52, %v5706_v12  ;;  %v11945_v32 = vld [vmem:[#allocation12_spill] sm:$0xff]  ;;  %v11947_v52 = vld [vmem:[#allocation83_spill] sm:$0xff] }
0x15ae   : > { %v5779_v49 = vsel %vm2589_vm4, %v10793_v42, %v5778_v45  ;;  %v5509_v2 = vsel %vm11928_vm7, %v5508_v63, %v5507_v15  ;;  %v5848_v34 = vsel %vm2589_vm4, %v5847_v14, %v5846_v6  ;;  %v5709_v60 = vsel %vm2586_vm3, %v10782_v18, %v5708_v61  ;;  %v11938_v45 = vld [vmem:[#allocation71_spill] sm:$0xff] }
0x15af   : > { %v5781_v3 = vsel %vm11907_vm1, %v5780_v54, %v5779_v49  ;;  %v5511_v38 = vsel %vm11929_vm6, %v5510_v57, %v5509_v2  ;;  %v5849_v22 = vsel %vm11932_vm12, %v11919_v10, %v5848_v34  ;;  %vm11935_vm1 = vmmov %vm11898_vm2  ;;  %v5906_v31 = vrot.slane %v10720_v28, 7  ;;  %v11953_v34 = vld [vmem:[#allocation27_spill] sm:$0xff] }
0x15b0   : > { %v5783_v55 = vsel %vm11927_vm5, %v5782_v51, %v5781_v3  ;;  %v5851_v54 = vsel %vm11935_vm1, %v5850_v11, %v5849_v22  ;;  %vm11937_vm5 = vmmov %vm11935_vm1  ;;  %v5913_v51 = vrot.slane %v10782_v18, 3  ;;  %v5915_v63 = vrot.slane %v10793_v42, 2  ;;  %v11951_v11 = vld [vmem:[#allocation26_spill] sm:$0xff] }
0x15b1   : > { %v5917_v28 = vrot.slane %v11919_v10, 1  ;;  %v5902_v18 = vsel %vm2589_vm4, %v5901_v23, %v11940_v36  ;;  %vm11944_vm6 = vmmov %vm11935_vm1  ;;  %vm11961_vm10 = vcmask 392192   ;;  %vm11962_vm12 = vcmask 457728  }
0x15b3   : > { %5586 = vrot.lane.b32.xlu2 %v5579_v17, %s6802_s15  ;;  %v5710_v17 = vrot.slane %v10793_v42, 7  ;;  %s283_s15 = sand.u32 1, %s6786_s25  }
0x15b4   : > { %5720 = vrot.lane.b32.xlu0 %v5701_v4, %s11903_s8  ;;  %5788 = vrot.lane.b32.xlu1 %v5769_v8, %s6805_s18  ;;  %v5643_v4 = vsel %vm2589_vm4, %v5642_v21, %v5641_v19  ;;  %v5907_v21 = vrot.slane %v10717_v30, 6  ;;  %v5911_v30 = vrot.slane %v10758_v27, 4  ;;  %v5010_v19 = vadd.f32 %v10817_v58, %v11938_v45 }
0x15b5   : > { %v5645_v8 = vsel %vm11926_vm11, %v5644_v24, %v5643_v4  ;;  %v5711_v62 = vsel %vm2589_vm4, %v5710_v17, %v5709_v60  ;;  %vm11936_vm11 = vmmov %vm11928_vm7  ;;  %v5909_v24 = vrot.slane %v11918_v29, 5  ;;  %v11941_v4 = vld [vmem:[#allocation20_spill] sm:$0xff] }
0x15b6   : > { %v5647_v48 = vsel %vm11898_vm2, %v5646_v43, %v5645_v8  ;;  %v5713_v59 = vsel %vm11936_vm11, %v5712_v41, %v5711_v62  ;;  %v5903_v43 = vrot.slane %v10675_v46, 1  ;;  %v5908_v29 = vsel %vm2577_vm9, %v5907_v21, %v5906_v31  ;;  %vm11939_vm2 = vmmov %vm11930_vm8  ;;  %v5255_v8 = vpop.permute.xlu1 %5254  ;;  %v11952_v41 = vld [vmem:[#allocation46_spill] sm:$0xff]  ;;  %v11954_v62 = vld [vmem:[#allocation49_spill] sm:$0xff] }
0x15b7   : > { %v5715_v0 = vsel %vm11937_vm5, %v5714_v13, %v5713_v59  ;;  %v5910_v53 = vsel %vm2580_vm15, %v5909_v24, %v5908_v29  ;;  %v5059_v57 = vadd.f32 %v10833_v20, %v5010_v19  ;;  %vm11942_vm9 = vmmov %vm11935_vm1  ;;  %vm11960_vm8 = vcmask 326656  }
0x15b8   : > { %v5912_v27 = vsel %vm11939_vm2, %v5911_v30, %v5910_v53  ;;  %v5904_v49 = vsel %vm11928_vm7, %v5903_v43, %v5902_v18  ;;  %vm11943_vm15 = vmmov %vm11928_vm7  ;;  %v11956_v43 = vld [vmem:[#allocation53_spill] sm:$0xff] }
0x15b9   : > { %v5914_v46 = vsel %vm2586_vm3, %v5913_v51, %v5912_v27  ;;  %v5108_v40 = vadd.f32 %v11941_v4, %v5059_v57  ;;  %v5905_v58 = vsel %vm11942_vm9, %v10680_v39, %v5904_v49  ;;  %vm11957_vm3 = vcmask 195584   ;;  %v11958_v27 = vld [vmem:[#allocation64_spill] sm:$0xff]  ;;  %vm11966_vm5 = vmmov %vm11960_vm8 }
0x15ba   : > { %v5916_v42 = vsel %vm2589_vm4, %v5915_v63, %v5914_v46  ;;  %vm11959_vm4 = vcmask 261120   ;;  %vm11964_vm1 = vmmov %vm11957_vm3 }
0x15bb   : > { %5790 = vrot.lane.b32.xlu2 %v5783_v55, %s6805_s18  ;;  %v5918_v10 = vsel %vm11943_vm15, %v5917_v28, %v5916_v42  ;;  %v5137_v35 = vadd.f32 %v10890_v5, %v5108_v40  ;;  %vm11965_vm11 = vmmov %vm11959_vm4 }
0x15bc   : > { %5654 = vrot.lane.b32.xlu0 %v5647_v48, %s6803_s16  ;;  %5518 = vrot.lane.b32.xlu1 %v5511_v38, %s6801_s14  ;;  %v5919_v20 = vsel %vm11944_vm6, %v10827_v25, %v5918_v10  ;;  %v4884_v25 = vadd.f32 %v11946_v56, %v11945_v32  ;;  %s6065_s16 = sshll.u32 %s283_s15, 5  ;;  %vm11968_vm2 = vmmov %vm11961_vm10 }
0x15bd   : > { %v5186_v3 = vadd.f32 %v10902_v33, %v5137_v35  ;;  %v11949_v33 = vld [vmem:[#allocation68_spill] sm:$0xff]  ;;  %s11301_s18 = scalar_lea.vmem [#allocation6], %s6065_s16  ;;  %vm11969_vm7 = vmmov %vm11962_vm12  ;;  %s6748_s16 = scalar_lea.hbm %s11380_s7, 64 }
0x15be   : > { %v5300_v9 = vpop.permute.xlu1 %5299  ;;  %v4933_v5 = vadd.f32 %v11947_v52, %v4884_v25  ;;  %vm11972_vm9 = vmmov %vm11964_vm1  ;;  %s5982_s9 = sshll.u32 %s11301_s18, 4  ;;  %s5983_s9 = int_to_ptr.vmem [resolvable:$true] %s5982_s9 }
0x15bf   : > { %v5235_v15 = vadd.f32 %v10914_v26, %v5186_v3  ;;  %v11950_v26 = vld [vmem:[#allocation37_spill] sm:$0xff]  ;;  %v5311_v57 = vadd.f32 %v5300_v9, %v11958_v27  ;;  %v11967_v9 = vld [vmem:[#allocation34_spill] sm:$0xff]  ;;  %vm11973_vm15 = vmmov %vm11959_vm4 }
0x15c0   : > { %v4982_v14 = vadd.f32 %v11948_v1, %v4933_v5  ;;  %vm11974_vm6 = vmmov %vm11964_vm1 }
0x15c1   : > { %v5264_v55 = vadd.f32 %v5255_v8, %v5235_v15 }
0x15c2   : > { %v5011_v37 = vadd.f32 %v11949_v33, %v4982_v14 }
0x15c3   : > { %5922 = vrot.lane.b32.xlu2 %v5891_v16, %s6808_s21  ;;  %v5313_v48 = vadd.f32 %v5304_v7, %v5264_v55 }
0x15c4   : > { %5858 = vrot.lane.b32.xlu0 %v5851_v54, %s11901_s29  ;;  %5722 = vrot.lane.b32.xlu1 %v5715_v0, %s11903_s8  ;;  %v5060_v44 = vadd.f32 %v11950_v26, %v5011_v37 }
0x15c6   : > { %v5306_v17 = vpop.permute.xlu1 %5305  ;;  %v5109_v12 = vadd.f32 %v11951_v11, %v5060_v44  ;;  %v11971_v44 = vld [vmem:[#allocation29_spill] sm:$0xff] }
0x15c8   : > { %v5138_v6 = vadd.f32 %v11952_v41, %v5109_v12 }
0x15ca   : > { %v5187_v60 = vadd.f32 %v11953_v34, %v5138_v6 }
0x15cc   : > { %5924 = vrot.lane.b32.xlu0 %v5905_v58, %s6808_s21  ;;  %5926 = vrot.lane.b32.xlu1 %v5919_v20, %s6808_s21  ;;  %v5236_v21 = vadd.f32 %v11954_v62, %v5187_v60  ;;  %v11963_v20 = vld [vmem:[#allocation52_spill] sm:$0xff]  ;;  %s6205_s21 = sshll.u32 %s6874_s28, 5  ;;  %s5970_s28 = scalar_lea.sflag [#allocation4], %s283_s15 }
0x15cd   : > { %s5981_s20 = scalar_lea.hbm %s11380_s7, %s6205_s21 }
0x15ce   : > { %v5265_v16 = vadd.f32 %v11955_v47, %v5236_v21  ;;  %s5984_s19 = sshll.u32 %s5981_s20, 4  ;;  %s5985_s19 = int_to_ptr.hbm [resolvable:$true] %s5984_s19 }
0x15cf   : > { %s6742_s22 = sshra.s32 %s5985_s19, 4  ;;  %s6743_s22 = int_to_ptr.hbm [resolvable:$true] %s6742_s22 }
0x15d0   : > { %v5314_v54 = vadd.f32 %v5306_v17, %v5265_v16  ;;  %v11970_v17 = vld [vmem:[#allocation21_spill] sm:$0xff]  ;;  %s6744_s23 = scalar_lea.hbm %s6743_s22, 32  ;;  %p6749_p3 = scmp.lt.s32.totalorder %s6743_s22, %s11380_s7 }
0x15d1   : > { %p6745_p0 = scmp.ne.s32.totalorder %s6743_s22, %s6744_s23  ;;  %p6750_p4 = scmp.lt.s32.totalorder %s6748_s16, %s6744_s23 }
0x15d3   : > { %p6746_p1 = pnand %p6745_p0, %p6891_p5  ;;  %p6751_p7 = por %p6750_p4, %p6749_p3 }
0x15d5   : > { %v5353_v39 = vpop.permute.xlu2 %5352  ;;  %p6747_p2 = pneg %p6746_p1 }
0x15d6   : > { %v11274_v2 = vadd.f32 %v5353_v39, %v5313_v48 }
0x15d7   : > { %p6752_p8 = pnand %p6751_p7, %p6747_p2 }
0x15dd   : > { %v5581_v38 = vpop.permute.xlu2 %5580 }
0x15e5   : > { %v5785_v50 = vpop.permute.xlu2 %5784 }
0x15ed   : > { %v5515_v61 = vpop.permute.xlu2 %5514  ;;  %v5349_v13 = vpop.permute.xlu0 %5348 }
0x15ee   : > { %v5351_v22 = vpop.permute.xlu1 %5350  ;;  %v5360_v46 = vadd.f32 %v5349_v13, %v5311_v57  ;;  %v5933_v35 = vsel %vm324_vm0, %v11963_v20, %v5515_v61 }
0x15f5   : > { %v5719_v59 = vpop.permute.xlu2 %5718  ;;  %v5355_v24 = vpop.permute.xlu0 %5354 }
0x15f6   : > { %v11287_v0 = vadd.f32 %v5355_v24, %v5314_v54  ;;  %v5921_v31 = vpop.permute.xlu1 %5920 }
0x15fd   : > { %v5653_v30 = vpop.permute.xlu2 %5652  ;;  %v5649_v23 = vpop.permute.xlu0 %5648 }
0x15fe   : > { %v5513_v51 = vpop.permute.xlu1 %5512 }
0x15ff   : > { %v5932_v29 = vsel %vm324_vm0, %v11956_v43, %v5513_v51 }
0x1600   : > { %v5936_v63 = vsel %vm3123_vm13, %v5932_v29, %v5581_v38  ;;  %v5361_v38 = vadd.f32 %v5351_v22, %v11967_v9 }
0x1601   : > { %v5940_v53 = vsel %vm11957_vm3, %v5936_v63, %v5649_v23  ;;  %vm11975_vm3 = vmmov %vm11959_vm4 }
0x1605   : > { %v5857_v45 = vpop.permute.xlu2 %5856 }
0x1606   : > { %v5853_v19 = vpop.permute.xlu0 %5852  ;;  %v5717_v28 = vpop.permute.xlu1 %5716 }
0x1607   : > { %v5944_v36 = vsel %vm11959_vm4, %v5940_v53, %v5717_v28  ;;  %vm11976_vm4 = vmmov %vm11966_vm5 }
0x1608   : > { %v5948_v18 = vsel %vm11960_vm8, %v5944_v36, %v5785_v50  ;;  %vm11979_vm8 = vmmov %vm11969_vm7 }
0x1609   : > { %v5952_v49 = vsel %vm11961_vm10, %v5948_v18, %v5853_v19  ;;  %vm11980_vm10 = vmmov %vm11968_vm2 }
0x160a   : > { %v5956_v42 = vsel %vm11962_vm12, %v5952_v49, %v5921_v31  ;;  %vm11981_vm12 = vmmov %vm11969_vm7 }
0x160b   : > { %v5960_v4 = vadd.f32 %v5956_v42, %v5360_v46 }
0x160d   : > { %v5587_v40 = vpop.permute.xlu2 %5586  ;;  %5965 = vst.msk [vmem:[%s11301_s18] sm:$0xff] %vm5964_vm14, %v5960_v4 }
0x160e   : > { %v5583_v58 = vpop.permute.xlu0 %5582  ;;  %v5651_v10 = vpop.permute.xlu1 %5650 }
0x160f   : > { %v5937_v3 = vsel %vm3123_vm13, %v5933_v35, %v5583_v58 }
0x1610   : > { %v5941_v7 = vsel %vm11964_vm1, %v5937_v3, %v5651_v10 }
0x1611   : > { %v5945_v48 = vsel %vm11965_vm11, %v5941_v7, %v5719_v59 }
0x1615   : > { %v5791_v8 = vpop.permute.xlu2 %5790 }
0x1616   : > { %v5787_v15 = vpop.permute.xlu0 %5786  ;;  %v5855_v55 = vpop.permute.xlu1 %5854 }
0x1617   : > { %v5949_v39 = vsel %vm11966_vm5, %v5945_v48, %v5787_v15 }
0x1618   : > { %v5953_v32 = vsel %vm11968_vm2, %v5949_v39, %v5855_v55 }
0x161d   : > { %v5923_v56 = vpop.permute.xlu2 %5922 }
0x161e   : > { %v5517_v25 = vpop.permute.xlu0 %5516  ;;  %v5957_v52 = vsel %vm11969_vm7, %v5953_v32, %v5923_v56  ;;  %v5585_v5 = vpop.permute.xlu1 %5584 }
0x161f   : > { %v5961_v1 = vadd.f32 %v5957_v52, %v5361_v38  ;;  %v5934_v26 = vsel %vm324_vm0, %v11970_v17, %v5517_v25 }
0x1620   : > { %v5938_v12 = vsel %vm3123_vm13, %v5934_v26, %v5585_v5 }
0x1621   : > { %5966 = vst.msk [vmem:[%s11301_s18 + $0x8] sm:$0xff] %vm5964_vm14, %v5961_v1  ;;  %v5942_v61 = vsel %vm11972_vm9, %v5938_v12, %v5653_v30 }
0x1626   : > { %v5721_v14 = vpop.permute.xlu0 %5720  ;;  %v5789_v50 = vpop.permute.xlu1 %5788 }
0x1627   : > { %v5946_v34 = vsel %vm11973_vm15, %v5942_v61, %v5721_v14 }
0x1628   : > { %v5950_v62 = vsel %vm11976_vm4, %v5946_v34, %v5789_v50 }
0x162e   : > { %v5655_v33 = vpop.permute.xlu0 %5654  ;;  %v5519_v37 = vpop.permute.xlu1 %5518 }
0x162f   : > { %v5935_v11 = vsel %vm324_vm0, %v11971_v44, %v5519_v37  ;;  %vm11977_vm0 = vmmov %vm11976_vm4 }
0x1630   : > { %v5939_v41 = vsel %vm3123_vm13, %v5935_v11, %v5587_v40  ;;  %vm11978_vm13 = vmmov %vm11968_vm2 }
0x1631   : > { %v5943_v60 = vsel %vm11974_vm6, %v5939_v41, %v5655_v33  ;;  %v5954_v16 = vsel %vm11978_vm13, %v5950_v62, %v5857_v45 }
0x1636   : > { %v5859_v6 = vpop.permute.xlu0 %5858  ;;  %v5723_v13 = vpop.permute.xlu1 %5722 }
0x1637   : > { %v5947_v22 = vsel %vm11975_vm3, %v5943_v60, %v5723_v13 }
0x1638   : > { %v5951_v21 = vsel %vm11977_vm0, %v5947_v22, %v5791_v8 }
0x1639   : > { %v5955_v59 = vsel %vm11980_vm10, %v5951_v21, %v5859_v6 }
0x163e   : > { %v5925_v47 = vpop.permute.xlu0 %5924  ;;  %v5927_v24 = vpop.permute.xlu1 %5926 }
0x163f   : > { %v5958_v54 = vsel %vm11979_vm8, %v5954_v16, %v5925_v47  ;;  %v5959_v30 = vsel %vm11981_vm12, %v5955_v59, %v5927_v24 }
0x1640   : > { %v5962_v31 = vadd.f32 %v5958_v54, %v11274_v2  ;;  %v5963_v23 = vadd.f32 %v5959_v30, %v11287_v0 }
0x1642   : > { %5967 = vst.msk [vmem:[%s11301_s18 + $0x10] sm:$0xff] %vm5964_vm14, %v5962_v31 }
0x1643   : > { %5968 = vst.msk [vmem:[%s11301_s18 + $0x18] sm:$0xff] %vm5964_vm14, %v5963_v23 }
0x1644   : > { %6755 = shalt.err (!%p6752_p8)
}
0x1645   : > { %s6811_s15 = smov 128  }
0x1646   : > { %6243 = dma.vmem_to_hbm [thread:$0]  (%p6891_p5), %s5983_s9, 512, %s5985_s19, %s5970_s28, %s6811_s15, %s6811_s15, %s6801_s14  }
0x1647 PF: > { %p6255_p9 = scmp.ge.s32.totalorder %s6794_s27, 2  ;;  %s5999_s18 = sand.u32 1, %s6782_s24  }
0x1648   : > { %s6000_s17 = scalar_lea.sflag [#allocation4], %s5999_s18 }
0x1649   : > { %p6250_p10 = pnand %p6255_p9, %p6895_p6 }
0x164b   : > { %p6251_p11 = pneg %p6250_p10 }
0x164d   : > { %6777 = dma.done.wait (%p6251_p11), %s6000_s17, 512  }
0x164e   : > { %6779 = vsyncadd (%p6251_p11), %s6000_s17, 4294966784  ;;  %p18_p12 = scmp.ge.s32.totalorder %s6878_s30, 4   ;;  %s11982_s24 = smov %s6786_s25 }
0x164f   : > { %s11983_s25 = smov %s6790_s26  ;;  %s11984_s26 = smov %s6889_s10 }
0x1650   : > { %s11985_s27 = smov %s6878_s30  ;;  %20 = sbr.rel (!%p18_p12) target bundleno = 4 (0x4), region = 90 }
0x1655   :  { %6006 = vsyncpa [#allocation4], 1 }
0x1656   :  { %6008 = vsyncpa [#allocation4 + $0x1], 1 }
0x1657   :  { %6009 = vsyncpa [#allocation5], 1 }
0x1658   :  { %6011 = vsyncpa [#allocation5 + $0x1], 1 }

</bundles_post_ra>
